<compile_context>
chip_gen: v7x
topology: tpu7x:2x2x1
jax: 0.10.0
libtpu: 0.0.40
codegen_flags: <defaults>
</compile_context>

<pallas_src>
import jax
import jax.numpy as jnp
import numpy as np
from jax.experimental import pallas as pl
from jax.experimental.pallas import tpu as pltpu

_BN_EPS = 1e-5
_LANE = 128


def _round_up(x, m):
    return ((x + m - 1) // m) * m


def _pick_tile_images(n, h, w, target_pixels=4096):
    """Images per tile: largest divisor of n with ti*h*w <= target_pixels."""
    best = 1
    for ti in range(1, n + 1):
        if n % ti == 0 and ti * h * w <= target_pixels:
            best = ti
    return best


def _compiler_params(semantics, est_vmem_bytes):
    """Only override the scoped-VMEM limit when the working set needs it."""
    kwargs = {}
    if est_vmem_bytes > 12 * 1024 * 1024:
        kwargs["vmem_limit_bytes"] = int(
            min(max(2 * est_vmem_bytes, 32 * 1024 * 1024), 64 * 1024 * 1024))
    return pltpu.CompilerParams(dimension_semantics=semantics, **kwargs)


# ---------------------------------------------------------------------------
# In-kernel helpers
# ---------------------------------------------------------------------------
def _pad_hw_1(a):
    """Zero-pad axes 1 (H) and 2 (W) of a (TI, H, W, C) value by 1 each side."""
    ti, h, w, c = a.shape
    zr = jnp.zeros((ti, 1, w, c), a.dtype)
    a = jnp.concatenate([zr, a, zr], axis=1)
    zc = jnp.zeros((ti, h + 2, 1, c), a.dtype)
    return jnp.concatenate([zc, a, zc], axis=2)


def _im2col_3x3(ap):
    """(TI, H+2, W+2, Cin) padded block (Ref or value) -> (TI*H*W, 9*Cin).

    Tap order is dy-major / dx-minor with Cin contiguous per tap, matching the
    (9*Cin, CP) weight packing, so the whole 3x3 conv is one MXU dot."""
    ti, hp, wp, c = ap.shape
    h, w = hp - 2, wp - 2
    cols = [ap[:, dy:dy + h, dx:dx + w, :].reshape(ti * h * w, c)
            for dy in range(3) for dx in range(3)]
    return jnp.concatenate(cols, axis=-1)


# ---------------------------------------------------------------------------
# Pallas kernels
# ---------------------------------------------------------------------------
def _conv_stats_kernel(xp_ref, w_ref, y_ref, s1_ref, s2_ref):
    """Block-1 pass 1: 3x3 conv over TI whole (pre-padded) images as a single
    im2col matmul (K = 9*Cin, bf16 operands, f32 accumulation) + per-channel
    sum / sum-of-squares accumulation for the global batch-norm statistics."""
    @pl.when(pl.program_id(1) == 0)
    def _init():
        s1_ref[...] = jnp.zeros_like(s1_ref)
        s2_ref[...] = jnp.zeros_like(s2_ref)

    patch = _im2col_3x3(xp_ref)                                   # (TM, 9*Cin) bf16
    acc = jnp.dot(patch, w_ref[...], preferred_element_type=jnp.float32)
    y_ref[...] = acc.astype(y_ref.dtype)
    s1_ref[...] += jnp.sum(acc, axis=0, keepdims=True).reshape(s1_ref.shape)
    s2_ref[...] += jnp.sum(acc * acc, axis=0, keepdims=True).reshape(s2_ref.shape)


def _bn_relu_conv_stats_kernel(y_in_ref, sc_ref, sh_ref, w_ref,
                               y_out_ref, s1_ref, s2_ref):
    """Fused block-1 pass 2 + block-2 pass 1: apply ReLU(y*scale + shift) to the
    previous raw conv output (per-channel affine -> tile-local), zero-pad H/W in
    VMEM, then the second 3x3 conv as one im2col matmul + BN-stat accumulation."""
    @pl.when(pl.program_id(1) == 0)
    def _init():
        s1_ref[...] = jnp.zeros_like(s1_ref)
        s2_ref[...] = jnp.zeros_like(s2_ref)

    cin = w_ref.shape[0] // 9
    sc = sc_ref[...].reshape(1, 1, 1, -1)
    sh = sh_ref[...].reshape(1, 1, 1, -1)
    a = jnp.maximum(y_in_ref[...].astype(jnp.float32) * sc + sh, 0.0)  # (TI,H,W,CP)
    a = a[..., :cin].astype(jnp.bfloat16)                              # (TI,H,W,Cin)
    patch = _im2col_3x3(_pad_hw_1(a))                                  # (TM, 9*Cin)
    acc = jnp.dot(patch, w_ref[...], preferred_element_type=jnp.float32)
    y_out_ref[...] = acc.astype(y_out_ref.dtype)
    s1_ref[...] += jnp.sum(acc, axis=0, keepdims=True).reshape(s1_ref.shape)
    s2_ref[...] += jnp.sum(acc * acc, axis=0, keepdims=True).reshape(s2_ref.shape)


def _bn_add_relu_kernel(y_ref, sc_ref, sh_ref, skip_ref, o_ref):
    """Block-2 pass 2: BN apply (activation=False path) + identity residual
    (un-padded (TM, C) skip, lane-padded here) + final ReLU."""
    y = y_ref[...].astype(jnp.float32) * sc_ref[...] + sh_ref[...]     # (TM, CP)
    skip = skip_ref[...]                                               # (TM, C) f32
    c = skip.shape[-1]
    cp = y.shape[-1]
    if cp > c:
        skip = jnp.concatenate(
            [skip, jnp.zeros((skip.shape[0], cp - c), jnp.float32)], axis=-1)
    o_ref[...] = jnp.maximum(y + skip, 0.0)


# ---------------------------------------------------------------------------
# Res_block forward (in_channels == out_channels -> identity skip)
# ---------------------------------------------------------------------------
def _finalize_bn(s1, s2, gamma, beta, m):
    """Tiny per-channel finalize in XLA: batch mean/var -> scale & shift."""
    s1 = jnp.sum(s1, axis=0)                      # (1, CP), sums core partials
    s2 = jnp.sum(s2, axis=0)
    mean = s1 / m
    var = jnp.maximum(s2 / m - mean * mean, 0.0)
    scale = gamma * jax.lax.rsqrt(var + _BN_EPS)
    shift = beta - mean * scale
    return scale, shift


def res_block_forward(x_nchw, p):
    N, C, H, W = x_nchw.shape
    CP = p["w1"].shape[-1]
    M = N * H * W

    x = jnp.transpose(x_nchw, (0, 2, 3, 1)).astype(jnp.float32)   # NHWC f32
    # One bf16 H/W-padded activation copy; whole-image tiles need no halos.
    xp = jnp.pad(x.astype(jnp.bfloat16), ((0, 0), (1, 1), (1, 1), (0, 0)))

    TI = _pick_tile_images(N, H, W)          # images per tile
    NT = N // TI                             # number of image tiles
    G0 = 2 if (NT >= 2 and NT % 2 == 0) else 1   # 2-way core split when possible
    NI = NT // G0                            # inner ("arbitrary") grid extent
    TM = TI * H * W                          # pixels per tile
    grid = (G0, NI)
    sems = ("parallel", "arbitrary")

    xp_spec = pl.BlockSpec((TI, H + 2, W + 2, C), lambda g, i: (g * NI + i, 0, 0, 0))
    y4_spec = pl.BlockSpec((TI, H, W, CP), lambda g, i: (g * NI + i, 0, 0, 0))
    pix_spec = pl.BlockSpec((TM, CP), lambda g, i: (g * NI + i, 0))
    w_spec = pl.BlockSpec((9 * C, CP), lambda g, i: (0, 0))
    vec_spec = pl.BlockSpec((1, CP), lambda g, i: (0, 0))
    stat_spec = pl.BlockSpec((1, 1, CP), lambda g, i: (g, 0, 0))
    stat_shape = jax.ShapeDtypeStruct((G0, 1, CP), jnp.float32)

    est = (2 * (TI * (H + 2) * (W + 2) * C * 2 + 9 * C * CP * 2 + TM * CP * 2)
           + TM * 9 * C * 2 + 2 * TM * CP * 4)
    flops = 2 * M * 9 * C * CP

    # ---- block 1, pass 1: conv1 + BN1 batch statistics ----------------------
    y1, s1a, s2a = pl.pallas_call(
        _conv_stats_kernel,
        grid=grid,
        in_specs=[xp_spec, w_spec],
        out_specs=(pix_spec, stat_spec, stat_spec),
        out_shape=(jax.ShapeDtypeStruct((M, CP), jnp.bfloat16),
                   stat_shape, stat_shape),
        compiler_params=_compiler_params(sems, est),
        cost_estimate=pl.CostEstimate(
            flops=flops, transcendentals=0,
            bytes_accessed=N * (H + 2) * (W + 2) * C * 2 + 9 * C * CP * 2
                           + M * CP * 2 + 2 * CP * 4),
    )(xp, p["w1"])
    scale1, shift1 = _finalize_bn(s1a, s2a, p["g1"], p["be1"], M)

    # ---- block 1 pass 2 fused into block 2 pass 1 ----------------------------
    # (M, CP) -> (N, H, W, CP) is a free row-major reshape in XLA.
    y2, s1b, s2b = pl.pallas_call(
        _bn_relu_conv_stats_kernel,
        grid=grid,
        in_specs=[y4_spec, vec_spec, vec_spec, w_spec],
        out_specs=(pix_spec, stat_spec, stat_spec),
        out_shape=(jax.ShapeDtypeStruct((M, CP), jnp.bfloat16),
                   stat_shape, stat_shape),
        compiler_params=_compiler_params(sems, est + TM * CP * 4),
        cost_estimate=pl.CostEstimate(
            flops=flops, transcendentals=0,
            bytes_accessed=2 * M * CP * 2 + 9 * C * CP * 2 + 4 * CP * 4),
    )(y1.reshape(N, H, W, CP), scale1, shift1, p["w2"])
    scale2, shift2 = _finalize_bn(s1b, s2b, p["g2"], p["be2"], M)

    # ---- block 2, pass 2: BN2 apply + identity skip + final ReLU -------------
    skip = x.reshape(M, C)                   # original activation, no CP padding
    out = pl.pallas_call(
        _bn_add_relu_kernel,
        grid=(M // TM,),
        in_specs=[pl.BlockSpec((TM, CP), lambda i: (i, 0)),
                  pl.BlockSpec((1, CP), lambda i: (0, 0)),
                  pl.BlockSpec((1, CP), lambda i: (0, 0)),
                  pl.BlockSpec((TM, C), lambda i: (i, 0))],
        out_specs=pl.BlockSpec((TM, CP), lambda i: (i, 0)),
        out_shape=jax.ShapeDtypeStruct((M, CP), jnp.float32),
        compiler_params=_compiler_params(
            ("parallel",), 2 * (TM * CP * 2 + TM * C * 4 + TM * CP * 4)),
    )(y2, scale2, shift2, skip)

    out = out[:, :C].reshape(N, H, W, C)
    return jnp.transpose(out, (0, 3, 1, 2))                       # NCHW f32


# ---------------------------------------------------------------------------
# Parameter init (PyTorch-Conv2d-style uniform; BN gamma=1, beta=0)
# ---------------------------------------------------------------------------
def init_res_block_params(key, channels):
    """Weights packed as (9*Cin, CP) bf16 (tap-major, Cin-minor rows, Cout
    zero-padded to a lane multiple); gamma zero-padded so padded channels stay
    exactly 0.  Conv bias omitted: it cancels under batch-statistic BN."""
    CP = _round_up(channels, _LANE)
    ks = jax.random.split(key, 2)
    bound = 1.0 / np.sqrt(channels * 9)

    def pack_w(k):
        w = jax.random.uniform(k, (channels, channels, 3, 3), jnp.float32,
                               -bound, bound)
        wm = jnp.transpose(w, (2, 3, 1, 0)).reshape(9 * channels, channels)
        wm = jnp.pad(wm, ((0, 0), (0, CP - channels)))
        return wm.astype(jnp.bfloat16)

    gamma = jnp.pad(jnp.ones((1, channels), jnp.float32),
                    ((0, 0), (0, CP - channels)))
    beta = jnp.zeros((1, CP), jnp.float32)
    return dict(w1=pack_w(ks[0]), g1=gamma, be1=beta,
                w2=pack_w(ks[1]), g2=gamma, be2=beta)


# ---------------------------------------------------------------------------
# Pure-JAX reference (same mixed-precision math) for a sanity check
# ---------------------------------------------------------------------------
def _ref_forward(x_nchw, p):
    N, C, H, W = x_nchw.shape
    CP = p["w1"].shape[-1]
    M = N * H * W
    x = jnp.transpose(x_nchw, (0, 2, 3, 1)).astype(jnp.float32)

    def conv(a_bf16, wm):                       # (N,H,W,Cin) bf16, (9*Cin,CP) bf16
        ap = jnp.pad(a_bf16, ((0, 0), (1, 1), (1, 1), (0, 0)))
        cols = jnp.concatenate(
            [ap[:, dy:dy + H, dx:dx + W, :] for dy in range(3) for dx in range(3)],
            axis=-1)
        return jnp.dot(cols.reshape(M, wm.shape[0]), wm,
                       preferred_element_type=jnp.float32)

    def bn(y, gamma, beta):
        mean = jnp.sum(y, axis=0, keepdims=True) / M
        var = jnp.maximum(jnp.sum(y * y, axis=0, keepdims=True) / M - mean * mean,
                          0.0)
        scale = gamma * jax.lax.rsqrt(var + _BN_EPS)
        return scale, beta - mean * scale

    y1 = conv(x.astype(jnp.bfloat16), p["w1"])
    sc1, sh1 = bn(y1, p["g1"], p["be1"])
    a1 = jnp.maximum(y1.astype(jnp.bfloat16).astype(jnp.float32) * sc1 + sh1, 0.0)
    a1 = a1[:, :C].astype(jnp.bfloat16).reshape(N, H, W, C)

    y2 = conv(a1, p["w2"])
    sc2, sh2 = bn(y2, p["g2"], p["be2"])
    skip = jnp.pad(x.reshape(M, C), ((0, 0), (0, CP - C)))
    out = jnp.maximum(
        y2.astype(jnp.bfloat16).astype(jnp.float32) * sc2 + sh2 + skip, 0.0)
    out = out[:, :C].reshape(N, H, W, C)
    return jnp.transpose(out, (0, 3, 1, 2))


# ---------------------------------------------------------------------------
if __name__ == "__main__":
    key = jax.random.PRNGKey(0)
    kx, kp = jax.random.split(key)

    N, C, H, W = 2, 4, 16, 16                 # small NCHW input, in_ch == out_ch
    x = jax.random.normal(kx, (N, C, H, W), jnp.float32)
    params = init_res_block_params(kp, C)

    out = jax.block_until_ready(jax.jit(res_block_forward)(x, params))

    ref = _ref_forward(x, params)
    np.testing.assert_allclose(np.asarray(out), np.asarray(ref),
                               atol=2e-2, rtol=2e-2)
    assert out.shape == (N, C, H, W) and out.dtype == jnp.float32

    print("KERNEL_OK")
</pallas_src>

<mosaic_0001>
module attributes {stable_mosaic.version = 11 : i64} {
  func.func @_conv_stats_kernel(%arg0: i32, %arg1: i32, %arg2: memref<2x18x18x4xbf16, #tpu.memory_space<vmem>>, %arg3: memref<36x128xbf16, #tpu.memory_space<vmem>>, %arg4: memref<512x128xbf16, #tpu.memory_space<vmem>>, %arg5: memref<1x1x128xf32, #tpu.memory_space<vmem>>, %arg6: memref<1x1x128xf32, #tpu.memory_space<vmem>>) attributes {dimension_semantics = [#tpu.dimension_semantics<parallel>, #tpu.dimension_semantics<arbitrary>], iteration_bounds = array<i64: 1, 1>, scalar_prefetch = 0 : i64, scratch_operands = 0 : i64, tpu.core_type = #tpu.core_type<tc>, window_params = [{transform_indices = @transform_0, window_bounds = array<i64: 2, 18, 18, 4>}, {pipeline_mode = #tpu.pipeline_mode<synchronous>, transform_indices = @transform_1, window_bounds = array<i64: 36, 128>}, {transform_indices = @transform_2, window_bounds = array<i64: 512, 128>}, {transform_indices = @transform_3, window_bounds = array<i64: 1, 1, 128>}, {transform_indices = @transform_4, window_bounds = array<i64: 1, 1, 128>}]} {
    %c0_i32 = arith.constant 0 : i32
    %0 = arith.cmpi eq, %arg1, %c0_i32 : i32
    %1 = arith.extui %0 : i1 to i32
    %c0_i32_0 = arith.constant 0 : i32
    %2 = arith.cmpi ne, %1, %c0_i32_0 : i32
    scf.if %2 {
      %cst_52 = arith.constant 0.000000e+00 : f32
      %39 = vector.broadcast %cst_52 : f32 to vector<1x1x128xf32>
      %c0_53 = arith.constant 0 : index
      %c0_54 = arith.constant 0 : index
      %c0_55 = arith.constant 0 : index
      %40 = vector.load %arg5[%c0_53, %c0_54, %c0_55] : memref<1x1x128xf32, #tpu.memory_space<vmem>>, vector<1x1x128xf32>
      tpu.vector_store %arg5[%c0_53, %c0_54, %c0_55], %39 {strides = array<i32>} : memref<1x1x128xf32, #tpu.memory_space<vmem>>, vector<1x1x128xf32>,
      %cst_56 = arith.constant 0.000000e+00 : f32
      %41 = vector.broadcast %cst_56 : f32 to vector<1x1x128xf32>
      %c0_57 = arith.constant 0 : index
      %c0_58 = arith.constant 0 : index
      %c0_59 = arith.constant 0 : index
      %42 = vector.load %arg6[%c0_57, %c0_58, %c0_59] : memref<1x1x128xf32, #tpu.memory_space<vmem>>, vector<1x1x128xf32>
      tpu.vector_store %arg6[%c0_57, %c0_58, %c0_59], %41 {strides = array<i32>} : memref<1x1x128xf32, #tpu.memory_space<vmem>>, vector<1x1x128xf32>,
    } else {
    }
    %c0 = arith.constant 0 : index
    %c0_1 = arith.constant 0 : index
    %c0_2 = arith.constant 0 : index
    %c0_3 = arith.constant 0 : index
    %3 = vector.load %arg2[%c0, %c0_1, %c0_2, %c0_3] : memref<2x18x18x4xbf16, #tpu.memory_space<vmem>>, vector<2x16x16x4xbf16>
    %4 = vector.shape_cast %3 : vector<2x16x16x4xbf16> to vector<512x4xbf16>
    %c0_4 = arith.constant 0 : index
    %c0_5 = arith.constant 0 : index
    %c1 = arith.constant 1 : index
    %c0_6 = arith.constant 0 : index
    %5 = vector.load %arg2[%c0_4, %c0_5, %c1, %c0_6] : memref<2x18x18x4xbf16, #tpu.memory_space<vmem>>, vector<2x16x16x4xbf16>
    %6 = vector.shape_cast %5 : vector<2x16x16x4xbf16> to vector<512x4xbf16>
    %c0_7 = arith.constant 0 : index
    %c0_8 = arith.constant 0 : index
    %c2 = arith.constant 2 : index
    %c0_9 = arith.constant 0 : index
    %7 = vector.load %arg2[%c0_7, %c0_8, %c2, %c0_9] : memref<2x18x18x4xbf16, #tpu.memory_space<vmem>>, vector<2x16x16x4xbf16>
    %8 = vector.shape_cast %7 : vector<2x16x16x4xbf16> to vector<512x4xbf16>
    %c0_10 = arith.constant 0 : index
    %c1_11 = arith.constant 1 : index
    %c0_12 = arith.constant 0 : index
    %c0_13 = arith.constant 0 : index
    %9 = vector.load %arg2[%c0_10, %c1_11, %c0_12, %c0_13] : memref<2x18x18x4xbf16, #tpu.memory_space<vmem>>, vector<2x16x16x4xbf16>
    %10 = vector.shape_cast %9 : vector<2x16x16x4xbf16> to vector<512x4xbf16>
    %c0_14 = arith.constant 0 : index
    %c1_15 = arith.constant 1 : index
    %c1_16 = arith.constant 1 : index
    %c0_17 = arith.constant 0 : index
    %11 = vector.load %arg2[%c0_14, %c1_15, %c1_16, %c0_17] : memref<2x18x18x4xbf16, #tpu.memory_space<vmem>>, vector<2x16x16x4xbf16>
    %12 = vector.shape_cast %11 : vector<2x16x16x4xbf16> to vector<512x4xbf16>
    %c0_18 = arith.constant 0 : index
    %c1_19 = arith.constant 1 : index
    %c2_20 = arith.constant 2 : index
    %c0_21 = arith.constant 0 : index
    %13 = vector.load %arg2[%c0_18, %c1_19, %c2_20, %c0_21] : memref<2x18x18x4xbf16, #tpu.memory_space<vmem>>, vector<2x16x16x4xbf16>
    %14 = vector.shape_cast %13 : vector<2x16x16x4xbf16> to vector<512x4xbf16>
    %c0_22 = arith.constant 0 : index
    %c2_23 = arith.constant 2 : index
    %c0_24 = arith.constant 0 : index
    %c0_25 = arith.constant 0 : index
    %15 = vector.load %arg2[%c0_22, %c2_23, %c0_24, %c0_25] : memref<2x18x18x4xbf16, #tpu.memory_space<vmem>>, vector<2x16x16x4xbf16>
    %16 = vector.shape_cast %15 : vector<2x16x16x4xbf16> to vector<512x4xbf16>
    %c0_26 = arith.constant 0 : index
    %c2_27 = arith.constant 2 : index
    %c1_28 = arith.constant 1 : index
    %c0_29 = arith.constant 0 : index
    %17 = vector.load %arg2[%c0_26, %c2_27, %c1_28, %c0_29] : memref<2x18x18x4xbf16, #tpu.memory_space<vmem>>, vector<2x16x16x4xbf16>
    %18 = vector.shape_cast %17 : vector<2x16x16x4xbf16> to vector<512x4xbf16>
    %c0_30 = arith.constant 0 : index
    %c2_31 = arith.constant 2 : index
    %c2_32 = arith.constant 2 : index
    %c0_33 = arith.constant 0 : index
    %19 = vector.load %arg2[%c0_30, %c2_31, %c2_32, %c0_33] : memref<2x18x18x4xbf16, #tpu.memory_space<vmem>>, vector<2x16x16x4xbf16>
    %20 = vector.shape_cast %19 : vector<2x16x16x4xbf16> to vector<512x4xbf16>
    %21 = tpu.concatenate %4, %6, %8, %10, %12, %14, %16, %18, %20 in 1 : vector<512x4xbf16>, vector<512x4xbf16>, vector<512x4xbf16>, vector<512x4xbf16>, vector<512x4xbf16>, vector<512x4xbf16>, vector<512x4xbf16>, vector<512x4xbf16>, vector<512x4xbf16> -> vector<512x36xbf16>
    %c0_34 = arith.constant 0 : index
    %c0_35 = arith.constant 0 : index
    %22 = vector.load %arg3[%c0_34, %c0_35] : memref<36x128xbf16, #tpu.memory_space<vmem>>, vector<36x128xbf16>
    %cst = arith.constant dense<0.000000e+00> : vector<512x128xf32>
    %23 = tpu.matmul %21, %22, %cst {dimension_numbers = #tpu.dot_dimension_numbers<[1], [0], [0], [1], [0, 0, 1, 1], [], []>} : vector<512x36xbf16>, vector<36x128xbf16>, vector<512x128xf32> -> vector<512x128xf32>
    %24 = arith.truncf %23 : vector<512x128xf32> to vector<512x128xbf16>
    %c0_36 = arith.constant 0 : index
    %c0_37 = arith.constant 0 : index
    %25 = vector.load %arg4[%c0_36, %c0_37] : memref<512x128xbf16, #tpu.memory_space<vmem>>, vector<512x128xbf16>
    tpu.vector_store %arg4[%c0_36, %c0_37], %24 {strides = array<i32>} : memref<512x128xbf16, #tpu.memory_space<vmem>>, vector<512x128xbf16>,
    %c0_38 = arith.constant 0 : index
    %c0_39 = arith.constant 0 : index
    %c0_40 = arith.constant 0 : index
    %26 = vector.load %arg5[%c0_38, %c0_39, %c0_40] : memref<1x1x128xf32, #tpu.memory_space<vmem>>, vector<1x1x128xf32>
    %cst_41 = arith.constant dense<0.000000e+00> : vector<128xf32>
    %27 = vector.multi_reduction <add>, %23, %cst_41 [0] : vector<512x128xf32> to vector<128xf32>
    %28 = vector.shape_cast %27 : vector<128xf32> to vector<1x128xf32>
    %29 = vector.shape_cast %28 : vector<1x128xf32> to vector<1x1x128xf32>
    %30 = arith.addf %26, %29 : vector<1x1x128xf32>
    %c0_42 = arith.constant 0 : index
    %c0_43 = arith.constant 0 : index
    %c0_44 = arith.constant 0 : index
    %31 = vector.load %arg5[%c0_42, %c0_43, %c0_44] : memref<1x1x128xf32, #tpu.memory_space<vmem>>, vector<1x1x128xf32>
    tpu.vector_store %arg5[%c0_42, %c0_43, %c0_44], %30 {strides = array<i32>} : memref<1x1x128xf32, #tpu.memory_space<vmem>>, vector<1x1x128xf32>,
    %c0_45 = arith.constant 0 : index
    %c0_46 = arith.constant 0 : index
    %c0_47 = arith.constant 0 : index
    %32 = vector.load %arg6[%c0_45, %c0_46, %c0_47] : memref<1x1x128xf32, #tpu.memory_space<vmem>>, vector<1x1x128xf32>
    %33 = arith.mulf %23, %23 : vector<512x128xf32>
    %cst_48 = arith.constant dense<0.000000e+00> : vector<128xf32>
    %34 = vector.multi_reduction <add>, %33, %cst_48 [0] : vector<512x128xf32> to vector<128xf32>
    %35 = vector.shape_cast %34 : vector<128xf32> to vector<1x128xf32>
    %36 = vector.shape_cast %35 : vector<1x128xf32> to vector<1x1x128xf32>
    %37 = arith.addf %32, %36 : vector<1x1x128xf32>
    %c0_49 = arith.constant 0 : index
    %c0_50 = arith.constant 0 : index
    %c0_51 = arith.constant 0 : index
    %38 = vector.load %arg6[%c0_49, %c0_50, %c0_51] : memref<1x1x128xf32, #tpu.memory_space<vmem>>, vector<1x1x128xf32>
    tpu.vector_store %arg6[%c0_49, %c0_50, %c0_51], %37 {strides = array<i32>} : memref<1x1x128xf32, #tpu.memory_space<vmem>>, vector<1x1x128xf32>,
    return
  }
  func.func @transform_0(%arg0: i32, %arg1: i32) -> (i32, i32, i32, i32) {
    %c1_i32 = arith.constant 1 : i32
    %0 = arith.muli %arg0, %c1_i32 : i32
    %1 = arith.addi %0, %arg1 : i32
    %c0_i32 = arith.constant 0 : i32
    %c0_i32_0 = arith.constant 0 : i32
    %c0_i32_1 = arith.constant 0 : i32
    %c0_i32_2 = arith.constant 0 : i32
    return %1, %c0_i32, %c0_i32_0, %c0_i32_1 : i32, i32, i32, i32
  }
  func.func @transform_1(%arg0: i32, %arg1: i32) -> (i32, i32) {
    %c0_i32 = arith.constant 0 : i32
    %c0_i32_0 = arith.constant 0 : i32
    %c0_i32_1 = arith.constant 0 : i32
    return %c0_i32, %c0_i32_0 : i32, i32
  }
  func.func @transform_2(%arg0: i32, %arg1: i32) -> (i32, i32) {
    %c1_i32 = arith.constant 1 : i32
    %0 = arith.muli %arg0, %c1_i32 : i32
    %1 = arith.addi %0, %arg1 : i32
    %c0_i32 = arith.constant 0 : i32
    %c0_i32_0 = arith.constant 0 : i32
    return %1, %c0_i32 : i32, i32
  }
  func.func @transform_3(%arg0: i32, %arg1: i32) -> (i32, i32, i32) {
    %c0_i32 = arith.constant 0 : i32
    %c0_i32_0 = arith.constant 0 : i32
    %c0_i32_1 = arith.constant 0 : i32
    return %arg0, %c0_i32, %c0_i32_0 : i32, i32, i32
  }
  func.func @transform_4(%arg0: i32, %arg1: i32) -> (i32, i32, i32) {
    %c0_i32 = arith.constant 0 : i32
    %c0_i32_0 = arith.constant 0 : i32
    %c0_i32_1 = arith.constant 0 : i32
    return %arg0, %c0_i32, %c0_i32_0 : i32, i32, i32
  }
}

module attributes {stable_mosaic.version = 11 : i64} {
  func.func @_bn_add_relu_kernel(%arg0: i32, %arg1: memref<512x128xbf16, #tpu.memory_space<vmem>>, %arg2: memref<1x128xf32, #tpu.memory_space<vmem>>, %arg3: memref<1x128xf32, #tpu.memory_space<vmem>>, %arg4: memref<512x4xf32, #tpu.memory_space<vmem>>, %arg5: memref<512x128xf32, #tpu.memory_space<vmem>>) attributes {dimension_semantics = [#tpu.dimension_semantics<parallel>], iteration_bounds = array<i64: 1>, scalar_prefetch = 0 : i64, scratch_operands = 0 : i64, tpu.core_type = #tpu.core_type<tc>, window_params = [{transform_indices = @transform_0, window_bounds = array<i64: 512, 128>}, {pipeline_mode = #tpu.pipeline_mode<synchronous>, transform_indices = @transform_1, window_bounds = array<i64: 1, 128>}, {pipeline_mode = #tpu.pipeline_mode<synchronous>, transform_indices = @transform_2, window_bounds = array<i64: 1, 128>}, {transform_indices = @transform_3, window_bounds = array<i64: 512, 4>}, {transform_indices = @transform_4, window_bounds = array<i64: 512, 128>}]} {
    %c0 = arith.constant 0 : index
    %c0_0 = arith.constant 0 : index
    %0 = vector.load %arg1[%c0, %c0_0] : memref<512x128xbf16, #tpu.memory_space<vmem>>, vector<512x128xbf16>
    %1 = arith.extf %0 : vector<512x128xbf16> to vector<512x128xf32>
    %c0_1 = arith.constant 0 : index
    %c0_2 = arith.constant 0 : index
    %2 = vector.load %arg2[%c0_1, %c0_2] : memref<1x128xf32, #tpu.memory_space<vmem>>, vector<1x128xf32>
    %3 = vector.broadcast %2 : vector<1x128xf32> to vector<512x128xf32>
    %4 = arith.mulf %1, %3 : vector<512x128xf32>
    %c0_3 = arith.constant 0 : index
    %c0_4 = arith.constant 0 : index
    %5 = vector.load %arg3[%c0_3, %c0_4] : memref<1x128xf32, #tpu.memory_space<vmem>>, vector<1x128xf32>
    %6 = vector.broadcast %5 : vector<1x128xf32> to vector<512x128xf32>
    %7 = arith.addf %4, %6 : vector<512x128xf32>
    %c0_5 = arith.constant 0 : index
    %c0_6 = arith.constant 0 : index
    %8 = vector.load %arg4[%c0_5, %c0_6] : memref<512x4xf32, #tpu.memory_space<vmem>>, vector<512x4xf32>
    %cst = arith.constant 0.000000e+00 : f32
    %9 = vector.broadcast %cst : f32 to vector<512x124xf32>
    %10 = tpu.concatenate %8, %9 in 1 : vector<512x4xf32>, vector<512x124xf32> -> vector<512x128xf32>
    %11 = arith.addf %7, %10 : vector<512x128xf32>
    %cst_7 = arith.constant 0.000000e+00 : f32
    %12 = vector.broadcast %cst_7 : f32 to vector<512x128xf32>
    %13 = arith.maximumf %11, %12 : vector<512x128xf32>
    %c0_8 = arith.constant 0 : index
    %c0_9 = arith.constant 0 : index
    %14 = vector.load %arg5[%c0_8, %c0_9] : memref<512x128xf32, #tpu.memory_space<vmem>>, vector<512x128xf32>
    tpu.vector_store %arg5[%c0_8, %c0_9], %13 {strides = array<i32>} : memref<512x128xf32, #tpu.memory_space<vmem>>, vector<512x128xf32>,
    return
  }
  func.func @transform_0(%arg0: i32) -> (i32, i32) {
    %c0_i32 = arith.constant 0 : i32
    %c0_i32_0 = arith.constant 0 : i32
    return %arg0, %c0_i32 : i32, i32
  }
  func.func @transform_1(%arg0: i32) -> (i32, i32) {
    %c0_i32 = arith.constant 0 : i32
    %c0_i32_0 = arith.constant 0 : i32
    %c0_i32_1 = arith.constant 0 : i32
    return %c0_i32, %c0_i32_0 : i32, i32
  }
  func.func @transform_2(%arg0: i32) -> (i32, i32) {
    %c0_i32 = arith.constant 0 : i32
    %c0_i32_0 = arith.constant 0 : i32
    %c0_i32_1 = arith.constant 0 : i32
    return %c0_i32, %c0_i32_0 : i32, i32
  }
  func.func @transform_3(%arg0: i32) -> (i32, i32) {
    %c0_i32 = arith.constant 0 : i32
    %c0_i32_0 = arith.constant 0 : i32
    return %arg0, %c0_i32 : i32, i32
  }
  func.func @transform_4(%arg0: i32) -> (i32, i32) {
    %c0_i32 = arith.constant 0 : i32
    %c0_i32_0 = arith.constant 0 : i32
    return %arg0, %c0_i32 : i32, i32
  }
}

module attributes {stable_mosaic.version = 11 : i64} {
  func.func @_bn_relu_conv_stats_kernel(%arg0: i32, %arg1: i32, %arg2: memref<2x16x16x128xbf16, #tpu.memory_space<vmem>>, %arg3: memref<1x128xf32, #tpu.memory_space<vmem>>, %arg4: memref<1x128xf32, #tpu.memory_space<vmem>>, %arg5: memref<36x128xbf16, #tpu.memory_space<vmem>>, %arg6: memref<512x128xbf16, #tpu.memory_space<vmem>>, %arg7: memref<1x1x128xf32, #tpu.memory_space<vmem>>, %arg8: memref<1x1x128xf32, #tpu.memory_space<vmem>>) attributes {dimension_semantics = [#tpu.dimension_semantics<parallel>, #tpu.dimension_semantics<arbitrary>], iteration_bounds = array<i64: 1, 1>, scalar_prefetch = 0 : i64, scratch_operands = 0 : i64, tpu.core_type = #tpu.core_type<tc>, window_params = [{transform_indices = @transform_0, window_bounds = array<i64: 2, 16, 16, 128>}, {pipeline_mode = #tpu.pipeline_mode<synchronous>, transform_indices = @transform_1, window_bounds = array<i64: 1, 128>}, {pipeline_mode = #tpu.pipeline_mode<synchronous>, transform_indices = @transform_2, window_bounds = array<i64: 1, 128>}, {pipeline_mode = #tpu.pipeline_mode<synchronous>, transform_indices = @transform_3, window_bounds = array<i64: 36, 128>}, {transform_indices = @transform_4, window_bounds = array<i64: 512, 128>}, {transform_indices = @transform_5, window_bounds = array<i64: 1, 1, 128>}, {transform_indices = @transform_6, window_bounds = array<i64: 1, 1, 128>}]} {
    %c0_i32 = arith.constant 0 : i32
    %0 = arith.cmpi eq, %arg1, %c0_i32 : i32
    %1 = arith.extui %0 : i1 to i32
    %c0_i32_0 = arith.constant 0 : i32
    %2 = arith.cmpi ne, %1, %c0_i32_0 : i32
    scf.if %2 {
      %cst_29 = arith.constant 0.000000e+00 : f32
      %57 = vector.broadcast %cst_29 : f32 to vector<1x1x128xf32>
      %c0_30 = arith.constant 0 : index
      %c0_31 = arith.constant 0 : index
      %c0_32 = arith.constant 0 : index
      %58 = vector.load %arg7[%c0_30, %c0_31, %c0_32] : memref<1x1x128xf32, #tpu.memory_space<vmem>>, vector<1x1x128xf32>
      tpu.vector_store %arg7[%c0_30, %c0_31, %c0_32], %57 {strides = array<i32>} : memref<1x1x128xf32, #tpu.memory_space<vmem>>, vector<1x1x128xf32>,
      %cst_33 = arith.constant 0.000000e+00 : f32
      %59 = vector.broadcast %cst_33 : f32 to vector<1x1x128xf32>
      %c0_34 = arith.constant 0 : index
      %c0_35 = arith.constant 0 : index
      %c0_36 = arith.constant 0 : index
      %60 = vector.load %arg8[%c0_34, %c0_35, %c0_36] : memref<1x1x128xf32, #tpu.memory_space<vmem>>, vector<1x1x128xf32>
      tpu.vector_store %arg8[%c0_34, %c0_35, %c0_36], %59 {strides = array<i32>} : memref<1x1x128xf32, #tpu.memory_space<vmem>>, vector<1x1x128xf32>,
    } else {
    }
    %c0 = arith.constant 0 : index
    %c0_1 = arith.constant 0 : index
    %3 = vector.load %arg3[%c0, %c0_1] : memref<1x128xf32, #tpu.memory_space<vmem>>, vector<1x128xf32>
    %4 = vector.shape_cast %3 : vector<1x128xf32> to vector<1x1x1x128xf32>
    %c0_2 = arith.constant 0 : index
    %c0_3 = arith.constant 0 : index
    %5 = vector.load %arg4[%c0_2, %c0_3] : memref<1x128xf32, #tpu.memory_space<vmem>>, vector<1x128xf32>
    %6 = vector.shape_cast %5 : vector<1x128xf32> to vector<1x1x1x128xf32>
    %c0_4 = arith.constant 0 : index
    %c0_5 = arith.constant 0 : index
    %c0_6 = arith.constant 0 : index
    %c0_7 = arith.constant 0 : index
    %7 = vector.load %arg2[%c0_4, %c0_5, %c0_6, %c0_7] : memref<2x16x16x128xbf16, #tpu.memory_space<vmem>>, vector<2x16x16x128xbf16>
    %8 = arith.extf %7 : vector<2x16x16x128xbf16> to vector<2x16x16x128xf32>
    %9 = vector.broadcast %4 : vector<1x1x1x128xf32> to vector<2x16x16x128xf32>
    %10 = arith.mulf %8, %9 : vector<2x16x16x128xf32>
    %11 = vector.broadcast %6 : vector<1x1x1x128xf32> to vector<2x16x16x128xf32>
    %12 = arith.addf %10, %11 : vector<2x16x16x128xf32>
    %cst = arith.constant 0.000000e+00 : f32
    %13 = vector.broadcast %cst : f32 to vector<2x16x16x128xf32>
    %14 = arith.maximumf %12, %13 : vector<2x16x16x128xf32>
    %15 = vector.extract_strided_slice %14 {offsets = [0, 0, 0, 0], sizes = [2, 16, 16, 4], strides = [1, 1, 1, 1]} : vector<2x16x16x128xf32> to vector<2x16x16x4xf32>
    %16 = arith.truncf %15 : vector<2x16x16x4xf32> to vector<2x16x16x4xbf16>
    %cst_8 = arith.constant 0.000000e+00 : bf16
    %17 = vector.broadcast %cst_8 : bf16 to vector<2x1x16x4xbf16>
    %18 = tpu.concatenate %17, %16, %17 in 1 : vector<2x1x16x4xbf16>, vector<2x16x16x4xbf16>, vector<2x1x16x4xbf16> -> vector<2x18x16x4xbf16>
    %cst_9 = arith.constant 0.000000e+00 : bf16
    %19 = vector.broadcast %cst_9 : bf16 to vector<2x18x1x4xbf16>
    %20 = tpu.concatenate %19, %18, %19 in 2 : vector<2x18x1x4xbf16>, vector<2x18x16x4xbf16>, vector<2x18x1x4xbf16> -> vector<2x18x18x4xbf16>
    %21 = vector.extract_strided_slice %20 {offsets = [0, 0, 0, 0], sizes = [2, 16, 16, 4], strides = [1, 1, 1, 1]} : vector<2x18x18x4xbf16> to vector<2x16x16x4xbf16>
    %22 = vector.shape_cast %21 : vector<2x16x16x4xbf16> to vector<512x4xbf16>
    %23 = vector.extract_strided_slice %20 {offsets = [0, 0, 1, 0], sizes = [2, 16, 16, 4], strides = [1, 1, 1, 1]} : vector<2x18x18x4xbf16> to vector<2x16x16x4xbf16>
    %24 = vector.shape_cast %23 : vector<2x16x16x4xbf16> to vector<512x4xbf16>
    %25 = vector.extract_strided_slice %20 {offsets = [0, 0, 2, 0], sizes = [2, 16, 16, 4], strides = [1, 1, 1, 1]} : vector<2x18x18x4xbf16> to vector<2x16x16x4xbf16>
    %26 = vector.shape_cast %25 : vector<2x16x16x4xbf16> to vector<512x4xbf16>
    %27 = vector.extract_strided_slice %20 {offsets = [0, 1, 0, 0], sizes = [2, 16, 16, 4], strides = [1, 1, 1, 1]} : vector<2x18x18x4xbf16> to vector<2x16x16x4xbf16>
    %28 = vector.shape_cast %27 : vector<2x16x16x4xbf16> to vector<512x4xbf16>
    %29 = vector.extract_strided_slice %20 {offsets = [0, 1, 1, 0], sizes = [2, 16, 16, 4], strides = [1, 1, 1, 1]} : vector<2x18x18x4xbf16> to vector<2x16x16x4xbf16>
    %30 = vector.shape_cast %29 : vector<2x16x16x4xbf16> to vector<512x4xbf16>
    %31 = vector.extract_strided_slice %20 {offsets = [0, 1, 2, 0], sizes = [2, 16, 16, 4], strides = [1, 1, 1, 1]} : vector<2x18x18x4xbf16> to vector<2x16x16x4xbf16>
    %32 = vector.shape_cast %31 : vector<2x16x16x4xbf16> to vector<512x4xbf16>
    %33 = vector.extract_strided_slice %20 {offsets = [0, 2, 0, 0], sizes = [2, 16, 16, 4], strides = [1, 1, 1, 1]} : vector<2x18x18x4xbf16> to vector<2x16x16x4xbf16>
    %34 = vector.shape_cast %33 : vector<2x16x16x4xbf16> to vector<512x4xbf16>
    %35 = vector.extract_strided_slice %20 {offsets = [0, 2, 1, 0], sizes = [2, 16, 16, 4], strides = [1, 1, 1, 1]} : vector<2x18x18x4xbf16> to vector<2x16x16x4xbf16>
    %36 = vector.shape_cast %35 : vector<2x16x16x4xbf16> to vector<512x4xbf16>
    %37 = vector.extract_strided_slice %20 {offsets = [0, 2, 2, 0], sizes = [2, 16, 16, 4], strides = [1, 1, 1, 1]} : vector<2x18x18x4xbf16> to vector<2x16x16x4xbf16>
    %38 = vector.shape_cast %37 : vector<2x16x16x4xbf16> to vector<512x4xbf16>
    %39 = tpu.concatenate %22, %24, %26, %28, %30, %32, %34, %36, %38 in 1 : vector<512x4xbf16>, vector<512x4xbf16>, vector<512x4xbf16>, vector<512x4xbf16>, vector<512x4xbf16>, vector<512x4xbf16>, vector<512x4xbf16>, vector<512x4xbf16>, vector<512x4xbf16> -> vector<512x36xbf16>
    %c0_10 = arith.constant 0 : index
    %c0_11 = arith.constant 0 : index
    %40 = vector.load %arg5[%c0_10, %c0_11] : memref<36x128xbf16, #tpu.memory_space<vmem>>, vector<36x128xbf16>
    %cst_12 = arith.constant dense<0.000000e+00> : vector<512x128xf32>
    %41 = tpu.matmul %39, %40, %cst_12 {dimension_numbers = #tpu.dot_dimension_numbers<[1], [0], [0], [1], [0, 0, 1, 1], [], []>} : vector<512x36xbf16>, vector<36x128xbf16>, vector<512x128xf32> -> vector<512x128xf32>
    %42 = arith.truncf %41 : vector<512x128xf32> to vector<512x128xbf16>
    %c0_13 = arith.constant 0 : index
    %c0_14 = arith.constant 0 : index
    %43 = vector.load %arg6[%c0_13, %c0_14] : memref<512x128xbf16, #tpu.memory_space<vmem>>, vector<512x128xbf16>
    tpu.vector_store %arg6[%c0_13, %c0_14], %42 {strides = array<i32>} : memref<512x128xbf16, #tpu.memory_space<vmem>>, vector<512x128xbf16>,
    %c0_15 = arith.constant 0 : index
    %c0_16 = arith.constant 0 : index
    %c0_17 = arith.constant 0 : index
    %44 = vector.load %arg7[%c0_15, %c0_16, %c0_17] : memref<1x1x128xf32, #tpu.memory_space<vmem>>, vector<1x1x128xf32>
    %cst_18 = arith.constant dense<0.000000e+00> : vector<128xf32>
    %45 = vector.multi_reduction <add>, %41, %cst_18 [0] : vector<512x128xf32> to vector<128xf32>
    %46 = vector.shape_cast %45 : vector<128xf32> to vector<1x128xf32>
    %47 = vector.shape_cast %46 : vector<1x128xf32> to vector<1x1x128xf32>
    %48 = arith.addf %44, %47 : vector<1x1x128xf32>
    %c0_19 = arith.constant 0 : index
    %c0_20 = arith.constant 0 : index
    %c0_21 = arith.constant 0 : index
    %49 = vector.load %arg7[%c0_19, %c0_20, %c0_21] : memref<1x1x128xf32, #tpu.memory_space<vmem>>, vector<1x1x128xf32>
    tpu.vector_store %arg7[%c0_19, %c0_20, %c0_21], %48 {strides = array<i32>} : memref<1x1x128xf32, #tpu.memory_space<vmem>>, vector<1x1x128xf32>,
    %c0_22 = arith.constant 0 : index
    %c0_23 = arith.constant 0 : index
    %c0_24 = arith.constant 0 : index
    %50 = vector.load %arg8[%c0_22, %c0_23, %c0_24] : memref<1x1x128xf32, #tpu.memory_space<vmem>>, vector<1x1x128xf32>
    %51 = arith.mulf %41, %41 : vector<512x128xf32>
    %cst_25 = arith.constant dense<0.000000e+00> : vector<128xf32>
    %52 = vector.multi_reduction <add>, %51, %cst_25 [0] : vector<512x128xf32> to vector<128xf32>
    %53 = vector.shape_cast %52 : vector<128xf32> to vector<1x128xf32>
    %54 = vector.shape_cast %53 : vector<1x128xf32> to vector<1x1x128xf32>
    %55 = arith.addf %50, %54 : vector<1x1x128xf32>
    %c0_26 = arith.constant 0 : index
    %c0_27 = arith.constant 0 : index
    %c0_28 = arith.constant 0 : index
    %56 = vector.load %arg8[%c0_26, %c0_27, %c0_28] : memref<1x1x128xf32, #tpu.memory_space<vmem>>, vector<1x1x128xf32>
    tpu.vector_store %arg8[%c0_26, %c0_27, %c0_28], %55 {strides = array<i32>} : memref<1x1x128xf32, #tpu.memory_space<vmem>>, vector<1x1x128xf32>,
    return
  }
  func.func @transform_0(%arg0: i32, %arg1: i32) -> (i32, i32, i32, i32) {
    %c1_i32 = arith.constant 1 : i32
    %0 = arith.muli %arg0, %c1_i32 : i32
    %1 = arith.addi %0, %arg1 : i32
    %c0_i32 = arith.constant 0 : i32
    %c0_i32_0 = arith.constant 0 : i32
    %c0_i32_1 = arith.constant 0 : i32
    %c0_i32_2 = arith.constant 0 : i32
    return %1, %c0_i32, %c0_i32_0, %c0_i32_1 : i32, i32, i32, i32
  }
  func.func @transform_1(%arg0: i32, %arg1: i32) -> (i32, i32) {
    %c0_i32 = arith.constant 0 : i32
    %c0_i32_0 = arith.constant 0 : i32
    %c0_i32_1 = arith.constant 0 : i32
    return %c0_i32, %c0_i32_0 : i32, i32
  }
  func.func @transform_2(%arg0: i32, %arg1: i32) -> (i32, i32) {
    %c0_i32 = arith.constant 0 : i32
    %c0_i32_0 = arith.constant 0 : i32
    %c0_i32_1 = arith.constant 0 : i32
    return %c0_i32, %c0_i32_0 : i32, i32
  }
  func.func @transform_3(%arg0: i32, %arg1: i32) -> (i32, i32) {
    %c0_i32 = arith.constant 0 : i32
    %c0_i32_0 = arith.constant 0 : i32
    %c0_i32_1 = arith.constant 0 : i32
    return %c0_i32, %c0_i32_0 : i32, i32
  }
  func.func @transform_4(%arg0: i32, %arg1: i32) -> (i32, i32) {
    %c1_i32 = arith.constant 1 : i32
    %0 = arith.muli %arg0, %c1_i32 : i32
    %1 = arith.addi %0, %arg1 : i32
    %c0_i32 = arith.constant 0 : i32
    %c0_i32_0 = arith.constant 0 : i32
    return %1, %c0_i32 : i32, i32
  }
  func.func @transform_5(%arg0: i32, %arg1: i32) -> (i32, i32, i32) {
    %c0_i32 = arith.constant 0 : i32
    %c0_i32_0 = arith.constant 0 : i32
    %c0_i32_1 = arith.constant 0 : i32
    return %arg0, %c0_i32, %c0_i32_0 : i32, i32, i32
  }
  func.func @transform_6(%arg0: i32, %arg1: i32) -> (i32, i32, i32) {
    %c0_i32 = arith.constant 0 : i32
    %c0_i32_0 = arith.constant 0 : i32
    %c0_i32_1 = arith.constant 0 : i32
    return %arg0, %c0_i32, %c0_i32_0 : i32, i32, i32
  }
}

</mosaic_0001>

<bundles_post_ra>
// kernel: res_block_forward.5
= control target key start
LH: loop header
LB: loop body
LE: loop exit
PB: predicated region body
PF: predicated region fallthrough
CT: control target
= control target key end

     0   :  { %vm351_vm0 = vcmask 31744   ;;  %s1482_s0 = inlined_call_operand.vmem [shape: bf16[512,128], index: 0, kind: input, shape index: {}]   ;;  %s1483_s1 = inlined_call_operand.vmem [shape: f32[1,128], index: 1, kind: input, shape index: {}]   ;;  %s1484_s2 = inlined_call_operand.vmem [shape: f32[1,128], index: 2, kind: input, shape index: {}]   ;;  %s1485_s3 = inlined_call_operand.vmem [shape: f32[512,4], index: 3, kind: input, shape index: {}]   ;;  %s1486_s4 = inlined_call_operand.vmem [shape: f32[512,128], index: 4, kind: output, shape index: {}]  }
   0x1   :  { %v615_v0 = vld [vmem:[%s1482_s0] sm:$0xff]   ;;  %v288_v6 = vld [vmem:[%s1485_s3 + $0x8] sm:$0xff]  ;;  %v289_v11 = vld [vmem:[%s1485_s3 + $0x10] sm:$0xff] }
   0x2   :  { %v806_v1 = vld [vmem:[%s1483_s1] ss:$0 sm:$0xff]  ;;  %v616_v3 = vunpack.c.l.bf16 %v615_v0  ;;  %v617_v5 = vunpack.c.h.bf16 %v615_v0  ;;  %v742_v7 = vld [vmem:[%s1482_s0 + $0x8] sm:$0xff]   ;;  %v353_v9 = vsel %vm351_vm0, %v288_v6, 0.0  ;;  %v290_v13 = vld [vmem:[%s1485_s3 + $0x18] sm:$0xff]  ;;  %v354_v17 = vsel %vm351_vm0, %v289_v11, 0.0 }
   0x3   :  { %v811_v2 = vld [vmem:[%s1484_s2] ss:$0 sm:$0xff]  ;;  %v620_v10 = vunpack.c.l.bf16 %v742_v7  ;;  %v621_v12 = vunpack.c.h.bf16 %v742_v7  ;;  %v743_v14 = vld [vmem:[%s1482_s0 + $0x10] sm:$0xff]   ;;  %v355_v18 = vsel %vm351_vm0, %v290_v13, 0.0  ;;  %v292_v20 = vld [vmem:[%s1485_s3 + $0x28] sm:$0xff] }
   0x4   :  { %v287_v4 = vld [vmem:[%s1485_s3] sm:$0xff]  ;;  %v152_v15 = vmul.f32 %v616_v3, %v806_v1  ;;  %v153_v16 = vmul.f32 %v617_v5, %v806_v1  ;;  %v744_v21 = vld [vmem:[%s1482_s0 + $0x18] sm:$0xff]   ;;  %v624_v24 = vunpack.c.l.bf16 %v743_v14  ;;  %v293_v26 = vld [vmem:[%s1485_s3 + $0x30] sm:$0xff]  ;;  %v625_v29 = vunpack.c.h.bf16 %v743_v14 }
   0x5   :  { %v352_v8 = vsel %vm351_vm0, %v287_v4, 0.0  ;;  %v291_v19 = vld [vmem:[%s1485_s3 + $0x20] sm:$0xff]  ;;  %v154_v22 = vmul.f32 %v620_v10, %v806_v1  ;;  %v155_v23 = vmul.f32 %v621_v12, %v806_v1  ;;  %v357_v30 = vsel %vm351_vm0, %v292_v20, 0.0  ;;  %v294_v48 = vld [vmem:[%s1485_s3 + $0x38] sm:$0xff]  ;;  %v296_v57 = vld [vmem:[%s1485_s3 + $0x48] sm:$0xff] }
   0x6   :  { %v356_v25 = vsel %vm351_vm0, %v291_v19, 0.0  ;;  %v223_v27 = vadd.f32 %v811_v2, %v152_v15  ;;  %v224_v28 = vadd.f32 %v811_v2, %v153_v16  ;;  %v156_v33 = vmul.f32 %v624_v24, %v806_v1  ;;  %v745_v43 = vld [vmem:[%s1482_s0 + $0x20] sm:$0xff]   ;;  %v746_v58 = vld [vmem:[%s1482_s0 + $0x28] sm:$0xff]   ;;  %v297_v63 = vld [vmem:[%s1485_s3 + $0x50] sm:$0xff] }
   0x7   :  { %v225_v31 = vadd.f32 %v811_v2, %v154_v22  ;;  %v226_v32 = vadd.f32 %v811_v2, %v155_v23  ;;  %v628_v34 = vunpack.c.l.bf16 %v744_v21  ;;  %v157_v37 = vmul.f32 %v625_v29, %v806_v1  ;;  %v295_v53 = vld [vmem:[%s1485_s3 + $0x40] sm:$0xff]  ;;  %v298_v6 = vld [vmem:[%s1485_s3 + $0x58] sm:$0xff]  ;;  %v747_v7 = vld [vmem:[%s1482_s0 + $0x30] sm:$0xff]  }
   0x8   :  { %v416_v35 = vadd.f32 %v352_v8, %v223_v27  ;;  %v417_v36 = vadd.f32 %v353_v9, %v224_v28  ;;  %v358_v38 = vsel %vm351_vm0, %v293_v26, 0.0  ;;  %v227_v41 = vadd.f32 %v811_v2, %v156_v33  ;;  %v299_v16 = vld [vmem:[%s1485_s3 + $0x60] sm:$0xff]  ;;  %v300_v26 = vld [vmem:[%s1485_s3 + $0x68] sm:$0xff] }
   0x9   :  { %v418_v39 = vadd.f32 %v354_v17, %v225_v31  ;;  %v419_v40 = vadd.f32 %v355_v18, %v226_v32  ;;  %v158_v42 = vmul.f32 %v628_v34, %v806_v1  ;;  %v228_v46 = vadd.f32 %v811_v2, %v157_v37 }
   0xa   :  { %v480_v44 = vmax.f32 %v416_v35, 0.0  ;;  %v481_v45 = vmax.f32 %v417_v36, 0.0  ;;  %v629_v47 = vunpack.c.h.bf16 %v744_v21  ;;  %v420_v51 = vadd.f32 %v356_v25, %v227_v41  ;;  %v748_v21 = vld [vmem:[%s1482_s0 + $0x38] sm:$0xff]   ;;  %v301_v35 = vld [vmem:[%s1485_s3 + $0x70] sm:$0xff]  ;;  %v749_v36 = vld [vmem:[%s1482_s0 + $0x40] sm:$0xff]  }
   0xb   :  { %v482_v49 = vmax.f32 %v418_v39, 0.0  ;;  %v483_v50 = vmax.f32 %v419_v40, 0.0  ;;  %v229_v52 = vadd.f32 %v811_v2, %v158_v42  ;;  %v421_v54 = vadd.f32 %v357_v30, %v228_v46 }
   0xc   :  { %544 = vst [vmem:[%s1486_s4] sm:$0xff] %v480_v44  ;;  %545 = vst [vmem:[%s1486_s4 + $0x8] sm:$0xff] %v481_v45  ;;  %v159_v55 = vmul.f32 %v629_v47, %v806_v1  ;;  %v632_v56 = vunpack.c.l.bf16 %v745_v43  ;;  %v484_v59 = vmax.f32 %v420_v51, 0.0  ;;  %v359_v61 = vsel %vm351_vm0, %v294_v48, 0.0  ;;  %v302_v45 = vld [vmem:[%s1485_s3 + $0x78] sm:$0xff] }
   0xd   :  { %546 = vst [vmem:[%s1486_s4 + $0x10] sm:$0xff] %v482_v49  ;;  %547 = vst [vmem:[%s1486_s4 + $0x18] sm:$0xff] %v483_v50  ;;  %v422_v60 = vadd.f32 %v358_v38, %v229_v52  ;;  %v633_v62 = vunpack.c.h.bf16 %v745_v43  ;;  %v485_v0 = vmax.f32 %v421_v54, 0.0  ;;  %v360_v5 = vsel %vm351_vm0, %v295_v53, 0.0  ;;  %v303_v50 = vld [vmem:[%s1485_s3 + $0x80] sm:$0xff] }
   0xe   :  { %v230_v3 = vadd.f32 %v811_v2, %v159_v55  ;;  %v160_v4 = vmul.f32 %v632_v56, %v806_v1  ;;  %548 = vst [vmem:[%s1486_s4 + $0x20] sm:$0xff] %v484_v59  ;;  %v361_v10 = vsel %vm351_vm0, %v296_v57, 0.0  ;;  %v636_v11 = vunpack.c.l.bf16 %v746_v58  ;;  %v304_v55 = vld [vmem:[%s1485_s3 + $0x88] sm:$0xff] }
   0xf   :  { %v486_v8 = vmax.f32 %v422_v60, 0.0  ;;  %v161_v9 = vmul.f32 %v633_v62, %v806_v1  ;;  %549 = vst [vmem:[%s1486_s4 + $0x28] sm:$0xff] %v485_v0  ;;  %v362_v14 = vsel %vm351_vm0, %v297_v63, 0.0  ;;  %v637_v15 = vunpack.c.h.bf16 %v746_v58  ;;  %v750_v56 = vld [vmem:[%s1482_s0 + $0x48] sm:$0xff]  }
  0x10   :  { %v423_v12 = vadd.f32 %v359_v61, %v230_v3  ;;  %v231_v13 = vadd.f32 %v811_v2, %v160_v4  ;;  %v162_v18 = vmul.f32 %v636_v11, %v806_v1  ;;  %v363_v19 = vsel %vm351_vm0, %v298_v6, 0.0  ;;  %v305_v61 = vld [vmem:[%s1485_s3 + $0x90] sm:$0xff] }
  0x11   :  { %550 = vst [vmem:[%s1486_s4 + $0x30] sm:$0xff] %v486_v8  ;;  %v232_v17 = vadd.f32 %v811_v2, %v161_v9  ;;  %v640_v20 = vunpack.c.l.bf16 %v747_v7  ;;  %v163_v24 = vmul.f32 %v637_v15, %v806_v1  ;;  %v641_v25 = vunpack.c.h.bf16 %v747_v7  ;;  %v751_v4 = vld [vmem:[%s1482_s0 + $0x50] sm:$0xff]   ;;  %v306_v9 = vld [vmem:[%s1485_s3 + $0x98] sm:$0xff] }
  0x12   :  { %v487_v22 = vmax.f32 %v423_v12, 0.0  ;;  %v424_v23 = vadd.f32 %v360_v5, %v231_v13  ;;  %v233_v28 = vadd.f32 %v811_v2, %v162_v18  ;;  %v364_v30 = vsel %vm351_vm0, %v299_v16, 0.0  ;;  %v307_v18 = vld [vmem:[%s1485_s3 + $0xa0] sm:$0xff] }
  0x13   :  { %v425_v27 = vadd.f32 %v361_v10, %v232_v17  ;;  %v164_v29 = vmul.f32 %v640_v20, %v806_v1  ;;  %v234_v32 = vadd.f32 %v811_v2, %v163_v24  ;;  %v165_v33 = vmul.f32 %v641_v25, %v806_v1  ;;  %v308_v24 = vld [vmem:[%s1485_s3 + $0xa8] sm:$0xff] }
  0x14   :  { %551 = vst [vmem:[%s1486_s4 + $0x38] sm:$0xff] %v487_v22  ;;  %v488_v31 = vmax.f32 %v424_v23, 0.0  ;;  %v644_v34 = vunpack.c.l.bf16 %v748_v21  ;;  %v426_v38 = vadd.f32 %v362_v14, %v233_v28  ;;  %v365_v40 = vsel %vm351_vm0, %v300_v26, 0.0 }
  0x15   :  { %v489_v37 = vmax.f32 %v425_v27, 0.0  ;;  %v235_v39 = vadd.f32 %v811_v2, %v164_v29  ;;  %v427_v41 = vadd.f32 %v363_v19, %v234_v32  ;;  %v236_v42 = vadd.f32 %v811_v2, %v165_v33  ;;  %v752_v19 = vld [vmem:[%s1482_s0 + $0x58] sm:$0xff]   ;;  %v309_v33 = vld [vmem:[%s1485_s3 + $0xb0] sm:$0xff] }
  0x16   :  { %552 = vst [vmem:[%s1486_s4 + $0x40] sm:$0xff] %v488_v31  ;;  %v166_v43 = vmul.f32 %v644_v34, %v806_v1  ;;  %v645_v44 = vunpack.c.h.bf16 %v748_v21  ;;  %v490_v46 = vmax.f32 %v426_v38, 0.0  ;;  %v366_v48 = vsel %vm351_vm0, %v301_v35, 0.0  ;;  %v753_v34 = vld [vmem:[%s1482_s0 + $0x60] sm:$0xff]  }
  0x17   :  { %553 = vst [vmem:[%s1486_s4 + $0x48] sm:$0xff] %v489_v37  ;;  %v428_v47 = vadd.f32 %v364_v30, %v235_v39  ;;  %v648_v49 = vunpack.c.l.bf16 %v749_v36  ;;  %v491_v51 = vmax.f32 %v427_v41, 0.0  ;;  %v429_v52 = vadd.f32 %v365_v40, %v236_v42 }
  0x18   :  { %v237_v53 = vadd.f32 %v811_v2, %v166_v43  ;;  %v167_v54 = vmul.f32 %v645_v44, %v806_v1  ;;  %554 = vst [vmem:[%s1486_s4 + $0x50] sm:$0xff] %v490_v46  ;;  %v367_v58 = vsel %vm351_vm0, %v302_v45, 0.0  ;;  %v649_v60 = vunpack.c.h.bf16 %v749_v36  ;;  %v310_v43 = vld [vmem:[%s1485_s3 + $0xb8] sm:$0xff] }
  0x19   :  { %v492_v57 = vmax.f32 %v428_v47, 0.0  ;;  %v168_v59 = vmul.f32 %v648_v49, %v806_v1  ;;  %555 = vst [vmem:[%s1486_s4 + $0x58] sm:$0xff] %v491_v51  ;;  %v493_v62 = vmax.f32 %v429_v52, 0.0  ;;  %v368_v3 = vsel %vm351_vm0, %v303_v50, 0.0 }
  0x1a   :  { %v430_v63 = vadd.f32 %v366_v48, %v237_v53  ;;  %v238_v0 = vadd.f32 %v811_v2, %v167_v54  ;;  %v169_v6 = vmul.f32 %v649_v60, %v806_v1  ;;  %v369_v7 = vsel %vm351_vm0, %v304_v55, 0.0  ;;  %v311_v48 = vld [vmem:[%s1485_s3 + $0xc0] sm:$0xff]  ;;  %v312_v53 = vld [vmem:[%s1485_s3 + $0xc8] sm:$0xff] }
  0x1b   :  { %556 = vst [vmem:[%s1486_s4 + $0x60] sm:$0xff] %v492_v57  ;;  %v239_v5 = vadd.f32 %v811_v2, %v168_v59  ;;  %v652_v8 = vunpack.c.l.bf16 %v750_v56  ;;  %557 = vst [vmem:[%s1486_s4 + $0x68] sm:$0xff] %v493_v62  ;;  %v370_v12 = vsel %vm351_vm0, %v305_v61, 0.0  ;;  %v653_v13 = vunpack.c.h.bf16 %v750_v56  ;;  %v754_v54 = vld [vmem:[%s1482_s0 + $0x68] sm:$0xff]   ;;  %v313_v59 = vld [vmem:[%s1485_s3 + $0xd0] sm:$0xff] }
  0x1c   :  { %v494_v10 = vmax.f32 %v430_v63, 0.0  ;;  %v431_v11 = vadd.f32 %v367_v58, %v238_v0  ;;  %v240_v15 = vadd.f32 %v811_v2, %v169_v6  ;;  %v656_v17 = vunpack.c.l.bf16 %v751_v4  ;;  %v755_v0 = vld [vmem:[%s1482_s0 + $0x70] sm:$0xff]  }
  0x1d   :  { %v432_v14 = vadd.f32 %v368_v3, %v239_v5  ;;  %v170_v16 = vmul.f32 %v652_v8, %v806_v1  ;;  %v171_v21 = vmul.f32 %v653_v13, %v806_v1  ;;  %v371_v22 = vsel %vm351_vm0, %v306_v9, 0.0 }
  0x1e   :  { %558 = vst [vmem:[%s1486_s4 + $0x70] sm:$0xff] %v494_v10  ;;  %v495_v20 = vmax.f32 %v431_v11, 0.0  ;;  %v657_v23 = vunpack.c.h.bf16 %v751_v4  ;;  %v433_v26 = vadd.f32 %v369_v7, %v240_v15  ;;  %v172_v28 = vmul.f32 %v656_v17, %v806_v1  ;;  %v314_v7 = vld [vmem:[%s1485_s3 + $0xd8] sm:$0xff] }
  0x1f   :  { %v496_v25 = vmax.f32 %v432_v14, 0.0  ;;  %v241_v27 = vadd.f32 %v811_v2, %v170_v16  ;;  %v242_v29 = vadd.f32 %v811_v2, %v171_v21  ;;  %v372_v30 = vsel %vm351_vm0, %v307_v18, 0.0  ;;  %v315_v16 = vld [vmem:[%s1485_s3 + $0xe0] sm:$0xff]  ;;  %v756_v17 = vld [vmem:[%s1482_s0 + $0x78] sm:$0xff]  }
  0x20   :  { %559 = vst [vmem:[%s1486_s4 + $0x78] sm:$0xff] %v495_v20  ;;  %v173_v31 = vmul.f32 %v657_v23, %v806_v1  ;;  %v660_v32 = vunpack.c.l.bf16 %v752_v19  ;;  %v497_v35 = vmax.f32 %v433_v26, 0.0  ;;  %v243_v37 = vadd.f32 %v811_v2, %v172_v28 }
  0x21   :  { %560 = vst [vmem:[%s1486_s4 + $0x80] sm:$0xff] %v496_v25  ;;  %v434_v36 = vadd.f32 %v370_v12, %v241_v27  ;;  %v373_v38 = vsel %vm351_vm0, %v308_v24, 0.0  ;;  %v435_v39 = vadd.f32 %v371_v22, %v242_v29  ;;  %v661_v42 = vunpack.c.h.bf16 %v752_v19  ;;  %v316_v22 = vld [vmem:[%s1485_s3 + $0xe8] sm:$0xff] }
  0x22   :  { %v244_v40 = vadd.f32 %v811_v2, %v173_v31  ;;  %v174_v41 = vmul.f32 %v660_v32, %v806_v1  ;;  %561 = vst [vmem:[%s1486_s4 + $0x88] sm:$0xff] %v497_v35  ;;  %v436_v45 = vadd.f32 %v372_v30, %v243_v37  ;;  %v374_v46 = vsel %vm351_vm0, %v309_v33, 0.0  ;;  %v317_v31 = vld [vmem:[%s1485_s3 + $0xf0] sm:$0xff]  ;;  %v757_v32 = vld [vmem:[%s1482_s0 + $0x80] sm:$0xff]  }
  0x23   :  { %v498_v44 = vmax.f32 %v434_v36, 0.0  ;;  %v664_v47 = vunpack.c.l.bf16 %v753_v34  ;;  %v499_v49 = vmax.f32 %v435_v39, 0.0  ;;  %v175_v52 = vmul.f32 %v661_v42, %v806_v1 }
  0x24   :  { %v437_v50 = vadd.f32 %v373_v38, %v244_v40  ;;  %v245_v51 = vadd.f32 %v811_v2, %v174_v41  ;;  %v500_v55 = vmax.f32 %v436_v45, 0.0  ;;  %v375_v56 = vsel %vm351_vm0, %v310_v43, 0.0  ;;  %v318_v41 = vld [vmem:[%s1485_s3 + $0xf8] sm:$0xff] }
  0x25   :  { %562 = vst [vmem:[%s1486_s4 + $0x90] sm:$0xff] %v498_v44  ;;  %v176_v57 = vmul.f32 %v664_v47, %v806_v1  ;;  %v665_v58 = vunpack.c.h.bf16 %v753_v34  ;;  %563 = vst [vmem:[%s1486_s4 + $0x98] sm:$0xff] %v499_v49  ;;  %v246_v62 = vadd.f32 %v811_v2, %v175_v52  ;;  %v376_v63 = vsel %vm351_vm0, %v311_v48, 0.0  ;;  %v758_v52 = vld [vmem:[%s1482_s0 + $0x88] sm:$0xff]  }
  0x26   :  { %v501_v60 = vmax.f32 %v437_v50, 0.0  ;;  %v438_v61 = vadd.f32 %v374_v46, %v245_v51  ;;  %564 = vst [vmem:[%s1486_s4 + $0xa0] sm:$0xff] %v500_v55  ;;  %v377_v5 = vsel %vm351_vm0, %v312_v53, 0.0  ;;  %v668_v6 = vunpack.c.l.bf16 %v754_v54  ;;  %v319_v46 = vld [vmem:[%s1485_s3 + $0x100] sm:$0xff]  ;;  %v320_v51 = vld [vmem:[%s1485_s3 + $0x108] sm:$0xff] }
  0x27   :  { %v247_v3 = vadd.f32 %v811_v2, %v176_v57  ;;  %v177_v4 = vmul.f32 %v665_v58, %v806_v1  ;;  %v439_v9 = vadd.f32 %v375_v56, %v246_v62  ;;  %v378_v10 = vsel %vm351_vm0, %v313_v59, 0.0  ;;  %v321_v57 = vld [vmem:[%s1485_s3 + $0x110] sm:$0xff] }
  0x28   :  { %565 = vst [vmem:[%s1486_s4 + $0xa8] sm:$0xff] %v501_v60  ;;  %v502_v8 = vmax.f32 %v438_v61, 0.0  ;;  %v669_v11 = vunpack.c.h.bf16 %v754_v54  ;;  %v178_v14 = vmul.f32 %v668_v6, %v806_v1  ;;  %v672_v15 = vunpack.c.l.bf16 %v755_v0  ;;  %v759_v62 = vld [vmem:[%s1482_s0 + $0x90] sm:$0xff]  }
  0x29   :  { %v440_v12 = vadd.f32 %v376_v63, %v247_v3  ;;  %v248_v13 = vadd.f32 %v811_v2, %v177_v4  ;;  %v503_v18 = vmax.f32 %v439_v9, 0.0  ;;  %v379_v20 = vsel %vm351_vm0, %v314_v7, 0.0 }
  0x2a   :  { %566 = vst [vmem:[%s1486_s4 + $0xb0] sm:$0xff] %v502_v8  ;;  %v179_v19 = vmul.f32 %v669_v11, %v806_v1  ;;  %v673_v21 = vunpack.c.h.bf16 %v755_v0  ;;  %v249_v25 = vadd.f32 %v811_v2, %v178_v14  ;;  %v180_v26 = vmul.f32 %v672_v15, %v806_v1  ;;  %v323_v14 = vld [vmem:[%s1485_s3 + $0x120] sm:$0xff]  ;;  %v760_v15 = vld [vmem:[%s1482_s0 + $0x98] sm:$0xff]  }
  0x2b   :  { %v504_v23 = vmax.f32 %v440_v12, 0.0  ;;  %v441_v24 = vadd.f32 %v377_v5, %v248_v13  ;;  %567 = vst [vmem:[%s1486_s4 + $0xb8] sm:$0xff] %v503_v18  ;;  %v380_v28 = vsel %vm351_vm0, %v315_v16, 0.0  ;;  %v676_v30 = vunpack.c.l.bf16 %v756_v17  ;;  %v322_v5 = vld [vmem:[%s1485_s3 + $0x118] sm:$0xff] }
  0x2c   :  { %v250_v27 = vadd.f32 %v811_v2, %v179_v19  ;;  %v181_v29 = vmul.f32 %v673_v21, %v806_v1  ;;  %v442_v34 = vadd.f32 %v378_v10, %v249_v25  ;;  %v251_v35 = vadd.f32 %v811_v2, %v180_v26 }
  0x2d   :  { %568 = vst [vmem:[%s1486_s4 + $0xc0] sm:$0xff] %v504_v23  ;;  %v505_v33 = vmax.f32 %v441_v24, 0.0  ;;  %v381_v36 = vsel %vm351_vm0, %v316_v22, 0.0  ;;  %v182_v39 = vmul.f32 %v676_v30, %v806_v1  ;;  %v677_v40 = vunpack.c.h.bf16 %v756_v17  ;;  %v761_v30 = vld [vmem:[%s1482_s0 + $0xa0] sm:$0xff]  }
  0x2e   :  { %v443_v37 = vadd.f32 %v379_v20, %v250_v27  ;;  %v252_v38 = vadd.f32 %v811_v2, %v181_v29  ;;  %v506_v42 = vmax.f32 %v442_v34, 0.0  ;;  %v444_v43 = vadd.f32 %v380_v28, %v251_v35  ;;  %v324_v20 = vld [vmem:[%s1485_s3 + $0x128] sm:$0xff]  ;;  %v325_v29 = vld [vmem:[%s1485_s3 + $0x130] sm:$0xff] }
  0x2f   :  { %569 = vst [vmem:[%s1486_s4 + $0xc8] sm:$0xff] %v505_v33  ;;  %v382_v44 = vsel %vm351_vm0, %v317_v31, 0.0  ;;  %v680_v45 = vunpack.c.l.bf16 %v757_v32  ;;  %v253_v49 = vadd.f32 %v811_v2, %v182_v39  ;;  %v183_v50 = vmul.f32 %v677_v40, %v806_v1  ;;  %v326_v39 = vld [vmem:[%s1485_s3 + $0x138] sm:$0xff] }
  0x30   :  { %v507_v47 = vmax.f32 %v443_v37, 0.0  ;;  %v445_v48 = vadd.f32 %v381_v36, %v252_v38  ;;  %570 = vst [vmem:[%s1486_s4 + $0xd0] sm:$0xff] %v506_v42  ;;  %v508_v53 = vmax.f32 %v444_v43, 0.0  ;;  %v383_v54 = vsel %vm351_vm0, %v318_v41, 0.0 }
  0x31   :  { %v184_v55 = vmul.f32 %v680_v45, %v806_v1  ;;  %v681_v56 = vunpack.c.h.bf16 %v757_v32  ;;  %v446_v59 = vadd.f32 %v382_v44, %v253_v49  ;;  %v254_v60 = vadd.f32 %v811_v2, %v183_v50  ;;  %v327_v44 = vld [vmem:[%s1485_s3 + $0x140] sm:$0xff]  ;;  %v328_v49 = vld [vmem:[%s1485_s3 + $0x148] sm:$0xff] }
  0x32   :  { %571 = vst [vmem:[%s1486_s4 + $0xd8] sm:$0xff] %v507_v47  ;;  %v509_v58 = vmax.f32 %v445_v48, 0.0  ;;  %v384_v61 = vsel %vm351_vm0, %v319_v46, 0.0  ;;  %572 = vst [vmem:[%s1486_s4 + $0xe0] sm:$0xff] %v508_v53  ;;  %v385_v3 = vsel %vm351_vm0, %v320_v51, 0.0  ;;  %v684_v4 = vunpack.c.l.bf16 %v758_v52  ;;  %v762_v50 = vld [vmem:[%s1482_s0 + $0xa8] sm:$0xff]  }
  0x33   :  { %v255_v63 = vadd.f32 %v811_v2, %v184_v55  ;;  %v185_v0 = vmul.f32 %v681_v56, %v806_v1  ;;  %v510_v6 = vmax.f32 %v446_v59, 0.0  ;;  %v447_v7 = vadd.f32 %v383_v54, %v254_v60  ;;  %v329_v55 = vld [vmem:[%s1485_s3 + $0x150] sm:$0xff] }
  0x34   :  { %573 = vst [vmem:[%s1486_s4 + $0xe8] sm:$0xff] %v509_v58  ;;  %v386_v8 = vsel %vm351_vm0, %v321_v57, 0.0  ;;  %v685_v9 = vunpack.c.h.bf16 %v758_v52  ;;  %v186_v12 = vmul.f32 %v684_v4, %v806_v1  ;;  %v688_v13 = vunpack.c.l.bf16 %v759_v62  ;;  %v763_v60 = vld [vmem:[%s1482_s0 + $0xb0] sm:$0xff]  }
  0x35   :  { %v448_v10 = vadd.f32 %v384_v61, %v255_v63  ;;  %v256_v11 = vadd.f32 %v811_v2, %v185_v0  ;;  %574 = vst [vmem:[%s1486_s4 + $0xf0] sm:$0xff] %v510_v6  ;;  %v511_v16 = vmax.f32 %v447_v7, 0.0  ;;  %v387_v18 = vsel %vm351_vm0, %v322_v5, 0.0 }
  0x36   :  { %v187_v17 = vmul.f32 %v685_v9, %v806_v1  ;;  %v689_v19 = vunpack.c.h.bf16 %v759_v62  ;;  %v257_v23 = vadd.f32 %v811_v2, %v186_v12  ;;  %v188_v24 = vmul.f32 %v688_v13, %v806_v1  ;;  %v331_v12 = vld [vmem:[%s1485_s3 + $0x160] sm:$0xff]  ;;  %v764_v13 = vld [vmem:[%s1482_s0 + $0xb8] sm:$0xff]  }
  0x37   :  { %v512_v21 = vmax.f32 %v448_v10, 0.0  ;;  %v449_v22 = vadd.f32 %v385_v3, %v256_v11  ;;  %575 = vst [vmem:[%s1486_s4 + $0xf8] sm:$0xff] %v511_v16  ;;  %v388_v26 = vsel %vm351_vm0, %v323_v14, 0.0  ;;  %v692_v28 = vunpack.c.l.bf16 %v760_v15  ;;  %v330_v3 = vld [vmem:[%s1485_s3 + $0x158] sm:$0xff] }
  0x38   :  { %v258_v25 = vadd.f32 %v811_v2, %v187_v17  ;;  %v189_v27 = vmul.f32 %v689_v19, %v806_v1  ;;  %v450_v32 = vadd.f32 %v386_v8, %v257_v23  ;;  %v259_v33 = vadd.f32 %v811_v2, %v188_v24 }
  0x39   :  { %576 = vst [vmem:[%s1486_s4 + $0x100] sm:$0xff] %v512_v21  ;;  %v513_v31 = vmax.f32 %v449_v22, 0.0  ;;  %v389_v34 = vsel %vm351_vm0, %v324_v20, 0.0  ;;  %v190_v37 = vmul.f32 %v692_v28, %v806_v1  ;;  %v693_v38 = vunpack.c.h.bf16 %v760_v15  ;;  %v765_v28 = vld [vmem:[%s1482_s0 + $0xc0] sm:$0xff]  }
  0x3a   :  { %v451_v35 = vadd.f32 %v387_v18, %v258_v25  ;;  %v260_v36 = vadd.f32 %v811_v2, %v189_v27  ;;  %v514_v40 = vmax.f32 %v450_v32, 0.0  ;;  %v452_v41 = vadd.f32 %v388_v26, %v259_v33  ;;  %v332_v18 = vld [vmem:[%s1485_s3 + $0x168] sm:$0xff]  ;;  %v333_v27 = vld [vmem:[%s1485_s3 + $0x170] sm:$0xff] }
  0x3b   :  { %577 = vst [vmem:[%s1486_s4 + $0x108] sm:$0xff] %v513_v31  ;;  %v390_v42 = vsel %vm351_vm0, %v325_v29, 0.0  ;;  %v696_v43 = vunpack.c.l.bf16 %v761_v30  ;;  %v261_v47 = vadd.f32 %v811_v2, %v190_v37  ;;  %v191_v48 = vmul.f32 %v693_v38, %v806_v1  ;;  %v334_v37 = vld [vmem:[%s1485_s3 + $0x178] sm:$0xff] }
  0x3c   :  { %v515_v45 = vmax.f32 %v451_v35, 0.0  ;;  %v453_v46 = vadd.f32 %v389_v34, %v260_v36  ;;  %578 = vst [vmem:[%s1486_s4 + $0x110] sm:$0xff] %v514_v40  ;;  %v516_v51 = vmax.f32 %v452_v41, 0.0  ;;  %v391_v52 = vsel %vm351_vm0, %v326_v39, 0.0 }
  0x3d   :  { %v192_v53 = vmul.f32 %v696_v43, %v806_v1  ;;  %v697_v54 = vunpack.c.h.bf16 %v761_v30  ;;  %v454_v57 = vadd.f32 %v390_v42, %v261_v47  ;;  %v262_v58 = vadd.f32 %v811_v2, %v191_v48  ;;  %v335_v42 = vld [vmem:[%s1485_s3 + $0x180] sm:$0xff]  ;;  %v336_v47 = vld [vmem:[%s1485_s3 + $0x188] sm:$0xff] }
  0x3e   :  { %579 = vst [vmem:[%s1486_s4 + $0x118] sm:$0xff] %v515_v45  ;;  %v517_v56 = vmax.f32 %v453_v46, 0.0  ;;  %v392_v59 = vsel %vm351_vm0, %v327_v44, 0.0  ;;  %580 = vst [vmem:[%s1486_s4 + $0x120] sm:$0xff] %v516_v51  ;;  %v393_v63 = vsel %vm351_vm0, %v328_v49, 0.0  ;;  %v700_v0 = vunpack.c.l.bf16 %v762_v50  ;;  %v766_v48 = vld [vmem:[%s1482_s0 + $0xc8] sm:$0xff]  }
  0x3f   :  { %v263_v61 = vadd.f32 %v811_v2, %v192_v53  ;;  %v193_v62 = vmul.f32 %v697_v54, %v806_v1  ;;  %v518_v4 = vmax.f32 %v454_v57, 0.0  ;;  %v455_v5 = vadd.f32 %v391_v52, %v262_v58  ;;  %v337_v53 = vld [vmem:[%s1485_s3 + $0x190] sm:$0xff] }
  0x40   :  { %581 = vst [vmem:[%s1486_s4 + $0x128] sm:$0xff] %v517_v56  ;;  %v394_v6 = vsel %vm351_vm0, %v329_v55, 0.0  ;;  %v701_v7 = vunpack.c.h.bf16 %v762_v50  ;;  %v194_v10 = vmul.f32 %v700_v0, %v806_v1  ;;  %v704_v11 = vunpack.c.l.bf16 %v763_v60  ;;  %v767_v58 = vld [vmem:[%s1482_s0 + $0xd0] sm:$0xff]  }
  0x41   :  { %v456_v8 = vadd.f32 %v392_v59, %v263_v61  ;;  %v264_v9 = vadd.f32 %v811_v2, %v193_v62  ;;  %582 = vst [vmem:[%s1486_s4 + $0x130] sm:$0xff] %v518_v4  ;;  %v519_v14 = vmax.f32 %v455_v5, 0.0  ;;  %v395_v16 = vsel %vm351_vm0, %v330_v3, 0.0 }
  0x42   :  { %v195_v15 = vmul.f32 %v701_v7, %v806_v1  ;;  %v705_v17 = vunpack.c.h.bf16 %v763_v60  ;;  %v265_v21 = vadd.f32 %v811_v2, %v194_v10  ;;  %v196_v22 = vmul.f32 %v704_v11, %v806_v1  ;;  %v339_v10 = vld [vmem:[%s1485_s3 + $0x1a0] sm:$0xff]  ;;  %v768_v11 = vld [vmem:[%s1482_s0 + $0xd8] sm:$0xff]  }
  0x43   :  { %v520_v19 = vmax.f32 %v456_v8, 0.0  ;;  %v457_v20 = vadd.f32 %v393_v63, %v264_v9  ;;  %583 = vst [vmem:[%s1486_s4 + $0x138] sm:$0xff] %v519_v14  ;;  %v396_v24 = vsel %vm351_vm0, %v331_v12, 0.0  ;;  %v708_v26 = vunpack.c.l.bf16 %v764_v13  ;;  %v338_v63 = vld [vmem:[%s1485_s3 + $0x198] sm:$0xff] }
  0x44   :  { %v266_v23 = vadd.f32 %v811_v2, %v195_v15  ;;  %v197_v25 = vmul.f32 %v705_v17, %v806_v1  ;;  %v458_v30 = vadd.f32 %v394_v6, %v265_v21  ;;  %v267_v31 = vadd.f32 %v811_v2, %v196_v22 }
  0x45   :  { %584 = vst [vmem:[%s1486_s4 + $0x140] sm:$0xff] %v520_v19  ;;  %v521_v29 = vmax.f32 %v457_v20, 0.0  ;;  %v397_v32 = vsel %vm351_vm0, %v332_v18, 0.0  ;;  %v198_v35 = vmul.f32 %v708_v26, %v806_v1  ;;  %v709_v36 = vunpack.c.h.bf16 %v764_v13  ;;  %v769_v26 = vld [vmem:[%s1482_s0 + $0xe0] sm:$0xff]  }
  0x46   :  { %v459_v33 = vadd.f32 %v395_v16, %v266_v23  ;;  %v268_v34 = vadd.f32 %v811_v2, %v197_v25  ;;  %v522_v38 = vmax.f32 %v458_v30, 0.0  ;;  %v460_v39 = vadd.f32 %v396_v24, %v267_v31  ;;  %v340_v16 = vld [vmem:[%s1485_s3 + $0x1a8] sm:$0xff]  ;;  %v341_v25 = vld [vmem:[%s1485_s3 + $0x1b0] sm:$0xff] }
  0x47   :  { %585 = vst [vmem:[%s1486_s4 + $0x148] sm:$0xff] %v521_v29  ;;  %v398_v40 = vsel %vm351_vm0, %v333_v27, 0.0  ;;  %v712_v41 = vunpack.c.l.bf16 %v765_v28  ;;  %v269_v45 = vadd.f32 %v811_v2, %v198_v35  ;;  %v199_v46 = vmul.f32 %v709_v36, %v806_v1  ;;  %v342_v35 = vld [vmem:[%s1485_s3 + $0x1b8] sm:$0xff] }
  0x48   :  { %v523_v43 = vmax.f32 %v459_v33, 0.0  ;;  %v461_v44 = vadd.f32 %v397_v32, %v268_v34  ;;  %586 = vst [vmem:[%s1486_s4 + $0x150] sm:$0xff] %v522_v38  ;;  %v524_v49 = vmax.f32 %v460_v39, 0.0  ;;  %v399_v50 = vsel %vm351_vm0, %v334_v37, 0.0 }
  0x49   :  { %v200_v51 = vmul.f32 %v712_v41, %v806_v1  ;;  %v713_v52 = vunpack.c.h.bf16 %v765_v28  ;;  %v462_v55 = vadd.f32 %v398_v40, %v269_v45  ;;  %v270_v56 = vadd.f32 %v811_v2, %v199_v46  ;;  %v343_v40 = vld [vmem:[%s1485_s3 + $0x1c0] sm:$0xff]  ;;  %v344_v45 = vld [vmem:[%s1485_s3 + $0x1c8] sm:$0xff] }
  0x4a   :  { %587 = vst [vmem:[%s1486_s4 + $0x158] sm:$0xff] %v523_v43  ;;  %v525_v54 = vmax.f32 %v461_v44, 0.0  ;;  %v400_v57 = vsel %vm351_vm0, %v335_v42, 0.0  ;;  %588 = vst [vmem:[%s1486_s4 + $0x160] sm:$0xff] %v524_v49  ;;  %v401_v61 = vsel %vm351_vm0, %v336_v47, 0.0  ;;  %v716_v62 = vunpack.c.l.bf16 %v766_v48  ;;  %v770_v46 = vld [vmem:[%s1482_s0 + $0xe8] sm:$0xff]  }
  0x4b   :  { %v271_v59 = vadd.f32 %v811_v2, %v200_v51  ;;  %v201_v60 = vmul.f32 %v713_v52, %v806_v1  ;;  %v526_v0 = vmax.f32 %v462_v55, 0.0  ;;  %v463_v3 = vadd.f32 %v399_v50, %v270_v56  ;;  %v345_v51 = vld [vmem:[%s1485_s3 + $0x1d0] sm:$0xff] }
  0x4c   :  { %589 = vst [vmem:[%s1486_s4 + $0x168] sm:$0xff] %v525_v54  ;;  %v402_v4 = vsel %vm351_vm0, %v337_v53, 0.0  ;;  %v717_v5 = vunpack.c.h.bf16 %v766_v48  ;;  %v202_v8 = vmul.f32 %v716_v62, %v806_v1  ;;  %v720_v9 = vunpack.c.l.bf16 %v767_v58  ;;  %v771_v56 = vld [vmem:[%s1482_s0 + $0xf0] sm:$0xff]  }
  0x4d   :  { %v464_v6 = vadd.f32 %v400_v57, %v271_v59  ;;  %v272_v7 = vadd.f32 %v811_v2, %v201_v60  ;;  %590 = vst [vmem:[%s1486_s4 + $0x170] sm:$0xff] %v526_v0  ;;  %v527_v12 = vmax.f32 %v463_v3, 0.0  ;;  %v403_v14 = vsel %vm351_vm0, %v338_v63, 0.0 }
  0x4e   :  { %v203_v13 = vmul.f32 %v717_v5, %v806_v1  ;;  %v721_v15 = vunpack.c.h.bf16 %v767_v58  ;;  %v273_v19 = vadd.f32 %v811_v2, %v202_v8  ;;  %v204_v20 = vmul.f32 %v720_v9, %v806_v1  ;;  %v347_v8 = vld [vmem:[%s1485_s3 + $0x1e0] sm:$0xff]  ;;  %v772_v9 = vld [vmem:[%s1482_s0 + $0xf8] sm:$0xff]  }
  0x4f   :  { %v528_v17 = vmax.f32 %v464_v6, 0.0  ;;  %v465_v18 = vadd.f32 %v401_v61, %v272_v7  ;;  %591 = vst [vmem:[%s1486_s4 + $0x178] sm:$0xff] %v527_v12  ;;  %v404_v22 = vsel %vm351_vm0, %v339_v10, 0.0  ;;  %v724_v24 = vunpack.c.l.bf16 %v768_v11  ;;  %v346_v61 = vld [vmem:[%s1485_s3 + $0x1d8] sm:$0xff] }
  0x50   :  { %v274_v21 = vadd.f32 %v811_v2, %v203_v13  ;;  %v205_v23 = vmul.f32 %v721_v15, %v806_v1  ;;  %v466_v28 = vadd.f32 %v402_v4, %v273_v19  ;;  %v275_v29 = vadd.f32 %v811_v2, %v204_v20 }
  0x51   :  { %592 = vst [vmem:[%s1486_s4 + $0x180] sm:$0xff] %v528_v17  ;;  %v529_v27 = vmax.f32 %v465_v18, 0.0  ;;  %v405_v30 = vsel %vm351_vm0, %v340_v16, 0.0  ;;  %v206_v33 = vmul.f32 %v724_v24, %v806_v1  ;;  %v725_v34 = vunpack.c.h.bf16 %v768_v11 }
  0x52   :  { %v467_v31 = vadd.f32 %v403_v14, %v274_v21  ;;  %v276_v32 = vadd.f32 %v811_v2, %v205_v23  ;;  %v530_v36 = vmax.f32 %v466_v28, 0.0  ;;  %v468_v37 = vadd.f32 %v404_v22, %v275_v29  ;;  %v348_v14 = vld [vmem:[%s1485_s3 + $0x1e8] sm:$0xff]  ;;  %v349_v23 = vld [vmem:[%s1485_s3 + $0x1f0] sm:$0xff]  ;;  %v774_v29 = vld [vmem:[%s1483_s1] ss:$0 sm:$0xff] }
  0x53   :  { %593 = vst [vmem:[%s1486_s4 + $0x188] sm:$0xff] %v529_v27  ;;  %v406_v38 = vsel %vm351_vm0, %v341_v25, 0.0  ;;  %v728_v39 = vunpack.c.l.bf16 %v769_v26  ;;  %v277_v43 = vadd.f32 %v811_v2, %v206_v33  ;;  %v207_v44 = vmul.f32 %v725_v34, %v806_v1 }
  0x54   :  { %v531_v41 = vmax.f32 %v467_v31, 0.0  ;;  %v469_v42 = vadd.f32 %v405_v30, %v276_v32  ;;  %594 = vst [vmem:[%s1486_s4 + $0x190] sm:$0xff] %v530_v36  ;;  %v532_v47 = vmax.f32 %v468_v37, 0.0  ;;  %v407_v48 = vsel %vm351_vm0, %v342_v35, 0.0  ;;  %v350_v32 = vld [vmem:[%s1485_s3 + $0x1f8] sm:$0xff] }
  0x55   :  { %v208_v49 = vmul.f32 %v728_v39, %v806_v1  ;;  %v729_v50 = vunpack.c.h.bf16 %v769_v26  ;;  %v470_v53 = vadd.f32 %v406_v38, %v277_v43  ;;  %v278_v54 = vadd.f32 %v811_v2, %v207_v44  ;;  %v773_v26 = vld [vmem:[%s1484_s2] ss:$0 sm:$0xff] }
  0x56   :  { %595 = vst [vmem:[%s1486_s4 + $0x198] sm:$0xff] %v531_v41  ;;  %v533_v52 = vmax.f32 %v469_v42, 0.0  ;;  %v408_v55 = vsel %vm351_vm0, %v343_v40, 0.0  ;;  %596 = vst [vmem:[%s1486_s4 + $0x1a0] sm:$0xff] %v532_v47  ;;  %v409_v59 = vsel %vm351_vm0, %v344_v45, 0.0  ;;  %v732_v60 = vunpack.c.l.bf16 %v770_v46 }
  0x57   :  { %v279_v57 = vadd.f32 %v811_v2, %v208_v49  ;;  %v209_v58 = vmul.f32 %v729_v50, %v806_v1  ;;  %v534_v62 = vmax.f32 %v470_v53, 0.0  ;;  %v471_v63 = vadd.f32 %v407_v48, %v278_v54 }
  0x58   :  { %597 = vst [vmem:[%s1486_s4 + $0x1a8] sm:$0xff] %v533_v52  ;;  %v410_v0 = vsel %vm351_vm0, %v345_v51, 0.0  ;;  %v733_v3 = vunpack.c.h.bf16 %v770_v46  ;;  %v210_v6 = vmul.f32 %v732_v60, %v806_v1  ;;  %v736_v7 = vunpack.c.l.bf16 %v771_v56 }
  0x59   :  { %v472_v4 = vadd.f32 %v408_v55, %v279_v57  ;;  %v280_v5 = vadd.f32 %v811_v2, %v209_v58  ;;  %598 = vst [vmem:[%s1486_s4 + $0x1b0] sm:$0xff] %v534_v62  ;;  %v535_v10 = vmax.f32 %v471_v63, 0.0  ;;  %v411_v12 = vsel %vm351_vm0, %v346_v61, 0.0 }
  0x5a   :  { %v211_v11 = vmul.f32 %v733_v3, %v806_v1  ;;  %v737_v13 = vunpack.c.h.bf16 %v771_v56  ;;  %v281_v17 = vadd.f32 %v811_v2, %v210_v6  ;;  %v212_v18 = vmul.f32 %v736_v7, %v806_v1 }
  0x5b   :  { %v536_v15 = vmax.f32 %v472_v4, 0.0  ;;  %v473_v16 = vadd.f32 %v409_v59, %v280_v5  ;;  %599 = vst [vmem:[%s1486_s4 + $0x1b8] sm:$0xff] %v535_v10  ;;  %v412_v20 = vsel %vm351_vm0, %v347_v8, 0.0  ;;  %v740_v22 = vunpack.c.l.bf16 %v772_v9 }
  0x5c   :  { %v282_v19 = vadd.f32 %v811_v2, %v211_v11  ;;  %v213_v21 = vmul.f32 %v737_v13, %v806_v1  ;;  %v474_v25 = vadd.f32 %v410_v0, %v281_v17  ;;  %v283_v2 = vadd.f32 %v773_v26, %v212_v18 }
  0x5d   :  { %600 = vst [vmem:[%s1486_s4 + $0x1c0] sm:$0xff] %v536_v15  ;;  %v537_v24 = vmax.f32 %v473_v16, 0.0  ;;  %v413_v27 = vsel %vm351_vm0, %v348_v14, 0.0  ;;  %v214_v30 = vmul.f32 %v774_v29, %v740_v22  ;;  %v741_v31 = vunpack.c.h.bf16 %v772_v9 }
  0x5e   :  { %v475_v28 = vadd.f32 %v411_v12, %v282_v19  ;;  %v284_v1 = vadd.f32 %v773_v26, %v213_v21  ;;  %v538_v33 = vmax.f32 %v474_v25, 0.0  ;;  %v476_v34 = vadd.f32 %v412_v20, %v283_v2 }
  0x5f   :  { %601 = vst [vmem:[%s1486_s4 + $0x1c8] sm:$0xff] %v537_v24  ;;  %v414_v35 = vsel %vm351_vm0, %v349_v23, 0.0  ;;  %v285_v38 = vadd.f32 %v773_v26, %v214_v30  ;;  %v215_v39 = vmul.f32 %v774_v29, %v741_v31  ;;  %v415_v41 = vsel %vm351_vm0, %v350_v32, 0.0 }
  0x60   :  { %v539_v36 = vmax.f32 %v475_v28, 0.0  ;;  %v477_v37 = vadd.f32 %v413_v27, %v284_v1  ;;  %602 = vst [vmem:[%s1486_s4 + $0x1d0] sm:$0xff] %v538_v33  ;;  %v540_v40 = vmax.f32 %v476_v34, 0.0 }
  0x61   :  { %v478_v43 = vadd.f32 %v414_v35, %v285_v38  ;;  %v286_v44 = vadd.f32 %v773_v26, %v215_v39 }
  0x62   :  { %603 = vst [vmem:[%s1486_s4 + $0x1d8] sm:$0xff] %v539_v36  ;;  %v541_v42 = vmax.f32 %v477_v37, 0.0  ;;  %604 = vst [vmem:[%s1486_s4 + $0x1e0] sm:$0xff] %v540_v40 }
  0x63   :  { %v542_v45 = vmax.f32 %v478_v43, 0.0  ;;  %v479_v46 = vadd.f32 %v415_v41, %v286_v44 }
  0x64   :  { %605 = vst [vmem:[%s1486_s4 + $0x1e8] sm:$0xff] %v541_v42 }
  0x65   :  { %606 = vst [vmem:[%s1486_s4 + $0x1f0] sm:$0xff] %v542_v45  ;;  %v543_v47 = vmax.f32 %v479_v46, 0.0 }
  0x67   :  { %607 = vst [vmem:[%s1486_s4 + $0x1f8] sm:$0xff] %v543_v47 }

// kernel: res_block_forward.4
= control target key start
LH: loop header
LB: loop body
LE: loop exit
PB: predicated region body
PF: predicated region fallthrough
CT: control target
= control target key end

     0   :  { %vm729_vm0 = vcmask 1040384   ;;  %vm730_vm1 = vsmask.f32 256  ;;  %v3967_v0 = vmov 0   ;;  %vm798_vm3 = vsmask.f32 7424  ;;  %s5848_s0 = inlined_call_operand.vmem [shape: bf16[2,16,16,128], index: 0, kind: input, shape index: {}]   ;;  %s5849_s1 = inlined_call_operand.vmem [shape: f32[1,128], index: 1, kind: input, shape index: {}]   ;;  %s5850_s2 = inlined_call_operand.vmem [shape: f32[1,128], index: 2, kind: input, shape index: {}]   ;;  %s5851_s3 = inlined_call_operand.vmem [shape: bf16[36,128], index: 3, kind: input, shape index: {}]   ;;  %s5852_s4 = inlined_call_operand.vmem [shape: bf16[512,128], index: 4, kind: output, shape index: {0}]   ;;  %s5853_s5 = inlined_call_operand.vmem [shape: f32[1,1,128], index: 5, kind: output, shape index: {1}]   ;;  %s5854_s6 = inlined_call_operand.vmem [shape: f32[1,1,128], index: 6, kind: output, shape index: {2}]  }
   0x1   :  { %v435_v1 = vrot.slane %v3967_v0, 7  ;;  %vm4012_vm2 = vmand %vm729_vm0, %vm730_vm1  ;;  %v4019_v3 = vld [vmem:[%s5849_s1] ss:$0 sm:$0xff]  ;;  %v3775_v4 = vld [vmem:[%s5848_s0 + $0x8] sm:$0xff]   ;;  %s3968_s11 = smov 4   ;;  %vm1233_vm4 = vcmask 1046528  }
   0x2   :  { %v3488_v5 = vld [vmem:[%s5848_s0] sm:$0xff]   ;;  %v3776_v6 = vld [vmem:[%s5848_s0 + $0x10] sm:$0xff]   ;;  %v3493_v9 = vunpack.c.l.bf16 %v3775_v4  ;;  %v3494_v10 = vunpack.c.h.bf16 %v3775_v4  ;;  %v3777_v20 = vld [vmem:[%s5848_s0 + $0x18] sm:$0xff]   ;;  %s3969_s20 = smov 8   ;;  %s3971_s21 = smov 16   ;;  %vm2461_vm5 = vcmask 1041408  }
   0x3   :  { %v4032_v7 = vsel %vm4012_vm2, 0, %v435_v1  ;;  %v4036_v8 = vsel %vm4012_vm2, %v435_v1, 0  ;;  %v4044_v14 = vld [vmem:[%s5850_s2] ss:$0 sm:$0xff]  ;;  %v3489_v15 = vunpack.c.l.bf16 %v3488_v5  ;;  %v3490_v18 = vunpack.c.h.bf16 %v3488_v5  ;;  %s3972_s24 = smov 20   ;;  %s3973_s27 = smov 24  }
   0x4   :  { %v800_v11 = vshrl.u32 %v4032_v7, 16  ;;  %v802_v12 = vshll.u32 %v4032_v7, 16  ;;  %v807_v13 = vshll.u32 %v4036_v8, 16  ;;  %v204_v16 = vmul.f32 %v3493_v9, %v4019_v3  ;;  %v3778_v37 = vld [vmem:[%s5848_s0 + $0x20] sm:$0xff]   ;;  %s3974_s30 = smov 28  }
   0x5   :  { %v205_v17 = vmul.f32 %v3494_v10, %v4019_v3  ;;  %v3497_v19 = vunpack.c.l.bf16 %v3776_v6  ;;  %v202_v23 = vmul.f32 %v3489_v15, %v4019_v3  ;;  %v3498_v24 = vunpack.c.h.bf16 %v3776_v6 }
   0x6   :  { %v804_v21 = vrot.slane %v802_v12, 1  ;;  %v809_v22 = vrot.slane %v807_v13, 1  ;;  %v274_v25 = vadd.f32 %v4044_v14, %v204_v16  ;;  %v203_v27 = vmul.f32 %v3490_v18, %v4019_v3 }
   0x7   :  { %v275_v26 = vadd.f32 %v4044_v14, %v205_v17  ;;  %v206_v28 = vmul.f32 %v3497_v19, %v4019_v3  ;;  %v272_v30 = vadd.f32 %v4044_v14, %v202_v23  ;;  %v207_v31 = vmul.f32 %v3498_v24, %v4019_v3 }
   0x8   :  { %v805_v29 = vor.u32 %v804_v21, %v800_v11  ;;  %v3501_v32 = vunpack.c.l.bf16 %v3777_v20  ;;  %v338_v33 = vmax.f32 %v274_v25, 0.0  ;;  %v273_v35 = vadd.f32 %v4044_v14, %v203_v27 }
   0x9   :  { %v339_v34 = vmax.f32 %v275_v26, 0.0  ;;  %v276_v36 = vadd.f32 %v4044_v14, %v206_v28  ;;  %v336_v39 = vmax.f32 %v272_v30, 0.0  ;;  %v277_v40 = vadd.f32 %v4044_v14, %v207_v31 }
   0xa   :  { %v4064_v38 = vsel %vm798_vm3, %v805_v29, %v809_v22  ;;  %v3502_v41 = vunpack.c.h.bf16 %v3777_v20  ;;  %v337_v43 = vmax.f32 %v273_v35, 0.0  ;;  %v208_v45 = vmul.f32 %v3501_v32, %v4019_v3 }
   0xb   :  { %5944 = vst [vmem:[#allocation2_spill] sm:$0xff] %v4064_v38  ;;  %1361 = vrot.lane.b32.xlu0 %v4064_v38, %s3968_s11  ;;  %v401_v42 = vpack.c.bf16 %v339_v34, %v338_v33  ;;  %v340_v44 = vmax.f32 %v276_v36, 0.0  ;;  %v341_v46 = vmax.f32 %v277_v40, 0.0  ;;  %v3505_v48 = vunpack.c.l.bf16 %v3778_v37  ;;  %v3779_v40 = vld [vmem:[%s5848_s0 + $0x28] sm:$0xff]  }
   0xc   :  { %v209_v47 = vmul.f32 %v3502_v41, %v4019_v3  ;;  %v3506_v49 = vunpack.c.h.bf16 %v3778_v37  ;;  %v400_v52 = vpack.c.bf16 %v337_v43, %v336_v39  ;;  %v278_v53 = vadd.f32 %v4044_v14, %v208_v45 }
   0xd   :  { %v447_v50 = vshrl.u32 %v401_v42, 16  ;;  %v450_v51 = vshll.u32 %v401_v42, 16  ;;  %v402_v54 = vpack.c.bf16 %v341_v46, %v340_v44  ;;  %v210_v56 = vmul.f32 %v3505_v48, %v4019_v3 }
   0xe   :  { %v279_v55 = vadd.f32 %v4044_v14, %v209_v47  ;;  %v211_v57 = vmul.f32 %v3506_v49, %v4019_v3  ;;  %v440_v59 = vshrl.u32 %v400_v52, 16  ;;  %v443_v60 = vshll.u32 %v400_v52, 16 }
   0xf   :  { %v449_v58 = vrot.slane %v447_v50, 7  ;;  %v342_v61 = vmax.f32 %v278_v53, 0.0  ;;  %v454_v62 = vshrl.u32 %v402_v54, 16  ;;  %v457_v63 = vshll.u32 %v402_v54, 16  ;;  %v3780_v53 = vld [vmem:[%s5848_s0 + $0x30] sm:$0xff]  }
  0x10   :  { %v343_v0 = vmax.f32 %v279_v55, 0.0  ;;  %v280_v1 = vadd.f32 %v4044_v14, %v210_v56  ;;  %v442_v6 = vrot.slane %v440_v59, 7  ;;  %v281_v9 = vadd.f32 %v4044_v14, %v211_v57 }
  0x11   :  { %v452_v4 = vor.u32 %v450_v51, %v449_v58  ;;  %v4078_v5 = vsel %vm4012_vm2, %v449_v58, 0  ;;  %v456_v11 = vrot.slane %v454_v62, 7  ;;  %v3509_v52 = vunpack.c.l.bf16 %v3779_v40 }
  0x12   :  { %v831_v10 = vshll.u32 %v4078_v5, 16  ;;  %v403_v12 = vpack.c.bf16 %v343_v0, %v342_v61  ;;  %v344_v13 = vmax.f32 %v280_v1, 0.0  ;;  %v445_v16 = vor.u32 %v443_v60, %v442_v6 }
  0x13   :  { %v4084_v15 = vsel %vm4012_vm2, 0, %v452_v4  ;;  %v4088_v17 = vsel %vm4012_vm2, %v442_v6, 0  ;;  %v345_v18 = vmax.f32 %v281_v9, 0.0  ;;  %v459_v24 = vor.u32 %v457_v63, %v456_v11  ;;  %v3781_v4 = vld [vmem:[%s5848_s0 + $0x38] sm:$0xff]  }
  0x14   :  { %v824_v19 = vshrl.u32 %v4084_v15, 16  ;;  %v826_v20 = vshll.u32 %v4084_v15, 16  ;;  %v833_v21 = vrot.slane %v831_v10, 1  ;;  %v819_v22 = vshll.u32 %v4088_v17, 16 }
  0x15   :  { %v4095_v23 = vsel %vm4012_vm2, 0, %v445_v16  ;;  %v4099_v25 = vsel %vm4012_vm2, %v456_v11, 0  ;;  %v461_v26 = vshrl.u32 %v403_v12, 16  ;;  %v4105_v31 = vsel %vm4012_vm2, 0, %v459_v24  ;;  %v3782_v24 = vld [vmem:[%s5848_s0 + $0x40] sm:$0xff]  }
  0x16   :  { %v828_v27 = vrot.slane %v826_v20, 1  ;;  %v812_v28 = vshrl.u32 %v4095_v23, 16  ;;  %v814_v29 = vshll.u32 %v4095_v23, 16  ;;  %v821_v30 = vrot.slane %v819_v22, 1 }
  0x17   :  { %v843_v32 = vshll.u32 %v4099_v25, 16  ;;  %v463_v33 = vrot.slane %v461_v26, 7  ;;  %v464_v34 = vshll.u32 %v403_v12, 16  ;;  %v836_v37 = vshrl.u32 %v4105_v31, 16 }
  0x18   :  { %v829_v35 = vor.u32 %v828_v27, %v824_v19  ;;  %v816_v36 = vrot.slane %v814_v29, 1  ;;  %v838_v39 = vshll.u32 %v4105_v31, 16  ;;  %v404_v44 = vpack.c.bf16 %v345_v18, %v344_v13 }
  0x19   :  { %v845_v41 = vrot.slane %v843_v32, 1  ;;  %v466_v42 = vor.u32 %v464_v34, %v463_v33  ;;  %v4115_v43 = vsel %vm4012_vm2, %v463_v33, 0  ;;  %v3510_v60 = vunpack.c.h.bf16 %v3779_v40 }
  0x1a   :  { %v4118_v45 = vsel %vm798_vm3, %v829_v35, %v833_v21  ;;  %v817_v46 = vor.u32 %v816_v36, %v812_v28  ;;  %v840_v47 = vrot.slane %v838_v39, 1  ;;  %v855_v48 = vshll.u32 %v4115_v43, 16 }
  0x1b   :  { %1365 = vrot.lane.b32.xlu1 %v4118_v45, %s3968_s11  ;;  %v4125_v49 = vsel %vm4012_vm2, 0, %v466_v42  ;;  %v468_v50 = vshrl.u32 %v404_v44, 16  ;;  %v471_v51 = vshll.u32 %v404_v44, 16  ;;  %v212_v61 = vmul.f32 %v3509_v52, %v4019_v3 }
  0x1c   :  { %v4131_v54 = vsel %vm798_vm3, %v817_v46, %v821_v30  ;;  %v841_v55 = vor.u32 %v840_v47, %v836_v37  ;;  %v848_v56 = vshrl.u32 %v4125_v49, 16  ;;  %v850_v57 = vshll.u32 %v4125_v49, 16 }
  0x1d   :  { %1363 = vrot.lane.b32.xlu0 %v4131_v54, %s3968_s11  ;;  %v857_v58 = vrot.slane %v855_v48, 1  ;;  %v470_v59 = vrot.slane %v468_v50, 7  ;;  %v3513_v0 = vunpack.c.l.bf16 %v3780_v53  ;;  %v3514_v1 = vunpack.c.h.bf16 %v3780_v53 }
  0x1e   :  { %v4139_v62 = vsel %vm798_vm3, %v841_v55, %v845_v41  ;;  %v852_v63 = vrot.slane %v850_v57, 1  ;;  %v213_v10 = vmul.f32 %v3510_v60, %v4019_v3  ;;  %v282_v11 = vadd.f32 %v4044_v14, %v212_v61 }
  0x1f   :  { %1367 = vrot.lane.b32.xlu1 %v4139_v62, %s3968_s11  ;;  %v473_v6 = vor.u32 %v471_v51, %v470_v59  ;;  %v4148_v9 = vsel %vm4012_vm2, %v470_v59, 0  ;;  %v214_v16 = vmul.f32 %v3513_v0, %v4019_v3  ;;  %v215_v18 = vmul.f32 %v3514_v1, %v4019_v3 }
  0x20   :  { %v853_v12 = vor.u32 %v852_v63, %v848_v56  ;;  %v867_v13 = vshll.u32 %v4148_v9, 16  ;;  %v283_v20 = vadd.f32 %v4044_v14, %v213_v10  ;;  %v346_v21 = vmax.f32 %v282_v11, 0.0  ;;  %v3783_v56 = vld [vmem:[%s5848_s0 + $0x48] sm:$0xff]  }
  0x21   :  { %v4157_v19 = vsel %vm4012_vm2, 0, %v473_v6  ;;  %v3517_v22 = vunpack.c.l.bf16 %v3781_v4  ;;  %v284_v32 = vadd.f32 %v4044_v14, %v214_v16  ;;  %v285_v33 = vadd.f32 %v4044_v14, %v215_v18 }
  0x22   :  { %v4164_v26 = vsel %vm798_vm3, %v853_v12, %v857_v58  ;;  %v860_v27 = vshrl.u32 %v4157_v19, 16  ;;  %v862_v28 = vshll.u32 %v4157_v19, 16  ;;  %v869_v29 = vrot.slane %v867_v13, 1 }
  0x23   :  { %1369 = vrot.lane.b32.xlu0 %v4164_v26, %s3968_s11  ;;  %v347_v30 = vmax.f32 %v283_v20, 0.0  ;;  %v3518_v34 = vunpack.c.h.bf16 %v3781_v4  ;;  %v216_v36 = vmul.f32 %v3517_v22, %v4019_v3  ;;  %v3521_v37 = vunpack.c.l.bf16 %v3782_v24 }
  0x24   :  { %v864_v35 = vrot.slane %v862_v28, 1  ;;  %v3522_v39 = vunpack.c.h.bf16 %v3782_v24  ;;  %v348_v41 = vmax.f32 %v284_v32, 0.0  ;;  %v349_v42 = vmax.f32 %v285_v33, 0.0 }
  0x25   :  { %v405_v40 = vpack.c.bf16 %v347_v30, %v346_v21  ;;  %v217_v44 = vmul.f32 %v3518_v34, %v4019_v3  ;;  %v286_v47 = vadd.f32 %v4044_v14, %v216_v36  ;;  %v218_v48 = vmul.f32 %v3521_v37, %v4019_v3 }
  0x26   :  { %v865_v46 = vor.u32 %v864_v35, %v860_v27  ;;  %v219_v50 = vmul.f32 %v3522_v39, %v4019_v3  ;;  %v406_v53 = vpack.c.bf16 %v349_v42, %v348_v41  ;;  %v3525_v10 = vunpack.c.l.bf16 %v3783_v56 }
  0x27   :  { %v475_v51 = vshrl.u32 %v405_v40, 16  ;;  %v478_v52 = vshll.u32 %v405_v40, 16  ;;  %v287_v55 = vadd.f32 %v4044_v14, %v217_v44  ;;  %v350_v58 = vmax.f32 %v286_v47, 0.0 }
  0x28   :  { %v4182_v57 = vsel %vm798_vm3, %v865_v46, %v869_v29  ;;  %v288_v59 = vadd.f32 %v4044_v14, %v218_v48  ;;  %v289_v60 = vadd.f32 %v4044_v14, %v219_v50  ;;  %v482_v63 = vshrl.u32 %v406_v53, 16 }
  0x29   :  { %1371 = vrot.lane.b32.xlu1 %v4182_v57, %s3968_s11  ;;  %v477_v61 = vrot.slane %v475_v51, 7  ;;  %v485_v0 = vshll.u32 %v406_v53, 16  ;;  %v351_v1 = vmax.f32 %v287_v55, 0.0  ;;  %v3526_v11 = vunpack.c.h.bf16 %v3783_v56 }
  0x2a   :  { %v352_v4 = vmax.f32 %v288_v59, 0.0  ;;  %v353_v6 = vmax.f32 %v289_v60, 0.0  ;;  %v484_v16 = vrot.slane %v482_v63, 7  ;;  %v220_v22 = vmul.f32 %v3525_v10, %v4019_v3 }
  0x2b   :  { %v480_v12 = vor.u32 %v478_v52, %v477_v61  ;;  %v4190_v13 = vsel %vm4012_vm2, %v477_v61, 0  ;;  %v407_v18 = vpack.c.bf16 %v351_v1, %v350_v58  ;;  %v221_v24 = vmul.f32 %v3526_v11, %v4019_v3 }
  0x2c   :  { %v879_v20 = vshll.u32 %v4190_v13, 16  ;;  %v408_v21 = vpack.c.bf16 %v353_v6, %v352_v4  ;;  %v487_v28 = vor.u32 %v485_v0, %v484_v16  ;;  %v4201_v29 = vsel %vm4012_vm2, %v484_v16, 0  ;;  %v3784_v6 = vld [vmem:[%s5848_s0 + $0x50] sm:$0xff]  }
  0x2d   :  { %v4197_v27 = vsel %vm4012_vm2, 0, %v480_v12  ;;  %v489_v30 = vshrl.u32 %v407_v18, 16  ;;  %v891_v35 = vshll.u32 %v4201_v29, 16  ;;  %v492_v39 = vshll.u32 %v407_v18, 16  ;;  %v3785_v18 = vld [vmem:[%s5848_s0 + $0x58] sm:$0xff]  }
  0x2e   :  { %v872_v32 = vshrl.u32 %v4197_v27, 16  ;;  %v874_v33 = vshll.u32 %v4197_v27, 16  ;;  %v881_v34 = vrot.slane %v879_v20, 1  ;;  %v4208_v36 = vsel %vm4012_vm2, 0, %v487_v28  ;;  %v3786_v28 = vld [vmem:[%s5848_s0 + $0x60] sm:$0xff]  }
  0x2f   :  { %v491_v37 = vrot.slane %v489_v30, 7  ;;  %v496_v40 = vshrl.u32 %v408_v21, 16  ;;  %v884_v42 = vshrl.u32 %v4208_v36, 16  ;;  %v886_v44 = vshll.u32 %v4208_v36, 16 }
  0x30   :  { %v876_v41 = vrot.slane %v874_v33, 1  ;;  %v893_v46 = vrot.slane %v891_v35, 1  ;;  %v499_v51 = vshll.u32 %v408_v21, 16  ;;  %v290_v56 = vadd.f32 %v4044_v14, %v220_v22 }
  0x31   :  { %v494_v47 = vor.u32 %v492_v39, %v491_v37  ;;  %v4214_v48 = vsel %vm4012_vm2, %v491_v37, 0  ;;  %v498_v50 = vrot.slane %v496_v40, 7  ;;  %v888_v53 = vrot.slane %v886_v44, 1 }
  0x32   :  { %v877_v52 = vor.u32 %v876_v41, %v872_v32  ;;  %v903_v55 = vshll.u32 %v4214_v48, 16  ;;  %v291_v61 = vadd.f32 %v4044_v14, %v221_v24  ;;  %v354_v16 = vmax.f32 %v290_v56, 0.0 }
  0x33   :  { %v4220_v58 = vsel %vm4012_vm2, 0, %v494_v47  ;;  %v501_v59 = vor.u32 %v499_v51, %v498_v50  ;;  %v4224_v60 = vsel %vm4012_vm2, %v498_v50, 0  ;;  %v889_v0 = vor.u32 %v888_v53, %v884_v42 }
  0x34   :  { %v4228_v63 = vsel %vm798_vm3, %v877_v52, %v881_v34  ;;  %v896_v1 = vshrl.u32 %v4220_v58, 16  ;;  %v898_v4 = vshll.u32 %v4220_v58, 16  ;;  %v905_v10 = vrot.slane %v903_v55, 1 }
  0x35   :  { %1373 = vrot.lane.b32.xlu0 %v4228_v63, %s3968_s11  ;;  %v4239_v11 = vsel %vm4012_vm2, 0, %v501_v59  ;;  %v915_v12 = vshll.u32 %v4224_v60, 16  ;;  %v4246_v20 = vsel %vm798_vm3, %v889_v0, %v893_v46  ;;  %v355_v32 = vmax.f32 %v291_v61, 0.0  ;;  %v3787_v61 = vld [vmem:[%s5848_s0 + $0x68] sm:$0xff]  }
  0x36   :  { %v900_v21 = vrot.slane %v898_v4, 1  ;;  %v908_v22 = vshrl.u32 %v4239_v11, 16  ;;  %v910_v24 = vshll.u32 %v4239_v11, 16  ;;  %1375 = vrot.lane.b32.xlu1 %v4246_v20, %s3968_s11  ;;  %v3529_v33 = vunpack.c.l.bf16 %v3784_v6 }
  0x37   :  { %v917_v30 = vrot.slane %v915_v12, 1  ;;  %v3530_v34 = vunpack.c.h.bf16 %v3784_v6  ;;  %v3533_v39 = vunpack.c.l.bf16 %v3785_v18  ;;  %v3534_v40 = vunpack.c.h.bf16 %v3785_v18 }
  0x38   :  { %v901_v35 = vor.u32 %v900_v21, %v896_v1  ;;  %v912_v37 = vrot.slane %v910_v24, 1  ;;  %v409_v41 = vpack.c.bf16 %v355_v32, %v354_v16  ;;  %v222_v42 = vmul.f32 %v3529_v33, %v4019_v3 }
  0x39   :  { %v223_v44 = vmul.f32 %v3530_v34, %v4019_v3  ;;  %v3537_v46 = vunpack.c.l.bf16 %v3786_v28  ;;  %v224_v51 = vmul.f32 %v3533_v39, %v4019_v3  ;;  %v225_v52 = vmul.f32 %v3534_v40, %v4019_v3 }
  0x3a   :  { %v4258_v47 = vsel %vm798_vm3, %v901_v35, %v905_v10  ;;  %v913_v50 = vor.u32 %v912_v37, %v908_v22  ;;  %v503_v53 = vshrl.u32 %v409_v41, 16  ;;  %v506_v55 = vshll.u32 %v409_v41, 16 }
  0x3b   :  { %1377 = vrot.lane.b32.xlu0 %v4258_v47, %s3968_s11  ;;  %v292_v56 = vadd.f32 %v4044_v14, %v222_v42  ;;  %v293_v59 = vadd.f32 %v4044_v14, %v223_v44  ;;  %v294_v1 = vadd.f32 %v4044_v14, %v224_v51  ;;  %v295_v4 = vadd.f32 %v4044_v14, %v225_v52 }
  0x3c   :  { %v4270_v0 = vsel %vm798_vm3, %v913_v50, %v917_v30  ;;  %v3538_v6 = vunpack.c.h.bf16 %v3786_v28  ;;  %v505_v10 = vrot.slane %v503_v53, 7  ;;  %v226_v18 = vmul.f32 %v3537_v46, %v4019_v3  ;;  %v3788_v50 = vld [vmem:[%s5848_s0 + $0x70] sm:$0xff]  }
  0x3d   :  { %1379 = vrot.lane.b32.xlu1 %v4270_v0, %s3968_s11  ;;  %v356_v12 = vmax.f32 %v292_v56, 0.0  ;;  %v357_v16 = vmax.f32 %v293_v59, 0.0  ;;  %v358_v21 = vmax.f32 %v294_v1, 0.0  ;;  %v359_v22 = vmax.f32 %v295_v4, 0.0 }
  0x3e   :  { %v227_v24 = vmul.f32 %v3538_v6, %v4019_v3  ;;  %v3541_v32 = vunpack.c.l.bf16 %v3787_v61  ;;  %v508_v30 = vor.u32 %v506_v55, %v505_v10  ;;  %v4280_v33 = vsel %vm4012_vm2, %v505_v10, 0 }
  0x3f   :  { %v410_v34 = vpack.c.bf16 %v357_v16, %v356_v12  ;;  %v296_v28 = vadd.f32 %v4044_v14, %v226_v18  ;;  %v927_v35 = vshll.u32 %v4280_v33, 16  ;;  %v411_v37 = vpack.c.bf16 %v359_v22, %v358_v21 }
  0x40   :  { %v297_v39 = vadd.f32 %v4044_v14, %v227_v24  ;;  %v3542_v40 = vunpack.c.h.bf16 %v3787_v61  ;;  %v4287_v41 = vsel %vm4012_vm2, 0, %v508_v30  ;;  %v228_v1 = vmul.f32 %v3541_v32, %v4019_v3 }
  0x41   :  { %v510_v42 = vshrl.u32 %v410_v34, 16  ;;  %v513_v44 = vshll.u32 %v410_v34, 16  ;;  %v360_v46 = vmax.f32 %v296_v28, 0.0  ;;  %v920_v51 = vshrl.u32 %v4287_v41, 16 }
  0x42   :  { %v922_v52 = vshll.u32 %v4287_v41, 16  ;;  %v929_v53 = vrot.slane %v927_v35, 1  ;;  %v517_v55 = vshrl.u32 %v411_v37, 16  ;;  %v520_v59 = vshll.u32 %v411_v37, 16 }
  0x43   :  { %v512_v56 = vrot.slane %v510_v42, 7  ;;  %v361_v61 = vmax.f32 %v297_v39, 0.0  ;;  %v229_v10 = vmul.f32 %v3542_v40, %v4019_v3  ;;  %v3545_v12 = vunpack.c.l.bf16 %v3788_v50 }
  0x44   :  { %v924_v4 = vrot.slane %v922_v52, 1  ;;  %v519_v6 = vrot.slane %v517_v55, 7  ;;  %v298_v22 = vadd.f32 %v4044_v14, %v228_v1  ;;  %vm1863_vm6 = vcmask 31744  }
  0x45   :  { %v515_v16 = vor.u32 %v513_v44, %v512_v56  ;;  %v4298_v18 = vsel %vm4012_vm2, %v512_v56, 0  ;;  %v412_v21 = vpack.c.bf16 %v361_v61, %v360_v46  ;;  %v299_v56 = vadd.f32 %v4044_v14, %v229_v10 }
  0x46   :  { %v925_v24 = vor.u32 %v924_v4, %v920_v51  ;;  %v939_v30 = vshll.u32 %v4298_v18, 16  ;;  %v522_v34 = vor.u32 %v520_v59, %v519_v6  ;;  %v4304_v32 = vsel %vm4012_vm2, %v519_v6, 0  ;;  %v3790_v4 = vld [vmem:[%s5848_s0 + $0x80] sm:$0xff]  }
  0x47   :  { %5945 = vst [vmem:[#allocation3_spill] sm:$0xff] %v4304_v32  ;;  %v4308_v28 = vsel %vm4012_vm2, 0, %v515_v16  ;;  %v951_v35 = vshll.u32 %v4304_v32, 16  ;;  %v524_v37 = vshrl.u32 %v412_v21, 16  ;;  %v527_v39 = vshll.u32 %v412_v21, 16 }
  0x48   :  { %v4312_v40 = vsel %vm798_vm3, %v925_v24, %v929_v53  ;;  %v932_v42 = vshrl.u32 %v4308_v28, 16  ;;  %v934_v44 = vshll.u32 %v4308_v28, 16  ;;  %v941_v46 = vrot.slane %v939_v30, 1 }
  0x49   :  { %1381 = vrot.lane.b32.xlu0 %v4312_v40, %s3968_s11  ;;  %v4320_v51 = vsel %vm4012_vm2, 0, %v522_v34  ;;  %v953_v52 = vrot.slane %v951_v35, 1  ;;  %v526_v55 = vrot.slane %v524_v37, 7  ;;  %v362_v1 = vmax.f32 %v298_v22, 0.0 }
  0x4a   :  { %5946 = vst [vmem:[#allocation4_spill] sm:$0xff] %v4320_v51  ;;  %v936_v59 = vrot.slane %v934_v44, 1  ;;  %v944_v53 = vshrl.u32 %v4320_v51, 16  ;;  %v946_v61 = vshll.u32 %v4320_v51, 16  ;;  %v363_v21 = vmax.f32 %v299_v56, 0.0 }
  0x4b   :  { %v529_v6 = vor.u32 %v527_v39, %v526_v55  ;;  %v4330_v16 = vsel %vm4012_vm2, %v526_v55, 0  ;;  %v3546_v24 = vunpack.c.h.bf16 %v3788_v50  ;;  %v230_v35 = vmul.f32 %v3545_v12, %v4019_v3  ;;  %v3791_v12 = vld [vmem:[%s5848_s0 + $0x88] sm:$0xff]  }
  0x4c   :  { %5947 = vst [vmem:[#allocation5_spill] sm:$0xff] %v4330_v16  ;;  %v937_v30 = vor.u32 %v936_v59, %v932_v42  ;;  %v948_v34 = vrot.slane %v946_v61, 1  ;;  %v963_v10 = vshll.u32 %v4330_v16, 16  ;;  %v413_v37 = vpack.c.bf16 %v363_v21, %v362_v1 }
  0x4d   :  { %v4336_v22 = vsel %vm4012_vm2, 0, %v529_v6  ;;  %v231_v44 = vmul.f32 %v3546_v24, %v4019_v3  ;;  %v3553_v39 = vunpack.c.l.bf16 %v3790_v4  ;;  %v300_v1 = vadd.f32 %v4044_v14, %v230_v35 }
  0x4e   :  { %5948 = vst [vmem:[#allocation6_spill] sm:$0xff] %v4336_v22  ;;  %v4340_v38 = vsel %vm798_vm3, %v937_v30, %v941_v46  ;;  %v949_v55 = vor.u32 %v948_v34, %v944_v53  ;;  %v956_v50 = vshrl.u32 %v4336_v22, 16  ;;  %v958_v42 = vshll.u32 %v4336_v22, 16 }
  0x4f   :  { %5949 = vst [vmem:[#allocation7_spill] sm:$0xff] %v4340_v38  ;;  %1383 = vrot.lane.b32.xlu1 %v4340_v38, %s3968_s11  ;;  %v965_v56 = vrot.slane %v963_v10, 1  ;;  %v531_v59 = vshrl.u32 %v413_v37, 16  ;;  %v534_v61 = vshll.u32 %v413_v37, 16  ;;  %v301_v6 = vadd.f32 %v4044_v14, %v231_v44 }
  0x50   :  { %v4351_v46 = vsel %vm798_vm3, %v949_v55, %v953_v52  ;;  %v960_v53 = vrot.slane %v958_v42, 1  ;;  %v3554_v21 = vunpack.c.h.bf16 %v3790_v4  ;;  %v364_v30 = vmax.f32 %v300_v1, 0.0 }
  0x51   :  { %5950 = vst [vmem:[#allocation8_spill] sm:$0xff] %v4351_v46  ;;  %1385 = vrot.lane.b32.xlu0 %v4351_v46, %s3968_s11  ;;  %v533_v24 = vrot.slane %v531_v59, 7  ;;  %v234_v34 = vmul.f32 %v3553_v39, %v4019_v3  ;;  %v3557_v16 = vunpack.c.l.bf16 %v3791_v12  ;;  %v365_v22 = vmax.f32 %v301_v6, 0.0 }
  0x52   :  { %v961_v10 = vor.u32 %v960_v53, %v956_v50  ;;  %v235_v37 = vmul.f32 %v3554_v21, %v4019_v3  ;;  %v3558_v35 = vunpack.c.h.bf16 %v3791_v12  ;;  %vm1926_vm7 = vcmask 64512  }
  0x53   :  { %v536_v32 = vor.u32 %v534_v61, %v533_v24  ;;  %v4360_v52 = vsel %vm4012_vm2, %v533_v24, 0  ;;  %v304_v4 = vadd.f32 %v4044_v14, %v234_v34  ;;  %v236_v44 = vmul.f32 %v3557_v16, %v4019_v3 }
  0x54   :  { %5951 = vst [vmem:[#allocation9_spill] sm:$0xff] %v4360_v52  ;;  %v4365_v55 = vsel %vm798_vm3, %v961_v10, %v965_v56  ;;  %v975_v39 = vshll.u32 %v4360_v52, 16  ;;  %v414_v42 = vpack.c.bf16 %v365_v22, %v364_v30  ;;  %v305_v50 = vadd.f32 %v4044_v14, %v235_v37  ;;  %v3792_v56 = vld [vmem:[%s5848_s0 + $0x90] sm:$0xff]  }
  0x55   :  { %5952 = vst [vmem:[#allocation10_spill] sm:$0xff] %v4365_v55  ;;  %1387 = vrot.lane.b32.xlu1 %v4365_v55, %s3968_s11  ;;  %v4373_v12 = vsel %vm4012_vm2, 0, %v536_v32  ;;  %v368_v59 = vmax.f32 %v304_v4, 0.0  ;;  %v237_v61 = vmul.f32 %v3558_v35, %v4019_v3  ;;  %v306_v16 = vadd.f32 %v4044_v14, %v236_v44  ;;  %v3793_v32 = vld [vmem:[%s5848_s0 + $0x98] sm:$0xff]  }
  0x56   :  { %5953 = vst [vmem:[#allocation11_spill] sm:$0xff] %v4373_v12  ;;  %v968_v22 = vshrl.u32 %v4373_v12, 16  ;;  %v970_v1 = vshll.u32 %v4373_v12, 16  ;;  %v977_v53 = vrot.slane %v975_v39, 1  ;;  %v538_v6 = vshrl.u32 %v414_v42, 16 }
  0x57   :  { %v541_v21 = vshll.u32 %v414_v42, 16  ;;  %v369_v24 = vmax.f32 %v305_v50, 0.0  ;;  %v307_v30 = vadd.f32 %v4044_v14, %v237_v61  ;;  %v370_v34 = vmax.f32 %v306_v16, 0.0 }
  0x58   :  { %v972_v10 = vrot.slane %v970_v1, 1  ;;  %v540_v37 = vrot.slane %v538_v6, 7  ;;  %v3561_v35 = vunpack.c.l.bf16 %v3792_v56  ;;  %v3562_v4 = vunpack.c.h.bf16 %v3792_v56 }
  0x59   :  { %v416_v44 = vpack.c.bf16 %v369_v24, %v368_v59  ;;  %v371_v52 = vmax.f32 %v307_v30, 0.0  ;;  %v3565_v55 = vunpack.c.l.bf16 %v3793_v32  ;;  %v3566_v46 = vunpack.c.h.bf16 %v3793_v32 }
  0x5a   :  { %v973_v12 = vor.u32 %v972_v10, %v968_v22  ;;  %v543_v39 = vor.u32 %v541_v21, %v540_v37  ;;  %v4388_v51 = vsel %vm4012_vm2, %v540_v37, 0  ;;  %v238_v42 = vmul.f32 %v3561_v35, %v4019_v3  ;;  %v3794_v10 = vld [vmem:[%s5848_s0 + $0xa0] sm:$0xff]  }
  0x5b   :  { %5954 = vst [vmem:[#allocation12_spill] sm:$0xff] %v4388_v51  ;;  %v987_v50 = vshll.u32 %v4388_v51, 16  ;;  %v552_v61 = vshrl.u32 %v416_v44, 16  ;;  %v555_v16 = vshll.u32 %v416_v44, 16  ;;  %v417_v1 = vpack.c.bf16 %v371_v52, %v370_v34 }
  0x5c   :  { %v4393_v6 = vsel %vm798_vm3, %v973_v12, %v977_v53  ;;  %v4397_v59 = vsel %vm4012_vm2, 0, %v543_v39  ;;  %v239_v56 = vmul.f32 %v3562_v4, %v4019_v3  ;;  %v308_v22 = vadd.f32 %v4044_v14, %v238_v42 }
  0x5d   :  { %5955 = vst [vmem:[#allocation13_spill] sm:$0xff] %v4393_v6  ;;  %5956 = vst [vmem:[#allocation14_spill] sm:$0xff] %v4397_v59  ;;  %1389 = vrot.lane.b32.xlu0 %v4393_v6, %s3968_s11  ;;  %v980_v32 = vshrl.u32 %v4397_v59, 16  ;;  %v982_v21 = vshll.u32 %v4397_v59, 16  ;;  %v989_v24 = vrot.slane %v987_v50, 1  ;;  %v554_v52 = vrot.slane %v552_v61, 7 }
  0x5e   :  { %v559_v30 = vshrl.u32 %v417_v1, 16  ;;  %v562_v12 = vshll.u32 %v417_v1, 16  ;;  %v309_v53 = vadd.f32 %v4044_v14, %v239_v56  ;;  %v372_v34 = vmax.f32 %v308_v22, 0.0 }
  0x5f   :  { %v984_v37 = vrot.slane %v982_v21, 1  ;;  %v557_v35 = vor.u32 %v555_v16, %v554_v52  ;;  %v4411_v4 = vsel %vm4012_vm2, %v554_v52, 0  ;;  %v240_v44 = vmul.f32 %v3565_v55, %v4019_v3 }
  0x60   :  { %5957 = vst [vmem:[#allocation15_spill] sm:$0xff] %v4411_v4  ;;  %v999_v39 = vshll.u32 %v4411_v4, 16  ;;  %v561_v42 = vrot.slane %v559_v30, 7  ;;  %v373_v50 = vmax.f32 %v309_v53, 0.0  ;;  %v241_v61 = vmul.f32 %v3566_v46, %v4019_v3 }
  0x61   :  { %v985_v1 = vor.u32 %v984_v37, %v980_v32  ;;  %v4418_v56 = vsel %vm4012_vm2, 0, %v557_v35  ;;  %v310_v22 = vadd.f32 %v4044_v14, %v240_v44  ;;  %v3569_v16 = vunpack.c.l.bf16 %v3794_v10 }
  0x62   :  { %5958 = vst [vmem:[#allocation16_spill] sm:$0xff] %v4418_v56  ;;  %v992_v21 = vshrl.u32 %v4418_v56, 16  ;;  %v994_v52 = vshll.u32 %v4418_v56, 16  ;;  %v1001_v51 = vrot.slane %v999_v39, 1  ;;  %v564_v55 = vor.u32 %v562_v12, %v561_v42 }
  0x63   :  { %v4424_v4 = vsel %vm798_vm3, %v985_v1, %v989_v24  ;;  %v4428_v46 = vsel %vm4012_vm2, %v561_v42, 0  ;;  %v418_v32 = vpack.c.bf16 %v373_v50, %v372_v34  ;;  %v311_v30 = vadd.f32 %v4044_v14, %v241_v61  ;;  %v3795_v24 = vld [vmem:[%s5848_s0 + $0xa8] sm:$0xff]  }
  0x64   :  { %5959 = vst [vmem:[#allocation17_spill] sm:$0xff] %v4424_v4  ;;  %5960 = vst [vmem:[#allocation18_spill] sm:$0xff] %v4428_v46  ;;  %1391 = vrot.lane.b32.xlu1 %v4424_v4, %s3968_s11  ;;  %v996_v53 = vrot.slane %v994_v52, 1  ;;  %v4435_v37 = vsel %vm4012_vm2, 0, %v564_v55  ;;  %v1011_v12 = vshll.u32 %v4428_v46, 16  ;;  %v374_v35 = vmax.f32 %v310_v22, 0.0 }
  0x65   :  { %5961 = vst [vmem:[#allocation19_spill] sm:$0xff] %v4435_v37  ;;  %v1004_v44 = vshrl.u32 %v4435_v37, 16  ;;  %v1006_v34 = vshll.u32 %v4435_v37, 16  ;;  %v566_v39 = vshrl.u32 %v418_v32, 16  ;;  %v569_v42 = vshll.u32 %v418_v32, 16 }
  0x66   :  { %v997_v50 = vor.u32 %v996_v53, %v992_v21  ;;  %v1013_v61 = vrot.slane %v1011_v12, 1  ;;  %v375_v1 = vmax.f32 %v311_v30, 0.0  ;;  %v3570_v52 = vunpack.c.h.bf16 %v3794_v10 }
  0x67   :  { %v1008_v56 = vrot.slane %v1006_v34, 1  ;;  %v568_v55 = vrot.slane %v566_v39, 7  ;;  %v242_v4 = vmul.f32 %v3569_v16, %v4019_v3  ;;  %v3573_v46 = vunpack.c.l.bf16 %v3795_v24 }
  0x68   :  { %v4445_v22 = vsel %vm798_vm3, %v997_v50, %v1001_v51  ;;  %v419_v59 = vpack.c.bf16 %v375_v1, %v374_v35  ;;  %v243_v6 = vmul.f32 %v3570_v52, %v4019_v3  ;;  %v3574_v38 = vunpack.c.h.bf16 %v3795_v24  ;;  %v3796_v35 = vld [vmem:[%s5848_s0 + $0xb0] sm:$0xff]  }
  0x69   :  { %5962 = vst [vmem:[#allocation20_spill] sm:$0xff] %v4445_v22  ;;  %1393 = vrot.lane.b32.xlu0 %v4445_v22, %s3968_s11  ;;  %v1009_v32 = vor.u32 %v1008_v56, %v1004_v44  ;;  %v571_v21 = vor.u32 %v569_v42, %v568_v55  ;;  %v4452_v10 = vsel %vm4012_vm2, %v568_v55, 0  ;;  %v312_v30 = vadd.f32 %v4044_v14, %v242_v4 }
  0x6a   :  { %5963 = vst [vmem:[#allocation21_spill] sm:$0xff] %v4452_v10  ;;  %v1023_v16 = vshll.u32 %v4452_v10, 16  ;;  %v573_v53 = vshrl.u32 %v419_v59, 16  ;;  %v576_v51 = vshll.u32 %v419_v59, 16  ;;  %v313_v12 = vadd.f32 %v4044_v14, %v243_v6 }
  0x6b   :  { %v4461_v24 = vsel %vm798_vm3, %v1009_v32, %v1013_v61  ;;  %v4465_v56 = vsel %vm4012_vm2, 0, %v571_v21  ;;  %v376_v44 = vmax.f32 %v312_v30, 0.0  ;;  %v244_v4 = vmul.f32 %v3573_v46, %v4019_v3 }
  0x6c   :  { %5964 = vst [vmem:[#allocation22_spill] sm:$0xff] %v4461_v24  ;;  %5965 = vst [vmem:[#allocation23_spill] sm:$0xff] %v4465_v56  ;;  %1395 = vrot.lane.b32.xlu1 %v4461_v24, %s3968_s11  ;;  %v1016_v59 = vshrl.u32 %v4465_v56, 16  ;;  %v1018_v6 = vshll.u32 %v4465_v56, 16  ;;  %v1025_v34 = vrot.slane %v1023_v16, 1  ;;  %v575_v39 = vrot.slane %v573_v53, 7 }
  0x6d   :  { %v377_v42 = vmax.f32 %v313_v12, 0.0  ;;  %v245_v50 = vmul.f32 %v3574_v38, %v4019_v3  ;;  %v314_v61 = vadd.f32 %v4044_v14, %v244_v4  ;;  %v3577_v1 = vunpack.c.l.bf16 %v3796_v35  ;;  %v3797_v4 = vld [vmem:[%s5848_s0 + $0xb8] sm:$0xff]  }
  0x6e   :  { %v1020_v52 = vrot.slane %v1018_v6, 1  ;;  %v578_v55 = vor.u32 %v576_v51, %v575_v39  ;;  %v4476_v46 = vsel %vm4012_vm2, %v575_v39, 0  ;;  %v3578_v32 = vunpack.c.h.bf16 %v3796_v35 }
  0x6f   :  { %5966 = vst [vmem:[#allocation24_spill] sm:$0xff] %v4476_v46  ;;  %v1035_v21 = vshll.u32 %v4476_v46, 16  ;;  %v420_v30 = vpack.c.bf16 %v377_v42, %v376_v44  ;;  %v315_v10 = vadd.f32 %v4044_v14, %v245_v50  ;;  %v378_v16 = vmax.f32 %v314_v61, 0.0 }
  0x70   :  { %v1021_v53 = vor.u32 %v1020_v52, %v1016_v59  ;;  %v4482_v38 = vsel %vm4012_vm2, 0, %v578_v55  ;;  %v246_v12 = vmul.f32 %v3577_v1, %v4019_v3  ;;  %v247_v51 = vmul.f32 %v3578_v32, %v4019_v3  ;;  %v3798_v59 = vld [vmem:[%s5848_s0 + $0xc0] sm:$0xff]  }
  0x71   :  { %5967 = vst [vmem:[#allocation25_spill] sm:$0xff] %v4482_v38  ;;  %v1028_v35 = vshrl.u32 %v4482_v38, 16  ;;  %v1030_v44 = vshll.u32 %v4482_v38, 16  ;;  %v1037_v6 = vrot.slane %v1035_v21, 1  ;;  %v580_v39 = vshrl.u32 %v420_v30, 16 }
  0x72   :  { %v4495_v42 = vsel %vm798_vm3, %v1021_v53, %v1025_v34  ;;  %v583_v50 = vshll.u32 %v420_v30, 16  ;;  %v379_v61 = vmax.f32 %v315_v10, 0.0  ;;  %v316_v1 = vadd.f32 %v4044_v14, %v246_v12 }
  0x73   :  { %5968 = vst [vmem:[#allocation26_spill] sm:$0xff] %v4495_v42  ;;  %1397 = vrot.lane.b32.xlu0 %v4495_v42, %s3968_s11  ;;  %v1032_v52 = vrot.slane %v1030_v44, 1  ;;  %v582_v55 = vrot.slane %v580_v39, 7  ;;  %v317_v32 = vadd.f32 %v4044_v14, %v247_v51  ;;  %v3581_v21 = vunpack.c.l.bf16 %v3797_v4 }
  0x74   :  { %v421_v46 = vpack.c.bf16 %v379_v61, %v378_v16  ;;  %v380_v38 = vmax.f32 %v316_v1, 0.0  ;;  %v3582_v56 = vunpack.c.h.bf16 %v3797_v4  ;;  %v3585_v22 = vunpack.c.l.bf16 %v3798_v59 }
  0x75   :  { %v1033_v24 = vor.u32 %v1032_v52, %v1028_v35  ;;  %v585_v37 = vor.u32 %v583_v50, %v582_v55  ;;  %v4503_v34 = vsel %vm4012_vm2, %v582_v55, 0  ;;  %v381_v10 = vmax.f32 %v317_v32, 0.0  ;;  %v4517_v35 = vld [vmem:[%s5849_s1] ss:$0 sm:$0xff] }
  0x76   :  { %5969 = vst [vmem:[#allocation27_spill] sm:$0xff] %v4503_v34  ;;  %v1047_v30 = vshll.u32 %v4503_v34, 16  ;;  %v587_v53 = vshrl.u32 %v421_v46, 16  ;;  %v590_v12 = vshll.u32 %v421_v46, 16  ;;  %v248_v44 = vmul.f32 %v3581_v21, %v4019_v3 }
  0x77   :  { %v4508_v51 = vsel %vm798_vm3, %v1033_v24, %v1037_v6  ;;  %v4512_v16 = vsel %vm4012_vm2, 0, %v585_v37  ;;  %v422_v4 = vpack.c.bf16 %v381_v10, %v380_v38  ;;  %v249_v39 = vmul.f32 %v4517_v35, %v3582_v56 }
  0x78   :  { %5970 = vst [vmem:[#allocation28_spill] sm:$0xff] %v4508_v51  ;;  %5971 = vst [vmem:[#allocation29_spill] sm:$0xff] %v4512_v16  ;;  %1399 = vrot.lane.b32.xlu1 %v4508_v51, %s3968_s11  ;;  %v1040_v3 = vshrl.u32 %v4512_v16, 16  ;;  %v1042_v24 = vshll.u32 %v4512_v16, 16  ;;  %v1049_v46 = vrot.slane %v1047_v30, 1  ;;  %v589_v6 = vrot.slane %v587_v53, 7 }
  0x79   :  { %v594_v50 = vshrl.u32 %v422_v4, 16  ;;  %v597_v37 = vshll.u32 %v422_v4, 16  ;;  %v318_v38 = vadd.f32 %v4044_v14, %v248_v44  ;;  %v319_v61 = vadd.f32 %v4044_v14, %v249_v39 }
  0x7a   :  { %v1044_v1 = vrot.slane %v1042_v24, 1  ;;  %v592_v52 = vor.u32 %v590_v12, %v589_v6  ;;  %v4528_v56 = vsel %vm4012_vm2, %v589_v6, 0  ;;  %v3586_v55 = vunpack.c.h.bf16 %v3798_v59 }
  0x7b   :  { %5972 = vst [vmem:[#allocation30_spill] sm:$0xff] %v4528_v56  ;;  %v1059_v32 = vshll.u32 %v4528_v56, 16  ;;  %v596_v21 = vrot.slane %v594_v50, 7  ;;  %v382_v10 = vmax.f32 %v318_v38, 0.0  ;;  %v383_v34 = vmax.f32 %v319_v61, 0.0 }
  0x7c   :  { %v1045_v30 = vor.u32 %v1044_v1, %v1040_v3  ;;  %v4533_v53 = vsel %vm4012_vm2, 0, %v592_v52  ;;  %v250_v44 = vmul.f32 %v4517_v35, %v3585_v22  ;;  %v251_v14 = vmul.f32 %v4517_v35, %v3586_v55  ;;  %v4549_v22 = vld [vmem:[%s5850_s2] ss:$0 sm:$0xff] }
  0x7d   :  { %5973 = vst [vmem:[#allocation31_spill] sm:$0xff] %v4533_v53  ;;  %v1052_v12 = vshrl.u32 %v4533_v53, 16  ;;  %v1054_v4 = vshll.u32 %v4533_v53, 16  ;;  %v1061_v39 = vrot.slane %v1059_v32, 1  ;;  %v599_v59 = vor.u32 %v597_v37, %v596_v21 }
  0x7e   :  { %v4540_v24 = vsel %vm798_vm3, %v1045_v30, %v1049_v46  ;;  %v4544_v3 = vsel %vm4012_vm2, %v596_v21, 0  ;;  %v423_v6 = vpack.c.bf16 %v383_v34, %v382_v10  ;;  %v320_v50 = vadd.f32 %v4549_v22, %v250_v44  ;;  %v3799_v34 = vld [vmem:[%s5848_s0 + $0xc8] sm:$0xff]   ;;  %v3800_v21 = vld [vmem:[%s5848_s0 + $0xd0] sm:$0xff]  }
  0x7f   :  { %5974 = vst [vmem:[#allocation32_spill] sm:$0xff] %v4540_v24  ;;  %5975 = vst [vmem:[#allocation33_spill] sm:$0xff] %v4544_v3  ;;  %1401 = vrot.lane.b32.xlu0 %v4540_v24, %s3968_s11  ;;  %v1056_v38 = vrot.slane %v1054_v4, 1  ;;  %v4556_v46 = vsel %vm4012_vm2, 0, %v599_v59  ;;  %v1071_v37 = vshll.u32 %v4544_v3, 16  ;;  %v321_v61 = vadd.f32 %v4549_v22, %v251_v14 }
  0x80   :  { %5976 = vst [vmem:[#allocation34_spill] sm:$0xff] %v4556_v46  ;;  %v1064_v1 = vshrl.u32 %v4556_v46, 16  ;;  %v1066_v52 = vshll.u32 %v4556_v46, 16  ;;  %v601_v55 = vshrl.u32 %v423_v6, 16  ;;  %v604_v32 = vshll.u32 %v423_v6, 16 }
  0x81   :  { %v1057_v10 = vor.u32 %v1056_v38, %v1052_v12  ;;  %v1073_v30 = vrot.slane %v1071_v37, 1  ;;  %v384_v44 = vmax.f32 %v320_v50, 0.0  ;;  %v385_v4 = vmax.f32 %v321_v61, 0.0 }
  0x82   :  { %v1068_v59 = vrot.slane %v1066_v52, 1  ;;  %v603_v14 = vrot.slane %v601_v55, 7  ;;  %v3589_v3 = vunpack.c.l.bf16 %v3799_v34  ;;  %v3590_v56 = vunpack.c.h.bf16 %v3799_v34 }
  0x83   :  { %v4569_v53 = vsel %vm798_vm3, %v1057_v10, %v1061_v39  ;;  %v424_v24 = vpack.c.bf16 %v385_v4, %v384_v44  ;;  %v3593_v16 = vunpack.c.l.bf16 %v3800_v21  ;;  %v3594_v46 = vunpack.c.h.bf16 %v3800_v21 }
  0x84   :  { %5977 = vst [vmem:[#allocation35_spill] sm:$0xff] %v4569_v53  ;;  %1403 = vrot.lane.b32.xlu1 %v4569_v53, %s3968_s11  ;;  %v1069_v6 = vor.u32 %v1068_v59, %v1064_v1  ;;  %v606_v51 = vor.u32 %v604_v32, %v603_v14  ;;  %v4575_v12 = vsel %vm4012_vm2, %v603_v14, 0  ;;  %v252_v50 = vmul.f32 %v4517_v35, %v3589_v3  ;;  %v3801_v3 = vld [vmem:[%s5848_s0 + $0xd8] sm:$0xff]  }
  0x85   :  { %5978 = vst [vmem:[#allocation36_spill] sm:$0xff] %v4575_v12  ;;  %v1083_v38 = vshll.u32 %v4575_v12, 16  ;;  %v608_v37 = vshrl.u32 %v424_v24, 16  ;;  %v611_v61 = vshll.u32 %v424_v24, 16  ;;  %v253_v39 = vmul.f32 %v4517_v35, %v3590_v56 }
  0x86   :  { %v4581_v34 = vsel %vm798_vm3, %v1069_v6, %v1073_v30  ;;  %v4585_v52 = vsel %vm4012_vm2, 0, %v606_v51  ;;  %v322_v1 = vadd.f32 %v4549_v22, %v252_v50  ;;  %v254_v55 = vmul.f32 %v4517_v35, %v3593_v16 }
  0x87   :  { %5979 = vst [vmem:[#allocation37_spill] sm:$0xff] %v4581_v34  ;;  %5980 = vst [vmem:[#allocation38_spill] sm:$0xff] %v4585_v52  ;;  %1405 = vrot.lane.b32.xlu0 %v4581_v34, %s3968_s11  ;;  %v1076_v56 = vshrl.u32 %v4585_v52, 16  ;;  %v1078_v24 = vshll.u32 %v4585_v52, 16  ;;  %v1085_v32 = vrot.slane %v1083_v38, 1  ;;  %v610_v21 = vrot.slane %v608_v37, 7 }
  0x88   :  { %v323_v51 = vadd.f32 %v4549_v22, %v253_v39  ;;  %v386_v10 = vmax.f32 %v322_v1, 0.0  ;;  %v255_v30 = vmul.f32 %v4517_v35, %v3594_v46  ;;  %v324_v16 = vadd.f32 %v4549_v22, %v254_v55 }
  0x89   :  { %v1080_v44 = vrot.slane %v1078_v24, 1  ;;  %v613_v4 = vor.u32 %v611_v61, %v610_v21  ;;  %v4601_v59 = vsel %vm4012_vm2, %v610_v21, 0  ;;  %v3597_v14 = vunpack.c.l.bf16 %v3801_v3  ;;  %v3802_v61 = vld [vmem:[%s5848_s0 + $0xe0] sm:$0xff]  }
  0x8a   :  { %5981 = vst [vmem:[#allocation39_spill] sm:$0xff] %v4601_v59  ;;  %v1095_v6 = vshll.u32 %v4601_v59, 16  ;;  %v387_v50 = vmax.f32 %v323_v51, 0.0  ;;  %v325_v38 = vadd.f32 %v4549_v22, %v255_v30  ;;  %v388_v37 = vmax.f32 %v324_v16, 0.0 }
  0x8b   :  { %v1081_v12 = vor.u32 %v1080_v44, %v1076_v56  ;;  %v4607_v39 = vsel %vm4012_vm2, 0, %v613_v4  ;;  %v3598_v46 = vunpack.c.h.bf16 %v3801_v3  ;;  %v256_v1 = vmul.f32 %v4517_v35, %v3597_v14  ;;  %v3803_v44 = vld [vmem:[%s5848_s0 + $0xe8] sm:$0xff]  }
  0x8c   :  { %5982 = vst [vmem:[#allocation40_spill] sm:$0xff] %v4607_v39  ;;  %v1088_v55 = vshrl.u32 %v4607_v39, 16  ;;  %v1090_v24 = vshll.u32 %v4607_v39, 16  ;;  %v1097_v21 = vrot.slane %v1095_v6, 1  ;;  %v425_v51 = vpack.c.bf16 %v387_v50, %v386_v10 }
  0x8d   :  { %v4616_v30 = vsel %vm798_vm3, %v1081_v12, %v1085_v32  ;;  %v389_v56 = vmax.f32 %v325_v38, 0.0  ;;  %v257_v16 = vmul.f32 %v4517_v35, %v3598_v46  ;;  %v326_v3 = vadd.f32 %v4549_v22, %v256_v1 }
  0x8e   :  { %1407 = vrot.lane.b32.xlu1 %v4616_v30, %s3968_s11  ;;  %v1092_v4 = vrot.slane %v1090_v24, 1  ;;  %v615_v14 = vshrl.u32 %v425_v51, 16  ;;  %v618_v59 = vshll.u32 %v425_v51, 16  ;;  %v3601_v6 = vunpack.c.l.bf16 %v3802_v61 }
  0x8f   :  { %v426_v10 = vpack.c.bf16 %v389_v56, %v388_v37  ;;  %v327_v12 = vadd.f32 %v4549_v22, %v257_v16  ;;  %v390_v32 = vmax.f32 %v326_v3, 0.0  ;;  %v3602_v50 = vunpack.c.h.bf16 %v3802_v61 }
  0x90   :  { %v1093_v38 = vor.u32 %v1092_v4, %v1088_v55  ;;  %v617_v46 = vrot.slane %v615_v14, 7  ;;  %v258_v1 = vmul.f32 %v4517_v35, %v3601_v6  ;;  %v3605_v39 = vunpack.c.l.bf16 %v3803_v44 }
  0x91   :  { %v622_v52 = vshrl.u32 %v426_v10, 16  ;;  %v625_v34 = vshll.u32 %v426_v10, 16  ;;  %v391_v53 = vmax.f32 %v327_v12, 0.0  ;;  %v259_v42 = vmul.f32 %v4517_v35, %v3602_v50 }
  0x92   :  { %v4629_v24 = vsel %vm798_vm3, %v1093_v38, %v1097_v21  ;;  %v620_v51 = vor.u32 %v618_v59, %v617_v46  ;;  %v4633_v37 = vsel %vm4012_vm2, %v617_v46, 0  ;;  %v328_v61 = vadd.f32 %v4549_v22, %v258_v1 }
  0x93   :  { %5983 = vst [vmem:[#allocation41_spill] sm:$0xff] %v4633_v37  ;;  %1409 = vrot.lane.b32.xlu0 %v4629_v24, %s3968_s11  ;;  %v1107_v55 = vshll.u32 %v4633_v37, 16  ;;  %v624_v56 = vrot.slane %v622_v52, 7  ;;  %v427_v16 = vpack.c.bf16 %v391_v53, %v390_v32  ;;  %v329_v3 = vadd.f32 %v4549_v22, %v259_v42 }
  0x94   :  { %v4642_v21 = vsel %vm4012_vm2, 0, %v620_v51  ;;  %v392_v59 = vmax.f32 %v328_v61, 0.0  ;;  %v3606_v4 = vunpack.c.h.bf16 %v3803_v44  ;;  %v260_v14 = vmul.f32 %v4517_v35, %v3605_v39 }
  0x95   :  { %v1100_v6 = vshrl.u32 %v4642_v21, 16  ;;  %v1102_v10 = vshll.u32 %v4642_v21, 16  ;;  %v1109_v12 = vrot.slane %v1107_v55, 1  ;;  %v627_v50 = vor.u32 %v625_v34, %v624_v56 }
  0x96   :  { %v4649_v52 = vsel %vm4012_vm2, %v624_v56, 0  ;;  %v629_v53 = vshrl.u32 %v427_v16, 16  ;;  %v632_v42 = vshll.u32 %v427_v16, 16  ;;  %v393_v32 = vmax.f32 %v329_v3, 0.0 }
  0x97   :  { %5984 = vst [vmem:[#allocation42_spill] sm:$0xff] %v4649_v52  ;;  %v1104_v38 = vrot.slane %v1102_v10, 1  ;;  %v4653_v46 = vsel %vm4012_vm2, 0, %v627_v50  ;;  %v1119_v39 = vshll.u32 %v4649_v52, 16  ;;  %v261_v44 = vmul.f32 %v4517_v35, %v3606_v4  ;;  %v3804_v4 = vld [vmem:[%s5848_s0 + $0xf0] sm:$0xff]  }
  0x98   :  { %v1112_v1 = vshrl.u32 %v4653_v46, 16  ;;  %v1114_v34 = vshll.u32 %v4653_v46, 16  ;;  %v631_v51 = vrot.slane %v629_v53, 7  ;;  %v428_v61 = vpack.c.bf16 %v393_v32, %v392_v59 }
  0x99   :  { %v1105_v55 = vor.u32 %v1104_v38, %v1100_v6  ;;  %v1121_v56 = vrot.slane %v1119_v39, 1  ;;  %v330_v16 = vadd.f32 %v4549_v22, %v260_v14  ;;  %v331_v3 = vadd.f32 %v4549_v22, %v261_v44 }
  0x9a   :  { %v1116_v10 = vrot.slane %v1114_v34, 1  ;;  %v634_v37 = vor.u32 %v632_v42, %v631_v51  ;;  %v4663_v50 = vsel %vm4012_vm2, %v631_v51, 0  ;;  %v636_v52 = vshrl.u32 %v428_v61, 16 }
  0x9b   :  { %5985 = vst [vmem:[#allocation43_spill] sm:$0xff] %v4663_v50  ;;  %v4669_v53 = vsel %vm798_vm3, %v1105_v55, %v1109_v12  ;;  %v1131_v59 = vshll.u32 %v4663_v50, 16  ;;  %v639_v6 = vshll.u32 %v428_v61, 16  ;;  %v394_v14 = vmax.f32 %v330_v16, 0.0 }
  0x9c   :  { %1411 = vrot.lane.b32.xlu1 %v4669_v53, %s3968_s11  ;;  %v1117_v42 = vor.u32 %v1116_v10, %v1112_v1  ;;  %v4676_v32 = vsel %vm4012_vm2, 0, %v634_v37  ;;  %v638_v38 = vrot.slane %v636_v52, 7  ;;  %v395_v39 = vmax.f32 %v331_v3, 0.0 }
  0x9d   :  { %5986 = vst [vmem:[#allocation44_spill] sm:$0xff] %v4676_v32  ;;  %v1124_v44 = vshrl.u32 %v4676_v32, 16  ;;  %v1126_v34 = vshll.u32 %v4676_v32, 16  ;;  %v1133_v12 = vrot.slane %v1131_v59, 1  ;;  %v3609_v51 = vunpack.c.l.bf16 %v3804_v4 }
  0x9e   :  { %v4681_v55 = vsel %vm798_vm3, %v1117_v42, %v1121_v56  ;;  %v641_v61 = vor.u32 %v639_v6, %v638_v38  ;;  %v4685_v16 = vsel %vm4012_vm2, %v638_v38, 0  ;;  %v429_v1 = vpack.c.bf16 %v395_v39, %v394_v14 }
  0x9f   :  { %5987 = vst [vmem:[#allocation45_spill] sm:$0xff] %v4681_v55  ;;  %5988 = vst [vmem:[#allocation46_spill] sm:$0xff] %v4685_v16  ;;  %1413 = vrot.lane.b32.xlu0 %v4681_v55, %s3968_s11  ;;  %v1128_v37 = vrot.slane %v1126_v34, 1  ;;  %v1143_v52 = vshll.u32 %v4685_v16, 16  ;;  %v3610_v3 = vunpack.c.h.bf16 %v3804_v4  ;;  %v262_v10 = vmul.f32 %v4517_v35, %v3609_v51 }
  0xa0   :  { %v4693_v59 = vsel %vm4012_vm2, 0, %v641_v61  ;;  %v643_v56 = vshrl.u32 %v429_v1, 16  ;;  %v646_v6 = vshll.u32 %v429_v1, 16  ;;  %vm1989_vm8 = vcmask 97280  }
  0xa1   :  { %5989 = vst [vmem:[#allocation47_spill] sm:$0xff] %v4693_v59  ;;  %v1129_v42 = vor.u32 %v1128_v37, %v1124_v44  ;;  %v1136_v38 = vshrl.u32 %v4693_v59, 16  ;;  %v1138_v14 = vshll.u32 %v4693_v59, 16  ;;  %v263_v50 = vmul.f32 %v4517_v35, %v3610_v3 }
  0xa2   :  { %v645_v39 = vrot.slane %v643_v56, 7  ;;  %v332_v34 = vadd.f32 %v4549_v22, %v262_v10  ;;  %v1145_v16 = vrot.slane %v1143_v52, 1  ;;  %vm2054_vm9 = vcmask 130048  }
  0xa3   :  { %v4700_v4 = vsel %vm798_vm3, %v1129_v42, %v1133_v12  ;;  %v1140_v51 = vrot.slane %v1138_v14, 1  ;;  %v333_v1 = vadd.f32 %v4549_v22, %v263_v50  ;;  %vm2119_vm10 = vcmask 162816  }
  0xa4   :  { %5990 = vst [vmem:[#allocation48_spill] sm:$0xff] %v4700_v4  ;;  %1415 = vrot.lane.b32.xlu1 %v4700_v4, %s3968_s11  ;;  %v648_v61 = vor.u32 %v646_v6, %v645_v39  ;;  %v4706_v44 = vsel %vm4012_vm2, %v645_v39, 0  ;;  %v396_v37 = vmax.f32 %v332_v34, 0.0  ;;  %vm2184_vm11 = vcmask 195584  }
  0xa5   :  { %5991 = vst [vmem:[#allocation49_spill] sm:$0xff] %v4706_v44  ;;  %v1141_v56 = vor.u32 %v1140_v51, %v1136_v38  ;;  %v1155_v3 = vshll.u32 %v4706_v44, 16  ;;  %v397_v10 = vmax.f32 %v333_v1, 0.0  ;;  %v1235_v1 = vrot.slane %v4036_v8, 1 }
  0xa6   :  { %v4712_v12 = vsel %vm4012_vm2, 0, %v648_v61  ;;  %v1234_v61 = vrot.slane %v4032_v7, 1  ;;  %vm2248_vm12 = vcmask 228352   ;;  %vm2312_vm13 = vcmask 261120  }
  0xa7   :  { %5992 = vst [vmem:[#allocation50_spill] sm:$0xff] %v4712_v12  ;;  %v4715_v52 = vsel %vm798_vm3, %v1141_v56, %v1145_v16  ;;  %v1148_v6 = vshrl.u32 %v4712_v12, 16  ;;  %v1150_v42 = vshll.u32 %v4712_v12, 16  ;;  %v430_v50 = vpack.c.bf16 %v397_v10, %v396_v37 }
  0xa8   :  { %5993 = vst [vmem:[#allocation51_spill] sm:$0xff] %v4715_v52  ;;  %1417 = vrot.lane.b32.xlu0 %v4715_v52, %s3968_s11  ;;  %v1157_v38 = vrot.slane %v1155_v3, 1  ;;  %v1240_v3 = vrot.slane %v4084_v15, 1  ;;  %v1241_v10 = vrot.slane %v4078_v5, 1  ;;  %v4736_v8 = vsel %vm1233_vm4, %v1234_v61, %v1235_v1 }
  0xa9   :  { %v1152_v14 = vrot.slane %v1150_v42, 1  ;;  %v650_v39 = vshrl.u32 %v430_v50, 16  ;;  %v653_v34 = vshll.u32 %v430_v50, 16  ;;  %v1237_v61 = vrot.slane %v4095_v23, 1 }
  0xaa   :  { %v1238_v1 = vrot.slane %v4088_v17, 1  ;;  %v1243_v17 = vrot.slane %v4105_v31, 1  ;;  %vm2396_vm14 = vcmask 293888  }
  0xab   :  { %v1153_v51 = vor.u32 %v1152_v14, %v1148_v6  ;;  %v652_v44 = vrot.slane %v650_v39, 7  ;;  %v1246_v39 = vrot.slane %v4125_v49, 1 }
  0xad   :  { %v4724_v16 = vsel %vm798_vm3, %v1153_v51, %v1157_v38  ;;  %v655_v56 = vor.u32 %v653_v34, %v652_v44  ;;  %v4730_v37 = vsel %vm4012_vm2, %v652_v44, 0  ;;  %v4747_v44 = vsel %vm1233_vm4, %v1240_v3, %v1241_v10 }
  0xae   :  { %5994 = vst [vmem:[#allocation52_spill] sm:$0xff] %v4724_v16  ;;  %1419 = vrot.lane.b32.xlu1 %v4724_v16, %s3968_s11  ;;  %5995 = vst [vmem:[#allocation53_spill] sm:$0xff] %v4730_v37  ;;  %v1167_v6 = vshll.u32 %v4730_v37, 16  ;;  %v1247_v34 = vrot.slane %v4115_v43, 1  ;;  %v1252_v10 = vrot.slane %v4197_v27, 1  ;;  %v1239_v43 = vsel %vm1233_vm4, %v1237_v61, %v1238_v1  ;;  %v4811_v1 = vpop.permute.xlu1 %1365 }
  0xaf   :  { %v4740_v42 = vsel %vm4012_vm2, 0, %v655_v56  ;;  %v1256_v61 = vrot.slane %v4201_v29, 1  ;;  %v3960_v29 = vld [vmem:[%s5851_s3] sm:$0xff]  }
  0xb0   :  { %5996 = vst [vmem:[#allocation54_spill] sm:$0xff] %v4740_v42  ;;  %v1160_v50 = vshrl.u32 %v4740_v42, 16  ;;  %v1162_v14 = vshll.u32 %v4740_v42, 16  ;;  %v1169_v38 = vrot.slane %v1167_v6, 1  ;;  %v4759_v3 = vsel %vm1233_vm4, %v1246_v39, %v1247_v34  ;;  %3872 = vmatprep.subr.bf16.mxu0 %v3960_v29  ;;  %3942 = vmatprep.subr.bf16.mxu1 %v3960_v29 }
  0xb1   :  { %v1253_v6 = vrot.slane %v4190_v13, 1  ;;  %v1249_v39 = vrot.slane %v4157_v19, 1  ;;  %v1250_v34 = vrot.slane %v4148_v9, 1  ;;  %3873 = vmatpush3.bf16.msra.mxu0 %v3960_v29  ;;  %3945 = vmatpush3.bf16.msra.mxu1 %v3960_v29  ;;  %v1267_v42 = vrot.slane %v4308_v28, 1 }
  0xb2   :  { %1423 = vrot.lane.b32.xlu1 %v4736_v8, %s3969_s20  ;;  %v1164_v5 = vrot.slane %v1162_v14, 1 }
  0xb3   :  { %v4771_v14 = vsel %vm1233_vm4, %v1252_v10, %v1253_v6  ;;  %v3961_v10 = vld [vmem:[%s5851_s3 + $0x8] sm:$0xff]   ;;  %v4820_v6 = vpop.permute.xlu0 %1361 }
  0xb4   :  { %v1165_v51 = vor.u32 %v1164_v5, %v1160_v50  ;;  %v1244_v50 = vrot.slane %v4099_v25, 1  ;;  %v1258_v5 = vrot.slane %v4220_v58, 1  ;;  %3874 = vmatprep.subr.bf16.mxu0 %v3961_v10  ;;  %3943 = vmatprep.subr.bf16.mxu1 %v3961_v10 }
  0xb5   :  { %3875 = vmatpush3.bf16.msra.mxu0 %v3961_v10  ;;  %3946 = vmatpush3.bf16.msra.mxu1 %v3961_v10 }
  0xb6   :  { %1427 = vrot.lane.b32.xlu1 %v4747_v44, %s3969_s20  ;;  %v4756_v56 = vsel %vm798_vm3, %v1165_v51, %v1169_v38  ;;  %v1259_v38 = vrot.slane %v4214_v48, 1  ;;  %v4777_v13 = vsel %vm1233_vm4, %v1243_v17, %v1244_v50  ;;  %v4789_v48 = vsel %vm1233_vm4, %v1249_v39, %v1250_v34  ;;  %v4824_v17 = vpop.permute.xlu1 %1367  ;;  %v3962_v50 = vld [vmem:[%s5851_s3 + $0x10] ss:$0 sps:$4 sm:$0x33]   ;;  %s3975_s3 = smov 32  }
  0xb7   :  { %5997 = vst [vmem:[#allocation55_spill] sm:$0xff] %v4756_v56  ;;  %1421 = vrot.lane.b32.xlu0 %v4756_v56, %s3968_s11  ;;  %v1255_v51 = vrot.slane %v4208_v36, 1  ;;  %s3970_s11 = smov 12   ;;  %3948 = vmatprep.subr.msk.bf16.mxu0 %vm2461_vm5, %v3962_v50 }
  0xb8   :  { %v4784_v25 = vsel %vm1233_vm4, %v1258_v5, %v1259_v38  ;;  %3949 = vmatprep.subr.msk.bf16.mxu1 %vm2461_vm5, %v3962_v50  ;;  %v4832_v5 = vpop.permute.xlu0 %1363 }
  0xb9   :  { %v4798_v9 = vsel %vm1233_vm4, %v1255_v51, %v1256_v61 }
  0xba   :  { %1431 = vrot.lane.b32.xlu1 %v4759_v3, %s3969_s20  ;;  %v4836_v38 = vpop.permute.xlu1 %1371 }
  0xbb   :  { %1425 = vrot.lane.b32.xlu0 %v1239_v43, %s3969_s20 }
  0xbe   :  { %1435 = vrot.lane.b32.xlu1 %v4771_v14, %s3969_s20  ;;  %v4846_v39 = vpop.permute.xlu1 %1375 }
  0xbf   :  { %1429 = vrot.lane.b32.xlu0 %v4777_v13, %s3969_s20 }
  0xc2   :  { %1439 = vrot.lane.b32.xlu1 %v4784_v25, %s3969_s20  ;;  %v4856_v51 = vpop.permute.xlu1 %1379 }
  0xc3   :  { %1433 = vrot.lane.b32.xlu0 %v4789_v48, %s3969_s20 }
  0xc6   :  { %1487 = vrot.lane.b32.xlu1 %v4084_v15, %s3970_s11 }
  0xc7   :  { %1437 = vrot.lane.b32.xlu0 %v4798_v9, %s3969_s20 }
  0xca   :  { %1551 = vrot.lane.b32.xlu1 %v4118_v45, %s3971_s21 }
  0xcb   :  { %1485 = vrot.lane.b32.xlu0 %v4095_v23, %s3970_s11 }
  0xce   :  { %1615 = vrot.lane.b32.xlu1 %v4747_v44, %s3972_s24 }
  0xcf   :  { %1549 = vrot.lane.b32.xlu0 %v4131_v54, %s3971_s21  ;;  %v2463_v54 = vsel %vm2461_vm5, %v3962_v50, 0 }
  0xd0   :  { %3877 = vmatpush3.bf16.msra.mxu0 %v2463_v54  ;;  %3947 = vmatpush3.bf16.msra.mxu1 %v2463_v54 }
  0xd2   :  { %1679 = vrot.lane.b32.xlu1 %v4105_v31, %s3973_s27 }
  0xd3   :  { %1613 = vrot.lane.b32.xlu0 %v1239_v43, %s3972_s24  ;;  %v4842_v43 = vpop.permute.xlu0 %1369 }
  0xd6   :  { %1741 = vrot.lane.b32.xlu1 %v4139_v62, %s3974_s30 }
  0xd7   :  { %1677 = vrot.lane.b32.xlu0 %v4084_v15, %s3973_s27  ;;  %v4852_v34 = vpop.permute.xlu0 %1373 }
  0xda   :  { %1803 = vrot.lane.b32.xlu1 %v4777_v13, %s3975_s3 }
  0xdb   :  { %1739 = vrot.lane.b32.xlu0 %v4118_v45, %s3974_s30  ;;  %v4862_v45 = vpop.permute.xlu0 %1377 }
  0xde   :  { %1491 = vrot.lane.b32.xlu1 %v4125_v49, %s3970_s11 }
  0xdf   :  { %1801 = vrot.lane.b32.xlu0 %v4747_v44, %s3975_s3  ;;  %v4866_v44 = vpop.permute.xlu1 %1383  ;;  %v4872_v61 = vpop.permute.xlu0 %1381 }
  0xe2   :  { %1555 = vrot.lane.b32.xlu1 %v4164_v26, %s3971_s21 }
  0xe3   :  { %1489 = vrot.lane.b32.xlu0 %v4105_v31, %s3970_s11  ;;  %v4876_v29 = vpop.permute.xlu1 %1387 }
  0xe6   :  { %1619 = vrot.lane.b32.xlu1 %v4759_v3, %s3972_s24 }
  0xe7   :  { %1553 = vrot.lane.b32.xlu0 %v4139_v62, %s3971_s21  ;;  %v4882_v62 = vpop.permute.xlu0 %1385 }
  0xea   :  { %1683 = vrot.lane.b32.xlu1 %v4157_v19, %s3973_s27 }
  0xeb   :  { %1617 = vrot.lane.b32.xlu0 %v4777_v13, %s3972_s24  ;;  %v4886_v13 = vpop.permute.xlu1 %1391  ;;  %v4892_v10 = vpop.permute.xlu0 %1389 }
  0xee   :  { %1745 = vrot.lane.b32.xlu1 %v4182_v57, %s3974_s30 }
  0xef   :  { %1681 = vrot.lane.b32.xlu0 %v4125_v49, %s3973_s27  ;;  %v4896_v50 = vpop.permute.xlu1 %1395 }
  0xf0   :  { %5998 = vst [vmem:[#allocation56_spill] sm:$0xff] %v4896_v50 }
  0xf2   :  { %1807 = vrot.lane.b32.xlu1 %v4789_v48, %s3975_s3 }
  0xf3   :  { %1743 = vrot.lane.b32.xlu0 %v4164_v26, %s3974_s30  ;;  %v4902_v26 = vpop.permute.xlu0 %1393 }
  0xf4   :  { %5999 = vst [vmem:[#allocation57_spill] sm:$0xff] %v4902_v26 }
  0xf6   :  { %1495 = vrot.lane.b32.xlu1 %v4197_v27, %s3970_s11 }
  0xf7   :  { %1805 = vrot.lane.b32.xlu0 %v4759_v3, %s3975_s3  ;;  %v4906_v3 = vpop.permute.xlu1 %1399  ;;  %v4912_v54 = vpop.permute.xlu0 %1397 }
  0xf8   :  { %6000 = vst [vmem:[#allocation58_spill] sm:$0xff] %v4906_v3  ;;  %6001 = vst [vmem:[#allocation59_spill] sm:$0xff] %v4912_v54 }
  0xfa   :  { %1559 = vrot.lane.b32.xlu1 %v4228_v63, %s3971_s21 }
  0xfb   :  { %1493 = vrot.lane.b32.xlu0 %v4157_v19, %s3970_s11  ;;  %v4916_v56 = vpop.permute.xlu1 %1403 }
  0xfc   :  { %6002 = vst [vmem:[#allocation60_spill] sm:$0xff] %v4916_v56 }
  0xfe   :  { %1623 = vrot.lane.b32.xlu1 %v4771_v14, %s3972_s24 }
  0xff   :  { %1557 = vrot.lane.b32.xlu0 %v4182_v57, %s3971_s21  ;;  %v4922_v57 = vpop.permute.xlu0 %1401 }
 0x100   :  { %6003 = vst [vmem:[#allocation61_spill] sm:$0xff] %v4922_v57 }
 0x102   :  { %1687 = vrot.lane.b32.xlu1 %v4208_v36, %s3973_s27 }
 0x103   :  { %1621 = vrot.lane.b32.xlu0 %v4789_v48, %s3972_s24  ;;  %v4926_v48 = vpop.permute.xlu1 %1407  ;;  %v4930_v3 = vpop.permute.xlu0 %1405 }
 0x104   :  { %6004 = vst [vmem:[#allocation62_spill] sm:$0xff] %v4926_v48  ;;  %6005 = vst [vmem:[#allocation63_spill] sm:$0xff] %v4930_v3  ;;  %v1261_v48 = vrot.slane %v4239_v11, 1  ;;  %v1262_v3 = vrot.slane %v4224_v60, 1 }
 0x106   :  { %1749 = vrot.lane.b32.xlu1 %v4246_v20, %s3974_s30 }
 0x107   :  { %1685 = vrot.lane.b32.xlu0 %v4197_v27, %s3973_s27 }
 0x10a   :  { %1811 = vrot.lane.b32.xlu1 %v4798_v9, %s3975_s3 }
 0x10b   :  { %1747 = vrot.lane.b32.xlu0 %v4228_v63, %s3974_s30  ;;  %v4942_v63 = vpop.permute.xlu0 %1409 }
 0x10c   :  { %6007 = vst [vmem:[#allocation65_spill] sm:$0xff] %v4942_v63 }
 0x10e   :  { %1499 = vrot.lane.b32.xlu1 %v4220_v58, %s3970_s11  ;;  %v4936_v56 = vpop.permute.xlu1 %1411 }
 0x10f   :  { %1809 = vrot.lane.b32.xlu0 %v4771_v14, %s3975_s3  ;;  %6006 = vst [vmem:[#allocation64_spill] sm:$0xff] %v4936_v56 }
 0x111   :  { %v4952_v56 = vpop.permute.xlu0 %1413 }
 0x112   :  { %1563 = vrot.lane.b32.xlu1 %v4258_v47, %s3971_s21  ;;  %6009 = vst [vmem:[#allocation67_spill] sm:$0xff] %v4952_v56 }
 0x113   :  { %1497 = vrot.lane.b32.xlu0 %v4208_v36, %s3970_s11 }
 0x116   :  { %1627 = vrot.lane.b32.xlu1 %v4784_v25, %s3972_s24  ;;  %v4946_v14 = vpop.permute.xlu1 %1415 }
 0x117   :  { %1561 = vrot.lane.b32.xlu0 %v4246_v20, %s3971_s21  ;;  %6008 = vst [vmem:[#allocation66_spill] sm:$0xff] %v4946_v14  ;;  %v1263_v20 = vsel %vm1233_vm4, %v1261_v48, %v1262_v3 }
 0x11a   :  { %1691 = vrot.lane.b32.xlu1 %v4239_v11, %s3973_s27  ;;  %v4964_v60 = vpop.permute.xlu0 %1417 }
 0x11b   :  { %1625 = vrot.lane.b32.xlu0 %v4798_v9, %s3972_s24  ;;  %6011 = vst [vmem:[#allocation69_spill] sm:$0xff] %v4964_v60  ;;  %v1265_v60 = vrot.slane %v4280_v33, 1 }
 0x11e   :  { %1753 = vrot.lane.b32.xlu1 %v4270_v0, %s3974_s30 }
 0x11f   :  { %1689 = vrot.lane.b32.xlu0 %v4220_v58, %s3973_s27 }
 0x120   :  { %v4959_v63 = vpop.permute.xlu1 %1419 }
 0x121   :  { %6010 = vst [vmem:[#allocation68_spill] sm:$0xff] %v4959_v63 }
 0x122   :  { %1815 = vrot.lane.b32.xlu1 %v1263_v20, %s3975_s3 }
 0x123   :  { %1751 = vrot.lane.b32.xlu0 %v4258_v47, %s3974_s30 }
 0x124   :  { %v1424_v9 = vpop.permute.xlu1 %1423 }
 0x126   :  { %1501 = vrot.lane.b32.xlu1 %v4239_v11, %s3970_s11 }
 0x127   :  { %1813 = vrot.lane.b32.xlu0 %v4784_v25, %s3975_s3  ;;  %v1264_v25 = vrot.slane %v4287_v41, 1 }
 0x128   :  { %v4970_v3 = vpop.permute.xlu1 %1427 }
 0x129   :  { %v4972_v48 = vpop.permute.xlu0 %1421 }
 0x12a   :  { %6012 = vst [vmem:[#allocation70_spill] sm:$0xff] %v4972_v48  ;;  %1565 = vrot.lane.b32.xlu1 %v4270_v0, %s3971_s21 }
 0x12b   :  { %1441 = vrot.lane.b32.xlu0 %v1263_v20, %s3969_s20 }
 0x12c   :  { %v4977_v63 = vpop.permute.xlu1 %1431 }
 0x12d   :  { %v1426_v47 = vpop.permute.xlu0 %1425 }
 0x12e   :  { %1629 = vrot.lane.b32.xlu1 %v1263_v20, %s3972_s24  ;;  %v1266_v20 = vsel %vm1233_vm4, %v1264_v25, %v1265_v60  ;;  %v1268_v60 = vrot.slane %v4298_v18, 1 }
 0x12f   :  { %1503 = vrot.lane.b32.xlu0 %v4287_v41, %s3970_s11 }
 0x130   :  { %v4982_v14 = vpop.permute.xlu1 %1435  ;;  %v1269_v12 = vsel %vm1233_vm4, %v1267_v42, %v1268_v60  ;;  %v1867_v42 = vsel %vm1863_vm6, %v4095_v23, %v4832_v5  ;;  %v1865_v60 = vsel %vm1863_vm6, %v4032_v7, %v4820_v6  ;;  %v6015_v5 = vld [vmem:[#allocation3_spill] sm:$0xff] }
 0x131   :  { %v4986_v48 = vpop.permute.xlu0 %1429  ;;  %v1930_v59 = vsel %vm1926_vm7, %v1867_v42, %v1426_v47  ;;  %v5028_v32 = vsel %vm1926_vm7, %v1865_v60, %v1424_v9  ;;  %v1271_v26 = vrot.slane %v6015_v5, 1  ;;  %v6016_v60 = vld [vmem:[#allocation8_spill] sm:$0xff] }
 0x132   :  { %1693 = vrot.lane.b32.xlu1 %v4287_v41, %s3973_s27 }
 0x133   :  { %1567 = vrot.lane.b32.xlu0 %v4312_v40, %s3971_s21 }
 0x134   :  { %v4992_v0 = vpop.permute.xlu1 %1439 }
 0x135   :  { %v4995_v56 = vpop.permute.xlu0 %1433 }
 0x136   :  { %1755 = vrot.lane.b32.xlu1 %v4312_v40, %s3974_s30  ;;  %v6013_v40 = vld [vmem:[#allocation7_spill] sm:$0xff] }
 0x137   :  { %1631 = vrot.lane.b32.xlu0 %v1266_v20, %s3972_s24 }
 0x138   :  { %v1488_v33 = vpop.permute.xlu1 %1487 }
 0x139   :  { %v5000_v57 = vpop.permute.xlu0 %1437 }
 0x13a   :  { %1817 = vrot.lane.b32.xlu1 %v1266_v20, %s3975_s3 }
 0x13b   :  { %1695 = vrot.lane.b32.xlu0 %v4308_v28, %s3973_s27 }
 0x13c   :  { %v1552_v37 = vpop.permute.xlu1 %1551 }
 0x13d   :  { %v1486_v25 = vpop.permute.xlu0 %1485 }
 0x13e   :  { %1443 = vrot.lane.b32.xlu1 %v1266_v20, %s3969_s20  ;;  %v1991_v6 = vsel %vm1989_vm8, %v5028_v32, %v1486_v25 }
 0x13f   :  { %1757 = vrot.lane.b32.xlu0 %v6013_v40, %s3974_s30 }
 0x140   :  { %v1616_v16 = vpop.permute.xlu1 %1615 }
 0x141   :  { %v1550_v50 = vpop.permute.xlu0 %1549 }
 0x142   :  { %1505 = vrot.lane.b32.xlu1 %v4308_v28, %s3970_s11  ;;  %v2056_v55 = vsel %vm2054_vm9, %v1991_v6, %v1550_v50 }
 0x143   :  { %1819 = vrot.lane.b32.xlu0 %v1269_v12, %s3975_s3 }
 0x144   :  { %v1680_v54 = vpop.permute.xlu1 %1679 }
 0x145   :  { %v1614_v52 = vpop.permute.xlu0 %1613 }
 0x146   :  { %1569 = vrot.lane.b32.xlu1 %v6013_v40, %s3971_s21  ;;  %v6014_v40 = vld [vmem:[#allocation4_spill] sm:$0xff] }
 0x147   :  { %1445 = vrot.lane.b32.xlu0 %v1269_v12, %s3969_s20  ;;  %v1270_v23 = vrot.slane %v6014_v40, 1 }
 0x148   :  { %v1742_v18 = vpop.permute.xlu1 %1741 }
 0x149   :  { %v1678_v20 = vpop.permute.xlu0 %1677  ;;  %v1272_v5 = vsel %vm1233_vm4, %v1270_v23, %v1271_v26 }
 0x14a   :  { %1633 = vrot.lane.b32.xlu1 %v1269_v12, %s3972_s24  ;;  %v1993_v12 = vsel %vm1989_vm8, %v1930_v59, %v1488_v33  ;;  %v2121_v59 = vsel %vm2119_vm10, %v2056_v55, %v1614_v52  ;;  %v3789_v52 = vld [vmem:[%s5848_s0 + $0x78] sm:$0xff]  }
 0x14b   :  { %1507 = vrot.lane.b32.xlu0 %v6014_v40, %s3970_s11  ;;  %v2058_v47 = vsel %vm2054_vm9, %v1993_v12, %v1552_v37  ;;  %v2186_v37 = vsel %vm2184_vm11, %v2121_v59, %v1678_v20  ;;  %v6017_v20 = vld [vmem:[#allocation6_spill] sm:$0xff] }
 0x14c   :  { %v1804_v4 = vpop.permute.xlu1 %1803  ;;  %v2123_v9 = vsel %vm2119_vm10, %v2058_v47, %v1616_v16  ;;  %v1273_v47 = vrot.slane %v6017_v20, 1 }
 0x14d   :  { %v1740_v42 = vpop.permute.xlu0 %1739  ;;  %v2188_v33 = vsel %vm2184_vm11, %v2123_v9, %v1680_v54 }
 0x14e   :  { %1697 = vrot.lane.b32.xlu1 %v6014_v40, %s3973_s27  ;;  %v2252_v12 = vsel %vm2248_vm12, %v2188_v33, %v1742_v18  ;;  %v2250_v50 = vsel %vm2248_vm12, %v2186_v37, %v1740_v42  ;;  %v3550_v18 = vunpack.c.h.bf16 %v3789_v52  ;;  %v6018_v42 = vld [vmem:[#allocation5_spill] sm:$0xff]  ;;  %v6019_v37 = vld [vmem:[#allocation10_spill] sm:$0xff] }
 0x14f   :  { %1571 = vrot.lane.b32.xlu0 %v6016_v60, %s3971_s21  ;;  %v2316_v6 = vsel %vm2312_vm13, %v2252_v12, %v1804_v4  ;;  %v3549_v4 = vunpack.c.l.bf16 %v3789_v52  ;;  %v1274_v9 = vrot.slane %v6018_v42, 1 }
 0x150   :  { %v1492_v25 = vpop.permute.xlu1 %1491 }
 0x151   :  { %v1802_v16 = vpop.permute.xlu0 %1801  ;;  %v232_v33 = vmul.f32 %v4517_v35, %v3549_v4 }
 0x152   :  { %1759 = vrot.lane.b32.xlu1 %v6016_v60, %s3974_s30  ;;  %v2314_v55 = vsel %vm2312_vm13, %v2250_v50, %v1802_v16  ;;  %v233_v60 = vmul.f32 %v4517_v35, %v3550_v18  ;;  %v1275_v50 = vsel %vm1233_vm4, %v1273_v47, %v1274_v9  ;;  %v1871_v18 = vsel %vm1863_vm6, %v4105_v31, %v4824_v17 }
 0x153   :  { %1635 = vrot.lane.b32.xlu0 %v1272_v5, %s3972_s24  ;;  %3878 = vmatprep.mubr.msk.bf16.mxu0 %vm2396_vm14, %v2314_v55  ;;  %v1869_v47 = vsel %vm1863_vm6, %v4084_v15, %v4811_v1 }
 0x154   :  { %v1556_v26 = vpop.permute.xlu1 %1555  ;;  %3879 = vmatmul.mubr.msk.bf16.vlgmr.msra.gmra.mrb[0].mxu0 %vm2396_vm14, %v2316_v6  ;;  %v302_v6 = vadd.f32 %v4549_v22, %v232_v33  ;;  %v303_v55 = vadd.f32 %v4549_v22, %v233_v60  ;;  %v1934_v22 = vsel %vm1926_vm7, %v1871_v18, %v4986_v48  ;;  %v1932_v9 = vsel %vm1926_vm7, %v1869_v47, %v4970_v3  ;;  %v6020_v3 = vld [vmem:[#allocation11_spill] sm:$0xff]  ;;  %v6022_v18 = vld [vmem:[#allocation13_spill] sm:$0xff] }
 0x155   :  { %v1490_v54 = vpop.permute.xlu0 %1489  ;;  %v1997_v33 = vsel %vm1989_vm8, %v1934_v22, %v1492_v25 }
 0x156   :  { %1821 = vrot.lane.b32.xlu1 %v1272_v5, %s3975_s3  ;;  %v366_v35 = vmax.f32 %v302_v6, 0.0  ;;  %v367_v4 = vmax.f32 %v303_v55, 0.0  ;;  %v1995_v60 = vsel %vm1989_vm8, %v1932_v9, %v1490_v54  ;;  %v1276_v55 = vrot.slane %v6020_v3, 1 }
 0x157   :  { %1699 = vrot.lane.b32.xlu0 %v6017_v20, %s3973_s27 }
 0x158   :  { %v1620_v23 = vpop.permute.xlu1 %1619  ;;  %v415_v17 = vpack.c.bf16 %v367_v4, %v366_v35 }
 0x159   :  { %v1554_v59 = vpop.permute.xlu0 %1553 }
 0x15a   :  { %1447 = vrot.lane.b32.xlu1 %v1272_v5, %s3969_s20  ;;  %v2060_v15 = vsel %vm2054_vm9, %v1995_v60, %v1554_v59 }
 0x15b   :  { %1761 = vrot.lane.b32.xlu0 %v6019_v37, %s3974_s30 }
 0x15c   :  { %v1684_v12 = vpop.permute.xlu1 %1683 }
 0x15d   :  { %v1618_v16 = vpop.permute.xlu0 %1617 }
 0x15e   :  { %1509 = vrot.lane.b32.xlu1 %v6017_v20, %s3970_s11  ;;  %v2125_v48 = vsel %vm2119_vm10, %v2060_v15, %v1618_v16 }
 0x15f   :  { %1823 = vrot.lane.b32.xlu0 %v1275_v50, %s3975_s3 }
 0x160   :  { %v1746_v5 = vpop.permute.xlu1 %1745 }
 0x161   :  { %v1682_v52 = vpop.permute.xlu0 %1681 }
 0x162   :  { %1573 = vrot.lane.b32.xlu1 %v6019_v37, %s3971_s21  ;;  %v2062_v37 = vsel %vm2054_vm9, %v1997_v33, %v1556_v26  ;;  %v2190_v54 = vsel %vm2184_vm11, %v2125_v48, %v1682_v52 }
 0x163   :  { %1449 = vrot.lane.b32.xlu0 %v1275_v50, %s3969_s20  ;;  %v2127_v1 = vsel %vm2119_vm10, %v2062_v37, %v1620_v23  ;;  %v6023_v37 = vld [vmem:[#allocation14_spill] sm:$0xff] }
 0x164   :  { %v1808_v42 = vpop.permute.xlu1 %1807  ;;  %v2192_v6 = vsel %vm2184_vm11, %v2127_v1, %v1684_v12  ;;  %v545_v12 = vshrl.u32 %v415_v17, 16  ;;  %v1279_v15 = vrot.slane %v6023_v37, 1  ;;  %v6024_v1 = vld [vmem:[#allocation12_spill] sm:$0xff] }
 0x165   :  { %v1744_v31 = vpop.permute.xlu0 %1743  ;;  %v2256_v26 = vsel %vm2248_vm12, %v2192_v6, %v1746_v5  ;;  %v1280_v48 = vrot.slane %v6024_v1, 1 }
 0x166   :  { %1637 = vrot.lane.b32.xlu1 %v1275_v50, %s3972_s24  ;;  %v6021_v50 = vld [vmem:[#allocation9_spill] sm:$0xff]  ;;  %v2254_v59 = vsel %vm2248_vm12, %v2190_v54, %v1744_v31  ;;  %v2320_v23 = vsel %vm2312_vm13, %v2256_v26, %v1808_v42  ;;  %v547_v22 = vrot.slane %v545_v12, 7  ;;  %v548_v42 = vshll.u32 %v415_v17, 16 }
 0x167   :  { %1511 = vrot.lane.b32.xlu0 %v6020_v3, %s3970_s11  ;;  %v1277_v35 = vrot.slane %v6021_v50, 1  ;;  %v6025_v54 = vld [vmem:[#allocation17_spill] sm:$0xff] }
 0x168   :  { %v1496_v25 = vpop.permute.xlu1 %1495  ;;  %v550_v60 = vor.u32 %v548_v42, %v547_v22 }
 0x169   :  { %v1806_v4 = vpop.permute.xlu0 %1805  ;;  %v1278_v52 = vsel %vm1233_vm4, %v1276_v55, %v1277_v35  ;;  %v1281_v55 = vsel %vm1233_vm4, %v1279_v15, %v1280_v48 }
 0x16a   :  { %1701 = vrot.lane.b32.xlu1 %v6020_v3, %s3973_s27  ;;  %v2318_v16 = vsel %vm2312_vm13, %v2254_v59, %v1806_v4  ;;  %v748_v17 = vsel %vm4012_vm2, 0, %v550_v60  ;;  %v781_v59 = vsel %vm4012_vm2, %v547_v22, 0  ;;  %v1875_v4 = vsel %vm1863_vm6, %v4157_v19, %v4836_v38 }
 0x16b   :  { %1575 = vrot.lane.b32.xlu0 %v6022_v18, %s3971_s21  ;;  %3882 = vmatprep.mubr.msk.bf16.mxu0 %vm2396_vm14, %v2318_v16  ;;  %v1330_v50 = vshll.u32 %v748_v17, 16  ;;  %v1938_v12 = vsel %vm1926_vm7, %v1875_v4, %v4995_v56  ;;  %v1335_v60 = vshll.u32 %v781_v59, 16 }
 0x16c   :  { %v1560_v5 = vpop.permute.xlu1 %1559  ;;  %3883 = vmatmul.mubr.msk.bf16.gmra.mrb[4].mxu0 %vm2396_vm14, %v2320_v23  ;;  %v1873_v23 = vsel %vm1863_vm6, %v4125_v49, %v4842_v43  ;;  %v2001_v22 = vsel %vm1989_vm8, %v1938_v12, %v1496_v25 }
 0x16d   :  { %v1494_v47 = vpop.permute.xlu0 %1493  ;;  %v1332_v42 = vrot.slane %v1330_v50, 1  ;;  %v2066_v38 = vsel %vm2054_vm9, %v2001_v22, %v1560_v5  ;;  %v1337_v48 = vrot.slane %v1335_v60, 1 }
 0x16e   :  { %1763 = vrot.lane.b32.xlu1 %v6022_v18, %s3974_s30  ;;  %v1328_v18 = vshrl.u32 %v748_v17, 16 }
 0x16f   :  { %1639 = vrot.lane.b32.xlu0 %v1278_v52, %s3972_s24 }
 0x170   :  { %v1624_v9 = vpop.permute.xlu1 %1623  ;;  %v1333_v5 = vor.u32 %v1332_v42, %v1328_v18 }
 0x171   :  { %v1558_v33 = vpop.permute.xlu0 %1557  ;;  %v2131_v56 = vsel %vm2119_vm10, %v2066_v38, %v1624_v9  ;;  %v1879_v38 = vsel %vm1863_vm6, %v4208_v36, %v4846_v39 }
 0x172   :  { %1825 = vrot.lane.b32.xlu1 %v1278_v52, %s3975_s3 }
 0x173   :  { %1703 = vrot.lane.b32.xlu0 %v6023_v37, %s3973_s27 }
 0x174   :  { %v1688_v31 = vpop.permute.xlu1 %1687 }
 0x175   :  { %v1622_v6 = vpop.permute.xlu0 %1621 }
 0x176   :  { %1451 = vrot.lane.b32.xlu1 %v1278_v52, %s3969_s20  ;;  %v1936_v52 = vsel %vm1926_vm7, %v1873_v23, %v4977_v63  ;;  %v2196_v63 = vsel %vm2184_vm11, %v2131_v56, %v1688_v31  ;;  %v6028_v56 = vld [vmem:[#allocation2_spill] sm:$0xff] }
 0x177   :  { %1765 = vrot.lane.b32.xlu0 %v6025_v54, %s3974_s30  ;;  %v1999_v19 = vsel %vm1989_vm8, %v1936_v52, %v1494_v47  ;;  %v6027_v52 = vld [vmem:[#allocation15_spill] sm:$0xff] }
 0x178   :  { %v1750_v26 = vpop.permute.xlu1 %1749  ;;  %v2064_v49 = vsel %vm2054_vm9, %v1999_v19, %v1558_v33  ;;  %v1283_v22 = vrot.slane %v6027_v52, 1  ;;  %v6033_v52 = vld [vmem:[#allocation23_spill] sm:$0xff] }
 0x179   :  { %v1686_v35 = vpop.permute.xlu0 %1685  ;;  %v2129_v43 = vsel %vm2119_vm10, %v2064_v49, %v1622_v6  ;;  %v2260_v47 = vsel %vm2248_vm12, %v2196_v63, %v1750_v26  ;;  %v1338_v6 = vsel %vm798_vm3, %v1333_v5, %v1337_v48  ;;  %v1355_v26 = vrot.slane %v748_v17, 1  ;;  %v6030_v5 = vld [vmem:[#allocation18_spill] sm:$0xff] }
 0x17a   :  { %1513 = vrot.lane.b32.xlu1 %v6023_v37, %s3970_s11  ;;  %v2194_v1 = vsel %vm2184_vm11, %v2129_v43, %v1686_v35  ;;  %v1356_v35 = vrot.slane %v781_v59, 1  ;;  %v1942_v49 = vsel %vm1926_vm7, %v1879_v38, %v5000_v57  ;;  %v1286_v48 = vrot.slane %v6030_v5, 1 }
 0x17b   :  { %1827 = vrot.lane.b32.xlu0 %v1281_v55, %s3975_s3 }
 0x17c   :  { %v1812_v16 = vpop.permute.xlu1 %1811 }
 0x17d   :  { %v1748_v15 = vpop.permute.xlu0 %1747  ;;  %v2324_v33 = vsel %vm2312_vm13, %v2260_v47, %v1812_v16  ;;  %v6026_v16 = vld [vmem:[#allocation16_spill] sm:$0xff]  ;;  %v6029_v47 = vld [vmem:[#allocation19_spill] sm:$0xff] }
 0x17e   :  { %1577 = vrot.lane.b32.xlu1 %v6025_v54, %s3971_s21  ;;  %v2258_v50 = vsel %vm2248_vm12, %v2194_v1, %v1748_v15  ;;  %v1282_v18 = vrot.slane %v6026_v16, 1  ;;  %v1877_v15 = vsel %vm1863_vm6, %v4197_v27, %v4852_v34  ;;  %v1285_v57 = vrot.slane %v6029_v47, 1 }
 0x17f   :  { %1453 = vrot.lane.b32.xlu0 %v1281_v55, %s3969_s20 }
 0x180   :  { %v1500_v25 = vpop.permute.xlu1 %1499 }
 0x181   :  { %v1810_v54 = vpop.permute.xlu0 %1809  ;;  %v2005_v63 = vsel %vm1989_vm8, %v1942_v49, %v1500_v25 }
 0x182   :  { %1641 = vrot.lane.b32.xlu1 %v1281_v55, %s3972_s24  ;;  %v2322_v9 = vsel %vm2312_vm13, %v2258_v50, %v1810_v54  ;;  %v1357_v55 = vsel %vm1233_vm4, %v1355_v26, %v1356_v35  ;;  %v6031_v26 = vld [vmem:[#allocation22_spill] sm:$0xff] }
 0x183   :  { %1515 = vrot.lane.b32.xlu0 %v748_v17, %s3970_s11  ;;  %3886 = vmatprep.mubr.msk.bf16.mxu0 %vm2396_vm14, %v2322_v9 }
 0x184   :  { %v1564_v31 = vpop.permute.xlu1 %1563  ;;  %3887 = vmatmul.mubr.msk.bf16.gmra.mrb[8].mxu0 %vm2396_vm14, %v2324_v33 }
 0x185   :  { %v1498_v4 = vpop.permute.xlu0 %1497  ;;  %v2070_v36 = vsel %vm2054_vm9, %v2005_v63, %v1564_v31 }
 0x186   :  { %1705 = vrot.lane.b32.xlu1 %v748_v17, %s3973_s27  ;;  %v1284_v17 = vsel %vm1233_vm4, %v1282_v18, %v1283_v22  ;;  %v1288_v22 = vrot.slane %v6033_v52, 1 }
 0x187   :  { %1579 = vrot.lane.b32.xlu0 %v1338_v6, %s3971_s21 }
 0x188   :  { %v1628_v23 = vpop.permute.xlu1 %1627 }
 0x189   :  { %v1562_v12 = vpop.permute.xlu0 %1561  ;;  %v2135_v34 = vsel %vm2119_vm10, %v2070_v36, %v1628_v23 }
 0x18a   :  { %1767 = vrot.lane.b32.xlu1 %v1338_v6, %s3974_s30 }
 0x18b   :  { %1643 = vrot.lane.b32.xlu0 %v1357_v55, %s3972_s24 }
 0x18c   :  { %v1692_v42 = vpop.permute.xlu1 %1691 }
 0x18d   :  { %v1626_v60 = vpop.permute.xlu0 %1625  ;;  %v2200_v25 = vsel %vm2184_vm11, %v2135_v34, %v1692_v42  ;;  %v6034_v42 = vld [vmem:[#allocation21_spill] sm:$0xff] }
 0x18e   :  { %1829 = vrot.lane.b32.xlu1 %v1357_v55, %s3975_s3  ;;  %v6032_v55 = vld [vmem:[#allocation20_spill] sm:$0xff] }
 0x18f   :  { %1707 = vrot.lane.b32.xlu0 %v4032_v7, %s3973_s27  ;;  %v1940_v7 = vsel %vm1926_vm7, %v1877_v15, %v4982_v14  ;;  %v6035_v15 = vld [vmem:[#allocation26_spill] sm:$0xff] }
 0x190   :  { %v1754_v59 = vpop.permute.xlu1 %1753  ;;  %v2003_v1 = vsel %vm1989_vm8, %v1940_v7, %v1498_v4  ;;  %v1287_v4 = vsel %vm1233_vm4, %v1285_v57, %v1286_v48 }
 0x191   :  { %v1690_v19 = vpop.permute.xlu0 %1689  ;;  %v2068_v27 = vsel %vm2054_vm9, %v2003_v1, %v1562_v12  ;;  %v2264_v33 = vsel %vm2248_vm12, %v2200_v25, %v1754_v59 }
 0x192   :  { %1455 = vrot.lane.b32.xlu1 %v1284_v17, %s3969_s20  ;;  %v2133_v14 = vsel %vm2119_vm10, %v2068_v27, %v1626_v60  ;;  %v1289_v60 = vrot.slane %v6034_v42, 1  ;;  %v1883_v27 = vsel %vm1863_vm6, %v4239_v11, %v4856_v51  ;;  %v6040_v42 = vld [vmem:[#allocation27_spill] sm:$0xff] }
 0x193   :  { %1769 = vrot.lane.b32.xlu0 %v6028_v56, %s3974_s30  ;;  %v2198_v54 = vsel %vm2184_vm11, %v2133_v14, %v1690_v19  ;;  %v1881_v19 = vsel %vm1863_vm6, %v4220_v58, %v4862_v45  ;;  %v6036_v14 = vld [vmem:[#allocation25_spill] sm:$0xff] }
 0x194   :  { %v1816_v43 = vpop.permute.xlu1 %1815  ;;  %v1944_v49 = vsel %vm1926_vm7, %v1881_v19, %v4992_v0  ;;  %v1290_v56 = vsel %vm1233_vm4, %v1288_v22, %v1289_v60  ;;  %v1295_v60 = vrot.slane %v6040_v42, 1  ;;  %v1885_v19 = vsel %vm1863_vm6, %v4287_v41, %v4872_v61 }
 0x195   :  { %v1752_v39 = vpop.permute.xlu0 %1751  ;;  %v2328_v6 = vsel %vm2312_vm13, %v2264_v33, %v1816_v43 }
 0x196   :  { %1519 = vrot.lane.b32.xlu1 %v6029_v47, %s3970_s11  ;;  %v2262_v9 = vsel %vm2248_vm12, %v2198_v54, %v1752_v39  ;;  %v6037_v54 = vld [vmem:[#allocation24_spill] sm:$0xff] }
 0x197   :  { %1831 = vrot.lane.b32.xlu0 %v4736_v8, %s3975_s3  ;;  %v1292_v33 = vrot.slane %v6037_v54, 1 }
 0x198   :  { %v1502_v50 = vpop.permute.xlu1 %1501 }
 0x199   :  { %v1814_v31 = vpop.permute.xlu0 %1813  ;;  %v2007_v43 = vsel %vm1989_vm8, %v1944_v49, %v1502_v50  ;;  %v1291_v50 = vrot.slane %v6036_v14, 1  ;;  %v6041_v49 = vld [vmem:[#allocation32_spill] sm:$0xff] }
 0x19a   :  { %1583 = vrot.lane.b32.xlu1 %v6031_v26, %s3971_s21  ;;  %v2326_v35 = vsel %vm2312_vm13, %v2262_v9, %v1814_v31 }
 0x19b   :  { %1517 = vrot.lane.b32.xlu0 %v6026_v16, %s3970_s11  ;;  %3890 = vmatprep.mubr.msk.bf16.mxu0 %vm2396_vm14, %v2326_v35 }
 0x19c   :  { %v1566_v8 = vpop.permute.xlu1 %1565  ;;  %3891 = vmatmul.mubr.msk.bf16.gmra.mrb[12].mxu0 %vm2396_vm14, %v2328_v6 }
 0x19d   :  { %v1442_v23 = vpop.permute.xlu0 %1441  ;;  %v2072_v7 = vsel %vm2054_vm9, %v2007_v43, %v1566_v8  ;;  %v1293_v8 = vsel %vm1233_vm4, %v1291_v50, %v1292_v33  ;;  %v6043_v50 = vld [vmem:[#allocation30_spill] sm:$0xff] }
 0x19e   :  { %1647 = vrot.lane.b32.xlu1 %v1287_v4, %s3972_s24  ;;  %v1946_v57 = vsel %vm1926_vm7, %v1883_v27, %v1442_v23  ;;  %v1298_v54 = vrot.slane %v6043_v50, 1 }
 0x19f   :  { %1581 = vrot.lane.b32.xlu0 %v6032_v55, %s3971_s21 }
 0x1a0   :  { %v1630_v12 = vpop.permute.xlu1 %1629 }
 0x1a1   :  { %v1504_v18 = vpop.permute.xlu0 %1503  ;;  %v2137_v63 = vsel %vm2119_vm10, %v2072_v7, %v1630_v12 }
 0x1a2   :  { %1711 = vrot.lane.b32.xlu1 %v6033_v52, %s3973_s27  ;;  %v2009_v5 = vsel %vm1989_vm8, %v1946_v57, %v1504_v18  ;;  %v6039_v18 = vld [vmem:[#allocation29_spill] sm:$0xff] }
 0x1a3   :  { %1645 = vrot.lane.b32.xlu0 %v1284_v17, %s3972_s24  ;;  %v1294_v22 = vrot.slane %v6039_v18, 1 }
 0x1a4   :  { %v1694_v59 = vpop.permute.xlu1 %1693 }
 0x1a5   :  { %v1568_v38 = vpop.permute.xlu0 %1567  ;;  %v2202_v45 = vsel %vm2184_vm11, %v2137_v63, %v1694_v59  ;;  %v1296_v43 = vsel %vm1233_vm4, %v1294_v22, %v1295_v60  ;;  %v1889_v60 = vsel %vm1863_vm6, %v6014_v40, %v4882_v62 }
 0x1a6   :  { %1773 = vrot.lane.b32.xlu1 %v6035_v15, %s3974_s30  ;;  %v2074_v25 = vsel %vm2054_vm9, %v2009_v5, %v1568_v38  ;;  %v6042_v5 = vld [vmem:[#allocation31_spill] sm:$0xff] }
 0x1a7   :  { %1709 = vrot.lane.b32.xlu0 %v6029_v47, %s3973_s27 }
 0x1a8   :  { %v1756_v17 = vpop.permute.xlu1 %1755 }
 0x1a9   :  { %v1632_v58 = vpop.permute.xlu0 %1631  ;;  %v2266_v0 = vsel %vm2248_vm12, %v2202_v45, %v1756_v17 }
 0x1aa   :  { %1835 = vrot.lane.b32.xlu1 %v1290_v56, %s3975_s3  ;;  %v2139_v9 = vsel %vm2119_vm10, %v2074_v25, %v1632_v58  ;;  %v1297_v25 = vrot.slane %v6042_v5, 1 }
 0x1ab   :  { %1771 = vrot.lane.b32.xlu0 %v6031_v26, %s3974_s30  ;;  %v6038_v26 = vld [vmem:[#allocation28_spill] sm:$0xff] }
 0x1ac   :  { %v1818_v1 = vpop.permute.xlu1 %1817 }
 0x1ad   :  { %v2330_v36 = vsel %vm2312_vm13, %v2266_v0, %v1818_v1  ;;  %v1696_v39 = vpop.permute.xlu0 %1695 }
 0x1ae   :  { %1459 = vrot.lane.b32.xlu1 %v1290_v56, %s3969_s20  ;;  %3894 = vmatprep.mubr.msk.bf16.mxu0 %vm2396_vm14, %v2330_v36  ;;  %v2204_v51 = vsel %vm2184_vm11, %v2139_v9, %v1696_v39  ;;  %v1887_v36 = vsel %vm1863_vm6, %v4308_v28, %v4866_v44 }
 0x1af   :  { %1833 = vrot.lane.b32.xlu0 %v1287_v4, %s3975_s3 }
 0x1b0   :  { %v1444_v34 = vpop.permute.xlu1 %1443 }
 0x1b1   :  { %v1758_v48 = vpop.permute.xlu0 %1757 }
 0x1b2   :  { %1523 = vrot.lane.b32.xlu1 %v6036_v14, %s3970_s11  ;;  %v2268_v31 = vsel %vm2248_vm12, %v2204_v51, %v1758_v48  ;;  %v6044_v51 = vld [vmem:[#allocation35_spill] sm:$0xff] }
 0x1b3   :  { %1457 = vrot.lane.b32.xlu0 %v1287_v4, %s3969_s20 }
 0x1b4   :  { %v1506_v11 = vpop.permute.xlu1 %1505 }
 0x1b5   :  { %v1820_v6 = vpop.permute.xlu0 %1819 }
 0x1b6   :  { %1587 = vrot.lane.b32.xlu1 %v6038_v26, %s3971_s21  ;;  %v2332_v35 = vsel %vm2312_vm13, %v2268_v31, %v1820_v6  ;;  %v1299_v6 = vsel %vm1233_vm4, %v1297_v25, %v1298_v54 }
 0x1b7   :  { %1521 = vrot.lane.b32.xlu0 %v6033_v52, %s3970_s11  ;;  %3895 = vmatmul.mubr.msk.bf16.gmra.mrb[16].mxu0 %vm2396_vm14, %v2332_v35 }
 0x1b8   :  { %v1570_v23 = vpop.permute.xlu1 %1569 }
 0x1b9   :  { %v1446_v4 = vpop.permute.xlu0 %1445 }
 0x1ba   :  { %1651 = vrot.lane.b32.xlu1 %v1293_v8, %s3972_s24  ;;  %v1950_v27 = vsel %vm1926_vm7, %v1887_v36, %v1446_v4  ;;  %v6045_v4 = vld [vmem:[#allocation34_spill] sm:$0xff] }
 0x1bb   :  { %1585 = vrot.lane.b32.xlu0 %v6035_v15, %s3971_s21  ;;  %v1948_v15 = vsel %vm1926_vm7, %v1885_v19, %v1444_v34  ;;  %v6047_v19 = vld [vmem:[#allocation37_spill] sm:$0xff] }
 0x1bc   :  { %v1634_v55 = vpop.permute.xlu1 %1633  ;;  %v2011_v17 = vsel %vm1989_vm8, %v1948_v15, %v1506_v11 }
 0x1bd   :  { %v1508_v12 = vpop.permute.xlu0 %1507 }
 0x1be   :  { %1715 = vrot.lane.b32.xlu1 %v6039_v18, %s3973_s27  ;;  %v2013_v34 = vsel %vm1989_vm8, %v1950_v27, %v1508_v12  ;;  %v6046_v12 = vld [vmem:[#allocation33_spill] sm:$0xff] }
 0x1bf   :  { %1649 = vrot.lane.b32.xlu0 %v1290_v56, %s3972_s24  ;;  %v2076_v56 = vsel %vm2054_vm9, %v2011_v17, %v1570_v23  ;;  %v1301_v22 = vrot.slane %v6046_v12, 1 }
 0x1c0   :  { %v1698_v59 = vpop.permute.xlu1 %1697  ;;  %v2141_v63 = vsel %vm2119_vm10, %v2076_v56, %v1634_v55  ;;  %v1300_v55 = vrot.slane %v6045_v4, 1 }
 0x1c1   :  { %v1572_v38 = vpop.permute.xlu0 %1571  ;;  %v2206_v41 = vsel %vm2184_vm11, %v2141_v63, %v1698_v59 }
 0x1c2   :  { %1777 = vrot.lane.b32.xlu1 %v6041_v49, %s3974_s30  ;;  %v2078_v48 = vsel %vm2054_vm9, %v2013_v34, %v1572_v38 }
 0x1c3   :  { %1713 = vrot.lane.b32.xlu0 %v6036_v14, %s3973_s27 }
 0x1c4   :  { %v1760_v7 = vpop.permute.xlu1 %1759 }
 0x1c5   :  { %v1636_v58 = vpop.permute.xlu0 %1635  ;;  %v2270_v61 = vsel %vm2248_vm12, %v2206_v41, %v1760_v7 }
 0x1c6   :  { %1839 = vrot.lane.b32.xlu1 %v1296_v43, %s3975_s3  ;;  %v2143_v33 = vsel %vm2119_vm10, %v2078_v48, %v1636_v58 }
 0x1c7   :  { %1775 = vrot.lane.b32.xlu0 %v6038_v26, %s3974_s30 }
 0x1c8   :  { %v1822_v45 = vpop.permute.xlu1 %1821 }
 0x1c9   :  { %v2334_v0 = vsel %vm2312_vm13, %v2270_v61, %v1822_v45  ;;  %v1700_v1 = vpop.permute.xlu0 %1699  ;;  %v1891_v61 = vsel %vm1863_vm6, %v6017_v20, %v4876_v29 }
 0x1ca   :  { %1463 = vrot.lane.b32.xlu1 %v1296_v43, %s3969_s20  ;;  %3898 = vmatprep.mubr.msk.bf16.mxu0 %vm2396_vm14, %v2334_v0  ;;  %v2208_v44 = vsel %vm2184_vm11, %v2143_v33, %v1700_v1 }
 0x1cb   :  { %1837 = vrot.lane.b32.xlu0 %v1293_v8, %s3975_s3 }
 0x1cc   :  { %v1448_v39 = vpop.permute.xlu1 %1447 }
 0x1cd   :  { %v1762_v57 = vpop.permute.xlu0 %1761  ;;  %v1952_v38 = vsel %vm1926_vm7, %v1889_v60, %v1448_v39  ;;  %v6048_v39 = vld [vmem:[#allocation38_spill] sm:$0xff] }
 0x1ce   :  { %1527 = vrot.lane.b32.xlu1 %v6042_v5, %s3970_s11  ;;  %v2272_v9 = vsel %vm2248_vm12, %v2208_v44, %v1762_v57  ;;  %v1303_v34 = vrot.slane %v6048_v39, 1  ;;  %v6049_v57 = vld [vmem:[#allocation36_spill] sm:$0xff] }
 0x1cf   :  { %1461 = vrot.lane.b32.xlu0 %v1293_v8, %s3969_s20  ;;  %v1304_v48 = vrot.slane %v6049_v57, 1 }
 0x1d0   :  { %v1510_v28 = vpop.permute.xlu1 %1509 }
 0x1d1   :  { %v1824_v11 = vpop.permute.xlu0 %1823  ;;  %v2015_v15 = vsel %vm1989_vm8, %v1952_v38, %v1510_v28  ;;  %v1305_v28 = vsel %vm1233_vm4, %v1303_v34, %v1304_v48 }
 0x1d2   :  { %1591 = vrot.lane.b32.xlu1 %v6044_v51, %s3971_s21  ;;  %v2336_v31 = vsel %vm2312_vm13, %v2272_v9, %v1824_v11 }
 0x1d3   :  { %1525 = vrot.lane.b32.xlu0 %v6039_v18, %s3970_s11  ;;  %3899 = vmatmul.mubr.msk.bf16.gmra.mrb[20].mxu0 %vm2396_vm14, %v2336_v31  ;;  %v6050_v31 = vld [vmem:[#allocation40_spill] sm:$0xff] }
 0x1d4   :  { %v1574_v26 = vpop.permute.xlu1 %1573 }
 0x1d5   :  { %v1450_v35 = vpop.permute.xlu0 %1449 }
 0x1d6   :  { %1655 = vrot.lane.b32.xlu1 %v1299_v6, %s3972_s24  ;;  %v1954_v0 = vsel %vm1926_vm7, %v1891_v61, %v1450_v35 }
 0x1d7   :  { %1589 = vrot.lane.b32.xlu0 %v6041_v49, %s3971_s21  ;;  %v1302_v49 = vsel %vm1233_vm4, %v1300_v55, %v1301_v22 }
 0x1d8   :  { %v1638_v8 = vpop.permute.xlu1 %1637 }
 0x1d9   :  { %v1512_v23 = vpop.permute.xlu0 %1511 }
 0x1da   :  { %1719 = vrot.lane.b32.xlu1 %v6045_v4, %s3973_s27  ;;  %v2017_v1 = vsel %vm1989_vm8, %v1954_v0, %v1512_v23  ;;  %v1893_v23 = vsel %vm1863_vm6, %v6020_v3, %v4892_v10 }
 0x1db   :  { %1653 = vrot.lane.b32.xlu0 %v1296_v43, %s3972_s24  ;;  %v2080_v43 = vsel %vm2054_vm9, %v2015_v15, %v1574_v26  ;;  %v6051_v26 = vld [vmem:[#allocation39_spill] sm:$0xff] }
 0x1dc   :  { %v1702_v42 = vpop.permute.xlu1 %1701  ;;  %v2145_v7 = vsel %vm2119_vm10, %v2080_v43, %v1638_v8  ;;  %v1307_v35 = vrot.slane %v6051_v26, 1  ;;  %v1895_v43 = vsel %vm1863_vm6, %v6023_v37, %v4886_v13 }
 0x1dd   :  { %v1576_v59 = vpop.permute.xlu0 %1575  ;;  %v2210_v62 = vsel %vm2184_vm11, %v2145_v7, %v1702_v42 }
 0x1de   :  { %1781 = vrot.lane.b32.xlu1 %v6047_v19, %s3974_s30  ;;  %v2082_v27 = vsel %vm2054_vm9, %v2017_v1, %v1576_v59 }
 0x1df   :  { %1717 = vrot.lane.b32.xlu0 %v6042_v5, %s3973_s27 }
 0x1e0   :  { %v1764_v17 = vpop.permute.xlu1 %1763 }
 0x1e1   :  { %v1640_v56 = vpop.permute.xlu0 %1639  ;;  %v2274_v40 = vsel %vm2248_vm12, %v2210_v62, %v1764_v17 }
 0x1e2   :  { %1843 = vrot.lane.b32.xlu1 %v1302_v49, %s3975_s3  ;;  %v2147_v25 = vsel %vm2119_vm10, %v2082_v27, %v1640_v56 }
 0x1e3   :  { %1779 = vrot.lane.b32.xlu0 %v6044_v51, %s3974_s30 }
 0x1e4   :  { %v1826_v63 = vpop.permute.xlu1 %1825 }
 0x1e5   :  { %v2338_v58 = vsel %vm2312_vm13, %v2274_v40, %v1826_v63  ;;  %v1704_v41 = vpop.permute.xlu0 %1703  ;;  %v1309_v63 = vrot.slane %v4642_v21, 1 }
 0x1e6   :  { %1467 = vrot.lane.b32.xlu1 %v1302_v49, %s3969_s20  ;;  %3902 = vmatprep.mubr.msk.bf16.mxu0 %vm2396_vm14, %v2338_v58  ;;  %v2212_v20 = vsel %vm2184_vm11, %v2147_v25, %v1704_v41  ;;  %v6052_v58 = vld [vmem:[#allocation41_spill] sm:$0xff]  ;;  %v1312_v25 = vrot.slane %v4653_v46, 1 }
 0x1e7   :  { %1841 = vrot.lane.b32.xlu0 %v1299_v6, %s3975_s3  ;;  %v1310_v41 = vrot.slane %v6052_v58, 1 }
 0x1e8   :  { %v1452_v45 = vpop.permute.xlu1 %1451 }
 0x1e9   :  { %v1766_v36 = vpop.permute.xlu0 %1765  ;;  %v1956_v12 = vsel %vm1926_vm7, %v1893_v23, %v1452_v45 }
 0x1ea   :  { %1531 = vrot.lane.b32.xlu1 %v6048_v39, %s3970_s11  ;;  %v2276_v50 = vsel %vm2248_vm12, %v2212_v20, %v1766_v36  ;;  %v1311_v36 = vsel %vm1233_vm4, %v1309_v63, %v1310_v41 }
 0x1eb   :  { %1465 = vrot.lane.b32.xlu0 %v1299_v6, %s3969_s20  ;;  %v1306_v6 = vrot.slane %v6050_v31, 1 }
 0x1ec   :  { %v1514_v29 = vpop.permute.xlu1 %1513 }
 0x1ed   :  { %v1828_v54 = vpop.permute.xlu0 %1827  ;;  %v1308_v22 = vsel %vm1233_vm4, %v1306_v6, %v1307_v35  ;;  %v2019_v42 = vsel %vm1989_vm8, %v1956_v12, %v1514_v29  ;;  %v6053_v29 = vld [vmem:[#allocation42_spill] sm:$0xff] }
 0x1ee   :  { %1595 = vrot.lane.b32.xlu1 %v4616_v30, %s3971_s21  ;;  %v2340_v33 = vsel %vm2312_vm13, %v2276_v50, %v1828_v54  ;;  %v1313_v20 = vrot.slane %v6053_v29, 1  ;;  %v3965_v29 = vld [vmem:[%s5849_s1] ss:$0 sm:$0xff] }
 0x1ef   :  { %1529 = vrot.lane.b32.xlu0 %v6045_v4, %s3970_s11  ;;  %3903 = vmatmul.mubr.msk.bf16.gmra.mrb[24].mxu0 %vm2396_vm14, %v2340_v33  ;;  %v6054_v33 = vld [vmem:[#allocation45_spill] sm:$0xff] }
 0x1f0   :  { %v1578_v44 = vpop.permute.xlu1 %1577 }
 0x1f1   :  { %v1454_v9 = vpop.permute.xlu0 %1453  ;;  %v2084_v59 = vsel %vm2054_vm9, %v2019_v42, %v1578_v44 }
 0x1f2   :  { %1659 = vrot.lane.b32.xlu1 %v1305_v28, %s3972_s24 }
 0x1f3   :  { %1593 = vrot.lane.b32.xlu0 %v6047_v19, %s3971_s21 }
 0x1f4   :  { %v1642_v11 = vpop.permute.xlu1 %1641 }
 0x1f5   :  { %v1516_v51 = vpop.permute.xlu0 %1515  ;;  %v2149_v19 = vsel %vm2119_vm10, %v2084_v59, %v1642_v11 }
 0x1f6   :  { %1723 = vrot.lane.b32.xlu1 %v6050_v31, %s3973_s27 }
 0x1f7   :  { %1657 = vrot.lane.b32.xlu0 %v1302_v49, %s3972_s24 }
 0x1f8   :  { %v1706_v8 = vpop.permute.xlu1 %1705 }
 0x1f9   :  { %v1580_v55 = vpop.permute.xlu0 %1579  ;;  %v2214_v10 = vsel %vm2184_vm11, %v2149_v19, %v1706_v8 }
 0x1fa   :  { %1785 = vrot.lane.b32.xlu1 %v4629_v24, %s3974_s30 }
 0x1fb   :  { %1721 = vrot.lane.b32.xlu0 %v6048_v39, %s3973_s27 }
 0x1fc   :  { %v1768_v60 = vpop.permute.xlu1 %1767 }
 0x1fd   :  { %v1644_v38 = vpop.permute.xlu0 %1643  ;;  %v2278_v3 = vsel %vm2248_vm12, %v2214_v10, %v1768_v60 }
 0x1fe   :  { %1847 = vrot.lane.b32.xlu1 %v1308_v22, %s3975_s3 }
 0x1ff   :  { %1783 = vrot.lane.b32.xlu0 %v4616_v30, %s3974_s30  ;;  %v1958_v30 = vsel %vm1926_vm7, %v1895_v43, %v1454_v9  ;;  %v6055_v9 = vld [vmem:[#allocation57_spill] sm:$0xff] }
 0x200   :  { %v1830_v49 = vpop.permute.xlu1 %1829  ;;  %v2021_v56 = vsel %vm1989_vm8, %v1958_v30, %v1516_v51  ;;  %v1897_v11 = vsel %vm1863_vm6, %v6026_v16, %v6055_v9  ;;  %v6058_v30 = vld [vmem:[#allocation48_spill] sm:$0xff] }
 0x201   :  { %v2342_v15 = vsel %vm2312_vm13, %v2278_v3, %v1830_v49  ;;  %v5386_v17 = vpop.permute.xlu0 %1707  ;;  %v2086_v40 = vsel %vm2054_vm9, %v2021_v56, %v1580_v55  ;;  %v6057_v49 = vld [vmem:[#allocation43_spill] sm:$0xff]  ;;  %v3805_v56 = vld [vmem:[%s5848_s0 + $0xf8] sm:$0xff]  }
 0x202   :  { %1471 = vrot.lane.b32.xlu1 %v1308_v22, %s3969_s20  ;;  %3906 = vmatprep.mubr.msk.bf16.mxu0 %vm2396_vm14, %v2342_v15  ;;  %v2151_v13 = vsel %vm2119_vm10, %v2086_v40, %v1644_v38  ;;  %v6056_v38 = vld [vmem:[#allocation44_spill] sm:$0xff]  ;;  %v1316_v15 = vrot.slane %v6057_v49, 1 }
 0x203   :  { %1845 = vrot.lane.b32.xlu0 %v1305_v28, %s3975_s3  ;;  %v2216_v61 = vsel %vm2184_vm11, %v2151_v13, %v5386_v17  ;;  %v1315_v3 = vrot.slane %v6056_v38, 1  ;;  %v3613_v13 = vunpack.c.l.bf16 %v3805_v56 }
 0x204   :  { %v1456_v7 = vpop.permute.xlu1 %1455 }
 0x205   :  { %v5396_v62 = vpop.permute.xlu0 %1769  ;;  %v1960_v51 = vsel %vm1926_vm7, %v1897_v11, %v1456_v7  ;;  %v5473_v40 = vsel %vm1233_vm4, %v1315_v3, %v1316_v15  ;;  %v6062_v3 = vld [vmem:[#allocation59_spill] sm:$0xff]  ;;  %v6063_v15 = vld [vmem:[#allocation56_spill] sm:$0xff] }
 0x206   :  { %1535 = vrot.lane.b32.xlu1 %v4642_v21, %s3970_s11  ;;  %v2280_v45 = vsel %vm2248_vm12, %v2216_v61, %v5396_v62  ;;  %v1901_v49 = vsel %vm1863_vm6, %v6033_v52, %v6062_v3 }
 0x207   :  { %1469 = vrot.lane.b32.xlu0 %v1305_v28, %s3969_s20  ;;  %v5430_v28 = vsel %vm1233_vm4, %v1312_v25, %v1313_v20  ;;  %v264_v20 = vmul.f32 %v3965_v29, %v3613_v13 }
 0x208   :  { %v1520_v37 = vpop.permute.xlu1 %1519 }
 0x209   :  { %v5409_v0 = vpop.permute.xlu0 %1831  ;;  %v2025_v26 = vsel %vm1989_vm8, %v1960_v51, %v1520_v37  ;;  %v6060_v51 = vld [vmem:[#allocation46_spill] sm:$0xff] }
 0x20a   :  { %1599 = vrot.lane.b32.xlu1 %v4669_v53, %s3971_s21  ;;  %v2344_v1 = vsel %vm2312_vm13, %v2280_v45, %v5409_v0  ;;  %v3614_v45 = vunpack.c.h.bf16 %v3805_v56  ;;  %v1899_v56 = vsel %vm1863_vm6, %v6029_v47, %v6063_v15 }
 0x20b   :  { %1533 = vrot.lane.b32.xlu0 %v6050_v31, %s3970_s11  ;;  %3907 = vmatmul.mubr.msk.bf16.gmra.mrb[28].mxu0 %vm2396_vm14, %v2344_v1 }
 0x20c   :  { %v1584_v27 = vpop.permute.xlu1 %1583  ;;  %v265_v9 = vmul.f32 %v3965_v29, %v3614_v45 }
 0x20d   :  { %v1518_v34 = vpop.permute.xlu0 %1517  ;;  %v2090_v8 = vsel %vm2054_vm9, %v2025_v26, %v1584_v27 }
 0x20e   :  { %1663 = vrot.lane.b32.xlu1 %v1311_v36, %s3972_s24  ;;  %v2023_v35 = vsel %vm1989_vm8, %v5028_v32, %v1518_v34 }
 0x20f   :  { %1597 = vrot.lane.b32.xlu0 %v4629_v24, %s3971_s21 }
 0x210   :  { %v1648_v57 = vpop.permute.xlu1 %1647 }
 0x211   :  { %v1582_v48 = vpop.permute.xlu0 %1581  ;;  %v2155_v16 = vsel %vm2119_vm10, %v2090_v8, %v1648_v57 }
 0x212   :  { %1727 = vrot.lane.b32.xlu1 %v4653_v46, %s3973_s27  ;;  %v2088_v55 = vsel %vm2054_vm9, %v2023_v35, %v1582_v48 }
 0x213   :  { %1661 = vrot.lane.b32.xlu0 %v1308_v22, %s3972_s24 }
 0x214   :  { %v1712_v50 = vpop.permute.xlu1 %1711 }
 0x215   :  { %v1646_v54 = vpop.permute.xlu0 %1645 }
 0x216   :  { %1789 = vrot.lane.b32.xlu1 %v6054_v33, %s3974_s30  ;;  %v2153_v12 = vsel %vm2119_vm10, %v2088_v55, %v1646_v54 }
 0x217   :  { %1725 = vrot.lane.b32.xlu0 %v4642_v21, %s3973_s27 }
 0x218   :  { %v1774_v24 = vpop.permute.xlu1 %1773 }
 0x219   :  { %v1710_v44 = vpop.permute.xlu0 %1709 }
 0x21a   :  { %1851 = vrot.lane.b32.xlu1 %v5430_v28, %s3975_s3  ;;  %v2218_v32 = vsel %vm2184_vm11, %v2153_v12, %v1710_v44  ;;  %v6059_v44 = vld [vmem:[#allocation47_spill] sm:$0xff] }
 0x21b   :  { %1787 = vrot.lane.b32.xlu0 %v4669_v53, %s3974_s30  ;;  %v2220_v53 = vsel %vm2184_vm11, %v2155_v16, %v1712_v50  ;;  %v1318_v11 = vrot.slane %v6059_v44, 1  ;;  %v6061_v16 = vld [vmem:[#allocation51_spill] sm:$0xff] }
 0x21c   :  { %v1836_v6 = vpop.permute.xlu1 %1835  ;;  %v2284_v42 = vsel %vm2248_vm12, %v2220_v53, %v1774_v24  ;;  %v3966_v53 = vld [vmem:[%s5850_s2] ss:$0 sm:$0xff] }
 0x21d   :  { %v1772_v23 = vpop.permute.xlu0 %1771  ;;  %v2348_v19 = vsel %vm2312_vm13, %v2284_v42, %v1836_v6  ;;  %v1319_v6 = vrot.slane %v6060_v51, 1  ;;  %v335_v42 = vadd.f32 %v3966_v53, %v265_v9 }
 0x21e   :  { %1475 = vrot.lane.b32.xlu1 %v5430_v28, %s3969_s20  ;;  %v2282_v60 = vsel %vm2248_vm12, %v2218_v32, %v1772_v23  ;;  %v334_v32 = vadd.f32 %v3966_v53, %v264_v20 }
 0x21f   :  { %1849 = vrot.lane.b32.xlu0 %v1311_v36, %s3975_s3 }
 0x220   :  { %v5453_v22 = vpop.permute.xlu1 %1459 }
 0x221   :  { %v1834_v59 = vpop.permute.xlu0 %1833 }
 0x222   :  { %1539 = vrot.lane.b32.xlu1 %v6056_v38, %s3970_s11  ;;  %v2346_v10 = vsel %vm2312_vm13, %v2282_v60, %v1834_v59  ;;  %v5502_v60 = vsel %vm1233_vm4, %v1318_v11, %v1319_v6 }
 0x223   :  { %1473 = vrot.lane.b32.xlu0 %v1311_v36, %s3969_s20  ;;  %3910 = vmatprep.mubr.msk.bf16.mxu1 %vm2396_vm14, %v2346_v10  ;;  %v399_v10 = vmax.f32 %v335_v42, 0.0 }
 0x224   :  { %v1524_v43 = vpop.permute.xlu1 %1523  ;;  %3911 = vmatmul.mubr.msk.bf16.vlgmr.msra.gmra.mrb[0].mxu1 %vm2396_vm14, %v2348_v19  ;;  %v398_v19 = vmax.f32 %v334_v32, 0.0 }
 0x225   :  { %v1458_v7 = vpop.permute.xlu0 %1457 }
 0x226   :  { %1603 = vrot.lane.b32.xlu1 %v6058_v30, %s3971_s21  ;;  %v1962_v13 = vsel %vm1926_vm7, %v1899_v56, %v1458_v7  ;;  %v431_v47 = vpack.c.bf16 %v399_v10, %v398_v19 }
 0x227   :  { %1537 = vrot.lane.b32.xlu0 %v4653_v46, %s3970_s11  ;;  %v3880_v63 = vpop.f32.mrb[0].mxu0 }
 0x228   :  { %v1588_v58 = vpop.permute.xlu1 %1587  ;;  %v2499_v41 = vpop.f32.mrb[1].mxu0  ;;  %v3149_v50 = vmul.f32 %v3880_v63, %v3880_v63 }
 0x229   :  { %v1522_v37 = vpop.permute.xlu0 %1521  ;;  %v3881_v61 = vpop.f32.mrb[2].mxu0  ;;  %v3147_v27 = vmul.f32 %v2499_v41, %v2499_v41 }
 0x22a   :  { %1667 = vrot.lane.b32.xlu1 %v5473_v40, %s3972_s24  ;;  %v3623_v1 = vpack.c.bf16 %v3881_v61, %v3880_v63  ;;  %v2502_v36 = vpop.f32.mrb[3].mxu0  ;;  %v3150_v26 = vmul.f32 %v3881_v61, %v3881_v61  ;;  %v2027_v45 = vsel %vm1989_vm8, %v1962_v13, %v1522_v37 }
 0x22b   :  { %1601 = vrot.lane.b32.xlu0 %v6054_v33, %s3971_s21  ;;  %v3618_v34 = vpack.c.bf16 %v2502_v36, %v2499_v41  ;;  %v3075_v57 = vadd.f32 %v2502_v36, %v2499_v41  ;;  %v3148_v48 = vmul.f32 %v2502_v36, %v2502_v36 }
 0x22c   :  { %v1652_v25 = vpop.permute.xlu1 %1651  ;;  %3806 = vst [vmem:[%s5852_s4 + $0x8] sm:$0xff] %v3623_v1  }
 0x22d   :  { %3619 = vst [vmem:[%s5852_s4] sm:$0xff] %v3618_v34   ;;  %v3076_v54 = vadd.f32 %v3880_v63, %v3075_v57  ;;  %v3211_v33 = vadd.f32 %v3148_v48, %v3147_v27  ;;  %v1586_v24 = vpop.permute.xlu0 %1585  ;;  %v1964_v63 = vsel %vm1926_vm7, %v1901_v49, %v5453_v22  ;;  %v6064_v48 = vld [vmem:[#allocation50_spill] sm:$0xff] }
 0x22e   :  { %1731 = vrot.lane.b32.xlu1 %v6059_v44, %s3973_s27  ;;  %v2092_v36 = vsel %vm2054_vm9, %v2027_v45, %v1586_v24  ;;  %v1321_v20 = vrot.slane %v6064_v48, 1  ;;  %v6067_v45 = vld [vmem:[#allocation54_spill] sm:$0xff] }
 0x22f   :  { %v3212_v35 = vadd.f32 %v3211_v33, %v3149_v50  ;;  %1665 = vrot.lane.b32.xlu0 %v5430_v28, %s3972_s24  ;;  %v3077_v23 = vadd.f32 %v3881_v61, %v3076_v54  ;;  %v2029_v61 = vsel %vm1989_vm8, %v1964_v63, %v1524_v43  ;;  %v6065_v50 = vld [vmem:[#allocation49_spill] sm:$0xff] }
 0x230   :  { %v1716_v8 = vpop.permute.xlu1 %1715  ;;  %v2094_v1 = vsel %vm2054_vm9, %v2029_v61, %v1588_v58  ;;  %v1322_v54 = vrot.slane %v6065_v50, 1  ;;  %v6071_v50 = vld [vmem:[#allocation58_spill] sm:$0xff] }
 0x231   :  { %v1650_v55 = vpop.permute.xlu0 %1649  ;;  %v3213_v12 = vadd.f32 %v3212_v35, %v3150_v26  ;;  %v2159_v22 = vsel %vm2119_vm10, %v2094_v1, %v1652_v25  ;;  %v657_v25 = vshrl.u32 %v431_v47, 16  ;;  %v6066_v35 = vld [vmem:[#allocation52_spill] sm:$0xff] }
 0x232   :  { %1793 = vrot.lane.b32.xlu1 %v6061_v16, %s3974_s30  ;;  %v2224_v27 = vsel %vm2184_vm11, %v2159_v22, %v1716_v8 }
 0x233   :  { %1729 = vrot.lane.b32.xlu0 %v6056_v38, %s3973_s27  ;;  %v659_v8 = vrot.slane %v657_v25, 7 }
 0x234   :  { %v1778_v28 = vpop.permute.xlu1 %1777 }
 0x235   :  { %v1714_v59 = vpop.permute.xlu0 %1713  ;;  %v2288_v58 = vsel %vm2248_vm12, %v2224_v27, %v1778_v28 }
 0x236   :  { %1855 = vrot.lane.b32.xlu1 %v5502_v60, %s3975_s3 }
 0x237   :  { %1791 = vrot.lane.b32.xlu0 %v6058_v30, %s3974_s30  ;;  %v2157_v30 = vsel %vm2119_vm10, %v2092_v36, %v1650_v55  ;;  %v660_v55 = vshll.u32 %v431_v47, 16  ;;  %v1324_v47 = vrot.slane %v6067_v45, 1  ;;  %v6068_v36 = vld [vmem:[#allocation53_spill] sm:$0xff] }
 0x238   :  { %v1840_v41 = vpop.permute.xlu1 %1839  ;;  %v2222_v7 = vsel %vm2184_vm11, %v2157_v30, %v1714_v59  ;;  %v1325_v22 = vrot.slane %v6068_v36, 1 }
 0x239   :  { %v1776_v52 = vpop.permute.xlu0 %1775  ;;  %v2352_v57 = vsel %vm2312_vm13, %v2288_v58, %v1840_v41  ;;  %v797_v58 = vsel %vm4012_vm2, %v659_v8, 0 }
 0x23a   :  { %1479 = vrot.lane.b32.xlu1 %v5502_v60, %s3969_s20  ;;  %v2286_v37 = vsel %vm2248_vm12, %v2222_v7, %v1776_v52  ;;  %v6069_v7 = vld [vmem:[#allocation55_spill] sm:$0xff]  ;;  %v1347_v25 = vshll.u32 %v797_v58, 16 }
 0x23b   :  { %1853 = vrot.lane.b32.xlu0 %v5473_v40, %s3975_s3 }
 0x23c   :  { %v5530_v43 = vpop.permute.xlu1 %1463 }
 0x23d   :  { %v1838_v34 = vpop.permute.xlu0 %1837 }
 0x23e   :  { %1543 = vrot.lane.b32.xlu1 %v6064_v48, %s3970_s11  ;;  %v2350_v29 = vsel %vm2312_vm13, %v2286_v37, %v1838_v34  ;;  %v5578_v37 = vsel %vm1233_vm4, %v1324_v47, %v1325_v22  ;;  %v1359_v47 = vrot.slane %v797_v58, 1 }
 0x23f   :  { %1477 = vrot.lane.b32.xlu0 %v5473_v40, %s3969_s20  ;;  %3914 = vmatprep.mubr.msk.bf16.mxu1 %vm2396_vm14, %v2350_v29  ;;  %v3884_v33 = vpop.f32.mrb[4].mxu0  ;;  %v5548_v40 = vsel %vm1233_vm4, %v1321_v20, %v1322_v54  ;;  %v6070_v20 = vld [vmem:[#allocation61_spill] sm:$0xff]  ;;  %v1903_v54 = vsel %vm1863_vm6, %v6036_v14, %v6071_v50 }
 0x240   :  { %v1528_v24 = vpop.permute.xlu1 %1527  ;;  %v2515_v9 = vpop.f32.mrb[5].mxu0  ;;  %3915 = vmatmul.mubr.msk.bf16.gmra.mrb[4].mxu1 %vm2396_vm14, %v2352_v57  ;;  %v3153_v10 = vmul.f32 %v3884_v33, %v3884_v33  ;;  %v1905_v2 = vsel %vm1863_vm6, %v6039_v18, %v6070_v20 }
 0x241   :  { %v1462_v11 = vpop.permute.xlu0 %1461  ;;  %v3078_v51 = vadd.f32 %v3077_v23, %v2515_v9  ;;  %v3151_v6 = vmul.f32 %v2515_v9, %v2515_v9  ;;  %v3885_v26 = vpop.f32.mrb[6].mxu0 }
 0x242   :  { %1607 = vrot.lane.b32.xlu1 %v6066_v35, %s3971_s21  ;;  %v3633_v53 = vpack.c.bf16 %v3885_v26, %v3884_v33  ;;  %v2518_v32 = vpop.f32.mrb[7].mxu0  ;;  %v3154_v56 = vmul.f32 %v3885_v26, %v3885_v26 }
 0x243   :  { %v3214_v42 = vadd.f32 %v3213_v12, %v3151_v6  ;;  %1541 = vrot.lane.b32.xlu0 %v6059_v44, %s3970_s11  ;;  %v3628_v28 = vpack.c.bf16 %v2518_v32, %v2515_v9  ;;  %v3079_v59 = vadd.f32 %v3078_v51, %v2518_v32  ;;  %v3152_v19 = vmul.f32 %v2518_v32, %v2518_v32 }
 0x244   :  { %v1592_v23 = vpop.permute.xlu1 %1591  ;;  %3808 = vst [vmem:[%s5852_s4 + $0x18] sm:$0xff] %v3633_v53   ;;  %v662_v12 = vor.u32 %v660_v55, %v659_v8  ;;  %v1966_v51 = vsel %vm1926_vm7, %v1903_v54, %v1462_v11  ;;  %v1349_v8 = vrot.slane %v1347_v25, 1 }
 0x245   :  { %3807 = vst [vmem:[%s5852_s4 + $0x10] sm:$0xff] %v3628_v28   ;;  %v3080_v3 = vadd.f32 %v3884_v33, %v3079_v59  ;;  %v3215_v49 = vadd.f32 %v3214_v42, %v3152_v19  ;;  %v1526_v15 = vpop.permute.xlu0 %1525  ;;  %v1968_v33 = vsel %vm1926_vm7, %v1905_v2, %v5530_v43 }
 0x246   :  { %1671 = vrot.lane.b32.xlu1 %v5548_v40, %s3972_s24  ;;  %v5566_v52 = vsel %vm4012_vm2, 0, %v662_v12  ;;  %v2033_v6 = vsel %vm1989_vm8, %v1968_v33, %v1528_v24  ;;  %v2031_v55 = vsel %vm1989_vm8, %v1966_v51, %v1526_v15 }
 0x247   :  { %v3216_v63 = vadd.f32 %v3215_v49, %v3153_v10  ;;  %1605 = vrot.lane.b32.xlu0 %v6061_v16, %s3971_s21  ;;  %v3081_v13 = vadd.f32 %v3885_v26, %v3080_v3  ;;  %v1342_v16 = vshll.u32 %v5566_v52, 16  ;;  %v1340_v57 = vshrl.u32 %v5566_v52, 16 }
 0x248   :  { %v1656_v41 = vpop.permute.xlu1 %1655  ;;  %v2098_v18 = vsel %vm2054_vm9, %v2033_v6, %v1592_v23  ;;  %v6072_v6 = vld [vmem:[#allocation63_spill] sm:$0xff] }
 0x249   :  { %v1590_v61 = vpop.permute.xlu0 %1589  ;;  %v3217_v1 = vadd.f32 %v3216_v63, %v3154_v56  ;;  %v2163_v43 = vsel %vm2119_vm10, %v2098_v18, %v1656_v41 }
 0x24a   :  { %1735 = vrot.lane.b32.xlu1 %v6067_v45, %s3973_s27  ;;  %v2096_v14 = vsel %vm2054_vm9, %v2031_v55, %v1590_v61  ;;  %v1358_v61 = vrot.slane %v5566_v52, 1  ;;  %v6073_v55 = vld [vmem:[#allocation60_spill] sm:$0xff] }
 0x24b   :  { %1669 = vrot.lane.b32.xlu0 %v5502_v60, %s3972_s24  ;;  %v1344_v60 = vrot.slane %v1342_v16, 1 }
 0x24c   :  { %v1720_v30 = vpop.permute.xlu1 %1719 }
 0x24d   :  { %v1654_v27 = vpop.permute.xlu0 %1653  ;;  %v1345_v26 = vor.u32 %v1344_v60, %v1340_v57  ;;  %v2228_v11 = vsel %vm2184_vm11, %v2163_v43, %v1720_v30 }
 0x24e   :  { %1797 = vrot.lane.b32.xlu1 %v6069_v7, %s3974_s30 }
 0x24f   :  { %1733 = vrot.lane.b32.xlu0 %v6064_v48, %s3973_s27  ;;  %v1350_v19 = vsel %vm798_vm3, %v1345_v26, %v1349_v8  ;;  %v1909_v26 = vsel %vm1863_vm6, %v6045_v4, %v6072_v6 }
 0x250   :  { %v1782_v34 = vpop.permute.xlu1 %1781 }
 0x251   :  { %v1718_v29 = vpop.permute.xlu0 %1717  ;;  %v2292_v28 = vsel %vm2248_vm12, %v2228_v11, %v1782_v34  ;;  %v1360_v34 = vsel %vm1233_vm4, %v1358_v61, %v1359_v47 }
 0x252   :  { %1859 = vrot.lane.b32.xlu1 %v5578_v37, %s3975_s3 }
 0x253   :  { %1795 = vrot.lane.b32.xlu0 %v6066_v35, %s3974_s30  ;;  %v2161_v35 = vsel %vm2119_vm10, %v2096_v14, %v1654_v27 }
 0x254   :  { %v1844_v9 = vpop.permute.xlu1 %1843  ;;  %v2226_v42 = vsel %vm2184_vm11, %v2161_v35, %v1718_v29 }
 0x255   :  { %v1780_v53 = vpop.permute.xlu0 %1779  ;;  %v2356_v12 = vsel %vm2312_vm13, %v2292_v28, %v1844_v9 }
 0x256   :  { %1483 = vrot.lane.b32.xlu1 %v5578_v37, %s3969_s20  ;;  %v2290_v23 = vsel %vm2248_vm12, %v2226_v42, %v1780_v53 }
 0x257   :  { %1857 = vrot.lane.b32.xlu0 %v5548_v40, %s3975_s3  ;;  %v3888_v24 = vpop.f32.mrb[8].mxu0 }
 0x258   :  { %v1468_v32 = vpop.permute.xlu1 %1467  ;;  %v2531_v59 = vpop.f32.mrb[9].mxu0 }
 0x259   :  { %v1842_v10 = vpop.permute.xlu0 %1841  ;;  %v3082_v3 = vadd.f32 %v3081_v13, %v2531_v59  ;;  %v3155_v49 = vmul.f32 %v2531_v59, %v2531_v59  ;;  %v3889_v15 = vpop.f32.mrb[10].mxu0  ;;  %v1972_v18 = vsel %vm1926_vm7, %v1909_v26, %v1468_v32 }
 0x25a   :  { %1547 = vrot.lane.b32.xlu1 %v5566_v52, %s3970_s11  ;;  %v2354_v56 = vsel %vm2312_vm13, %v2290_v23, %v1842_v10  ;;  %v3643_v63 = vpack.c.bf16 %v3889_v15, %v3888_v24  ;;  %v2534_v41 = vpop.f32.mrb[11].mxu0  ;;  %v3158_v25 = vmul.f32 %v3889_v15, %v3889_v15 }
 0x25b   :  { %v3218_v36 = vadd.f32 %v3217_v1, %v3155_v49  ;;  %1481 = vrot.lane.b32.xlu0 %v5548_v40, %s3969_s20  ;;  %3918 = vmatprep.mubr.msk.bf16.mxu1 %vm2396_vm14, %v2354_v56  ;;  %v3638_v13 = vpack.c.bf16 %v2534_v41, %v2531_v59  ;;  %v3083_v22 = vadd.f32 %v3082_v3, %v2534_v41 }
 0x25c   :  { %v1532_v30 = vpop.permute.xlu1 %1531  ;;  %3810 = vst [vmem:[%s5852_s4 + $0x28] sm:$0xff] %v3643_v63   ;;  %v3156_v16 = vmul.f32 %v2534_v41, %v2534_v41  ;;  %3919 = vmatmul.mubr.msk.bf16.gmra.mrb[8].mxu1 %vm2396_vm14, %v2356_v12  ;;  %v3157_v40 = vmul.f32 %v3888_v24, %v3888_v24 }
 0x25d   :  { %3809 = vst [vmem:[%s5852_s4 + $0x20] sm:$0xff] %v3638_v13   ;;  %v3084_v1 = vadd.f32 %v3888_v24, %v3083_v22  ;;  %v1466_v27 = vpop.permute.xlu0 %1465 }
 0x25e   :  { %1611 = vrot.lane.b32.xlu1 %v1350_v19, %s3971_s21  ;;  %v3219_v58 = vadd.f32 %v3218_v36, %v3156_v16 }
 0x25f   :  { %1545 = vrot.lane.b32.xlu0 %v6067_v45, %s3970_s11  ;;  %v3085_v60 = vadd.f32 %v3889_v15, %v3084_v1 }
 0x260   :  { %v1596_v57 = vpop.permute.xlu1 %1595  ;;  %v3220_v29 = vadd.f32 %v3219_v58, %v3157_v40 }
 0x261   :  { %v1530_v20 = vpop.permute.xlu0 %1529 }
 0x262   :  { %1675 = vrot.lane.b32.xlu1 %v1360_v34, %s3972_s24  ;;  %v3221_v2 = vadd.f32 %v3220_v29, %v3158_v25 }
 0x263   :  { %1609 = vrot.lane.b32.xlu0 %v6069_v7, %s3971_s21  ;;  %v1907_v7 = vsel %vm1863_vm6, %v6042_v5, %v6073_v55 }
 0x264   :  { %v1660_v50 = vpop.permute.xlu1 %1659  ;;  %v1970_v53 = vsel %vm1926_vm7, %v1907_v7, %v1466_v27 }
 0x265   :  { %v1594_v54 = vpop.permute.xlu0 %1593  ;;  %v2035_v43 = vsel %vm1989_vm8, %v1970_v53, %v1530_v20 }
 0x266   :  { %1799 = vrot.lane.b32.xlu1 %v1350_v19, %s3974_s30  ;;  %v2100_v11 = vsel %vm2054_vm9, %v2035_v43, %v1594_v54 }
 0x267   :  { %1673 = vrot.lane.b32.xlu0 %v5578_v37, %s3972_s24  ;;  %v2037_v37 = vsel %vm1989_vm8, %v1972_v18, %v1532_v30 }
 0x268   :  { %v1724_v33 = vpop.permute.xlu1 %1723  ;;  %v2102_v35 = vsel %vm2054_vm9, %v2037_v37, %v1596_v57 }
 0x269   :  { %v1658_v9 = vpop.permute.xlu0 %1657  ;;  %v2167_v24 = vsel %vm2119_vm10, %v2102_v35, %v1660_v50 }
 0x26a   :  { %v2165_v59 = vsel %vm2119_vm10, %v2100_v11, %v1658_v9  ;;  %v2232_v19 = vsel %vm2184_vm11, %v2167_v24, %v1724_v33  ;;  %v6074_v33 = vld [vmem:[#allocation65_spill] sm:$0xff] }
 0x26b   :  { %1737 = vrot.lane.b32.xlu0 %v5566_v52, %s3973_s27  ;;  %v1913_v9 = vsel %vm1863_vm6, %v6050_v31, %v6074_v33  ;;  %v6077_v33 = vld [vmem:[#allocation64_spill] sm:$0xff] }
 0x26c   :  { %v1786_v51 = vpop.permute.xlu1 %1785 }
 0x26d   :  { %v1722_v8 = vpop.permute.xlu0 %1721  ;;  %v2296_v61 = vsel %vm2248_vm12, %v2232_v19, %v1786_v51 }
 0x26e   :  { %v2230_v63 = vsel %vm2184_vm11, %v2165_v59, %v1722_v8  ;;  %v6075_v8 = vld [vmem:[#allocation62_spill] sm:$0xff] }
 0x26f   :  { %1861 = vrot.lane.b32.xlu0 %v1360_v34, %s3975_s3  ;;  %v3892_v14 = vpop.f32.mrb[12].mxu0  ;;  %v1911_v55 = vsel %vm1863_vm6, %v6048_v39, %v6075_v8 }
 0x270   :  { %v1848_v52 = vpop.permute.xlu1 %1847  ;;  %v2547_v4 = vpop.f32.mrb[13].mxu0  ;;  %v3161_v41 = vmul.f32 %v3892_v14, %v3892_v14 }
 0x271   :  { %v1784_v5 = vpop.permute.xlu0 %1783  ;;  %v3086_v42 = vadd.f32 %v3085_v60, %v2547_v4  ;;  %v3159_v32 = vmul.f32 %v2547_v4, %v2547_v4  ;;  %v3893_v28 = vpop.f32.mrb[14].mxu0  ;;  %v2360_v30 = vsel %vm2312_vm13, %v2296_v61, %v1848_v52 }
 0x272   :  { %v3653_v23 = vpack.c.bf16 %v3893_v28, %v3892_v14  ;;  %v2550_v10 = vpop.f32.mrb[15].mxu0  ;;  %v2294_v47 = vsel %vm2248_vm12, %v2230_v63, %v1784_v5  ;;  %v3162_v1 = vmul.f32 %v3893_v28, %v3893_v28 }
 0x273   :  { %v3222_v3 = vadd.f32 %v3221_v2, %v3159_v32  ;;  %v3648_v49 = vpack.c.bf16 %v2550_v10, %v2547_v4  ;;  %v3087_v15 = vadd.f32 %v3086_v42, %v2550_v10  ;;  %v3160_v12 = vmul.f32 %v2550_v10, %v2550_v10 }
 0x274   :  { %v1472_v56 = vpop.permute.xlu1 %1471  ;;  %3812 = vst [vmem:[%s5852_s4 + $0x38] sm:$0xff] %v3653_v23  }
 0x275   :  { %3811 = vst [vmem:[%s5852_s4 + $0x30] sm:$0xff] %v3648_v49   ;;  %v3088_v36 = vadd.f32 %v3892_v14, %v3087_v15  ;;  %v3223_v13 = vadd.f32 %v3222_v3, %v3160_v12  ;;  %v1846_v22 = vpop.permute.xlu0 %1845  ;;  %v1976_v6 = vsel %vm1926_vm7, %v1913_v9, %v1472_v56  ;;  %v1915_v9 = vsel %vm1863_vm6, %v4642_v21, %v6077_v33 }
 0x276   :  { %v2358_v16 = vsel %vm2312_vm13, %v2294_v47, %v1846_v22 }
 0x277   :  { %v3224_v27 = vadd.f32 %v3223_v13, %v3161_v41  ;;  %3922 = vmatprep.mubr.msk.bf16.mxu1 %vm2396_vm14, %v2358_v16  ;;  %v3089_v58 = vadd.f32 %v3893_v28, %v3088_v36 }
 0x278   :  { %v1536_v40 = vpop.permute.xlu1 %1535  ;;  %3923 = vmatmul.mubr.msk.bf16.gmra.mrb[12].mxu1 %vm2396_vm14, %v2360_v30 }
 0x279   :  { %v1470_v34 = vpop.permute.xlu0 %1469  ;;  %v3225_v57 = vadd.f32 %v3224_v27, %v3162_v1  ;;  %v2041_v7 = vsel %vm1989_vm8, %v1976_v6, %v1536_v40 }
 0x27a   :  { %v1974_v37 = vsel %vm1926_vm7, %v1911_v55, %v1470_v34 }
 0x27c   :  { %v1600_v60 = vpop.permute.xlu1 %1599 }
 0x27d   :  { %v1534_v25 = vpop.permute.xlu0 %1533  ;;  %v2106_v14 = vsel %vm2054_vm9, %v2041_v7, %v1600_v60 }
 0x27e   :  { %v2039_v31 = vsel %vm1989_vm8, %v1974_v37, %v1534_v25 }
 0x280   :  { %v1664_v29 = vpop.permute.xlu1 %1663 }
 0x281   :  { %v1598_v20 = vpop.permute.xlu0 %1597  ;;  %v2171_v4 = vsel %vm2119_vm10, %v2106_v14, %v1664_v29  ;;  %v6076_v29 = vld [vmem:[#allocation67_spill] sm:$0xff] }
 0x282   :  { %v2104_v39 = vsel %vm2054_vm9, %v2039_v31, %v1598_v20  ;;  %v1917_v20 = vsel %vm1863_vm6, %v4653_v46, %v6076_v29 }
 0x284   :  { %v1728_v2 = vpop.permute.xlu1 %1727 }
 0x285   :  { %v1662_v50 = vpop.permute.xlu0 %1661  ;;  %v2236_v19 = vsel %vm2184_vm11, %v2171_v4, %v1728_v2 }
 0x286   :  { %v2169_v59 = vsel %vm2119_vm10, %v2104_v39, %v1662_v50 }
 0x288   :  { %v1790_v54 = vpop.permute.xlu1 %1789 }
 0x289   :  { %v1726_v51 = vpop.permute.xlu0 %1725  ;;  %v2300_v15 = vsel %vm2248_vm12, %v2236_v19, %v1790_v54 }
 0x28a   :  { %v3896_v26 = vpop.f32.mrb[16].mxu0  ;;  %v2234_v3 = vsel %vm2184_vm11, %v2169_v59, %v1726_v51 }
 0x28b   :  { %v2563_v18 = vpop.f32.mrb[17].mxu0  ;;  %v3165_v12 = vmul.f32 %v3896_v26, %v3896_v26 }
 0x28c   :  { %v1852_v53 = vpop.permute.xlu1 %1851  ;;  %v3090_v52 = vadd.f32 %v3089_v58, %v2563_v18  ;;  %v3163_v43 = vmul.f32 %v2563_v18, %v2563_v18  ;;  %v3897_v35 = vpop.f32.mrb[18].mxu0 }
 0x28d   :  { %v3663_v11 = vpack.c.bf16 %v3897_v35, %v3896_v26  ;;  %v1788_v24 = vpop.permute.xlu0 %1787  ;;  %v2566_v5 = vpop.f32.mrb[19].mxu0  ;;  %v2364_v61 = vsel %vm2312_vm13, %v2300_v15, %v1852_v53  ;;  %v3166_v13 = vmul.f32 %v3897_v35, %v3897_v35 }
 0x28e   :  { %v3226_v42 = vadd.f32 %v3225_v57, %v3163_v43  ;;  %v3658_v32 = vpack.c.bf16 %v2566_v5, %v2563_v18  ;;  %v3091_v28 = vadd.f32 %v3090_v52, %v2566_v5  ;;  %v3164_v23 = vmul.f32 %v2566_v5, %v2566_v5 }
 0x28f   :  { %3814 = vst [vmem:[%s5852_s4 + $0x48] sm:$0xff] %v3663_v11   ;;  %v2298_v56 = vsel %vm2248_vm12, %v2234_v3, %v1788_v24 }
 0x290   :  { %v1476_v10 = vpop.permute.xlu1 %1475  ;;  %3813 = vst [vmem:[%s5852_s4 + $0x40] sm:$0xff] %v3658_v32   ;;  %v3092_v49 = vadd.f32 %v3896_v26, %v3091_v28  ;;  %v3227_v63 = vadd.f32 %v3226_v42, %v3164_v23 }
 0x291   :  { %v1850_v41 = vpop.permute.xlu0 %1849  ;;  %v1980_v50 = vsel %vm1926_vm7, %v1917_v20, %v1476_v10 }
 0x292   :  { %v2362_v47 = vsel %vm2312_vm13, %v2298_v56, %v1850_v41  ;;  %v3093_v36 = vadd.f32 %v3897_v35, %v3092_v49  ;;  %v3228_v22 = vadd.f32 %v3227_v63, %v3165_v12 }
 0x293   :  { %3926 = vmatprep.mubr.msk.bf16.mxu1 %vm2396_vm14, %v2362_v47 }
 0x294   :  { %v1540_v30 = vpop.permute.xlu1 %1539  ;;  %3927 = vmatmul.mubr.msk.bf16.gmra.mrb[16].mxu1 %vm2396_vm14, %v2364_v61  ;;  %v3229_v1 = vadd.f32 %v3228_v22, %v3166_v13 }
 0x295   :  { %v1474_v16 = vpop.permute.xlu0 %1473  ;;  %v2045_v51 = vsel %vm1989_vm8, %v1980_v50, %v1540_v30 }
 0x296   :  { %v1978_v8 = vsel %vm1926_vm7, %v1915_v9, %v1474_v16 }
 0x298   :  { %v1604_v27 = vpop.permute.xlu1 %1603 }
 0x299   :  { %v1538_v40 = vpop.permute.xlu0 %1537  ;;  %v2110_v55 = vsel %vm2054_vm9, %v2045_v51, %v1604_v27  ;;  %v6078_v27 = vld [vmem:[#allocation69_spill] sm:$0xff] }
 0x29a   :  { %v2043_v46 = vsel %vm1989_vm8, %v1978_v8, %v1538_v40  ;;  %v1921_v40 = vsel %vm1863_vm6, %v6059_v44, %v6078_v27 }
 0x29c   :  { %v1668_v58 = vpop.permute.xlu1 %1667 }
 0x29d   :  { %v1602_v34 = vpop.permute.xlu0 %1601  ;;  %v2175_v37 = vsel %vm2119_vm10, %v2110_v55, %v1668_v58 }
 0x29e   :  { %v2108_v21 = vsel %vm2054_vm9, %v2043_v46, %v1602_v34 }
 0x2a0   :  { %v1732_v57 = vpop.permute.xlu1 %1731 }
 0x2a1   :  { %v1666_v60 = vpop.permute.xlu0 %1665  ;;  %v2240_v24 = vsel %vm2184_vm11, %v2175_v37, %v1732_v57 }
 0x2a2   :  { %v2173_v11 = vsel %vm2119_vm10, %v2108_v21, %v1666_v60  ;;  %v6079_v60 = vld [vmem:[#allocation66_spill] sm:$0xff] }
 0x2a4   :  { %v1794_v25 = vpop.permute.xlu1 %1793 }
 0x2a5   :  { %v1730_v2 = vpop.permute.xlu0 %1729  ;;  %v2304_v28 = vsel %vm2248_vm12, %v2240_v24, %v1794_v25  ;;  %v1919_v25 = vsel %vm1863_vm6, %v6056_v38, %v6079_v60 }
 0x2a6   :  { %v3900_v54 = vpop.f32.mrb[20].mxu0  ;;  %v2238_v42 = vsel %vm2184_vm11, %v2173_v11, %v1730_v2 }
 0x2a7   :  { %v2579_v6 = vpop.f32.mrb[21].mxu0  ;;  %v3169_v59 = vmul.f32 %v3900_v54, %v3900_v54 }
 0x2a8   :  { %v1856_v26 = vpop.permute.xlu1 %1855  ;;  %v3094_v7 = vadd.f32 %v3093_v36, %v2579_v6  ;;  %v3167_v18 = vmul.f32 %v2579_v6, %v2579_v6  ;;  %v3901_v53 = vpop.f32.mrb[22].mxu0 }
 0x2a9   :  { %v3673_v14 = vpack.c.bf16 %v3901_v53, %v3900_v54  ;;  %v1792_v52 = vpop.permute.xlu0 %1791  ;;  %v2582_v43 = vpop.f32.mrb[23].mxu0  ;;  %v2368_v3 = vsel %vm2312_vm13, %v2304_v28, %v1856_v26  ;;  %v3170_v12 = vmul.f32 %v3901_v53, %v3901_v53 }
 0x2aa   :  { %v3230_v35 = vadd.f32 %v3229_v1, %v3167_v18  ;;  %v3668_v31 = vpack.c.bf16 %v2582_v43, %v2579_v6  ;;  %v3095_v4 = vadd.f32 %v3094_v7, %v2582_v43  ;;  %v3168_v5 = vmul.f32 %v2582_v43, %v2582_v43 }
 0x2ab   :  { %3816 = vst [vmem:[%s5852_s4 + $0x58] sm:$0xff] %v3673_v14   ;;  %v2302_v19 = vsel %vm2248_vm12, %v2238_v42, %v1792_v52 }
 0x2ac   :  { %v1480_v39 = vpop.permute.xlu1 %1479  ;;  %3815 = vst [vmem:[%s5852_s4 + $0x50] sm:$0xff] %v3668_v31   ;;  %v3096_v32 = vadd.f32 %v3900_v54, %v3095_v4  ;;  %v3231_v23 = vadd.f32 %v3230_v35, %v3168_v5 }
 0x2ad   :  { %v1854_v10 = vpop.permute.xlu0 %1853  ;;  %v1984_v34 = vsel %vm1926_vm7, %v1921_v40, %v1480_v39 }
 0x2ae   :  { %v2366_v49 = vsel %vm2312_vm13, %v2302_v19, %v1854_v10  ;;  %v3097_v15 = vadd.f32 %v3901_v53, %v3096_v32  ;;  %v3232_v56 = vadd.f32 %v3231_v23, %v3169_v59 }
 0x2af   :  { %3930 = vmatprep.mubr.msk.bf16.mxu1 %vm2396_vm14, %v2366_v49 }
 0x2b0   :  { %v1544_v63 = vpop.permute.xlu1 %1543  ;;  %3931 = vmatmul.mubr.msk.bf16.gmra.mrb[20].mxu1 %vm2396_vm14, %v2368_v3  ;;  %v3233_v61 = vadd.f32 %v3232_v56, %v3170_v12 }
 0x2b1   :  { %v1478_v41 = vpop.permute.xlu0 %1477  ;;  %v2049_v29 = vsel %vm1989_vm8, %v1984_v34, %v1544_v63 }
 0x2b2   :  { %v1982_v50 = vsel %vm1926_vm7, %v1919_v25, %v1478_v41 }
 0x2b4   :  { %v1608_v47 = vpop.permute.xlu1 %1607 }
 0x2b5   :  { %v1542_v36 = vpop.permute.xlu0 %1541  ;;  %v2114_v54 = vsel %vm2054_vm9, %v2049_v29, %v1608_v47  ;;  %v6081_v47 = vld [vmem:[#allocation68_spill] sm:$0xff] }
 0x2b6   :  { %v2047_v44 = vsel %vm1989_vm8, %v1982_v50, %v1542_v36  ;;  %v1923_v36 = vsel %vm1863_vm6, %v6064_v48, %v6081_v47 }
 0x2b8   :  { %v1672_v13 = vpop.permute.xlu1 %1671 }
 0x2b9   :  { %v1606_v22 = vpop.permute.xlu0 %1605  ;;  %v2179_v6 = vsel %vm2119_vm10, %v2114_v54, %v1672_v13 }
 0x2ba   :  { %v2112_v38 = vsel %vm2054_vm9, %v2047_v44, %v1606_v22 }
 0x2bc   :  { %v1736_v30 = vpop.permute.xlu1 %1735 }
 0x2bd   :  { %v1670_v16 = vpop.permute.xlu0 %1669  ;;  %v2244_v37 = vsel %vm2184_vm11, %v2179_v6, %v1736_v30 }
 0x2be   :  { %v2177_v46 = vsel %vm2119_vm10, %v2112_v38, %v1670_v16 }
 0x2c0   :  { %v1798_v1 = vpop.permute.xlu1 %1797 }
 0x2c1   :  { %v1734_v58 = vpop.permute.xlu0 %1733  ;;  %v2308_v35 = vsel %vm2248_vm12, %v2244_v37, %v1798_v1 }
 0x2c2   :  { %v3904_v57 = vpop.f32.mrb[24].mxu0  ;;  %v2242_v43 = vsel %vm2184_vm11, %v2177_v46, %v1734_v58 }
 0x2c3   :  { %v2595_v20 = vpop.f32.mrb[25].mxu0  ;;  %v3173_v31 = vmul.f32 %v3904_v57, %v3904_v57 }
 0x2c4   :  { %v1860_v2 = vpop.permute.xlu1 %1859  ;;  %v3098_v33 = vadd.f32 %v3097_v15, %v2595_v20  ;;  %v3171_v9 = vmul.f32 %v2595_v20, %v2595_v20  ;;  %v3905_v51 = vpop.f32.mrb[26].mxu0  ;;  %v6080_v15 = vld [vmem:[#allocation70_spill] sm:$0xff] }
 0x2c5   :  { %v3683_v26 = vpack.c.bf16 %v3905_v51, %v3904_v57  ;;  %v1796_v8 = vpop.permute.xlu0 %1795  ;;  %v2598_v55 = vpop.f32.mrb[27].mxu0  ;;  %v2372_v5 = vsel %vm2312_vm13, %v2308_v35, %v1860_v2  ;;  %v3174_v32 = vmul.f32 %v3905_v51, %v3905_v51  ;;  %v1925_v12 = vsel %vm1863_vm6, %v6067_v45, %v6080_v15 }
 0x2c6   :  { %v3234_v7 = vadd.f32 %v3233_v61, %v3171_v9  ;;  %v3678_v18 = vpack.c.bf16 %v2598_v55, %v2595_v20  ;;  %v3099_v53 = vadd.f32 %v3098_v33, %v2598_v55  ;;  %v3172_v14 = vmul.f32 %v2598_v55, %v2598_v55 }
 0x2c7   :  { %3818 = vst [vmem:[%s5852_s4 + $0x68] sm:$0xff] %v3683_v26   ;;  %v2306_v4 = vsel %vm2248_vm12, %v2242_v43, %v1796_v8 }
 0x2c8   :  { %v1484_v52 = vpop.permute.xlu1 %1483  ;;  %3817 = vst [vmem:[%s5852_s4 + $0x60] sm:$0xff] %v3678_v18   ;;  %v3100_v21 = vadd.f32 %v3904_v57, %v3099_v53  ;;  %v3235_v11 = vadd.f32 %v3234_v7, %v3172_v14 }
 0x2c9   :  { %v1858_v24 = vpop.permute.xlu0 %1857  ;;  %v1988_v63 = vsel %vm1926_vm7, %v1925_v12, %v1484_v52 }
 0x2ca   :  { %v2370_v39 = vsel %vm2312_vm13, %v2306_v4, %v1858_v24  ;;  %v3101_v42 = vadd.f32 %v3905_v51, %v3100_v21  ;;  %v3236_v28 = vadd.f32 %v3235_v11, %v3173_v31 }
 0x2cb   :  { %3934 = vmatprep.mubr.msk.bf16.mxu1 %vm2396_vm14, %v2370_v39 }
 0x2cc   :  { %v1548_v59 = vpop.permute.xlu1 %1547  ;;  %3935 = vmatmul.mubr.msk.bf16.gmra.mrb[24].mxu1 %vm2396_vm14, %v2372_v5  ;;  %v3237_v23 = vadd.f32 %v3236_v28, %v3174_v32 }
 0x2cd   :  { %v1482_v19 = vpop.permute.xlu0 %1481  ;;  %v2053_v41 = vsel %vm1989_vm8, %v1988_v63, %v1548_v59 }
 0x2ce   :  { %v1986_v22 = vsel %vm1926_vm7, %v1923_v36, %v1482_v19 }
 0x2d0   :  { %v1612_v3 = vpop.permute.xlu1 %1611 }
 0x2d1   :  { %v1546_v10 = vpop.permute.xlu0 %1545  ;;  %v2118_v13 = vsel %vm2054_vm9, %v2053_v41, %v1612_v3 }
 0x2d2   :  { %v2051_v16 = vsel %vm1989_vm8, %v1986_v22, %v1546_v10 }
 0x2d4   :  { %v1676_v56 = vpop.permute.xlu1 %1675 }
 0x2d5   :  { %v1610_v49 = vpop.permute.xlu0 %1609  ;;  %v2183_v30 = vsel %vm2119_vm10, %v2118_v13, %v1676_v56 }
 0x2d6   :  { %v2116_v45 = vsel %vm2054_vm9, %v2051_v16, %v1610_v49  ;;  %v2247_v58 = vsel %vm2184_vm11, %v2183_v30, %v5386_v17 }
 0x2d7   :  { %v2311_v33 = vsel %vm2248_vm12, %v2247_v58, %v5396_v62 }
 0x2d8   :  { %v1800_v27 = vpop.permute.xlu1 %1799  ;;  %v2375_v62 = vsel %vm2312_vm13, %v2311_v33, %v5409_v0 }
 0x2d9   :  { %v1674_v61 = vpop.permute.xlu0 %1673 }
 0x2da   :  { %v2181_v40 = vsel %vm2119_vm10, %v2116_v45, %v1674_v61 }
 0x2dd   :  { %v1738_v1 = vpop.permute.xlu0 %1737 }
 0x2de   :  { %v3908_v34 = vpop.f32.mrb[28].mxu0  ;;  %v2246_v48 = vsel %vm2184_vm11, %v2181_v40, %v1738_v1 }
 0x2df   :  { %v2611_v57 = vpop.f32.mrb[29].mxu0  ;;  %v2310_v29 = vsel %vm2248_vm12, %v2246_v48, %v1800_v27  ;;  %v3177_v26 = vmul.f32 %v3908_v34, %v3908_v34 }
 0x2e0   :  { %v3102_v60 = vadd.f32 %v3101_v42, %v2611_v57  ;;  %v3175_v25 = vmul.f32 %v2611_v57, %v2611_v57  ;;  %v3909_v20 = vpop.f32.mrb[30].mxu0 }
 0x2e1   :  { %v3693_v2 = vpack.c.bf16 %v3909_v20, %v3908_v34  ;;  %v2614_v50 = vpop.f32.mrb[31].mxu0  ;;  %v1862_v54 = vpop.permute.xlu0 %1861  ;;  %v3178_v38 = vmul.f32 %v3909_v20, %v3909_v20 }
 0x2e2   :  { %v3238_v9 = vadd.f32 %v3237_v23, %v3175_v25  ;;  %v3688_v51 = vpack.c.bf16 %v2614_v50, %v2611_v57  ;;  %v3103_v44 = vadd.f32 %v3102_v60, %v2614_v50  ;;  %v3176_v6 = vmul.f32 %v2614_v50, %v2614_v50 }
 0x2e3   :  { %3820 = vst [vmem:[%s5852_s4 + $0x78] sm:$0xff] %v3693_v2   ;;  %v2374_v17 = vsel %vm2312_vm13, %v2310_v29, %v1862_v54 }
 0x2e4   :  { %3819 = vst [vmem:[%s5852_s4 + $0x70] sm:$0xff] %v3688_v51   ;;  %v3104_v8 = vadd.f32 %v3908_v34, %v3103_v44  ;;  %v3239_v55 = vadd.f32 %v3238_v9, %v3176_v6  ;;  %3938 = vmatprep.mubr.msk.bf16.mxu1 %vm2396_vm14, %v2374_v17  ;;  %v3976_v6 = vmov 0.0  }
 0x2e5   :  { %3939 = vmatmul.mubr.msk.bf16.gmra.mrb[28].mxu1 %vm2396_vm14, %v2375_v62  ;;  %64 = vst [vmem:[%s5853_s5] sm:$0x1] %v3976_v6  ;;  %65 = vst [vmem:[%s5854_s6] sm:$0x1] %v3976_v6 }
 0x2e6   :  { %v3240_v7 = vadd.f32 %v3239_v55, %v3177_v26  ;;  %v3105_v18 = vadd.f32 %v3909_v20, %v3104_v8 }
 0x2e8   :  { %v3241_v53 = vadd.f32 %v3240_v7, %v3178_v38 }
 0x2f7   :  { %v3912_v46 = vpop.f32.mrb[0].mxu1 }
 0x2f8   :  { %v2627_v37 = vpop.f32.mrb[1].mxu1  ;;  %v3181_v0 = vmul.f32 %v3912_v46, %v3912_v46 }
 0x2f9   :  { %v3106_v14 = vadd.f32 %v3105_v18, %v2627_v37  ;;  %v3179_v52 = vmul.f32 %v2627_v37, %v2627_v37  ;;  %v3913_v43 = vpop.f32.mrb[2].mxu1 }
 0x2fa   :  { %v3703_v21 = vpack.c.bf16 %v3913_v43, %v3912_v46  ;;  %v2630_v35 = vpop.f32.mrb[3].mxu1  ;;  %v3182_v42 = vmul.f32 %v3913_v43, %v3913_v43 }
 0x2fb   :  { %v3242_v31 = vadd.f32 %v3241_v53, %v3179_v52  ;;  %v3698_v4 = vpack.c.bf16 %v2630_v35, %v2627_v37  ;;  %v3107_v11 = vadd.f32 %v3106_v14, %v2630_v35  ;;  %v3180_v24 = vmul.f32 %v2630_v35, %v2630_v35 }
 0x2fc   :  { %3822 = vst [vmem:[%s5852_s4 + $0x88] sm:$0xff] %v3703_v21  }
 0x2fd   :  { %3821 = vst [vmem:[%s5852_s4 + $0x80] sm:$0xff] %v3698_v4   ;;  %v3108_v5 = vadd.f32 %v3912_v46, %v3107_v11  ;;  %v3243_v39 = vadd.f32 %v3242_v31, %v3180_v24 }
 0x2ff   :  { %v3244_v32 = vadd.f32 %v3243_v39, %v3181_v0  ;;  %v3109_v28 = vadd.f32 %v3913_v43, %v3108_v5 }
 0x301   :  { %v3245_v59 = vadd.f32 %v3244_v32, %v3182_v42 }
 0x313   :  { %v3916_v19 = vpop.f32.mrb[4].mxu1 }
 0x314   :  { %v2643_v23 = vpop.f32.mrb[5].mxu1  ;;  %v3185_v47 = vmul.f32 %v3916_v19, %v3916_v19 }
 0x315   :  { %v3110_v10 = vadd.f32 %v3109_v28, %v2643_v23  ;;  %v3183_v3 = vmul.f32 %v2643_v23, %v2643_v23  ;;  %v3917_v49 = vpop.f32.mrb[6].mxu1 }
 0x316   :  { %v3713_v15 = vpack.c.bf16 %v3917_v49, %v3916_v19  ;;  %v2646_v12 = vpop.f32.mrb[7].mxu1  ;;  %v3186_v22 = vmul.f32 %v3917_v49, %v3917_v49 }
 0x317   :  { %v3246_v56 = vadd.f32 %v3245_v59, %v3183_v3  ;;  %v3708_v63 = vpack.c.bf16 %v2646_v12, %v2643_v23  ;;  %v3111_v41 = vadd.f32 %v3110_v10, %v2646_v12  ;;  %v3184_v61 = vmul.f32 %v2646_v12, %v2646_v12 }
 0x318   :  { %3824 = vst [vmem:[%s5852_s4 + $0x98] sm:$0xff] %v3713_v15  }
 0x319   :  { %3823 = vst [vmem:[%s5852_s4 + $0x90] sm:$0xff] %v3708_v63   ;;  %v3112_v36 = vadd.f32 %v3916_v19, %v3111_v41  ;;  %v3247_v13 = vadd.f32 %v3246_v56, %v3184_v61 }
 0x31b   :  { %v3248_v30 = vadd.f32 %v3247_v13, %v3185_v47  ;;  %v3113_v16 = vadd.f32 %v3917_v49, %v3112_v36 }
 0x31d   :  { %v3249_v45 = vadd.f32 %v3248_v30, %v3186_v22 }
 0x32f   :  { %v3920_v1 = vpop.f32.mrb[8].mxu1 }
 0x330   :  { %v2659_v27 = vpop.f32.mrb[9].mxu1  ;;  %v3189_v2 = vmul.f32 %v3920_v1, %v3920_v1 }
 0x331   :  { %v3114_v40 = vadd.f32 %v3113_v16, %v2659_v27  ;;  %v3187_v58 = vmul.f32 %v2659_v27, %v2659_v27  ;;  %v3921_v34 = vpop.f32.mrb[10].mxu1 }
 0x332   :  { %v3723_v48 = vpack.c.bf16 %v3921_v34, %v3920_v1  ;;  %v2662_v57 = vpop.f32.mrb[11].mxu1  ;;  %v3190_v33 = vmul.f32 %v3921_v34, %v3921_v34 }
 0x333   :  { %v3250_v60 = vadd.f32 %v3249_v45, %v3187_v58  ;;  %v3718_v25 = vpack.c.bf16 %v2662_v57, %v2659_v27  ;;  %v3115_v29 = vadd.f32 %v3114_v40, %v2662_v57  ;;  %v3188_v20 = vmul.f32 %v2662_v57, %v2662_v57 }
 0x334   :  { %3826 = vst [vmem:[%s5852_s4 + $0xa8] sm:$0xff] %v3723_v48  }
 0x335   :  { %3825 = vst [vmem:[%s5852_s4 + $0xa0] sm:$0xff] %v3718_v25   ;;  %v3116_v50 = vadd.f32 %v3920_v1, %v3115_v29  ;;  %v3251_v54 = vadd.f32 %v3250_v60, %v3188_v20 }
 0x337   :  { %v3252_v9 = vadd.f32 %v3251_v54, %v3189_v2  ;;  %v3117_v51 = vadd.f32 %v3921_v34, %v3116_v50 }
 0x339   :  { %v3253_v44 = vadd.f32 %v3252_v9, %v3190_v33 }
 0x34b   :  { %v3924_v17 = vpop.f32.mrb[12].mxu1 }
 0x34c   :  { %v2675_v26 = vpop.f32.mrb[13].mxu1  ;;  %v3193_v14 = vmul.f32 %v3924_v17, %v3924_v17 }
 0x34d   :  { %v3118_v8 = vadd.f32 %v3117_v51, %v2675_v26  ;;  %v3191_v55 = vmul.f32 %v2675_v26, %v2675_v26  ;;  %v3925_v62 = vpop.f32.mrb[14].mxu1 }
 0x34e   :  { %v3733_v38 = vpack.c.bf16 %v3925_v62, %v3924_v17  ;;  %v2678_v7 = vpop.f32.mrb[15].mxu1  ;;  %v3194_v21 = vmul.f32 %v3925_v62, %v3925_v62 }
 0x34f   :  { %v3254_v18 = vadd.f32 %v3253_v44, %v3191_v55  ;;  %v3728_v53 = vpack.c.bf16 %v2678_v7, %v2675_v26  ;;  %v3119_v46 = vadd.f32 %v3118_v8, %v2678_v7  ;;  %v3192_v37 = vmul.f32 %v2678_v7, %v2678_v7 }
 0x350   :  { %3828 = vst [vmem:[%s5852_s4 + $0xb8] sm:$0xff] %v3733_v38  }
 0x351   :  { %3827 = vst [vmem:[%s5852_s4 + $0xb0] sm:$0xff] %v3728_v53   ;;  %v3120_v52 = vadd.f32 %v3924_v17, %v3119_v46  ;;  %v3255_v43 = vadd.f32 %v3254_v18, %v3192_v37 }
 0x353   :  { %v3256_v35 = vadd.f32 %v3255_v43, %v3193_v14  ;;  %v3121_v31 = vadd.f32 %v3925_v62, %v3120_v52 }
 0x355   :  { %v3257_v4 = vadd.f32 %v3256_v35, %v3194_v21 }
 0x367   :  { %v3928_v11 = vpop.f32.mrb[16].mxu1 }
 0x368   :  { %v2691_v24 = vpop.f32.mrb[17].mxu1  ;;  %v3197_v10 = vmul.f32 %v3928_v11, %v3928_v11 }
 0x369   :  { %v3122_v0 = vadd.f32 %v3121_v31, %v2691_v24  ;;  %v3195_v5 = vmul.f32 %v2691_v24, %v2691_v24  ;;  %v3929_v39 = vpop.f32.mrb[18].mxu1 }
 0x36a   :  { %v3743_v42 = vpack.c.bf16 %v3929_v39, %v3928_v11  ;;  %v2694_v32 = vpop.f32.mrb[19].mxu1  ;;  %v3198_v15 = vmul.f32 %v3929_v39, %v3929_v39 }
 0x36b   :  { %v3258_v28 = vadd.f32 %v3257_v4, %v3195_v5  ;;  %v3738_v59 = vpack.c.bf16 %v2694_v32, %v2691_v24  ;;  %v3123_v19 = vadd.f32 %v3122_v0, %v2694_v32  ;;  %v3196_v23 = vmul.f32 %v2694_v32, %v2694_v32 }
 0x36c   :  { %3830 = vst [vmem:[%s5852_s4 + $0xc8] sm:$0xff] %v3743_v42  }
 0x36d   :  { %3829 = vst [vmem:[%s5852_s4 + $0xc0] sm:$0xff] %v3738_v59   ;;  %v3124_v3 = vadd.f32 %v3928_v11, %v3123_v19  ;;  %v3259_v49 = vadd.f32 %v3258_v28, %v3196_v23 }
 0x36f   :  { %v3260_v12 = vadd.f32 %v3259_v49, %v3197_v10  ;;  %v3125_v56 = vadd.f32 %v3929_v39, %v3124_v3 }
 0x371   :  { %v3261_v63 = vadd.f32 %v3260_v12, %v3198_v15 }
 0x383   :  { %v3932_v41 = vpop.f32.mrb[20].mxu1 }
 0x384   :  { %v2707_v61 = vpop.f32.mrb[21].mxu1  ;;  %v3201_v40 = vmul.f32 %v3932_v41, %v3932_v41 }
 0x385   :  { %v3126_v47 = vadd.f32 %v3125_v56, %v2707_v61  ;;  %v3199_v36 = vmul.f32 %v2707_v61, %v2707_v61  ;;  %v3933_v13 = vpop.f32.mrb[22].mxu1 }
 0x386   :  { %v3753_v22 = vpack.c.bf16 %v3933_v13, %v3932_v41  ;;  %v2710_v30 = vpop.f32.mrb[23].mxu1  ;;  %v3202_v48 = vmul.f32 %v3933_v13, %v3933_v13 }
 0x387   :  { %v3262_v16 = vadd.f32 %v3261_v63, %v3199_v36  ;;  %v3748_v45 = vpack.c.bf16 %v2710_v30, %v2707_v61  ;;  %v3127_v1 = vadd.f32 %v3126_v47, %v2710_v30  ;;  %v3200_v27 = vmul.f32 %v2710_v30, %v2710_v30  ;;  %v3074_v63 = vld [vmem:[%s5853_s5] sm:$0x1] }
 0x388   :  { %3832 = vst [vmem:[%s5852_s4 + $0xd8] sm:$0xff] %v3753_v22   ;;  %v3146_v47 = vld [vmem:[%s5854_s6] sm:$0x1] }
 0x389   :  { %3831 = vst [vmem:[%s5852_s4 + $0xd0] sm:$0xff] %v3748_v45   ;;  %v3128_v58 = vadd.f32 %v3932_v41, %v3127_v1  ;;  %v3263_v34 = vadd.f32 %v3262_v16, %v3200_v27 }
 0x38b   :  { %v3264_v57 = vadd.f32 %v3263_v34, %v3201_v40  ;;  %v3129_v60 = vadd.f32 %v3933_v13, %v3128_v58 }
 0x38d   :  { %v3265_v25 = vadd.f32 %v3264_v57, %v3202_v48 }
 0x39f   :  { %v3936_v29 = vpop.f32.mrb[24].mxu1 }
 0x3a0   :  { %v2723_v20 = vpop.f32.mrb[25].mxu1  ;;  %v3205_v26 = vmul.f32 %v3936_v29, %v3936_v29 }
 0x3a1   :  { %v3130_v2 = vadd.f32 %v3129_v60, %v2723_v20  ;;  %v3203_v50 = vmul.f32 %v2723_v20, %v2723_v20  ;;  %v3937_v54 = vpop.f32.mrb[26].mxu1 }
 0x3a2   :  { %v3763_v33 = vpack.c.bf16 %v3937_v54, %v3936_v29  ;;  %v2726_v9 = vpop.f32.mrb[27].mxu1  ;;  %v3206_v62 = vmul.f32 %v3937_v54, %v3937_v54 }
 0x3a3   :  { %v3266_v51 = vadd.f32 %v3265_v25, %v3203_v50  ;;  %v3758_v44 = vpack.c.bf16 %v2726_v9, %v2723_v20  ;;  %v3131_v6 = vadd.f32 %v3130_v2, %v2726_v9  ;;  %v3204_v17 = vmul.f32 %v2726_v9, %v2726_v9 }
 0x3a4   :  { %3834 = vst [vmem:[%s5852_s4 + $0xe8] sm:$0xff] %v3763_v33  }
 0x3a5   :  { %3833 = vst [vmem:[%s5852_s4 + $0xe0] sm:$0xff] %v3758_v44   ;;  %v3132_v8 = vadd.f32 %v3936_v29, %v3131_v6  ;;  %v3267_v55 = vadd.f32 %v3266_v51, %v3204_v17 }
 0x3a7   :  { %v3268_v38 = vadd.f32 %v3267_v55, %v3205_v26  ;;  %v3133_v7 = vadd.f32 %v3937_v54, %v3132_v8 }
 0x3a9   :  { %v3269_v18 = vadd.f32 %v3268_v38, %v3206_v62 }
 0x3b8   :  { %v3940_v53 = vpop.f32.mrb[28].mxu1 }
 0x3b9   :  { %v2739_v46 = vpop.f32.mrb[29].mxu1  ;;  %v3209_v24 = vmul.f32 %v3940_v53, %v3940_v53 }
 0x3ba   :  { %v3134_v37 = vadd.f32 %v3133_v7, %v2739_v46  ;;  %v3207_v14 = vmul.f32 %v2739_v46, %v2739_v46  ;;  %v3941_v52 = vpop.f32.mrb[30].mxu1 }
 0x3bb   :  { %v3773_v43 = vpack.c.bf16 %v3941_v52, %v3940_v53  ;;  %v2742_v21 = vpop.f32.mrb[31].mxu1  ;;  %v3210_v39 = vmul.f32 %v3941_v52, %v3941_v52 }
 0x3bc   :  { %v3270_v35 = vadd.f32 %v3269_v18, %v3207_v14  ;;  %v3768_v31 = vpack.c.bf16 %v2742_v21, %v2739_v46  ;;  %v3135_v4 = vadd.f32 %v3134_v37, %v2742_v21  ;;  %v3208_v11 = vmul.f32 %v2742_v21, %v2742_v21 }
 0x3bd   :  { %3836 = vst [vmem:[%s5852_s4 + $0xf8] sm:$0xff] %v3773_v43  }
 0x3be   :  { %3835 = vst [vmem:[%s5852_s4 + $0xf0] sm:$0xff] %v3768_v31   ;;  %v3136_v0 = vadd.f32 %v3940_v53, %v3135_v4  ;;  %v3271_v5 = vadd.f32 %v3270_v35, %v3208_v11 }
 0x3c0   :  { %v3137_v42 = vadd.f32 %v3941_v52, %v3136_v0  ;;  %v3272_v32 = vadd.f32 %v3271_v5, %v3209_v24 }
 0x3c2   :  { %v3138_v28 = vrot.slane %v3137_v42, 4  ;;  %v3273_v59 = vadd.f32 %v3272_v32, %v3210_v39 }
 0x3c4   :  { %v3139_v19 = vadd.f32 %v3138_v28, %v3137_v42  ;;  %v3274_v23 = vrot.slane %v3273_v59, 4 }
 0x3c6   :  { %v3140_v10 = vrot.slane %v3139_v19, 2  ;;  %v3275_v3 = vadd.f32 %v3274_v23, %v3273_v59 }
 0x3c8   :  { %v3141_v49 = vadd.f32 %v3140_v10, %v3139_v19  ;;  %v3276_v15 = vrot.slane %v3275_v3, 2 }
 0x3ca   :  { %v3142_v12 = vrot.slane %v3141_v49, 1  ;;  %v3277_v56 = vadd.f32 %v3276_v15, %v3275_v3 }
 0x3cc   :  { %v3143_v41 = vadd.f32 %v3142_v12, %v3141_v49  ;;  %v3278_v61 = vrot.slane %v3277_v56, 1 }
 0x3ce   :  { %v3144_v36 = vadd.f32 %v3143_v41, %v3074_v63  ;;  %v3279_v13 = vadd.f32 %v3278_v61, %v3277_v56 }
 0x3d0   :  { %3145 = vst [vmem:[%s5853_s5] sm:$0x1] %v3144_v36  ;;  %v3280_v22 = vadd.f32 %v3279_v13, %v3146_v47 }
 0x3d2   :  { %3281 = vst [vmem:[%s5854_s6] sm:$0x1] %v3280_v22 }

// kernel: res_block_forward.3
= control target key start
LH: loop header
LB: loop body
LE: loop exit
PB: predicated region body
PF: predicated region fallthrough
CT: control target
= control target key end

     0   :  { %vm156_vm0 = vsmask.f32 3328  ;;  %vm157_vm1 = vsmask.f32 7440  ;;  %s7999_s13 = smov 4   ;;  %vm1055_vm3 = vcmask 1042432   ;;  %s12345_s0 = inlined_call_operand.vmem [shape: bf16[2,18,18,4], index: 0, kind: input, shape index: {}]   ;;  %s12346_s1 = inlined_call_operand.vmem [shape: bf16[36,128], index: 1, kind: input, shape index: {}]   ;;  %s12347_s2 = inlined_call_operand.vmem [shape: bf16[512,128], index: 2, kind: output, shape index: {0}]   ;;  %s12348_s3 = inlined_call_operand.vmem [shape: f32[1,1,128], index: 3, kind: output, shape index: {1}]   ;;  %s12349_s4 = inlined_call_operand.vmem [shape: f32[1,1,128], index: 4, kind: output, shape index: {2}]  }
   0x1   :  { %v64_v0 = vld [vmem:[%s12345_s0 + $0x18] sm:$0xf]  ;;  %v65_v1 = vld [vmem:[%s12345_s0 + $0x1c] sm:$0xf]  ;;  %v126_v2 = vld [vmem:[%s12345_s0 + $0x20] sm:$0x1] }
   0x2   :  { %v208_v3 = vshrl.u32 %v64_v0, 16  ;;  %v211_v4 = vshll.u32 %v64_v0, 16  ;;  %v217_v5 = vshll.u32 %v65_v1, 16  ;;  %v221_v6 = vshrl.u32 %v65_v1, 16  ;;  %v60_v7 = vld [vmem:[%s12345_s0] sm:$0xf]  ;;  %vm8059_vm2 = vmor %vm156_vm0, %vm157_vm1 }
   0x3   :  { %v227_v8 = vshll.u32 %v126_v2, 16  ;;  %v61_v9 = vld [vmem:[%s12345_s0 + $0x4] sm:$0xf]  ;;  %v124_v10 = vld [vmem:[%s12345_s0 + $0x8] sm:$0x1]  ;;  %v160_v11 = vshrl.u32 %v60_v7, 16 }
   0x4   :  { %v210_v12 = vrot.slane %v208_v3, 4  ;;  %v213_v13 = vrot.slane %v211_v4, 5  ;;  %v219_v14 = vrot.slane %v217_v5, 5  ;;  %v223_v15 = vrot.slane %v221_v6, 4  ;;  %v66_v16 = vld [vmem:[%s12345_s0 + $0x24] sm:$0xf] }
   0x5   :  { %v229_v17 = vrot.slane %v227_v8, 5  ;;  %v162_v18 = vrot.slane %v160_v11, 4  ;;  %v163_v19 = vshll.u32 %v60_v7, 16  ;;  %v169_v20 = vshll.u32 %v61_v9, 16  ;;  %v67_v25 = vld [vmem:[%s12345_s0 + $0x28] sm:$0xf] }
   0x6   :  { %v214_v21 = vor.u32 %v213_v13, %v210_v12  ;;  %v224_v22 = vor.u32 %v223_v15, %v219_v14  ;;  %v173_v23 = vshrl.u32 %v61_v9, 16  ;;  %v179_v24 = vshll.u32 %v124_v10, 16  ;;  %v127_v35 = vld [vmem:[%s12345_s0 + $0x2c] sm:$0x1]  ;;  %v63_v45 = vld [vmem:[%s12345_s0 + $0x10] sm:$0xf] }
   0x7   :  { %v165_v27 = vrot.slane %v163_v19, 5  ;;  %v171_v28 = vrot.slane %v169_v20, 5  ;;  %v232_v29 = vshrl.u32 %v66_v16, 16  ;;  %v235_v30 = vshll.u32 %v66_v16, 16  ;;  %v62_v40 = vld [vmem:[%s12345_s0 + $0xc] sm:$0xf] }
   0x8   :  { %v215_v31 = vrot.slane %v214_v21, 4  ;;  %v225_v32 = vrot.slane %v224_v22, 4  ;;  %v175_v33 = vrot.slane %v173_v23, 4  ;;  %v181_v34 = vrot.slane %v179_v24, 5  ;;  %v125_v53 = vld [vmem:[%s12345_s0 + $0x14] sm:$0x1] }
   0x9   :  { %v166_v36 = vor.u32 %v165_v27, %v162_v18  ;;  %v234_v37 = vrot.slane %v232_v29, 4  ;;  %v237_v38 = vrot.slane %v235_v30, 5  ;;  %v241_v39 = vshll.u32 %v67_v25, 16  ;;  %v70_v59 = vld [vmem:[%s12345_s0 + $0x3c] sm:$0xf]  ;;  %s8001_s26 = smov 12  }
   0xa   :  { %v220_v41 = vsel %vm8059_vm2, %v215_v31, %v219_v14  ;;  %v230_v42 = vsel %vm8059_vm2, %v225_v32, %v229_v17  ;;  %v176_v43 = vor.u32 %v175_v33, %v171_v28  ;;  %v245_v44 = vshrl.u32 %v67_v25, 16  ;;  %v71_v0 = vld [vmem:[%s12345_s0 + $0x40] sm:$0xf]  ;;  %v129_v8 = vld [vmem:[%s12345_s0 + $0x44] sm:$0x1]  ;;  %s8002_s9 = smov 16  }
   0xb   :  { %v7072_v46 = vcombine.low %v220_v41, %v230_v42  ;;  %v167_v47 = vrot.slane %v166_v36, 4  ;;  %v238_v48 = vor.u32 %v237_v38, %v234_v37  ;;  %v243_v49 = vrot.slane %v241_v39, 5  ;;  %v68_v14 = vld [vmem:[%s12345_s0 + $0x30] sm:$0xf]  ;;  %v69_v19 = vld [vmem:[%s12345_s0 + $0x34] sm:$0xf] }
   0xc   :  { %v177_v50 = vrot.slane %v176_v43, 4  ;;  %v247_v51 = vrot.slane %v245_v44, 4  ;;  %v251_v52 = vshll.u32 %v127_v35, 16  ;;  %v184_v54 = vshrl.u32 %v62_v40, 16  ;;  %v128_v31 = vld [vmem:[%s12345_s0 + $0x38] sm:$0x1] }
   0xd   :  { %3944 = vrot.lane.b32.xlu1 %v7072_v46, %s7999_s13  ;;  %v172_v55 = vsel %vm8059_vm2, %v167_v47, %v171_v28  ;;  %v239_v56 = vrot.slane %v238_v48, 4  ;;  %v187_v57 = vshll.u32 %v62_v40, 16  ;;  %v193_v58 = vshll.u32 %v63_v45, 16  ;;  %v75_v46 = vld [vmem:[%s12345_s0 + $0x58] sm:$0xf]  ;;  %s8003_s15 = smov 20  }
   0xe   :  { %v182_v60 = vsel %vm8059_vm2, %v177_v50, %v181_v34  ;;  %v248_v61 = vor.u32 %v247_v51, %v243_v49  ;;  %v253_v62 = vrot.slane %v251_v52, 5  ;;  %v186_v63 = vrot.slane %v184_v54, 4  ;;  %v74_v34 = vld [vmem:[%s12345_s0 + $0x54] sm:$0xf]  ;;  %v131_v52 = vld [vmem:[%s12345_s0 + $0x5c] sm:$0x1] }
   0xf   :  { %v7070_v1 = vcombine.low %v172_v55, %v182_v60  ;;  %v244_v2 = vsel %vm8059_vm2, %v239_v56, %v243_v49  ;;  %v189_v3 = vrot.slane %v187_v57, 5  ;;  %v195_v4 = vrot.slane %v193_v58, 5  ;;  %s8004_s20 = smov 24   ;;  %s8005_s28 = smov 28  }
  0x10   :  { %v249_v5 = vrot.slane %v248_v61, 4  ;;  %v197_v6 = vshrl.u32 %v63_v45, 16  ;;  %v203_v7 = vshll.u32 %v125_v53, 16  ;;  %v280_v9 = vshrl.u32 %v70_v59, 16  ;;  %v72_v53 = vld [vmem:[%s12345_s0 + $0x48] sm:$0xf] }
  0x11   :  { %3940 = vrot.lane.b32.xlu0 %v7070_v1, %s7999_s13  ;;  %v190_v10 = vor.u32 %v189_v3, %v186_v63  ;;  %v283_v11 = vshll.u32 %v70_v59, 16  ;;  %v289_v12 = vshll.u32 %v71_v0, 16  ;;  %v293_v13 = vshrl.u32 %v71_v0, 16  ;;  %v73_v1 = vld [vmem:[%s12345_s0 + $0x4c] sm:$0xf]  ;;  %s8006_s16 = smov 32  }
  0x12   :  { %v254_v15 = vsel %vm8059_vm2, %v249_v5, %v253_v62  ;;  %v199_v16 = vrot.slane %v197_v6, 4  ;;  %v205_v17 = vrot.slane %v203_v7, 5  ;;  %v282_v18 = vrot.slane %v280_v9, 4  ;;  %v130_v6 = vld [vmem:[%s12345_s0 + $0x50] sm:$0x1] }
  0x13   :  { %v7073_v20 = vcombine.low %v244_v2, %v254_v15  ;;  %v191_v21 = vrot.slane %v190_v10, 4  ;;  %v285_v22 = vrot.slane %v283_v11, 5  ;;  %v291_v23 = vrot.slane %v289_v12, 5  ;;  %v78_v12 = vld [vmem:[%s12345_s0 + $0x6c] sm:$0xf] }
  0x14   :  { %v200_v24 = vor.u32 %v199_v16, %v195_v4  ;;  %v295_v25 = vrot.slane %v293_v13, 4  ;;  %v299_v27 = vshll.u32 %v129_v8, 16  ;;  %v256_v28 = vshrl.u32 %v68_v14, 16 }
  0x15   :  { %3946 = vrot.lane.b32.xlu1 %v7073_v20, %s7999_s13  ;;  %v196_v29 = vsel %vm8059_vm2, %v191_v21, %v195_v4  ;;  %v286_v30 = vor.u32 %v285_v22, %v282_v18  ;;  %v259_v32 = vshll.u32 %v68_v14, 16  ;;  %v265_v33 = vshll.u32 %v69_v19, 16  ;;  %v79_v21 = vld [vmem:[%s12345_s0 + $0x70] sm:$0xf] }
  0x16   :  { %v201_v35 = vrot.slane %v200_v24, 4  ;;  %v296_v36 = vor.u32 %v295_v25, %v291_v23  ;;  %v301_v37 = vrot.slane %v299_v27, 5  ;;  %v258_v38 = vrot.slane %v256_v28, 4  ;;  %v133_v25 = vld [vmem:[%s12345_s0 + $0x74] sm:$0x1] }
  0x17   :  { %v287_v39 = vrot.slane %v286_v30, 4  ;;  %v261_v40 = vrot.slane %v259_v32, 5  ;;  %v267_v41 = vrot.slane %v265_v33, 5  ;;  %v269_v42 = vshrl.u32 %v69_v19, 16 }
  0x18   :  { %v206_v43 = vsel %vm8059_vm2, %v201_v35, %v205_v17  ;;  %v297_v44 = vrot.slane %v296_v36, 4  ;;  %v275_v45 = vshll.u32 %v128_v31, 16  ;;  %v328_v47 = vshrl.u32 %v74_v34, 16  ;;  %v76_v36 = vld [vmem:[%s12345_s0 + $0x60] sm:$0xf] }
  0x19   :  { %v7071_v48 = vcombine.low %v196_v29, %v206_v43  ;;  %v292_v49 = vsel %vm8059_vm2, %v287_v39, %v291_v23  ;;  %v262_v50 = vor.u32 %v261_v40, %v258_v38  ;;  %v271_v51 = vrot.slane %v269_v42, 4 }
  0x1a   :  { %v302_v54 = vsel %vm8059_vm2, %v297_v44, %v301_v37  ;;  %v277_v55 = vrot.slane %v275_v45, 5  ;;  %v330_v56 = vrot.slane %v328_v47, 4  ;;  %v331_v57 = vshll.u32 %v74_v34, 16 }
  0x1b   :  { %3942 = vrot.lane.b32.xlu0 %v7071_v48, %s7999_s13  ;;  %v7075_v58 = vcombine.low %v292_v49, %v302_v54  ;;  %v263_v59 = vrot.slane %v262_v50, 4  ;;  %v272_v60 = vor.u32 %v271_v51, %v267_v41  ;;  %v337_v61 = vshll.u32 %v75_v46, 16  ;;  %v132_v49 = vld [vmem:[%s12345_s0 + $0x68] sm:$0x1] }
  0x1c   :  { %v333_v62 = vrot.slane %v331_v57, 5  ;;  %v341_v63 = vshrl.u32 %v75_v46, 16  ;;  %v347_v0 = vshll.u32 %v131_v52, 16  ;;  %v304_v2 = vshrl.u32 %v72_v53, 16 }
  0x1d   :  { %3950 = vrot.lane.b32.xlu1 %v7075_v58, %s7999_s13  ;;  %v268_v3 = vsel %vm8059_vm2, %v263_v59, %v267_v41  ;;  %v273_v4 = vrot.slane %v272_v60, 4  ;;  %v339_v5 = vrot.slane %v337_v61, 5  ;;  %v307_v7 = vshll.u32 %v72_v53, 16  ;;  %v77_v41 = vld [vmem:[%s12345_s0 + $0x64] sm:$0xf] }
  0x1e   :  { %v334_v8 = vor.u32 %v333_v62, %v330_v56  ;;  %v343_v9 = vrot.slane %v341_v63, 4  ;;  %v349_v10 = vrot.slane %v347_v0, 5  ;;  %v306_v11 = vrot.slane %v304_v2, 4  ;;  %v83_v60 = vld [vmem:[%s12345_s0 + $0x88] sm:$0xf] }
  0x1f   :  { %v278_v13 = vsel %vm8059_vm2, %v273_v4, %v277_v55  ;;  %v309_v14 = vrot.slane %v307_v7, 5  ;;  %v313_v15 = vshll.u32 %v73_v1, 16  ;;  %v317_v16 = vshrl.u32 %v73_v1, 16  ;;  %v82_v55 = vld [vmem:[%s12345_s0 + $0x84] sm:$0xf] }
  0x20   :  { %v7074_v17 = vcombine.low %v268_v3, %v278_v13  ;;  %v335_v18 = vrot.slane %v334_v8, 4  ;;  %v344_v19 = vor.u32 %v343_v9, %v339_v5  ;;  %v323_v20 = vshll.u32 %v130_v6, 16  ;;  %v135_v8 = vld [vmem:[%s12345_s0 + $0x8c] sm:$0x1] }
  0x21   :  { %v310_v22 = vor.u32 %v309_v14, %v306_v11  ;;  %v315_v23 = vrot.slane %v313_v15, 5  ;;  %v319_v24 = vrot.slane %v317_v16, 4  ;;  %v376_v27 = vshrl.u32 %v78_v12, 16  ;;  %v81_v15 = vld [vmem:[%s12345_s0 + $0x7c] sm:$0xf] }
  0x22   :  { %3948 = vrot.lane.b32.xlu0 %v7074_v17, %s7999_s13  ;;  %v340_v28 = vsel %vm8059_vm2, %v335_v18, %v339_v5  ;;  %v345_v29 = vrot.slane %v344_v19, 4  ;;  %v325_v30 = vrot.slane %v323_v20, 5  ;;  %v379_v31 = vshll.u32 %v78_v12, 16 }
  0x23   :  { %v311_v32 = vrot.slane %v310_v22, 4  ;;  %v320_v33 = vor.u32 %v319_v24, %v315_v23  ;;  %v378_v34 = vrot.slane %v376_v27, 4  ;;  %v385_v35 = vshll.u32 %v79_v21, 16  ;;  %v134_v27 = vld [vmem:[%s12345_s0 + $0x80] sm:$0x1] }
  0x24   :  { %v350_v37 = vsel %vm8059_vm2, %v345_v29, %v349_v10  ;;  %v381_v38 = vrot.slane %v379_v31, 5  ;;  %v389_v39 = vshrl.u32 %v79_v21, 16  ;;  %v395_v40 = vshll.u32 %v133_v25, 16  ;;  %v80_v10 = vld [vmem:[%s12345_s0 + $0x78] sm:$0xf] }
  0x25   :  { %v7077_v42 = vcombine.low %v340_v28, %v350_v37  ;;  %v316_v43 = vsel %vm8059_vm2, %v311_v32, %v315_v23  ;;  %v321_v44 = vrot.slane %v320_v33, 4  ;;  %v387_v45 = vrot.slane %v385_v35, 5  ;;  %v87_v35 = vld [vmem:[%s12345_s0 + $0xa0] sm:$0xf] }
  0x26   :  { %v382_v46 = vor.u32 %v381_v38, %v378_v34  ;;  %v391_v47 = vrot.slane %v389_v39, 4  ;;  %v397_v48 = vrot.slane %v395_v40, 5  ;;  %v352_v50 = vshrl.u32 %v76_v36, 16 }
  0x27   :  { %3954 = vrot.lane.b32.xlu1 %v7077_v42, %s7999_s13  ;;  %v326_v51 = vsel %vm8059_vm2, %v321_v44, %v325_v30  ;;  %v355_v52 = vshll.u32 %v76_v36, 16  ;;  %v361_v53 = vshll.u32 %v77_v41, 16  ;;  %v365_v54 = vshrl.u32 %v77_v41, 16  ;;  %v86_v30 = vld [vmem:[%s12345_s0 + $0x9c] sm:$0xf] }
  0x28   :  { %v7076_v56 = vcombine.low %v316_v43, %v326_v51  ;;  %v383_v57 = vrot.slane %v382_v46, 4  ;;  %v392_v58 = vor.u32 %v391_v47, %v387_v45  ;;  %v354_v59 = vrot.slane %v352_v50, 4  ;;  %v8208_v46 = vld [vmem:[%s12345_s0 + $0xa4] sm:$0x1] }
  0x29   :  { %v357_v61 = vrot.slane %v355_v52, 5  ;;  %v363_v62 = vrot.slane %v361_v53, 5  ;;  %v367_v63 = vrot.slane %v365_v54, 4  ;;  %v371_v0 = vshll.u32 %v132_v49, 16  ;;  %v84_v53 = vld [vmem:[%s12345_s0 + $0x90] sm:$0xf] }
  0x2a   :  { %3952 = vrot.lane.b32.xlu0 %v7076_v56, %s7999_s13  ;;  %v388_v1 = vsel %vm8059_vm2, %v383_v57, %v387_v45  ;;  %v393_v2 = vrot.slane %v392_v58, 4  ;;  %v424_v3 = vshrl.u32 %v82_v55, 16  ;;  %v427_v4 = vshll.u32 %v82_v55, 16  ;;  %v85_v58 = vld [vmem:[%s12345_s0 + $0x94] sm:$0xf] }
  0x2b   :  { %v358_v5 = vor.u32 %v357_v61, %v354_v59  ;;  %v368_v6 = vor.u32 %v367_v63, %v363_v62  ;;  %v373_v7 = vrot.slane %v371_v0, 5  ;;  %v433_v9 = vshll.u32 %v83_v60, 16 }
  0x2c   :  { %v398_v11 = vsel %vm8059_vm2, %v393_v2, %v397_v48  ;;  %v426_v12 = vrot.slane %v424_v3, 4  ;;  %v429_v13 = vrot.slane %v427_v4, 5  ;;  %v437_v14 = vshrl.u32 %v83_v60, 16 }
  0x2d   :  { %v7079_v16 = vcombine.low %v388_v1, %v398_v11  ;;  %v359_v17 = vrot.slane %v358_v5, 4  ;;  %v369_v18 = vrot.slane %v368_v6, 4  ;;  %v435_v19 = vrot.slane %v433_v9, 5  ;;  %v136_v1 = vld [vmem:[%s12345_s0 + $0x98] sm:$0x1] }
  0x2e   :  { %v430_v20 = vor.u32 %v429_v13, %v426_v12  ;;  %v439_v21 = vrot.slane %v437_v14, 4  ;;  %v443_v22 = vshll.u32 %v135_v8, 16  ;;  %v400_v23 = vshrl.u32 %v80_v10, 16  ;;  %v91_v12 = vld [vmem:[%s12345_s0 + $0xb8] sm:$0xf] }
  0x2f   :  { %3958 = vrot.lane.b32.xlu1 %v7079_v16, %s7999_s13  ;;  %v364_v24 = vsel %vm8059_vm2, %v359_v17, %v363_v62  ;;  %v374_v25 = vsel %vm8059_vm2, %v369_v18, %v373_v7  ;;  %v403_v28 = vshll.u32 %v80_v10, 16  ;;  %v409_v29 = vshll.u32 %v81_v15, 16  ;;  %v90_v7 = vld [vmem:[%s12345_s0 + $0xb4] sm:$0xf] }
  0x30   :  { %v7078_v31 = vcombine.low %v364_v24, %v374_v25  ;;  %v431_v32 = vrot.slane %v430_v20, 4  ;;  %v440_v33 = vor.u32 %v439_v21, %v435_v19  ;;  %v445_v34 = vrot.slane %v443_v22, 5 }
  0x31   :  { %v402_v36 = vrot.slane %v400_v23, 4  ;;  %v405_v37 = vrot.slane %v403_v28, 5  ;;  %v411_v38 = vrot.slane %v409_v29, 5  ;;  %v413_v39 = vshrl.u32 %v81_v15, 16  ;;  %v8241_v23 = vld [vmem:[%s12345_s0 + $0xbc] sm:$0x1] }
  0x32   :  { %3956 = vrot.lane.b32.xlu0 %v7078_v31, %s7999_s13  ;;  %v436_v40 = vsel %vm8059_vm2, %v431_v32, %v435_v19  ;;  %v441_v41 = vrot.slane %v440_v33, 4  ;;  %v419_v42 = vshll.u32 %v134_v27, 16  ;;  %v472_v43 = vshrl.u32 %v86_v30, 16  ;;  %v88_v27 = vld [vmem:[%s12345_s0 + $0xa8] sm:$0xf] }
  0x33   :  { %v406_v44 = vor.u32 %v405_v37, %v402_v36  ;;  %v415_v45 = vrot.slane %v413_v39, 4  ;;  %v475_v47 = vshll.u32 %v86_v30, 16  ;;  %v481_v48 = vshll.u32 %v87_v35, 16  ;;  %v89_v36 = vld [vmem:[%s12345_s0 + $0xac] sm:$0xf] }
  0x34   :  { %v446_v49 = vsel %vm8059_vm2, %v441_v41, %v445_v34  ;;  %v421_v50 = vrot.slane %v419_v42, 5  ;;  %v474_v51 = vrot.slane %v472_v43, 4  ;;  %v485_v52 = vshrl.u32 %v87_v35, 16  ;;  %v8256_v43 = vld [vmem:[%s12345_s0 + $0xb0] sm:$0x1] }
  0x35   :  { %v7081_v54 = vcombine.low %v436_v40, %v446_v49  ;;  %v407_v55 = vrot.slane %v406_v44, 4  ;;  %v416_v56 = vor.u32 %v415_v45, %v411_v38  ;;  %v477_v57 = vrot.slane %v475_v47, 5 }
  0x36   :  { %v483_v59 = vrot.slane %v481_v48, 5  ;;  %v487_v60 = vrot.slane %v485_v52, 4  ;;  %v491_v61 = vshll.u32 %v8208_v46, 16  ;;  %v448_v2 = vshrl.u32 %v84_v53, 16 }
  0x37   :  { %3962 = vrot.lane.b32.xlu1 %v7081_v54, %s7999_s13  ;;  %v412_v62 = vsel %vm8059_vm2, %v407_v55, %v411_v38  ;;  %v417_v63 = vrot.slane %v416_v56, 4  ;;  %v478_v0 = vor.u32 %v477_v57, %v474_v51  ;;  %v451_v5 = vshll.u32 %v84_v53, 16  ;;  %v95_v55 = vld [vmem:[%s12345_s0 + $0xe8] sm:$0xf] }
  0x38   :  { %v488_v3 = vor.u32 %v487_v60, %v483_v59  ;;  %v493_v4 = vrot.slane %v491_v61, 5  ;;  %v457_v6 = vshll.u32 %v85_v58, 16  ;;  %v450_v10 = vrot.slane %v448_v2, 4 }
  0x39   :  { %v422_v8 = vsel %vm8059_vm2, %v417_v63, %v421_v50  ;;  %v479_v9 = vrot.slane %v478_v0, 4  ;;  %v461_v11 = vshrl.u32 %v85_v58, 16  ;;  %v453_v15 = vrot.slane %v451_v5, 5  ;;  %v94_v50 = vld [vmem:[%s12345_s0 + $0xe4] sm:$0xf] }
  0x3a   :  { %v7080_v13 = vcombine.low %v412_v62, %v422_v8  ;;  %v489_v14 = vrot.slane %v488_v3, 4  ;;  %v459_v16 = vrot.slane %v457_v6, 5  ;;  %v467_v19 = vshll.u32 %v136_v1, 16  ;;  %v8273_v1 = vld [vmem:[%s12345_s0 + $0xec] sm:$0x1] }
  0x3b   :  { %v484_v17 = vsel %vm8059_vm2, %v479_v9, %v483_v59  ;;  %v463_v18 = vrot.slane %v461_v11, 4  ;;  %v520_v20 = vshrl.u32 %v90_v7, 16  ;;  %v454_v22 = vor.u32 %v453_v15, %v450_v10  ;;  %v92_v8 = vld [vmem:[%s12345_s0 + $0xd8] sm:$0xf] }
  0x3c   :  { %3960 = vrot.lane.b32.xlu0 %v7080_v13, %s7999_s13  ;;  %v494_v21 = vsel %vm8059_vm2, %v489_v14, %v493_v4  ;;  %v523_v24 = vshll.u32 %v90_v7, 16  ;;  %v529_v25 = vshll.u32 %v91_v12, 16  ;;  %v469_v30 = vrot.slane %v467_v19, 5  ;;  %v93_v13 = vld [vmem:[%s12345_s0 + $0xdc] sm:$0xf] }
  0x3d   :  { %v7083_v28 = vcombine.low %v484_v17, %v494_v21  ;;  %v464_v29 = vor.u32 %v463_v18, %v459_v16  ;;  %v522_v31 = vrot.slane %v520_v20, 4  ;;  %v455_v32 = vrot.slane %v454_v22, 4 }
  0x3e   :  { %v525_v33 = vrot.slane %v523_v24, 5  ;;  %v531_v34 = vrot.slane %v529_v25, 5  ;;  %v533_v35 = vshrl.u32 %v91_v12, 16  ;;  %v539_v38 = vshll.u32 %v8241_v23, 16  ;;  %v8290_v24 = vld [vmem:[%s12345_s0 + $0xe0] sm:$0x1] }
  0x3f   :  { %3966 = vrot.lane.b32.xlu1 %v7083_v28, %s7999_s13  ;;  %v465_v37 = vrot.slane %v464_v29, 4  ;;  %v496_v39 = vshrl.u32 %v88_v27, 16  ;;  %v460_v40 = vsel %vm8059_vm2, %v455_v32, %v459_v16  ;;  %v499_v44 = vshll.u32 %v88_v27, 16  ;;  %12366 = vst [vmem:[#allocation2_spill] sm:$0xff] %v8290_v24  ;;  %v98_v32 = vld [vmem:[%s12345_s0 + $0xfc] sm:$0xf] }
  0x40   :  { %v526_v41 = vor.u32 %v525_v33, %v522_v31  ;;  %v535_v42 = vrot.slane %v533_v35, 4  ;;  %v541_v47 = vrot.slane %v539_v38, 5  ;;  %v505_v49 = vshll.u32 %v89_v36, 16 }
  0x41   :  { %v470_v45 = vsel %vm8059_vm2, %v465_v37, %v469_v30  ;;  %v498_v48 = vrot.slane %v496_v39, 4  ;;  %v501_v54 = vrot.slane %v499_v44, 5  ;;  %v509_v57 = vshrl.u32 %v89_v36, 16  ;;  %v99_v37 = vld [vmem:[%s12345_s0 + $0x100] sm:$0xf] }
  0x42   :  { %v7082_v51 = vcombine.low %v460_v40, %v470_v45  ;;  %v527_v52 = vrot.slane %v526_v41, 4  ;;  %v536_v53 = vor.u32 %v535_v42, %v531_v34  ;;  %v507_v56 = vrot.slane %v505_v49, 5  ;;  %v143_v44 = vld [vmem:[%s12345_s0 + $0x104] sm:$0x1] }
  0x43   :  { %v515_v58 = vshll.u32 %v8256_v43, 16  ;;  %v502_v61 = vor.u32 %v501_v54, %v498_v48  ;;  %v568_v62 = vshrl.u32 %v94_v50, 16  ;;  %v511_v63 = vrot.slane %v509_v57, 4  ;;  %v97_v57 = vld [vmem:[%s12345_s0 + $0xf4] sm:$0xf] }
  0x44   :  { %3964 = vrot.lane.b32.xlu0 %v7082_v51, %s7999_s13  ;;  %v532_v59 = vsel %vm8059_vm2, %v527_v52, %v531_v34  ;;  %v537_v60 = vrot.slane %v536_v53, 4  ;;  %v571_v2 = vshll.u32 %v94_v50, 16  ;;  %v577_v3 = vshll.u32 %v95_v55, 16  ;;  %v96_v52 = vld [vmem:[%s12345_s0 + $0xf0] sm:$0xf] }
  0x45   :  { %v517_v0 = vrot.slane %v515_v58, 5  ;;  %v503_v5 = vrot.slane %v502_v61, 4  ;;  %v570_v6 = vrot.slane %v568_v62, 4  ;;  %v581_v7 = vshrl.u32 %v95_v55, 16 }
  0x46   :  { %v542_v4 = vsel %vm8059_vm2, %v537_v60, %v541_v47  ;;  %v512_v10 = vor.u32 %v511_v63, %v507_v56  ;;  %v573_v11 = vrot.slane %v571_v2, 5  ;;  %v579_v12 = vrot.slane %v577_v3, 5 }
  0x47   :  { %v7085_v9 = vcombine.low %v532_v59, %v542_v4  ;;  %v508_v14 = vsel %vm8059_vm2, %v503_v5, %v507_v56  ;;  %v583_v15 = vrot.slane %v581_v7, 4  ;;  %v587_v16 = vshll.u32 %v8273_v1, 16  ;;  %v102_v7 = vld [vmem:[%s12345_s0 + $0x114] sm:$0xf] }
  0x48   :  { %v513_v17 = vrot.slane %v512_v10, 4  ;;  %v574_v18 = vor.u32 %v573_v11, %v570_v6  ;;  %v544_v19 = vshrl.u32 %v92_v8, 16  ;;  %v547_v20 = vshll.u32 %v92_v8, 16 }
  0x49   :  { %3970 = vrot.lane.b32.xlu1 %v7085_v9, %s7999_s13  ;;  %v584_v21 = vor.u32 %v583_v15, %v579_v12  ;;  %v589_v22 = vrot.slane %v587_v16, 5  ;;  %v553_v25 = vshll.u32 %v93_v13, 16  ;;  %v557_v27 = vshrl.u32 %v93_v13, 16 }
  0x4a   :  { %v518_v28 = vsel %vm8059_vm2, %v513_v17, %v517_v0  ;;  %v575_v29 = vrot.slane %v574_v18, 4  ;;  %v546_v30 = vrot.slane %v544_v19, 4  ;;  %v549_v31 = vrot.slane %v547_v20, 5  ;;  %v142_v0 = vld [vmem:[%s12345_s0 + $0xf8] sm:$0x1] }
  0x4b   :  { %v7084_v33 = vcombine.low %v508_v14, %v518_v28  ;;  %v585_v34 = vrot.slane %v584_v21, 4  ;;  %v555_v35 = vrot.slane %v553_v25, 5  ;;  %v559_v36 = vrot.slane %v557_v27, 4 }
  0x4c   :  { %v580_v38 = vsel %vm8059_vm2, %v575_v29, %v579_v12  ;;  %v550_v39 = vor.u32 %v549_v31, %v546_v30  ;;  %v563_v40 = vshll.u32 %v8290_v24, 16  ;;  %v616_v45 = vshrl.u32 %v98_v32, 16  ;;  %v103_v12 = vld [vmem:[%s12345_s0 + $0x118] sm:$0xf] }
  0x4d   :  { %3968 = vrot.lane.b32.xlu0 %v7084_v33, %s7999_s13  ;;  %v590_v41 = vsel %vm8059_vm2, %v585_v34, %v589_v22  ;;  %v560_v42 = vor.u32 %v559_v36, %v555_v35  ;;  %v619_v47 = vshll.u32 %v98_v32, 16  ;;  %v625_v51 = vshll.u32 %v99_v37, 16  ;;  %v145_v22 = vld [vmem:[%s12345_s0 + $0x11c] sm:$0x1]  ;;  %v100_v32 = vld [vmem:[%s12345_s0 + $0x108] sm:$0xf] }
  0x4e   :  { %v7087_v48 = vcombine.low %v580_v38, %v590_v41  ;;  %v551_v49 = vrot.slane %v550_v39, 4  ;;  %v565_v50 = vrot.slane %v563_v40, 5  ;;  %v618_v54 = vrot.slane %v616_v45, 4 }
  0x4f   :  { %v561_v53 = vrot.slane %v560_v42, 4  ;;  %v621_v55 = vrot.slane %v619_v47, 5  ;;  %v629_v56 = vshrl.u32 %v99_v37, 16  ;;  %v627_v59 = vrot.slane %v625_v51, 5  ;;  %v101_v37 = vld [vmem:[%s12345_s0 + $0x10c] sm:$0xf] }
  0x50   :  { %3974 = vrot.lane.b32.xlu1 %v7087_v48, %s7999_s13  ;;  %v556_v58 = vsel %vm8059_vm2, %v551_v49, %v555_v35  ;;  %v635_v60 = vshll.u32 %v143_v44, 16  ;;  %v592_v2 = vshrl.u32 %v96_v52, 16  ;;  %v595_v5 = vshll.u32 %v96_v52, 16  ;;  %v144_v44 = vld [vmem:[%s12345_s0 + $0x110] sm:$0x1] }
  0x51   :  { %v566_v61 = vsel %vm8059_vm2, %v561_v53, %v565_v50  ;;  %v622_v62 = vor.u32 %v621_v55, %v618_v54  ;;  %v631_v63 = vrot.slane %v629_v56, 4  ;;  %v601_v6 = vshll.u32 %v97_v57, 16  ;;  %v106_v52 = vld [vmem:[%s12345_s0 + $0x12c] sm:$0xf] }
  0x52   :  { %v7086_v3 = vcombine.low %v556_v58, %v566_v61  ;;  %v637_v4 = vrot.slane %v635_v60, 5  ;;  %v594_v10 = vrot.slane %v592_v2, 4  ;;  %v605_v11 = vshrl.u32 %v97_v57, 16  ;;  %v107_v61 = vld [vmem:[%s12345_s0 + $0x130] sm:$0xf] }
  0x53   :  { %v623_v8 = vrot.slane %v622_v62, 4  ;;  %v632_v9 = vor.u32 %v631_v63, %v627_v59  ;;  %v597_v13 = vrot.slane %v595_v5, 5  ;;  %v603_v14 = vrot.slane %v601_v6, 5 }
  0x54   :  { %3972 = vrot.lane.b32.xlu0 %v7086_v3, %s7999_s13  ;;  %v611_v15 = vshll.u32 %v142_v0, 16  ;;  %v607_v18 = vrot.slane %v605_v11, 4  ;;  %v664_v19 = vshrl.u32 %v102_v7, 16  ;;  %v667_v25 = vshll.u32 %v102_v7, 16  ;;  %v8363_v0 = vld [vmem:[%s12345_s0 + $0x134] sm:$0x1] }
  0x55   :  { %v628_v16 = vsel %vm8059_vm2, %v623_v8, %v627_v59  ;;  %v633_v17 = vrot.slane %v632_v9, 4  ;;  %v598_v20 = vor.u32 %v597_v13, %v594_v10  ;;  %v673_v27 = vshll.u32 %v103_v12, 16  ;;  %12367 = vst [vmem:[#allocation3_spill] sm:$0xff] %v8363_v0  ;;  %v104_v7 = vld [vmem:[%s12345_s0 + $0x120] sm:$0xf] }
  0x56   :  { %v613_v21 = vrot.slane %v611_v15, 5  ;;  %v608_v29 = vor.u32 %v607_v18, %v603_v14  ;;  %v666_v30 = vrot.slane %v664_v19, 4  ;;  %v677_v31 = vshrl.u32 %v103_v12, 16  ;;  %v8380_v19 = vld [vmem:[%s12345_s0 + $0x128] sm:$0x1] }
  0x57   :  { %v638_v28 = vsel %vm8059_vm2, %v633_v17, %v637_v4  ;;  %v599_v34 = vrot.slane %v598_v20, 4  ;;  %v669_v35 = vrot.slane %v667_v25, 5  ;;  %v675_v36 = vrot.slane %v673_v27, 5  ;;  %12368 = vst [vmem:[#allocation4_spill] sm:$0xff] %v8380_v19 }
  0x58   :  { %v7089_v33 = vcombine.low %v628_v16, %v638_v28  ;;  %v609_v38 = vrot.slane %v608_v29, 4  ;;  %v679_v39 = vrot.slane %v677_v31, 4  ;;  %v683_v40 = vshll.u32 %v145_v22, 16  ;;  %v105_v16 = vld [vmem:[%s12345_s0 + $0x124] sm:$0xf] }
  0x59   :  { %v604_v41 = vsel %vm8059_vm2, %v599_v34, %v603_v14  ;;  %v670_v42 = vor.u32 %v669_v35, %v666_v30  ;;  %v640_v45 = vshrl.u32 %v100_v32, 16  ;;  %v643_v47 = vshll.u32 %v100_v32, 16 }
  0x5a   :  { %3978 = vrot.lane.b32.xlu1 %v7089_v33, %s7999_s13  ;;  %v614_v48 = vsel %vm8059_vm2, %v609_v38, %v613_v21  ;;  %v680_v49 = vor.u32 %v679_v39, %v675_v36  ;;  %v685_v50 = vrot.slane %v683_v40, 5  ;;  %v649_v51 = vshll.u32 %v101_v37, 16 }
  0x5b   :  { %v7088_v53 = vcombine.low %v604_v41, %v614_v48  ;;  %v671_v54 = vrot.slane %v670_v42, 4  ;;  %v642_v55 = vrot.slane %v640_v45, 4  ;;  %v645_v56 = vrot.slane %v643_v47, 5  ;;  %v8394_v42 = vld [vmem:[%s12345_s0 + $0x14c] sm:$0x1] }
  0x5c   :  { %v681_v57 = vrot.slane %v680_v49, 4  ;;  %v651_v58 = vrot.slane %v649_v51, 5  ;;  %v653_v59 = vshrl.u32 %v101_v37, 16  ;;  %v659_v60 = vshll.u32 %v144_v44, 16  ;;  %v111_v37 = vld [vmem:[%s12345_s0 + $0x148] sm:$0xf] }
  0x5d   :  { %3976 = vrot.lane.b32.xlu0 %v7088_v53, %s7999_s13  ;;  %v676_v62 = vsel %vm8059_vm2, %v671_v54, %v675_v36  ;;  %v646_v63 = vor.u32 %v645_v56, %v642_v55  ;;  %v712_v2 = vshrl.u32 %v106_v52, 16  ;;  %v715_v6 = vshll.u32 %v106_v52, 16  ;;  %v110_v36 = vld [vmem:[%s12345_s0 + $0x144] sm:$0xf]  ;;  %12369 = vst [vmem:[#allocation5_spill] sm:$0xff] %v8394_v42 }
  0x5e   :  { %v686_v3 = vsel %vm8059_vm2, %v681_v57, %v685_v50  ;;  %v655_v4 = vrot.slane %v653_v59, 4  ;;  %v661_v5 = vrot.slane %v659_v60, 5  ;;  %v721_v11 = vshll.u32 %v107_v61, 16  ;;  %v108_v56 = vld [vmem:[%s12345_s0 + $0x138] sm:$0xf] }
  0x5f   :  { %v7091_v8 = vcombine.low %v676_v62, %v686_v3  ;;  %v647_v9 = vrot.slane %v646_v63, 4  ;;  %v714_v10 = vrot.slane %v712_v2, 4  ;;  %v717_v13 = vrot.slane %v715_v6, 5  ;;  %v8411_v3 = vld [vmem:[%s12345_s0 + $0x140] sm:$0x1] }
  0x60   :  { %v656_v12 = vor.u32 %v655_v4, %v651_v58  ;;  %v725_v14 = vshrl.u32 %v107_v61, 16  ;;  %v731_v15 = vshll.u32 %v8363_v0, 16  ;;  %v723_v18 = vrot.slane %v721_v11, 5  ;;  %v109_v61 = vld [vmem:[%s12345_s0 + $0x13c] sm:$0xf]  ;;  %12370 = vst [vmem:[#allocation6_spill] sm:$0xff] %v8411_v3 }
  0x61   :  { %3982 = vrot.lane.b32.xlu1 %v7091_v8, %s7999_s13  ;;  %v652_v17 = vsel %vm8059_vm2, %v647_v9, %v651_v58  ;;  %v688_v20 = vshrl.u32 %v104_v7, 16  ;;  %v718_v22 = vor.u32 %v717_v13, %v714_v10  ;;  %v691_v29 = vshll.u32 %v104_v7, 16 }
  0x62   :  { %v657_v21 = vrot.slane %v656_v12, 4  ;;  %v727_v25 = vrot.slane %v725_v14, 4  ;;  %v733_v27 = vrot.slane %v731_v15, 5  ;;  %v697_v30 = vshll.u32 %v105_v16, 16  ;;  %v114_v12 = vld [vmem:[%s12345_s0 + $0x15c] sm:$0xf] }
  0x63   :  { %v690_v28 = vrot.slane %v688_v20, 4  ;;  %v701_v31 = vshrl.u32 %v105_v16, 16  ;;  %v719_v33 = vrot.slane %v718_v22, 4  ;;  %v707_v35 = vshll.u32 %v8380_v19, 16 }
  0x64   :  { %v662_v32 = vsel %vm8059_vm2, %v657_v21, %v661_v5  ;;  %v728_v34 = vor.u32 %v727_v25, %v723_v18  ;;  %v693_v39 = vrot.slane %v691_v29, 5  ;;  %v699_v40 = vrot.slane %v697_v30, 5  ;;  %v115_v21 = vld [vmem:[%s12345_s0 + $0x160] sm:$0xf] }
  0x65   :  { %v7090_v38 = vcombine.low %v652_v17, %v662_v32  ;;  %v703_v41 = vrot.slane %v701_v31, 4  ;;  %v724_v44 = vsel %vm8059_vm2, %v719_v33, %v723_v18  ;;  %v709_v47 = vrot.slane %v707_v35, 5 }
  0x66   :  { %v729_v45 = vrot.slane %v728_v34, 4  ;;  %v694_v48 = vor.u32 %v693_v39, %v690_v28  ;;  %v760_v50 = vshrl.u32 %v110_v36, 16  ;;  %v763_v51 = vshll.u32 %v110_v36, 16  ;;  %v8429_v28 = vld [vmem:[%s12345_s0 + $0x164] sm:$0x1] }
  0x67   :  { %3980 = vrot.lane.b32.xlu0 %v7090_v38, %s7999_s13  ;;  %v704_v49 = vor.u32 %v703_v41, %v699_v40  ;;  %v769_v53 = vshll.u32 %v111_v37, 16  ;;  %v773_v54 = vshrl.u32 %v111_v37, 16  ;;  %v779_v55 = vshll.u32 %v8394_v42, 16  ;;  %12371 = vst [vmem:[#allocation7_spill] sm:$0xff] %v8429_v28  ;;  %v112_v34 = vld [vmem:[%s12345_s0 + $0x150] sm:$0xf] }
  0x68   :  { %v734_v52 = vsel %vm8059_vm2, %v729_v45, %v733_v27  ;;  %v695_v58 = vrot.slane %v694_v48, 4  ;;  %v762_v60 = vrot.slane %v760_v50, 4  ;;  %v765_v62 = vrot.slane %v763_v51, 5  ;;  %v113_v45 = vld [vmem:[%s12345_s0 + $0x154] sm:$0xf] }
  0x69   :  { %v7093_v57 = vcombine.low %v724_v44, %v734_v52  ;;  %v705_v59 = vrot.slane %v704_v49, 4  ;;  %v771_v63 = vrot.slane %v769_v53, 5  ;;  %v775_v2 = vrot.slane %v773_v54, 4  ;;  %v8448_v54 = vld [vmem:[%s12345_s0 + $0x158] sm:$0x1] }
  0x6a   :  { %v700_v4 = vsel %vm8059_vm2, %v695_v58, %v699_v40  ;;  %v781_v6 = vrot.slane %v779_v55, 5  ;;  %v736_v7 = vshrl.u32 %v108_v56, 16  ;;  %v766_v9 = vor.u32 %v765_v62, %v762_v60  ;;  %12372 = vst [vmem:[#allocation8_spill] sm:$0xff] %v8448_v54 }
  0x6b   :  { %3986 = vrot.lane.b32.xlu1 %v7093_v57, %s7999_s13  ;;  %v710_v5 = vsel %vm8059_vm2, %v705_v59, %v709_v47  ;;  %v776_v10 = vor.u32 %v775_v2, %v771_v63  ;;  %v739_v11 = vshll.u32 %v108_v56, 16  ;;  %v745_v14 = vshll.u32 %v109_v61, 16  ;;  %v118_v59 = vld [vmem:[%s12345_s0 + $0x174] sm:$0xf]  ;;  %v119_v2 = vld [vmem:[%s12345_s0 + $0x178] sm:$0xf] }
  0x6c   :  { %v7092_v8 = vcombine.low %v700_v4, %v710_v5  ;;  %v738_v13 = vrot.slane %v736_v7, 4  ;;  %v749_v15 = vshrl.u32 %v109_v61, 16  ;;  %v755_v16 = vshll.u32 %v8411_v3, 16 }
  0x6d   :  { %v767_v17 = vrot.slane %v766_v9, 4  ;;  %v777_v18 = vrot.slane %v776_v10, 4  ;;  %v741_v20 = vrot.slane %v739_v11, 5  ;;  %v747_v22 = vrot.slane %v745_v14, 5 }
  0x6e   :  { %3984 = vrot.lane.b32.xlu0 %v7092_v8, %s7999_s13  ;;  %v751_v25 = vrot.slane %v749_v15, 4  ;;  %v757_v27 = vrot.slane %v755_v16, 5  ;;  %v808_v29 = vshrl.u32 %v114_v12, 16  ;;  %v811_v33 = vshll.u32 %v114_v12, 16 }
  0x6f   :  { %v772_v30 = vsel %vm8059_vm2, %v767_v17, %v771_v63  ;;  %v782_v31 = vsel %vm8059_vm2, %v777_v18, %v781_v6  ;;  %v742_v32 = vor.u32 %v741_v20, %v738_v13  ;;  %v817_v38 = vshll.u32 %v115_v21, 16  ;;  %v8465_v13 = vld [vmem:[%s12345_s0 + $0x17c] sm:$0x1] }
  0x70   :  { %v7095_v35 = vcombine.low %v772_v30, %v782_v31  ;;  %v752_v36 = vor.u32 %v751_v25, %v747_v22  ;;  %v810_v37 = vrot.slane %v808_v29, 4  ;;  %v813_v40 = vrot.slane %v811_v33, 5  ;;  %12373 = vst [vmem:[#allocation9_spill] sm:$0xff] %v8465_v13  ;;  %v117_v30 = vld [vmem:[%s12345_s0 + $0x16c] sm:$0xf] }
  0x71   :  { %v743_v39 = vrot.slane %v742_v32, 4  ;;  %v821_v41 = vshrl.u32 %v115_v21, 16  ;;  %v827_v44 = vshll.u32 %v8429_v28, 16  ;;  %v819_v48 = vrot.slane %v817_v38, 5  ;;  %v116_v21 = vld [vmem:[%s12345_s0 + $0x168] sm:$0xf] }
  0x72   :  { %3990 = vrot.lane.b32.xlu1 %v7095_v35, %s7999_s13  ;;  %v753_v47 = vrot.slane %v752_v36, 4  ;;  %v784_v49 = vshrl.u32 %v112_v34, 16  ;;  %v814_v51 = vor.u32 %v813_v40, %v810_v37  ;;  %v787_v57 = vshll.u32 %v112_v34, 16  ;;  %v8483_v37 = vld [vmem:[%s12345_s0 + $0x170] sm:$0x1] }
  0x73   :  { %v748_v50 = vsel %vm8059_vm2, %v743_v39, %v747_v22  ;;  %v823_v52 = vrot.slane %v821_v41, 4  ;;  %v829_v53 = vrot.slane %v827_v44, 5  ;;  %v793_v58 = vshll.u32 %v113_v45, 16  ;;  %12374 = vst [vmem:[#allocation10_spill] sm:$0xff] %v8483_v37 }
  0x74   :  { %v758_v55 = vsel %vm8059_vm2, %v753_v47, %v757_v27  ;;  %v786_v56 = vrot.slane %v784_v49, 4  ;;  %v815_v61 = vrot.slane %v814_v51, 4  ;;  %v797_v63 = vshrl.u32 %v113_v45, 16  ;;  %v122_v47 = vld [vmem:[%s12345_s0 + $0x18c] sm:$0xf] }
  0x75   :  { %v7094_v60 = vcombine.low %v748_v50, %v758_v55  ;;  %v824_v62 = vor.u32 %v823_v52, %v819_v48  ;;  %v789_v4 = vrot.slane %v787_v57, 5  ;;  %v795_v5 = vrot.slane %v793_v58, 5  ;;  %v123_v57 = vld [vmem:[%s12345_s0 + $0x190] sm:$0xf] }
  0x76   :  { %v803_v6 = vshll.u32 %v8448_v54, 16  ;;  %v820_v7 = vsel %vm8059_vm2, %v815_v61, %v819_v48  ;;  %v799_v9 = vrot.slane %v797_v63, 4  ;;  %v856_v10 = vshrl.u32 %v118_v59, 16  ;;  %v8501_v61 = vld [vmem:[%s12345_s0 + $0x194] sm:$0x1] }
  0x77   :  { %3988 = vrot.lane.b32.xlu0 %v7094_v60, %s7999_s13  ;;  %v825_v8 = vrot.slane %v824_v62, 4  ;;  %v790_v11 = vor.u32 %v789_v4, %v786_v56  ;;  %v859_v14 = vshll.u32 %v118_v59, 16  ;;  %v865_v15 = vshll.u32 %v119_v2, 16  ;;  %12375 = vst [vmem:[#allocation11_spill] sm:$0xff] %v8501_v61 }
  0x78   :  { %v805_v12 = vrot.slane %v803_v6, 5  ;;  %v800_v17 = vor.u32 %v799_v9, %v795_v5  ;;  %v858_v18 = vrot.slane %v856_v10, 4  ;;  %v869_v20 = vshrl.u32 %v119_v2, 16  ;;  %v120_v6 = vld [vmem:[%s12345_s0 + $0x180] sm:$0xf] }
  0x79   :  { %v830_v16 = vsel %vm8059_vm2, %v825_v8, %v829_v53  ;;  %v791_v25 = vrot.slane %v790_v11, 4  ;;  %v861_v27 = vrot.slane %v859_v14, 5  ;;  %v867_v29 = vrot.slane %v865_v15, 5 }
  0x7a   :  { %v7097_v22 = vcombine.low %v820_v7, %v830_v16  ;;  %v801_v32 = vrot.slane %v800_v17, 4  ;;  %v871_v33 = vrot.slane %v869_v20, 4  ;;  %v875_v34 = vshll.u32 %v8465_v13, 16  ;;  %v121_v16 = vld [vmem:[%s12345_s0 + $0x184] sm:$0xf] }
  0x7b   :  { %v796_v35 = vsel %vm8059_vm2, %v791_v25, %v795_v5  ;;  %v862_v36 = vor.u32 %v861_v27, %v858_v18  ;;  %v832_v38 = vshrl.u32 %v116_v21, 16  ;;  %v835_v39 = vshll.u32 %v116_v21, 16  ;;  %v8519_v21 = vld [vmem:[%s12345_s0 + $0x188] sm:$0x1] }
  0x7c   :  { %3994 = vrot.lane.b32.xlu1 %v7097_v22, %s7999_s13  ;;  %v806_v40 = vsel %vm8059_vm2, %v801_v32, %v805_v12  ;;  %v872_v41 = vor.u32 %v871_v33, %v867_v29  ;;  %v877_v44 = vrot.slane %v875_v34, 5  ;;  %v841_v45 = vshll.u32 %v117_v30, 16  ;;  %12376 = vst [vmem:[#allocation12_spill] sm:$0xff] %v8519_v21 }
  0x7d   :  { %v7096_v48 = vcombine.low %v796_v35, %v806_v40  ;;  %v863_v49 = vrot.slane %v862_v36, 4  ;;  %v834_v50 = vrot.slane %v832_v38, 4  ;;  %v837_v51 = vrot.slane %v835_v39, 5 }
  0x7e   :  { %v873_v52 = vrot.slane %v872_v41, 4  ;;  %v843_v53 = vrot.slane %v841_v45, 5  ;;  %v845_v55 = vshrl.u32 %v117_v30, 16  ;;  %v851_v56 = vshll.u32 %v8483_v37, 16 }
  0x7f   :  { %3992 = vrot.lane.b32.xlu0 %v7096_v48, %s7999_s13  ;;  %v868_v59 = vsel %vm8059_vm2, %v863_v49, %v867_v29  ;;  %v838_v60 = vor.u32 %v837_v51, %v834_v50  ;;  %v904_v62 = vshrl.u32 %v122_v47, 16  ;;  %v907_v5 = vshll.u32 %v122_v47, 16  ;;  %v928_v48 = vld [vmem:[%s12345_s0 + $0xc] sm:$0xe] }
  0x80   :  { %v878_v63 = vsel %vm8059_vm2, %v873_v52, %v877_v44  ;;  %v847_v2 = vrot.slane %v845_v55, 4  ;;  %v853_v4 = vrot.slane %v851_v56, 5  ;;  %v913_v10 = vshll.u32 %v123_v57, 16 }
  0x81   :  { %v7099_v7 = vcombine.low %v868_v59, %v878_v63  ;;  %v839_v8 = vrot.slane %v838_v60, 4  ;;  %v906_v9 = vrot.slane %v904_v62, 4  ;;  %v909_v12 = vrot.slane %v907_v5, 5  ;;  %v8543_v62 = vld [vmem:[%s12345_s0 + $0x10] sm:$0xf] }
  0x82   :  { %v848_v11 = vor.u32 %v847_v2, %v843_v53  ;;  %v917_v14 = vshrl.u32 %v123_v57, 16  ;;  %v923_v15 = vshll.u32 %v8501_v61, 16  ;;  %v915_v20 = vrot.slane %v913_v10, 5  ;;  %v7902_v2 = vld [vmem:[%s12345_s0 + $0x14] sm:$0x1] }
  0x83   :  { %3998 = vrot.lane.b32.xlu1 %v7099_v7, %s7999_s13  ;;  %v844_v18 = vsel %vm8059_vm2, %v839_v8, %v843_v53  ;;  %v880_v22 = vshrl.u32 %v120_v6, 16  ;;  %v910_v27 = vor.u32 %v909_v12, %v906_v9  ;;  %v883_v33 = vshll.u32 %v120_v6, 16  ;;  %v927_v53 = vld [vmem:[%s12345_s0] sm:$0xe]  ;;  %v930_v5 = vld [vmem:[%s12345_s0 + $0x24] sm:$0xe] }
  0x84   :  { %v849_v25 = vrot.slane %v848_v11, 4  ;;  %v919_v29 = vrot.slane %v917_v14, 4  ;;  %v925_v30 = vrot.slane %v923_v15, 5  ;;  %v889_v34 = vshll.u32 %v121_v16, 16  ;;  %v8557_v12 = vld [vmem:[%s12345_s0 + $0x4] sm:$0xf] }
  0x85   :  { %v882_v32 = vrot.slane %v880_v22, 4  ;;  %v893_v35 = vshrl.u32 %v121_v16, 16  ;;  %v911_v38 = vrot.slane %v910_v27, 4  ;;  %v899_v40 = vshll.u32 %v8519_v21, 16  ;;  %v7904_v15 = vld [vmem:[%s12345_s0 + $0x8] sm:$0x1] }
  0x86   :  { %v854_v36 = vsel %vm8059_vm2, %v849_v25, %v853_v4  ;;  %v920_v39 = vor.u32 %v919_v29, %v915_v20  ;;  %v885_v44 = vrot.slane %v883_v33, 5  ;;  %v891_v45 = vrot.slane %v889_v34, 5  ;;  %v8571_v25 = vld [vmem:[%s12345_s0 + $0x28] sm:$0xf]  ;;  %v929_v29 = vld [vmem:[%s12345_s0 + $0x18] sm:$0xe] }
  0x87   :  { %v7098_v41 = vcombine.low %v844_v18, %v854_v36  ;;  %v895_v47 = vrot.slane %v893_v35, 4  ;;  %v916_v50 = vsel %vm8059_vm2, %v911_v38, %v915_v20  ;;  %v901_v52 = vrot.slane %v899_v40, 5  ;;  %v932_v35 = vld [vmem:[%s12345_s0 + $0x3c] sm:$0xe]  ;;  %v7906_v40 = vld [vmem:[%s12345_s0 + $0x2c] sm:$0x1] }
  0x88   :  { %v921_v51 = vrot.slane %v920_v39, 4  ;;  %v886_v55 = vor.u32 %v885_v44, %v882_v32  ;;  %vm1056_vm4 = vcmask 1046532   ;;  %v6687_v60 = vrot.slane %v928_v48, 9  ;;  %v9109_v61 = vld [vmem:[%s12345_s0 + $0x44] sm:$0x1] }
  0x89   :  { %3996 = vrot.lane.b32.xlu0 %v7098_v41, %s7999_s13  ;;  %v896_v56 = vor.u32 %v895_v47, %v891_v45  ;;  %vm8536_vm5 = vmor %vm1055_vm3, %vm1056_vm4  ;;  %v1067_v63 = vrot.slane %v8543_v62, 5  ;;  %v1070_v4 = vrot.slane %v7902_v2, 5  ;;  %v6686_v9 = vrot.slane %v927_v53, 9  ;;  %v8595_v47 = vld [vmem:[%s12345_s0 + $0x1c] sm:$0xf] }
  0x8a   :  { %v926_v57 = vsel %vm8059_vm2, %v921_v51, %v925_v30  ;;  %v887_v7 = vrot.slane %v886_v55, 4  ;;  %v1060_v14 = vrot.slane %v8557_v12, 5  ;;  %v1063_v16 = vrot.slane %v7904_v15, 5 }
  0x8b   :  { %v7101_v6 = vcombine.low %v916_v50, %v926_v57  ;;  %v897_v8 = vrot.slane %v896_v56, 4  ;;  %v1068_v10 = vsel %vm8536_vm5, %v6687_v60, %v1067_v63  ;;  %v1069_v11 = vrot.slane %v1067_v63, 4  ;;  %v7908_v50 = vld [vmem:[%s12345_s0 + $0x20] sm:$0x1]  ;;  %v934_v63 = vld [vmem:[%s12345_s0 + $0x54] sm:$0xe] }
  0x8c   :  { %v892_v18 = vsel %vm8059_vm2, %v887_v7, %v891_v45  ;;  %v6689_v22 = vrot.slane %v930_v5, 9  ;;  %v1081_v27 = vrot.slane %v8571_v25, 5  ;;  %v1061_v33 = vsel %vm8536_vm5, %v6686_v9, %v1060_v14  ;;  %v8610_v57 = vld [vmem:[%s12345_s0 + $0x40] sm:$0xf] }
  0x8d   :  { %4002 = vrot.lane.b32.xlu1 %v7101_v6, %s7999_s13  ;;  %v902_v20 = vsel %vm8059_vm2, %v897_v8, %v901_v52  ;;  %v1071_v32 = vsel %vm8536_vm5, %v1069_v11, %v1070_v4  ;;  %v1062_v34 = vrot.slane %v1060_v14, 4  ;;  %v1084_v41 = vrot.slane %v7906_v40, 5  ;;  %v931_v52 = vld [vmem:[%s12345_s0 + $0x30] sm:$0xe]  ;;  %v7910_v6 = vld [vmem:[%s12345_s0 + $0x44] sm:$0x1] }
  0x8e   :  { %v7100_v30 = vcombine.low %v892_v18, %v902_v20  ;;  %v7103_v36 = vcombine.low %v1068_v10, %v1071_v32  ;;  %v1082_v38 = vsel %vm8536_vm5, %v6689_v22, %v1081_v27  ;;  %v1083_v39 = vrot.slane %v1081_v27, 4  ;;  %v8626_v11 = vld [vmem:[%s12345_s0 + $0x34] sm:$0xf]  ;;  %v8638_v22 = vld [vmem:[%s12345_s0 + $0x58] sm:$0xf] }
  0x8f   :  { %v1064_v44 = vsel %vm8536_vm5, %v1062_v34, %v1063_v16  ;;  %v6688_v45 = vrot.slane %v929_v29, 9  ;;  %v1074_v48 = vrot.slane %v8595_v47, 5  ;;  %v1077_v51 = vrot.slane %v7908_v50, 5  ;;  %v7912_v16 = vld [vmem:[%s12345_s0 + $0x38] sm:$0x1] }
  0x90   :  { %4000 = vrot.lane.b32.xlu0 %v7100_v30, %s7999_s13  ;;  %s8000_s13 = smov 8   ;;  %v7102_v53 = vcombine.low %v1061_v33, %v1064_v44  ;;  %v1085_v55 = vsel %vm8536_vm5, %v1083_v39, %v1084_v41  ;;  %v6691_v56 = vrot.slane %v932_v35, 9  ;;  %v1095_v60 = vrot.slane %v8610_v57, 5  ;;  %v933_v29 = vld [vmem:[%s12345_s0 + $0x48] sm:$0xe] }
  0x91   :  { %4102 = vrot.lane.b32.xlu1 %v7103_v36, %s8000_s13  ;;  %v7105_v2 = vcombine.low %v1082_v38, %v1085_v55  ;;  %v1075_v4 = vsel %vm8536_vm5, %v6688_v45, %v1074_v48  ;;  %v1076_v5 = vrot.slane %v1074_v48, 4  ;;  %v1098_v7 = vrot.slane %v7910_v6, 5  ;;  %v936_v35 = vld [vmem:[%s12345_s0 + $0x6c] sm:$0xe]  ;;  %v7914_v40 = vld [vmem:[%s12345_s0 + $0x5c] sm:$0x1] }
  0x92   :  { %v1096_v8 = vsel %vm8536_vm5, %v6691_v56, %v1095_v60  ;;  %v1097_v9 = vrot.slane %v1095_v60, 4  ;;  %v6690_v10 = vrot.slane %v931_v52, 9  ;;  %v1088_v14 = vrot.slane %v8626_v11, 5  ;;  %v8662_v48 = vld [vmem:[%s12345_s0 + $0x4c] sm:$0xf] }
  0x93   :  { %v1078_v15 = vsel %vm8536_vm5, %v1076_v5, %v1077_v51  ;;  %v1091_v18 = vrot.slane %v7912_v16, 5  ;;  %v6693_v20 = vrot.slane %v934_v63, 9  ;;  %v1109_v27 = vrot.slane %v8638_v22, 5  ;;  %v7916_v51 = vld [vmem:[%s12345_s0 + $0x50] sm:$0x1] }
  0x94   :  { %4100 = vrot.lane.b32.xlu0 %v7102_v53, %s8000_s13  ;;  %v7104_v30 = vcombine.low %v1075_v4, %v1078_v15  ;;  %v1099_v32 = vsel %vm8536_vm5, %v1097_v9, %v1098_v7  ;;  %v1089_v33 = vsel %vm8536_vm5, %v6690_v10, %v1088_v14  ;;  %v1090_v34 = vrot.slane %v1088_v14, 4  ;;  %v935_v53 = vld [vmem:[%s12345_s0 + $0x60] sm:$0xe]  ;;  %v8677_v63 = vld [vmem:[%s12345_s0 + $0x70] sm:$0xf] }
  0x95   :  { %4106 = vrot.lane.b32.xlu1 %v7105_v2, %s8000_s13  ;;  %v7107_v36 = vcombine.low %v1096_v8, %v1099_v32  ;;  %v1110_v38 = vsel %vm8536_vm5, %v6693_v20, %v1109_v27  ;;  %v1111_v39 = vrot.slane %v1109_v27, 4  ;;  %v1112_v41 = vrot.slane %v7914_v40, 5  ;;  %v938_v4 = vld [vmem:[%s12345_s0 + $0x84] sm:$0xe]  ;;  %v7918_v8 = vld [vmem:[%s12345_s0 + $0x74] sm:$0x1] }
  0x96   :  { %v1092_v44 = vsel %vm8536_vm5, %v1090_v34, %v1091_v18  ;;  %v6692_v45 = vrot.slane %v933_v29, 9  ;;  %v1102_v50 = vrot.slane %v8662_v48, 5  ;;  %v1105_v52 = vrot.slane %v7916_v51, 5  ;;  %v8694_v16 = vld [vmem:[%s12345_s0 + $0x64] sm:$0xf] }
  0x97   :  { %v7106_v55 = vcombine.low %v1089_v33, %v1092_v44  ;;  %v1113_v56 = vsel %vm8536_vm5, %v1111_v39, %v1112_v41  ;;  %v6695_v60 = vrot.slane %v936_v35, 9  ;;  %v1123_v2 = vrot.slane %v8677_v63, 5  ;;  %v7920_v27 = vld [vmem:[%s12345_s0 + $0x68] sm:$0x1]  ;;  %v937_v34 = vld [vmem:[%s12345_s0 + $0x78] sm:$0xe] }
  0x98   :  { %4104 = vrot.lane.b32.xlu0 %v7104_v30, %s8000_s13  ;;  %v7109_v5 = vcombine.low %v1110_v38, %v1113_v56  ;;  %v1103_v6 = vsel %vm8536_vm5, %v6692_v45, %v1102_v50  ;;  %v1104_v7 = vrot.slane %v1102_v50, 4  ;;  %v1126_v9 = vrot.slane %v7918_v8, 5  ;;  %v8705_v32 = vld [vmem:[%s12345_s0 + $0x88] sm:$0xf]  ;;  %v8719_v40 = vld [vmem:[%s12345_s0 + $0xc] sm:$0xf] }
  0x99   :  { %4110 = vrot.lane.b32.xlu1 %v7107_v36, %s8000_s13  ;;  %v1124_v10 = vsel %vm8536_vm5, %v6695_v60, %v1123_v2  ;;  %v1125_v14 = vrot.slane %v1123_v2, 4  ;;  %v6694_v15 = vrot.slane %v935_v53, 9  ;;  %v1116_v18 = vrot.slane %v8694_v16, 5  ;;  %v7922_v50 = vld [vmem:[%s12345_s0 + $0x8c] sm:$0x1] }
  0x9a   :  { %v1106_v20 = vsel %vm8536_vm5, %v1104_v7, %v1105_v52  ;;  %v1119_v29 = vrot.slane %v7920_v27, 5  ;;  %v6697_v30 = vrot.slane %v938_v4, 9  ;;  %v1137_v33 = vrot.slane %v8705_v32, 5  ;;  %v8730_v52 = vld [vmem:[%s12345_s0 + $0x10] sm:$0xf] }
  0x9b   :  { %v7108_v35 = vcombine.low %v1103_v6, %v1106_v20  ;;  %v1127_v36 = vsel %vm8536_vm5, %v1125_v14, %v1126_v9  ;;  %v1117_v38 = vsel %vm8536_vm5, %v6694_v15, %v1116_v18  ;;  %v1118_v39 = vrot.slane %v1116_v18, 4  ;;  %v8737_v56 = vld [vmem:[%s12345_s0 + $0x7c] sm:$0xf]  ;;  %v7924_v2 = vld [vmem:[%s12345_s0 + $0x80] sm:$0x1] }
  0x9c   :  { %4108 = vrot.lane.b32.xlu0 %v7106_v55, %s8000_s13  ;;  %v7111_v41 = vcombine.low %v1124_v10, %v1127_v36  ;;  %v1138_v44 = vsel %vm8536_vm5, %v6697_v30, %v1137_v33  ;;  %v1139_v45 = vrot.slane %v1137_v33, 4  ;;  %v1140_v51 = vrot.slane %v7922_v50, 5  ;;  %v8757_v20 = vld [vmem:[%s12345_s0 + $0x14] sm:$0x1] }
  0x9d   :  { %4114 = vrot.lane.b32.xlu1 %v7109_v5, %s8000_s13  ;;  %v1120_v53 = vsel %vm8536_vm5, %v1118_v39, %v1119_v29  ;;  %v6696_v55 = vrot.slane %v937_v34, 9  ;;  %v1130_v60 = vrot.slane %v8737_v56, 5  ;;  %v1133_v4 = vrot.slane %v7924_v2, 5  ;;  %v939_v5 = vld [vmem:[%s12345_s0 + $0x90] sm:$0xe] }
  0x9e   :  { %v7110_v6 = vcombine.low %v1117_v38, %v1120_v53  ;;  %v1141_v7 = vsel %vm8536_vm5, %v1139_v45, %v1140_v51  ;;  %v1380_v8 = vshrl.u32 %v8719_v40, 16  ;;  %v1383_v9 = vshll.u32 %v8719_v40, 16  ;;  %v8765_v34 = vld [vmem:[%s12345_s0 + $0x18] sm:$0xf]  ;;  %v8772_v36 = vld [vmem:[%s12345_s0 + $0x94] sm:$0xf] }
  0x9f   :  { %v7113_v10 = vcombine.low %v1138_v44, %v1141_v7  ;;  %v1131_v14 = vsel %vm8536_vm5, %v6696_v55, %v1130_v60  ;;  %v1132_v15 = vrot.slane %v1130_v60, 4  ;;  %v1393_v18 = vshrl.u32 %v8730_v52, 16  ;;  %v7926_v39 = vld [vmem:[%s12345_s0 + $0x98] sm:$0x1]  ;;  %v8782_v44 = vld [vmem:[%s12345_s0 + $0x1c] sm:$0xf] }
  0xa0   :  { %4112 = vrot.lane.b32.xlu0 %v7108_v35, %s8000_s13  ;;  %v1382_v27 = vrot.slane %v1380_v8, 4  ;;  %v1385_v29 = vrot.slane %v1383_v9, 5  ;;  %v7134_v30 = vcombine.low %v8719_v40, %v8730_v52  ;;  %v6698_v33 = vrot.slane %v939_v5, 9  ;;  %v6814_v5 = vld [vmem:[%s12345_s0 + $0xc] sm:$0xe] }
  0xa1   :  { %4118 = vrot.lane.b32.xlu1 %v7111_v41, %s8000_s13  ;;  %v1134_v35 = vsel %vm8536_vm5, %v1132_v15, %v1133_v4  ;;  %v1144_v38 = vrot.slane %v8772_v36, 5  ;;  %v1147_v40 = vrot.slane %v7926_v39, 5  ;;  %v1389_v41 = vshll.u32 %v8730_v52, 16 }
  0xa2   :  { %v7112_v45 = vcombine.low %v1131_v14, %v1134_v35  ;;  %v1386_v50 = vor.u32 %v1385_v29, %v1382_v27  ;;  %v1395_v51 = vrot.slane %v1393_v18, 4  ;;  %v1399_v53 = vshll.u32 %v8757_v20, 16 }
  0xa3   :  { %v1145_v55 = vsel %vm8536_vm5, %v6698_v33, %v1144_v38  ;;  %v1146_v60 = vrot.slane %v1144_v38, 4  ;;  %v1391_v2 = vrot.slane %v1389_v41, 5  ;;  %v1404_v4 = vshrl.u32 %v8765_v34, 16  ;;  %v8809_v33 = vld [vmem:[%s12345_s0 + $0x18] sm:$0xf] }
  0xa4   :  { %4116 = vrot.lane.b32.xlu0 %v7110_v6, %s8000_s13  ;;  %v1387_v7 = vrot.slane %v1386_v50, 4  ;;  %v1401_v8 = vrot.slane %v1399_v53, 5  ;;  %v1407_v9 = vshll.u32 %v8765_v34, 16  ;;  %v1417_v14 = vshrl.u32 %v8782_v44, 16  ;;  %v8795_v6 = vpop.permute.xlu1 %3944  ;;  %v8817_v53 = vpop.permute.xlu0 %3940 }
  0xa5   :  { %4122 = vrot.lane.b32.xlu1 %v7113_v10, %s8000_s13  ;;  %v1148_v15 = vsel %vm8536_vm5, %v1146_v60, %v1147_v40  ;;  %v1396_v18 = vor.u32 %v1395_v51, %v1391_v2  ;;  %v1406_v27 = vrot.slane %v1404_v4, 4  ;;  %v7135_v29 = vcombine.low %v8765_v34, %v8782_v44  ;;  %v8804_v10 = vld [vmem:[%s12345_s0 + $0x20] sm:$0x1] }
  0xa6   :  { %v7114_v35 = vcombine.low %v1145_v55, %v1148_v15  ;;  %v1392_v38 = vsel %vm8059_vm2, %v1387_v7, %v1391_v2  ;;  %v1409_v39 = vrot.slane %v1407_v9, 5  ;;  %v6846_v40 = vrot.slane %v6814_v5, 9 }
  0xa7   :  { %v1397_v41 = vrot.slane %v1396_v18, 4  ;;  %v2277_v34 = vrot.slane %v8730_v52, 5  ;;  %v2280_v50 = vrot.slane %v8757_v20, 5  ;;  %v1413_v51 = vshll.u32 %v8782_v44, 16 }
  0xa8   :  { %4120 = vrot.lane.b32.xlu0 %v7112_v45, %s8000_s13  ;;  %v1410_v55 = vor.u32 %v1409_v39, %v1406_v27  ;;  %v1419_v60 = vrot.slane %v1417_v14, 4  ;;  %v1423_v2 = vshll.u32 %v8804_v10, 16  ;;  %v8824_v45 = vld [vmem:[%s12345_s0 + $0x1c] sm:$0xf]  ;;  %v2597_v52 = vshrl.u32 %v8809_v33, 16  ;;  %v8834_v27 = vpop.permute.xlu1 %3946 }
  0xa9   :  { %4292 = vrot.lane.b32.xlu1 %v7134_v30, %s8001_s26  ;;  %v1402_v20 = vsel %vm8059_vm2, %v1397_v41, %v1401_v8  ;;  %v2278_v4 = vsel %vm8536_vm5, %v6846_v40, %v2277_v34  ;;  %v2279_v5 = vrot.slane %v2277_v34, 4  ;;  %v1415_v7 = vrot.slane %v1413_v51, 5  ;;  %v6815_v30 = vld [vmem:[%s12345_s0 + $0x18] sm:$0xe]  ;;  %v8844_v34 = vld [vmem:[%s12345_s0 + $0x20] sm:$0x1] }
  0xaa   :  { %v7166_v9 = vcombine.low %v1392_v38, %v1402_v20  ;;  %v1411_v14 = vrot.slane %v1410_v55, 4  ;;  %v1425_v15 = vrot.slane %v1423_v2, 5  ;;  %v2599_v18 = vrot.slane %v2597_v52, 4  ;;  %v8849_v38 = vld [vmem:[%s12345_s0 + $0x24] sm:$0xf] }
  0xab   :  { %v2281_v8 = vsel %vm8536_vm5, %v2279_v5, %v2280_v50  ;;  %v1420_v39 = vor.u32 %v1419_v60, %v1415_v7  ;;  %v2600_v40 = vshll.u32 %v8809_v33, 16  ;;  %v2610_v41 = vshrl.u32 %v8824_v45, 16  ;;  %v8857_v5 = vpop.permute.xlu0 %3942 }
  0xac   :  { %4124 = vrot.lane.b32.xlu0 %v7114_v35, %s8000_s13  ;;  %v7198_v50 = vcombine.low %v2278_v4, %v2281_v8  ;;  %v1416_v51 = vsel %vm8059_vm2, %v1411_v14, %v1415_v7  ;;  %v6847_v55 = vrot.slane %v6815_v30, 9  ;;  %v2284_v52 = vrot.slane %v8782_v44, 5  ;;  %v8864_v4 = vld [vmem:[%s12345_s0 + $0x28] sm:$0xf]  ;;  %v6974_v14 = vld [vmem:[%s12345_s0 + $0x18] sm:$0xe] }
  0xad   :  { %4452 = vrot.lane.b32.xlu1 %v7166_v9, %s8002_s9  ;;  %v1421_v60 = vrot.slane %v1420_v39, 4  ;;  %v2602_v2 = vrot.slane %v2600_v40, 5  ;;  %v2287_v20 = vrot.slane %v8804_v10, 5  ;;  %v2606_v49 = vshll.u32 %v8824_v45, 16 }
  0xae   :  { %v2612_v17 = vrot.slane %v2610_v41, 4  ;;  %v2616_v35 = vshll.u32 %v8844_v34, 16  ;;  %v2621_v7 = vshrl.u32 %v8849_v38, 16  ;;  %v2285_v10 = vsel %vm8536_vm5, %v6847_v55, %v2284_v52  ;;  %v8878_v41 = vpop.permute.xlu1 %3950 }
  0xaf   :  { %v1426_v44 = vsel %vm8059_vm2, %v1421_v60, %v1425_v15  ;;  %v2286_v30 = vrot.slane %v2284_v52, 4  ;;  %v2603_v9 = vor.u32 %v2602_v2, %v2599_v18  ;;  %v7230_v39 = vcombine.low %v8809_v33, %v8824_v45  ;;  %v8892_v52 = vld [vmem:[%s12345_s0 + $0x24] sm:$0xf] }
  0xb0   :  { %4294 = vrot.lane.b32.xlu0 %v7135_v29, %s8001_s26  ;;  %v7167_v8 = vcombine.low %v1416_v51, %v1426_v44  ;;  %v2608_v29 = vrot.slane %v2606_v49, 5  ;;  %v2623_v40 = vrot.slane %v2621_v7, 4  ;;  %v2624_v18 = vshll.u32 %v8849_v38, 16 }
  0xb1   :  { %4612 = vrot.lane.b32.xlu1 %v7198_v50, %s8003_s15  ;;  %v2288_v15 = vsel %vm8536_vm5, %v2286_v30, %v2287_v20  ;;  %v2604_v55 = vrot.slane %v2603_v9, 4  ;;  %v2634_v60 = vshrl.u32 %v8864_v4, 16  ;;  %v8887_v50 = vld [vmem:[%s12345_s0 + $0x2c] sm:$0x1]  ;;  %v2618_v33 = vrot.slane %v2616_v35, 5  ;;  %v8899_v9 = vpop.permute.xlu0 %3948 }
  0xb2   :  { %v7199_v51 = vcombine.low %v2285_v10, %v2288_v15  ;;  %v2613_v2 = vor.u32 %v2612_v17, %v2608_v29  ;;  %v7006_v49 = vrot.slane %v6974_v14, 9  ;;  %v2626_v7 = vrot.slane %v2624_v18, 5 }
  0xb3   :  { %v2609_v20 = vsel %vm8059_vm2, %v2604_v55, %v2608_v29  ;;  %v3494_v44 = vrot.slane %v8824_v45, 5  ;;  %v3497_v30 = vrot.slane %v8844_v34, 5  ;;  %v2630_v35 = vshll.u32 %v8864_v4, 16  ;;  %v8909_v45 = vld [vmem:[%s12345_s0 + $0x28] sm:$0xf] }
  0xb4   :  { %4454 = vrot.lane.b32.xlu0 %v7167_v8, %s8002_s9  ;;  %v2614_v17 = vrot.slane %v2613_v2, 4  ;;  %v2636_v10 = vrot.slane %v2634_v60, 4  ;;  %v2640_v14 = vshll.u32 %v8887_v50, 16  ;;  %v7231_v8 = vcombine.low %v8849_v38, %v8864_v4  ;;  %v6975_v38 = vld [vmem:[%s12345_s0 + $0x24] sm:$0xe] }
  0xb5   :  { %4804 = vrot.lane.b32.xlu1 %v7230_v39, %s8004_s20  ;;  %v3496_v29 = vrot.slane %v3494_v44, 4  ;;  %v2627_v15 = vor.u32 %v2626_v7, %v2623_v40  ;;  %v1428_v34 = vshrl.u32 %v8892_v52, 16  ;;  %v3495_v55 = vsel %vm8536_vm5, %v7006_v49, %v3494_v44  ;;  %v8920_v40 = vpop.permute.xlu1 %3954 }
  0xb6   :  { %v2619_v39 = vsel %vm8059_vm2, %v2614_v17, %v2618_v33  ;;  %v2632_v18 = vrot.slane %v2630_v35, 5  ;;  %v1431_v60 = vshll.u32 %v8892_v52, 16  ;;  %v2642_v31 = vrot.slane %v2640_v14, 5  ;;  %v8929_v35 = vld [vmem:[%s12345_s0 + $0x104] sm:$0x1] }
  0xb7   :  { %v7262_v2 = vcombine.low %v2609_v20, %v2619_v39  ;;  %v3498_v7 = vsel %vm8536_vm5, %v3496_v29, %v3497_v30  ;;  %v2628_v58 = vrot.slane %v2627_v15, 4  ;;  %v1430_v33 = vrot.slane %v1428_v34, 4  ;;  %v8934_v29 = vpop.permute.xlu0 %3952 }
  0xb8   :  { %4614 = vrot.lane.b32.xlu0 %v7199_v51, %s8003_s15  ;;  %v2637_v17 = vor.u32 %v2636_v10, %v2632_v18  ;;  %v1433_v49 = vrot.slane %v1431_v60, 5  ;;  %v1441_v44 = vshrl.u32 %v8909_v45, 16  ;;  %v7294_v51 = vcombine.low %v3495_v55, %v3498_v7  ;;  %v8939_v10 = vld [vmem:[%s12345_s0 + $0xf8] sm:$0x1]  ;;  %v8948_v55 = vld [vmem:[%s12345_s0 + $0x11c] sm:$0x1] }
  0xb9   :  { %4964 = vrot.lane.b32.xlu1 %v7262_v2, %s8005_s28  ;;  %v7007_v20 = vrot.slane %v6975_v38, 9  ;;  %v3501_v30 = vrot.slane %v8864_v4, 5  ;;  %12379 = vst [vmem:[#allocation13_spill] sm:$0xff] %v8939_v10  ;;  %v2633_v15 = vsel %vm8059_vm2, %v2628_v58, %v2632_v18  ;;  %v3504_v39 = vrot.slane %v8887_v50, 5  ;;  %12380 = vst [vmem:[#allocation14_spill] sm:$0xff] %v8948_v55 }
  0xba   :  { %v2638_v34 = vrot.slane %v2637_v17, 4  ;;  %v8955_v38 = vld [vmem:[%s12345_s0 + $0x2c] sm:$0x1]  ;;  %v1434_v2 = vor.u32 %v1433_v49, %v1430_v33  ;;  %v8960_v58 = vld [vmem:[%s12345_s0 + $0x30] sm:$0xf]  ;;  %v1443_v7 = vrot.slane %v1441_v44, 4  ;;  %v8972_v33 = vpop.permute.xlu1 %3958 }
  0xbb   :  { %v3503_v60 = vrot.slane %v3501_v30, 4  ;;  %v3502_v18 = vsel %vm8536_vm5, %v7007_v20, %v3501_v30  ;;  %v8970_v17 = vld [vmem:[%s12345_s0 + $0x34] sm:$0xf]  ;;  %v8982_v44 = vld [vmem:[%s12345_s0 + $0x110] sm:$0x1]  ;;  %v1447_v14 = vshll.u32 %v8955_v38, 16 }
  0xbc   :  { %4806 = vrot.lane.b32.xlu0 %v7231_v8, %s8004_s20  ;;  %v2643_v50 = vsel %vm8059_vm2, %v2638_v34, %v2642_v31  ;;  %v1437_v8 = vshll.u32 %v8909_v45, 16  ;;  %v7136_v31 = vcombine.low %v8892_v52, %v8909_v45  ;;  %v1435_v30 = vrot.slane %v1434_v2, 4  ;;  %12381 = vst [vmem:[#allocation15_spill] sm:$0xff] %v8982_v44  ;;  %v6816_v52 = vld [vmem:[%s12345_s0 + $0x24] sm:$0xe] }
  0xbd   :  { %5124 = vrot.lane.b32.xlu1 %v7294_v51, %s8006_s16  ;;  %v7263_v49 = vcombine.low %v2633_v15, %v2643_v50  ;;  %v3505_v20 = vsel %vm8536_vm5, %v3503_v60, %v3504_v39  ;;  %v1452_v51 = vshrl.u32 %v8960_v58, 16  ;;  %v1455_v60 = vshll.u32 %v8960_v58, 16  ;;  %v8994_v50 = vpop.permute.xlu0 %3956  ;;  %v9000_v55 = vld [vmem:[%s12345_s0 + $0x38] sm:$0x1]  ;;  %v9008_v15 = vld [vmem:[%s12345_s0 + $0x30] sm:$0xf] }
  0xbe   :  { %v1439_v4 = vrot.slane %v1437_v8, 5  ;;  %v7295_v39 = vcombine.low %v3502_v18, %v3505_v20  ;;  %v1465_v2 = vshrl.u32 %v8970_v17, 16  ;;  %v1449_v24 = vrot.slane %v1447_v14, 5  ;;  %v9013_v19 = vpop.permute.xlu1 %3962  ;;  %v9029_v10 = vld [vmem:[%s12345_s0 + $0x34] sm:$0xf] }
  0xbf   :  { %v1454_v44 = vrot.slane %v1452_v51, 4  ;;  %v6848_v20 = vrot.slane %v6816_v52, 9  ;;  %v2291_v14 = vrot.slane %v8909_v45, 5  ;;  %v2294_v51 = vrot.slane %v8955_v38, 5 }
  0xc0   :  { %4966 = vrot.lane.b32.xlu0 %v7263_v49, %s8005_s28  ;;  %v1444_v34 = vor.u32 %v1443_v7, %v1439_v4  ;;  %v1440_v18 = vsel %vm8059_vm2, %v1435_v30, %v1439_v4  ;;  %v1457_v49 = vrot.slane %v1455_v60, 5  ;;  %v1461_v8 = vshll.u32 %v8970_v17, 16  ;;  %v7856_v4 = vld [vmem:[%s12346_s1] sm:$0xff]  }
  0xc1   :  { %4296 = vrot.lane.b32.xlu1 %v7136_v31, %s8001_s26  ;;  %v7137_v31 = vcombine.low %v8960_v58, %v8970_v17  ;;  %v1467_v52 = vrot.slane %v1465_v2, 4  ;;  %v2292_v38 = vsel %vm8536_vm5, %v6848_v20, %v2291_v14  ;;  %v2293_v60 = vrot.slane %v2291_v14, 4  ;;  %7715 = vmatprep.subr.bf16.mxu0 %v7856_v4  ;;  %v6817_v14 = vld [vmem:[%s12345_s0 + $0x30] sm:$0xe] }
  0xc2   :  { %v1445_v7 = vrot.slane %v1444_v34, 4  ;;  %v1458_v30 = vor.u32 %v1457_v49, %v1454_v44  ;;  %v1471_v34 = vshll.u32 %v9000_v55, 16  ;;  %v1463_v0 = vrot.slane %v1461_v8, 5  ;;  %7785 = vmatprep.subr.bf16.mxu1 %v7856_v4  ;;  %v9033_v49 = vpop.permute.xlu0 %3960  ;;  %7716 = vmatpush3.bf16.msra.mxu0 %v7856_v4  ;;  %v9052_v58 = vpop.permute.xlu1 %3966 }
  0xc3   :  { %7788 = vmatpush3.bf16.msra.mxu1 %v7856_v4  ;;  %v2648_v4 = vshll.u32 %v9008_v15, 16  ;;  %v2658_v44 = vshrl.u32 %v9029_v10, 16  ;;  %vm5188_vm6 = vcmask 31744   ;;  %vm5285_vm7 = vcmask 64512  }
  0xc4   :  { %5126 = vrot.lane.b32.xlu0 %v7295_v39, %s8006_s16  ;;  %v1450_v45 = vsel %vm8059_vm2, %v1445_v7, %v1449_v24  ;;  %v1459_v2 = vrot.slane %v1458_v30, 4  ;;  %v2295_v24 = vsel %vm8536_vm5, %v2293_v60, %v2294_v51  ;;  %v1468_v8 = vor.u32 %v1467_v52, %v1463_v0 }
  0xc5   :  { %v7168_v39 = vcombine.low %v1440_v18, %v1450_v45  ;;  %v1473_v20 = vrot.slane %v1471_v34, 5  ;;  %v2645_v7 = vshrl.u32 %v9008_v15, 16  ;;  %v7857_v18 = vld [vmem:[%s12346_s1 + $0x8] sm:$0xff]   ;;  %v7200_v51 = vcombine.low %v2292_v38, %v2295_v24  ;;  %v9081_v45 = vld [vmem:[%s12345_s0 + $0x40] sm:$0xf] }
  0xc6   :  { %v1464_v52 = vsel %vm8059_vm2, %v1459_v2, %v1463_v0  ;;  %v1469_v34 = vrot.slane %v1468_v8, 4  ;;  %7717 = vmatprep.subr.bf16.mxu0 %v7857_v18  ;;  %7786 = vmatprep.subr.bf16.mxu1 %v7857_v18  ;;  %v2650_v30 = vrot.slane %v2648_v4, 5  ;;  %v7232_v2 = vcombine.low %v9008_v15, %v9029_v10  ;;  %v9065_v8 = vld [vmem:[%s12345_s0 + $0x38] sm:$0x1]  ;;  %v9073_v15 = vpop.permute.xlu0 %3964  ;;  %v9094_v21 = vpop.permute.xlu1 %3970 }
  0xc7   :  { %4456 = vrot.lane.b32.xlu1 %v7168_v39, %s8002_s9  ;;  %v2647_v60 = vrot.slane %v2645_v7, 4  ;;  %v6849_v39 = vrot.slane %v6817_v14, 9  ;;  %7718 = vmatpush3.bf16.msra.mxu0 %v7857_v18  ;;  %v2301_v24 = vrot.slane %v9000_v55, 5  ;;  %v2660_v38 = vrot.slane %v2658_v44, 4  ;;  %v6976_v55 = vld [vmem:[%s12345_s0 + $0x30] sm:$0xe] }
  0xc8   :  { %4298 = vrot.lane.b32.xlu0 %v7137_v31, %s8001_s26  ;;  %v2298_v31 = vrot.slane %v8970_v17, 5  ;;  %7789 = vmatpush3.bf16.msra.mxu1 %v7857_v18  ;;  %v1474_v0 = vsel %vm8059_vm2, %v1469_v34, %v1473_v20  ;;  %v6884_v17 = vld [vmem:[%s12345_s0 + $0x3c] sm:$0xf]  ;;  %v2654_v34 = vshll.u32 %v9029_v10, 16  ;;  %vm5350_vm8 = vcmask 97280  }
  0xc9   :  { %v7169_v7 = vcombine.low %v1464_v52, %v1474_v0  ;;  %v2651_v18 = vor.u32 %v2650_v30, %v2647_v60  ;;  %v2664_v60 = vshll.u32 %v9065_v8, 16  ;;  %v2672_v4 = vshll.u32 %v6884_v17, 16 }
  0xca   :  { %v2299_v20 = vsel %vm8536_vm5, %v6849_v39, %v2298_v31  ;;  %v2300_v14 = vrot.slane %v2298_v31, 4  ;;  %v2669_v39 = vshrl.u32 %v6884_v17, 16  ;;  %v2656_v0 = vrot.slane %v2654_v34, 5  ;;  %v9115_v37 = vpop.permute.xlu0 %3968 }
  0xcb   :  { %4616 = vrot.lane.b32.xlu1 %v7200_v51, %s8003_s15  ;;  %v7931_v51 = vld [vmem:[%s12345_s0 + $0x18] sm:$0xf]  ;;  %v2652_v31 = vrot.slane %v2651_v18, 4  ;;  %vm5415_vm9 = vcmask 130048   ;;  %vm5480_vm10 = vcmask 162816   ;;  %vm5545_vm11 = vcmask 195584  }
  0xcc   :  { %v7040_v30 = vcombine.low %v7931_v51, %v8595_v47  ;;  %4458 = vrot.lane.b32.xlu0 %v7169_v7, %s8002_s9  ;;  %v2302_v52 = vsel %vm8536_vm5, %v2300_v14, %v2301_v24  ;;  %v7932_v47 = vld [vmem:[%s12345_s0] sm:$0xf]  ;;  %v2671_v7 = vrot.slane %v2669_v39, 4  ;;  %v7933_v14 = vld [vmem:[%s12345_s0 + $0x24] sm:$0xf]  ;;  %v2661_v34 = vor.u32 %v2660_v38, %v2656_v0 }
  0xcd   :  { %v7201_v44 = vcombine.low %v2299_v20, %v2302_v52  ;;  %v7038_v24 = vcombine.low %v7932_v47, %v8557_v12  ;;  %v2682_v20 = vshrl.u32 %v9081_v45, 16  ;;  %v7041_v18 = vcombine.low %v7933_v14, %v8571_v25 }
  0xce   :  { %v2666_v51 = vrot.slane %v2664_v60, 5  ;;  %v2674_v52 = vrot.slane %v2672_v4, 5  ;;  %v7233_v12 = vcombine.low %v6884_v17, %v9081_v45  ;;  %v3508_v39 = vrot.slane %v9029_v10, 5 }
  0xcf   :  { %4808 = vrot.lane.b32.xlu1 %v7232_v2, %s8004_s20  ;;  %v7008_v2 = vrot.slane %v6976_v55, 9  ;;  %v3511_v47 = vrot.slane %v9065_v8, 5  ;;  %v2657_v25 = vsel %vm8059_vm2, %v2652_v31, %v2656_v0  ;;  %v2662_v38 = vrot.slane %v2661_v34, 4  ;;  %v6726_v0 = vld [vmem:[%s12345_s0 + $0x3c] sm:$0xf] }
  0xd0   :  { %4618 = vrot.lane.b32.xlu0 %v7201_v44, %s8003_s15  ;;  %v2675_v4 = vor.u32 %v2674_v52, %v2671_v7  ;;  %v2678_v60 = vshll.u32 %v9081_v45, 16  ;;  %v9122_v14 = vsel %vm5188_vm6, %v7040_v30, %v8795_v6  ;;  %v3510_v44 = vrot.slane %v3508_v39, 4  ;;  %v9132_v7 = vpop.permute.xlu1 %3974  ;;  %v7934_v30 = vld [vmem:[%s12345_s0 + $0xc] sm:$0xf]  ;;  %v9148_v52 = vld [vmem:[%s12345_s0 + $0x40] sm:$0xf] }
  0xd1   :  { %v2684_v17 = vrot.slane %v2682_v20, 4  ;;  %v2688_v55 = vshll.u32 %v9109_v61, 16  ;;  %v2667_v10 = vsel %vm8059_vm2, %v2662_v38, %v2666_v51  ;;  %v3509_v8 = vsel %vm8536_vm5, %v7008_v2, %v3508_v39 }
  0xd2   :  { %v2676_v13 = vrot.slane %v2675_v4, 4  ;;  %v2680_v31 = vrot.slane %v2678_v60, 5  ;;  %v9136_v6 = vsel %vm5188_vm6, %v7038_v24, %v8817_v53  ;;  %v7039_v20 = vcombine.low %v7934_v30, %v8543_v62  ;;  %v6977_v53 = vld [vmem:[%s12345_s0 + $0x3c] sm:$0xe]  ;;  %v9164_v60 = vpop.permute.xlu0 %3972 }
  0xd3   :  { %v7264_v34 = vcombine.low %v2657_v25, %v2667_v10  ;;  %v3512_v51 = vsel %vm8536_vm5, %v3510_v44, %v3511_v47  ;;  %v9155_v24 = vsel %vm5188_vm6, %v7041_v18, %v8834_v27  ;;  %v7935_v62 = vld [vmem:[%s12345_s0 + $0x3c] sm:$0xf]  ;;  %v2690_v39 = vrot.slane %v2688_v55, 5 }
  0xd4   :  { %4810 = vrot.lane.b32.xlu0 %v7233_v12, %s8004_s20  ;;  %v7043_v12 = vcombine.low %v7935_v62, %v8610_v57  ;;  %v2685_v2 = vor.u32 %v2684_v17, %v2680_v31  ;;  %v7296_v47 = vcombine.low %v3509_v8, %v3512_v51  ;;  %v2681_v25 = vsel %vm8059_vm2, %v2676_v13, %v2680_v31  ;;  %v6786_v13 = vld [vmem:[%s12345_s0 + $0x44] sm:$0x1]  ;;  %v7936_v31 = vld [vmem:[%s12345_s0 + $0x30] sm:$0xf] }
  0xd5   :  { %4968 = vrot.lane.b32.xlu1 %v7264_v34, %s8005_s28  ;;  %v1476_v38 = vshrl.u32 %v6726_v0, 16  ;;  %v1479_v4 = vshll.u32 %v6726_v0, 16  ;;  %v1489_v18 = vshrl.u32 %v9148_v52, 16  ;;  %v7009_v44 = vrot.slane %v6977_v53, 9  ;;  %v9187_v34 = vpop.permute.xlu1 %3978 }
  0xd6   :  { %v2686_v27 = vrot.slane %v2685_v2, 4  ;;  %v3515_v10 = vrot.slane %v9081_v45, 5  ;;  %v9170_v57 = vsel %vm5188_vm6, %v7039_v20, %v8857_v5  ;;  %v3518_v8 = vrot.slane %v9109_v61, 5  ;;  %v6728_v61 = vld [vmem:[%s12345_s0 + $0x48] sm:$0xf] }
  0xd7   :  { %v1478_v17 = vrot.slane %v1476_v38, 4  ;;  %v1481_v55 = vrot.slane %v1479_v4, 5  ;;  %v7042_v30 = vcombine.low %v7936_v31, %v8626_v11  ;;  %v7138_v53 = vcombine.low %v6726_v0, %v9148_v52 }
  0xd8   :  { %v2691_v45 = vsel %vm8059_vm2, %v2686_v27, %v2690_v39  ;;  %v3516_v5 = vsel %vm8536_vm5, %v7009_v44, %v3515_v10  ;;  %v3517_v20 = vrot.slane %v3515_v10, 4  ;;  %v1485_v11 = vshll.u32 %v9148_v52, 16  ;;  %v9201_v27 = vld [vmem:[%s12345_s0 + $0x4c] sm:$0xf]  ;;  %v7937_v10 = vld [vmem:[%s12345_s0 + $0x54] sm:$0xf] }
  0xd9   :  { %5128 = vrot.lane.b32.xlu1 %v7296_v47, %s8006_s16  ;;  %v7265_v51 = vcombine.low %v2681_v25, %v2691_v45  ;;  %v1482_v62 = vor.u32 %v1481_v55, %v1478_v17  ;;  %v9194_v2 = vsel %vm5188_vm6, %v7043_v12, %v8878_v41  ;;  %v1491_v38 = vrot.slane %v1489_v18, 4  ;;  %v6818_v41 = vld [vmem:[%s12345_s0 + $0x3c] sm:$0xe]  ;;  %v9207_v12 = vpop.permute.xlu0 %3976  ;;  %v7938_v55 = vld [vmem:[%s12345_s0 + $0x48] sm:$0xf] }
  0xda   :  { %v3519_v39 = vsel %vm8536_vm5, %v3517_v20, %v3518_v8  ;;  %v1495_v4 = vshll.u32 %v6786_v13, 16  ;;  %v1487_v25 = vrot.slane %v1485_v11, 5  ;;  %v1500_v44 = vshrl.u32 %v6728_v61, 16  ;;  %v9228_v11 = vld [vmem:[%s12345_s0 + $0x50] sm:$0x1] }
  0xdb   :  { %4970 = vrot.lane.b32.xlu0 %v7265_v51, %s8005_s28  ;;  %v7297_v0 = vcombine.low %v3516_v5, %v3519_v39  ;;  %v1483_v47 = vrot.slane %v1482_v62, 4  ;;  %v9211_v18 = vsel %vm5188_vm6, %v7042_v30, %v8899_v9  ;;  %v7045_v17 = vcombine.low %v7937_v10, %v8638_v22 }
  0xdc   :  { %v7044_v8 = vcombine.low %v7938_v55, %v8662_v48  ;;  %v1503_v31 = vshll.u32 %v6728_v61, 16  ;;  %v1492_v45 = vor.u32 %v1491_v38, %v1487_v25  ;;  %v1497_v5 = vrot.slane %v1495_v4, 5  ;;  %v9230_v48 = vpop.permute.xlu1 %3982 }
  0xdd   :  { %4300 = vrot.lane.b32.xlu1 %v7138_v53, %s8001_s26  ;;  %v1502_v20 = vrot.slane %v1500_v44, 4  ;;  %v1513_v9 = vshrl.u32 %v9201_v27, 16  ;;  %v7139_v51 = vcombine.low %v6728_v61, %v9201_v27  ;;  %v6850_v62 = vrot.slane %v6818_v41, 9 }
  0xde   :  { %v1505_v30 = vrot.slane %v1503_v31, 5  ;;  %v2305_v22 = vrot.slane %v9148_v52, 5  ;;  %v1488_v53 = vsel %vm8059_vm2, %v1483_v47, %v1487_v25  ;;  %v1493_v39 = vrot.slane %v1492_v45, 4  ;;  %v9250_v25 = vpop.permute.xlu0 %3980 }
  0xdf   :  { %5130 = vrot.lane.b32.xlu0 %v7297_v0, %s8006_s16  ;;  %v2308_v38 = vrot.slane %v6786_v13, 5  ;;  %v1509_v4 = vshll.u32 %v9201_v27, 16  ;;  %v9238_v61 = vsel %vm5188_vm6, %v7045_v17, %v8920_v40  ;;  %v1515_v55 = vrot.slane %v1513_v9, 4  ;;  %v9248_v13 = vld [vmem:[%s12345_s0 + $0x48] sm:$0xf] }
  0xe0   :  { %v2306_v52 = vsel %vm8536_vm5, %v6850_v62, %v2305_v22  ;;  %v2307_v44 = vrot.slane %v2305_v22, 4  ;;  %v1506_v41 = vor.u32 %v1505_v30, %v1502_v20  ;;  %v1498_v10 = vsel %vm8059_vm2, %v1493_v39, %v1497_v5  ;;  %v9261_v5 = vld [vmem:[%s12345_s0 + $0x4c] sm:$0xf]  ;;  %v6819_v22 = vld [vmem:[%s12345_s0 + $0x48] sm:$0xe] }
  0xe1   :  { %v1511_v0 = vrot.slane %v1509_v4, 5  ;;  %v1519_v47 = vshll.u32 %v9228_v11, 16  ;;  %v9254_v40 = vsel %vm5188_vm6, %v7044_v8, %v8934_v29  ;;  %v7170_v17 = vcombine.low %v1488_v53, %v1498_v10  ;;  %v7939_v20 = vld [vmem:[%s12345_s0 + $0x6c] sm:$0xf]  ;;  %v7940_v29 = vld [vmem:[%s12345_s0 + $0x60] sm:$0xf] }
  0xe2   :  { %v2309_v31 = vsel %vm8536_vm5, %v2307_v44, %v2308_v38  ;;  %v1507_v45 = vrot.slane %v1506_v41, 4  ;;  %v7047_v9 = vcombine.low %v7939_v20, %v8677_v63  ;;  %v7046_v8 = vcombine.low %v7940_v29, %v8694_v16  ;;  %v7941_v53 = vld [vmem:[%s12345_s0 + $0x84] sm:$0xf]  ;;  %v7942_v4 = vld [vmem:[%s12345_s0 + $0x78] sm:$0xf] }
  0xe3   :  { %4302 = vrot.lane.b32.xlu0 %v7139_v51, %s8001_s26  ;;  %v1516_v30 = vor.u32 %v1515_v55, %v1511_v0  ;;  %v1521_v62 = vrot.slane %v1519_v47, 5  ;;  %v7049_v63 = vcombine.low %v7941_v53, %v8705_v32  ;;  %4460 = vrot.lane.b32.xlu1 %v7170_v17, %s8002_s9  ;;  %v7202_v39 = vcombine.low %v2306_v52, %v2309_v31  ;;  %v9282_v51 = vpop.permute.xlu1 %3986 }
  0xe4   :  { %v2693_v38 = vshrl.u32 %v9248_v13, 16  ;;  %v2696_v16 = vshll.u32 %v9248_v13, 16  ;;  %v7048_v44 = vcombine.low %v7942_v4, %v8737_v56  ;;  %v1512_v41 = vsel %vm8059_vm2, %v1507_v45, %v1511_v0  ;;  %v9304_v45 = vld [vmem:[%s12345_s0 + $0x50] sm:$0x1] }
  0xe5   :  { %v1517_v10 = vrot.slane %v1516_v30, 4  ;;  %v2706_v32 = vshrl.u32 %v9261_v5, 16  ;;  %v6851_v47 = vrot.slane %v6819_v22, 9  ;;  %v2312_v17 = vrot.slane %v9201_v27, 5  ;;  %v9309_v27 = vld [vmem:[%s12345_s0 + $0x54] sm:$0xf] }
  0xe6   :  { %v2695_v55 = vrot.slane %v2693_v38, 4  ;;  %v2698_v52 = vrot.slane %v2696_v16, 5  ;;  %v9294_v31 = vsel %vm5188_vm6, %v7047_v9, %v8972_v33  ;;  %v7234_v56 = vcombine.low %v9248_v13, %v9261_v5  ;;  %v9311_v33 = vpop.permute.xlu0 %3984 }
  0xe7   :  { %v1522_v20 = vsel %vm8059_vm2, %v1517_v10, %v1521_v62  ;;  %v2315_v0 = vrot.slane %v9228_v11, 5  ;;  %4620 = vrot.lane.b32.xlu1 %v7202_v39, %s8003_s15  ;;  %v2313_v13 = vsel %vm8536_vm5, %v6851_v47, %v2312_v17  ;;  %v2314_v29 = vrot.slane %v2312_v17, 4  ;;  %v9328_v39 = vld [vmem:[%s12345_s0 + $0x58] sm:$0xf] }
  0xe8   :  { %v7171_v9 = vcombine.low %v1512_v41, %v1522_v20  ;;  %v2699_v11 = vor.u32 %v2698_v52, %v2695_v55  ;;  %v9318_v30 = vsel %vm5188_vm6, %v7046_v8, %v8994_v50  ;;  %v9322_v62 = vsel %vm5188_vm6, %v7049_v63, %v9013_v19  ;;  %v9339_v63 = vpop.permute.xlu1 %3990  ;;  %v7945_v52 = vld [vmem:[%s12345_s0 + $0x90] sm:$0xf] }
  0xe9   :  { %v2702_v22 = vshll.u32 %v9261_v5, 16  ;;  %v2708_v53 = vrot.slane %v2706_v32, 4  ;;  %v9332_v38 = vsel %vm5188_vm6, %v7048_v44, %v9033_v49  ;;  %v2316_v50 = vsel %vm8536_vm5, %v2314_v29, %v2315_v0  ;;  %12382 = vst [vmem:[#allocation16_spill] sm:$0xff] %v9339_v63  ;;  %v6978_v49 = vld [vmem:[%s12345_s0 + $0x48] sm:$0xe] }
  0xea   :  { %4462 = vrot.lane.b32.xlu0 %v7171_v9, %s8002_s9  ;;  %v2712_v19 = vshll.u32 %v9304_v45, 16  ;;  %v2717_v8 = vshrl.u32 %v9309_v27, 16  ;;  %v7203_v16 = vcombine.low %v2313_v13, %v2316_v50  ;;  %v2700_v4 = vrot.slane %v2699_v11, 4  ;;  %v7943_v44 = vld [vmem:[%s12345_s0 + $0x9c] sm:$0xf] }
  0xeb   :  { %v2704_v41 = vrot.slane %v2702_v22, 5  ;;  %v2720_v10 = vshll.u32 %v9309_v27, 16  ;;  %v7944_v32 = vld [vmem:[%s12345_s0 + $0xa0] sm:$0xf]  ;;  %v7050_v47 = vcombine.low %v7945_v52, %v8772_v36  ;;  %4812 = vrot.lane.b32.xlu1 %v7234_v56, %s8004_s20  ;;  %v2730_v20 = vshrl.u32 %v9328_v39, 16  ;;  %v9368_v56 = vpop.permute.xlu0 %3988 }
  0xec   :  { %v7051_v55 = vcombine.low %v7943_v44, %v7944_v32  ;;  %v2719_v17 = vrot.slane %v2717_v8, 4  ;;  %v7946_v0 = vld [vmem:[%s12345_s0 + $0xb4] sm:$0xf]  ;;  %v7947_v9 = vld [vmem:[%s12345_s0 + $0xb8] sm:$0xf]  ;;  %v2714_v11 = vrot.slane %v2712_v19, 5  ;;  %v7235_v50 = vcombine.low %v9309_v27, %v9328_v39 }
  0xed   :  { %v7053_v13 = vcombine.low %v7946_v0, %v7947_v9  ;;  %v2709_v29 = vor.u32 %v2708_v53, %v2704_v41  ;;  %v2722_v22 = vrot.slane %v2720_v10, 5  ;;  %v9366_v36 = vld [vmem:[%s12345_s0 + $0x5c] sm:$0x1]  ;;  %12383 = vst [vmem:[#allocation17_spill] sm:$0xff] %v9368_v56  ;;  %v7010_v8 = vrot.slane %v6978_v49, 9 }
  0xee   :  { %4622 = vrot.lane.b32.xlu0 %v7203_v16, %s8003_s15  ;;  %v3522_v44 = vrot.slane %v9261_v5, 5  ;;  %v3525_v32 = vrot.slane %v9304_v45, 5  ;;  %v2705_v53 = vsel %vm8059_vm2, %v2700_v4, %v2704_v41  ;;  %v2726_v52 = vshll.u32 %v9328_v39, 16  ;;  %v9383_v49 = vpop.permute.xlu1 %3994 }
  0xef   :  { %v2710_v19 = vrot.slane %v2709_v29, 4  ;;  %v2723_v10 = vor.u32 %v2722_v22, %v2719_v17  ;;  %v9380_v0 = vsel %vm5188_vm6, %v7051_v55, %v9052_v58  ;;  %v2732_v9 = vrot.slane %v2730_v20, 4  ;;  %12384 = vst [vmem:[#allocation18_spill] sm:$0xff] %v9383_v49  ;;  %v9392_v17 = vld [vmem:[%s12345_s0 + $0x54] sm:$0xf] }
  0xf0   :  { %v3524_v16 = vrot.slane %v3522_v44, 4  ;;  %v2736_v27 = vshll.u32 %v9366_v36, 16  ;;  %v3523_v45 = vsel %vm8536_vm5, %v7010_v8, %v3522_v44  ;;  %v2728_v41 = vrot.slane %v2726_v52, 5  ;;  %v7948_v55 = vld [vmem:[%s12345_s0 + $0xa8] sm:$0xf] }
  0xf1   :  { %v2715_v5 = vsel %vm8059_vm2, %v2710_v19, %v2714_v11  ;;  %v2724_v4 = vrot.slane %v2723_v10, 4  ;;  %v9396_v58 = vsel %vm5188_vm6, %v7050_v47, %v9073_v15  ;;  %v7949_v20 = vld [vmem:[%s12345_s0 + $0xac] sm:$0xf]  ;;  %v9410_v15 = vld [vmem:[%s12345_s0 + $0x58] sm:$0xf]  ;;  %v9417_v8 = vsel %vm5188_vm6, %v7053_v13, %v9094_v21  ;;  %v9425_v10 = vpop.permute.xlu0 %3992 }
  0xf2   :  { %v7052_v29 = vcombine.low %v7948_v55, %v7949_v20  ;;  %v7266_v11 = vcombine.low %v2705_v53, %v2715_v5  ;;  %4814 = vrot.lane.b32.xlu0 %v7235_v50, %s8004_s20  ;;  %v3526_v22 = vsel %vm8536_vm5, %v3524_v16, %v3525_v32  ;;  %v6979_v47 = vld [vmem:[%s12345_s0 + $0x54] sm:$0xe]  ;;  %v7950_v50 = vld [vmem:[%s12345_s0 + $0xe4] sm:$0xf]  ;;  %v7951_v44 = vld [vmem:[%s12345_s0 + $0xe8] sm:$0xf]  ;;  %v2733_v53 = vor.u32 %v2732_v9, %v2728_v41 }
  0xf3   :  { %v7055_v32 = vcombine.low %v7950_v50, %v7951_v44  ;;  %v2738_v19 = vrot.slane %v2736_v27, 5  ;;  %12385 = vst [vmem:[#allocation19_spill] sm:$0xff] %v9425_v10  ;;  %v7298_v52 = vcombine.low %v3523_v45, %v3526_v22  ;;  %v2729_v21 = vsel %vm8059_vm2, %v2724_v4, %v2728_v41  ;;  %v9442_v4 = vld [vmem:[%s12345_s0 + $0x5c] sm:$0x1]  ;;  %v7952_v22 = vld [vmem:[%s12345_s0 + $0xd8] sm:$0xf] }
  0xf4   :  { %4972 = vrot.lane.b32.xlu1 %v7266_v11, %s8005_s28  ;;  %v1524_v13 = vshrl.u32 %v9392_v17, 16  ;;  %v1527_v16 = vshll.u32 %v9392_v17, 16  ;;  %v2734_v5 = vrot.slane %v2733_v53, 4  ;;  %v1537_v55 = vshrl.u32 %v9410_v15, 16  ;;  %v9459_v44 = vld [vmem:[%s12345_s0 + $0x60] sm:$0xf] }
  0xf5   :  { %v7011_v20 = vrot.slane %v6979_v47, 9  ;;  %v3529_v50 = vrot.slane %v9328_v39, 5  ;;  %v9436_v9 = vsel %vm5188_vm6, %v7052_v29, %v9115_v37  ;;  %v3532_v45 = vrot.slane %v9366_v36, 5  ;;  %v9444_v41 = vpop.permute.xlu1 %3998  ;;  %v7953_v37 = vld [vmem:[%s12345_s0 + $0xdc] sm:$0xf] }
  0xf6   :  { %v1526_v27 = vrot.slane %v1524_v13, 4  ;;  %v1529_v11 = vrot.slane %v1527_v16, 5  ;;  %12386 = vst [vmem:[#allocation20_spill] sm:$0xff] %v9444_v41  ;;  %v7054_v39 = vcombine.low %v7952_v22, %v7953_v37  ;;  %v2739_v29 = vsel %vm8059_vm2, %v2734_v5, %v2738_v19  ;;  %v7955_v37 = vld [vmem:[%s12345_s0 + $0x100] sm:$0xf] }
  0xf7   :  { %v3530_v36 = vsel %vm8536_vm5, %v7011_v20, %v3529_v50  ;;  %v3531_v47 = vrot.slane %v3529_v50, 4  ;;  %v7267_v53 = vcombine.low %v2729_v21, %v2739_v29  ;;  %v7140_v13 = vcombine.low %v9392_v17, %v9410_v15  ;;  %v6890_v49 = vld [vmem:[%s12345_s0 + $0x60] sm:$0xf] }
  0xf8   :  { %5132 = vrot.lane.b32.xlu1 %v7298_v52, %s8006_s16  ;;  %v1530_v16 = vor.u32 %v1529_v11, %v1526_v27  ;;  %v1533_v22 = vshll.u32 %v9410_v15, 16  ;;  %v9467_v19 = vsel %vm5188_vm6, %v7055_v32, %v9132_v7  ;;  %v1539_v20 = vrot.slane %v1537_v55, 4  ;;  %v9475_v52 = vld [vmem:[%s12345_s0 + $0x64] sm:$0xf]  ;;  %v6820_v32 = vld [vmem:[%s12345_s0 + $0x54] sm:$0xe] }
  0xf9   :  { %v3533_v5 = vsel %vm8536_vm5, %v3531_v47, %v3532_v45  ;;  %v1543_v50 = vshll.u32 %v9442_v4, 16  ;;  %4974 = vrot.lane.b32.xlu0 %v7267_v53, %s8005_s28  ;;  %v1548_v7 = vshrl.u32 %v9459_v44, 16  ;;  %v9486_v55 = vsel %vm5188_vm6, %v7054_v39, %v9164_v60  ;;  %v7954_v45 = vld [vmem:[%s12345_s0 + $0xfc] sm:$0xf]  ;;  %v7957_v47 = vld [vmem:[%s12345_s0 + $0xf4] sm:$0xf] }
  0xfa   :  { %v7299_v17 = vcombine.low %v3530_v36, %v3533_v5  ;;  %v1531_v27 = vrot.slane %v1530_v16, 4  ;;  %v1535_v11 = vrot.slane %v1533_v22, 5  ;;  %v7057_v29 = vcombine.low %v7954_v45, %v7955_v37  ;;  %v7956_v36 = vld [vmem:[%s12345_s0 + $0xf0] sm:$0xf] }
  0xfb   :  { %v9477_v21 = vpop.permute.xlu0 %3996  ;;  %v7056_v53 = vcombine.low %v7956_v36, %v7957_v47  ;;  %v1551_v60 = vshll.u32 %v9459_v44, 16  ;;  %v1545_v16 = vrot.slane %v1543_v50, 5  ;;  %v1550_v22 = vrot.slane %v1548_v7, 4  ;;  %v9511_v36 = vld [vmem:[%s12345_s0 + $0x68] sm:$0x1] }
  0xfc   :  { %12387 = vst [vmem:[#allocation21_spill] sm:$0xff] %v9477_v21  ;;  %4304 = vrot.lane.b32.xlu1 %v7140_v13, %s8001_s26  ;;  %v1540_v39 = vor.u32 %v1539_v20, %v1535_v11  ;;  %v1561_v5 = vshrl.u32 %v9475_v52, 16  ;;  %v7141_v37 = vcombine.low %v9459_v44, %v9475_v52  ;;  %v6852_v41 = vrot.slane %v6820_v32, 9  ;;  %v7958_v44 = vld [vmem:[%s12345_s0 + $0x114] sm:$0xf] }
  0xfd   :  { %v1553_v45 = vrot.slane %v1551_v60, 5  ;;  %v2319_v10 = vrot.slane %v9410_v15, 5  ;;  %5134 = vrot.lane.b32.xlu0 %v7299_v17, %s8006_s16  ;;  %v1536_v13 = vsel %vm8059_vm2, %v1531_v27, %v1535_v11  ;;  %v2322_v50 = vrot.slane %v9442_v4, 5  ;;  %v7959_v15 = vld [vmem:[%s12345_s0 + $0x118] sm:$0xf] }
  0xfe   :  { %v1541_v20 = vrot.slane %v1540_v39, 4  ;;  %v1557_v7 = vshll.u32 %v9475_v52, 16  ;;  %v7059_v32 = vcombine.low %v7958_v44, %v7959_v15  ;;  %v1563_v39 = vrot.slane %v1561_v5, 4 }
  0xff   :  { %v9503_v21 = vpop.permute.xlu1 %4002  ;;  %v2320_v17 = vsel %vm8536_vm5, %v6852_v41, %v2319_v10  ;;  %v2321_v47 = vrot.slane %v2319_v10, 4  ;;  %v1554_v60 = vor.u32 %v1553_v45, %v1550_v22  ;;  %v9538_v41 = vsel %vm5188_vm6, %v7057_v29, %v9187_v34  ;;  %v7961_v34 = vld [vmem:[%s12345_s0 + $0x10c] sm:$0xf] }
 0x100   :  { %12388 = vst [vmem:[#allocation22_spill] sm:$0xff] %v9503_v21  ;;  %v1546_v4 = vsel %vm8059_vm2, %v1541_v20, %v1545_v16  ;;  %v1559_v11 = vrot.slane %v1557_v7, 5  ;;  %v1567_v21 = vshll.u32 %v9511_v36, 16  ;;  %12390 = vst [vmem:[#allocation24_spill] sm:$0xff] %v9538_v41  ;;  %v9545_v16 = vld [vmem:[%s12345_s0 + $0x64] sm:$0xf]  ;;  %v9549_v5 = vsel %vm5188_vm6, %v7056_v53, %v9207_v12 }
 0x101   :  { %v7172_v10 = vcombine.low %v1536_v13, %v1546_v4  ;;  %v2323_v22 = vsel %vm8536_vm5, %v2321_v47, %v2322_v50  ;;  %v1555_v45 = vrot.slane %v1554_v60, 4  ;;  %12391 = vst [vmem:[#allocation25_spill] sm:$0xff] %v9549_v5  ;;  %v7960_v20 = vld [vmem:[%s12345_s0 + $0x108] sm:$0xf]  ;;  %4306 = vrot.lane.b32.xlu0 %v7141_v37, %s8001_s26  ;;  %v6821_v7 = vld [vmem:[%s12345_s0 + $0x60] sm:$0xe]  ;;  %v9563_v12 = vsel %vm5188_vm6, %v7059_v32, %v9230_v48 }
 0x102   :  { %v9526_v27 = vpop.permute.xlu0 %4000  ;;  %v7058_v29 = vcombine.low %v7960_v20, %v7961_v34  ;;  %v1564_v13 = vor.u32 %v1563_v39, %v1559_v11  ;;  %v1569_v50 = vrot.slane %v1567_v21, 5  ;;  %12392 = vst [vmem:[#allocation26_spill] sm:$0xff] %v9563_v12  ;;  %v7204_v53 = vcombine.low %v2320_v17, %v2323_v22  ;;  %v7962_v37 = vld [vmem:[%s12345_s0 + $0x12c] sm:$0xf]  ;;  %v7963_v21 = vld [vmem:[%s12345_s0 + $0x130] sm:$0xf] }
 0x103   :  { %12389 = vst [vmem:[#allocation23_spill] sm:$0xff] %v9526_v27  ;;  %v9534_v56 = vpop.permute.xlu1 %4102  ;;  %4464 = vrot.lane.b32.xlu1 %v7172_v10, %s8002_s9  ;;  %v2741_v44 = vshrl.u32 %v6890_v49, 16  ;;  %v2744_v15 = vshll.u32 %v6890_v49, 16  ;;  %v7061_v60 = vcombine.low %v7962_v37, %v7963_v21  ;;  %v1560_v4 = vsel %vm8059_vm2, %v1555_v45, %v1559_v11  ;;  %v9587_v45 = vld [vmem:[%s12345_s0 + $0x68] sm:$0x1] }
 0x104   :  { %v1565_v48 = vrot.slane %v1564_v13, 4  ;;  %v2754_v32 = vshrl.u32 %v9545_v16, 16  ;;  %v6853_v22 = vrot.slane %v6821_v7, 9  ;;  %v2326_v20 = vrot.slane %v9475_v52, 5  ;;  %v6892_v52 = vld [vmem:[%s12345_s0 + $0x6c] sm:$0xf] }
 0x105   :  { %v2743_v17 = vrot.slane %v2741_v44, 4  ;;  %v2746_v10 = vrot.slane %v2744_v15, 5  ;;  %v9578_v34 = vsel %vm5188_vm6, %v7058_v29, %v9250_v25  ;;  %v7236_v37 = vcombine.low %v6890_v49, %v9545_v16  ;;  %v9598_v49 = vld [vmem:[%s12345_s0 + $0x70] sm:$0xf] }
 0x106   :  { %v4101_v47 = vpop.permute.xlu0 %4100  ;;  %12393 = vst [vmem:[#allocation27_spill] sm:$0xff] %v9578_v34  ;;  %v1570_v27 = vsel %vm8059_vm2, %v1565_v48, %v1569_v50  ;;  %v2329_v11 = vrot.slane %v9511_v36, 5  ;;  %v2327_v29 = vsel %vm8536_vm5, %v6853_v22, %v2326_v20  ;;  %v2328_v13 = vrot.slane %v2326_v20, 4 }
 0x107   :  { %v4107_v39 = vpop.permute.xlu1 %4106  ;;  %4624 = vrot.lane.b32.xlu1 %v7204_v53, %s8003_s15  ;;  %v7173_v25 = vcombine.low %v1560_v4, %v1570_v27  ;;  %v2747_v50 = vor.u32 %v2746_v10, %v2743_v17  ;;  %v9602_v7 = vsel %vm5188_vm6, %v7061_v60, %v9282_v51  ;;  %v9607_v53 = vld [vmem:[%s12345_s0 + $0x120] sm:$0xf]  ;;  %v9612_v27 = vld [vmem:[%s12345_s0 + $0x124] sm:$0xf]  ;;  %v2750_v15 = vshll.u32 %v9545_v16, 16 }
 0x108   :  { %12394 = vst [vmem:[#allocation28_spill] sm:$0xff] %v9602_v7  ;;  %v2756_v21 = vrot.slane %v2754_v32, 4  ;;  %v2330_v51 = vsel %vm8536_vm5, %v2328_v13, %v2329_v11  ;;  %v2760_v48 = vshll.u32 %v9587_v45, 16  ;;  %v2765_v17 = vshrl.u32 %v6892_v52, 16  ;;  %v6980_v32 = vld [vmem:[%s12345_s0 + $0x60] sm:$0xe] }
 0x109   :  { %4466 = vrot.lane.b32.xlu0 %v7173_v25, %s8002_s9  ;;  %v2748_v60 = vrot.slane %v2747_v50, 4  ;;  %v7205_v10 = vcombine.low %v2327_v29, %v2330_v51  ;;  %v2752_v22 = vrot.slane %v2750_v15, 5  ;;  %v2768_v20 = vshll.u32 %v6892_v52, 16 }
 0x10a   :  { %v4105_v36 = vpop.permute.xlu0 %4104  ;;  %v2778_v63 = vshrl.u32 %v9598_v49, 16  ;;  %v2762_v44 = vrot.slane %v2760_v48, 5  ;;  %v2767_v25 = vrot.slane %v2765_v17, 4  ;;  %v7237_v7 = vcombine.low %v6892_v52, %v9598_v49 }
 0x10b   :  { %v9617_v4 = vpop.permute.xlu1 %4110  ;;  %4816 = vrot.lane.b32.xlu1 %v7236_v37, %s8004_s20  ;;  %v2753_v13 = vsel %vm8059_vm2, %v2748_v60, %v2752_v22  ;;  %v2757_v29 = vor.u32 %v2756_v21, %v2752_v22  ;;  %v2770_v50 = vrot.slane %v2768_v20, 5  ;;  %v9634_v15 = vsel %vm5285_vm7, %v9170_v57, %v9534_v56  ;;  %v9639_v37 = vld [vmem:[%s12345_s0 + $0x74] sm:$0x1]  ;;  %v9654_v20 = vld [vmem:[%s12345_s0 + $0x6c] sm:$0xf] }
 0x10c   :  { %v9646_v52 = vsel %vm5285_vm7, %v9136_v6, %v4101_v47  ;;  %v7012_v21 = vrot.slane %v6980_v32, 9  ;;  %v3536_v60 = vrot.slane %v9545_v16, 5  ;;  %v3539_v48 = vrot.slane %v9587_v45, 5 }
 0x10d   :  { %4626 = vrot.lane.b32.xlu0 %v7205_v10, %s8003_s15  ;;  %v2758_v57 = vrot.slane %v2757_v29, 4  ;;  %v2771_v56 = vor.u32 %v2770_v50, %v2767_v25  ;;  %v2774_v17 = vshll.u32 %v9598_v49, 16  ;;  %v2780_v22 = vrot.slane %v2778_v63, 4  ;;  %v9674_v50 = vld [vmem:[%s12345_s0 + $0x70] sm:$0xf] }
 0x10e   :  { %v4109_v11 = vpop.permute.xlu0 %4108  ;;  %v3537_v10 = vsel %vm8536_vm5, %v7012_v21, %v3536_v60  ;;  %v3538_v6 = vrot.slane %v3536_v60, 4  ;;  %v2784_v47 = vshll.u32 %v9639_v37, 16  ;;  %v9661_v16 = vsel %vm5285_vm7, %v9155_v24, %v4107_v39  ;;  %v6981_v24 = vld [vmem:[%s12345_s0 + $0x6c] sm:$0xe] }
 0x10f   :  { %v9641_v51 = vpop.permute.xlu1 %4114  ;;  %v2763_v63 = vsel %vm8059_vm2, %v2758_v57, %v2762_v44  ;;  %v2772_v32 = vrot.slane %v2771_v56, 4  ;;  %v2776_v25 = vrot.slane %v2774_v17, 5  ;;  %v9669_v29 = vsel %vm5285_vm7, %v9122_v14, %v4105_v36 }
 0x110   :  { %v7268_v21 = vcombine.low %v2753_v13, %v2763_v63  ;;  %v3540_v44 = vsel %vm8536_vm5, %v3538_v6, %v3539_v48  ;;  %v2786_v60 = vrot.slane %v2784_v47, 5  ;;  %v1572_v14 = vshrl.u32 %v9654_v20, 16  ;;  %v9695_v48 = vld [vmem:[%s12345_s0 + $0x74] sm:$0x1] }
 0x111   :  { %4818 = vrot.lane.b32.xlu0 %v7237_v7, %s8004_s20  ;;  %v7300_v36 = vcombine.low %v3537_v10, %v3540_v44  ;;  %v2777_v57 = vsel %vm8059_vm2, %v2772_v32, %v2776_v25  ;;  %v2781_v56 = vor.u32 %v2780_v22, %v2776_v25  ;;  %v1575_v17 = vshll.u32 %v9654_v20, 16  ;;  %v9704_v25 = vld [vmem:[%s12345_s0 + $0x78] sm:$0xf] }
 0x112   :  { %v9663_v45 = vpop.permute.xlu0 %4112  ;;  %4976 = vrot.lane.b32.xlu1 %v7268_v21, %s8005_s28  ;;  %v1574_v34 = vrot.slane %v1572_v14, 4  ;;  %v1585_v13 = vshrl.u32 %v9674_v50, 16  ;;  %v7142_v7 = vcombine.low %v9654_v20, %v9674_v50  ;;  %v7013_v63 = vrot.slane %v6981_v24, 9 }
 0x113   :  { %v9679_v39 = vpop.permute.xlu1 %4118  ;;  %v2782_v6 = vrot.slane %v2781_v56, 4  ;;  %v1577_v22 = vrot.slane %v1575_v17, 5  ;;  %v3543_v47 = vrot.slane %v9598_v49, 5  ;;  %v3546_v32 = vrot.slane %v9639_v37, 5  ;;  %v9721_v37 = vld [vmem:[%s12345_s0 + $0x7c] sm:$0xf] }
 0x114   :  { %v9711_v24 = vsel %vm5285_vm7, %v9194_v2, %v9617_v4  ;;  %v9715_v21 = vsel %vm5285_vm7, %v9211_v18, %v4109_v11  ;;  %v1581_v49 = vshll.u32 %v9674_v50, 16  ;;  %v1587_v44 = vrot.slane %v1585_v13, 4 }
 0x115   :  { %v2787_v14 = vsel %vm8059_vm2, %v2782_v6, %v2786_v60  ;;  %v3544_v56 = vsel %vm8536_vm5, %v7013_v63, %v3543_v47  ;;  %v3545_v2 = vrot.slane %v3543_v47, 4  ;;  %v1578_v4 = vor.u32 %v1577_v22, %v1574_v34  ;;  %v6822_v34 = vld [vmem:[%s12345_s0 + $0x6c] sm:$0xe] }
 0x116   :  { %v9697_v10 = vpop.permute.xlu0 %4116  ;;  %5136 = vrot.lane.b32.xlu1 %v7300_v36, %s8006_s16  ;;  %v7269_v18 = vcombine.low %v2777_v57, %v2787_v14  ;;  %v1583_v11 = vrot.slane %v1581_v49, 5  ;;  %v1591_v17 = vshll.u32 %v9695_v48, 16  ;;  %v1596_v13 = vshrl.u32 %v9704_v25, 16 }
 0x117   :  { %v9706_v20 = vpop.permute.xlu1 %4122  ;;  %v3547_v54 = vsel %vm8536_vm5, %v3545_v2, %v3546_v32  ;;  %v1579_v5 = vrot.slane %v1578_v4, 4  ;;  %v1599_v60 = vshll.u32 %v9704_v25, 16  ;;  %v1609_v63 = vshrl.u32 %v9721_v37, 16  ;;  %v6791_v4 = vld [vmem:[%s12345_s0 + $0x80] sm:$0x1] }
 0x118   :  { %4978 = vrot.lane.b32.xlu0 %v7269_v18, %s8005_s28  ;;  %v7301_v57 = vcombine.low %v3544_v56, %v3547_v54  ;;  %v1588_v6 = vor.u32 %v1587_v44, %v1583_v11  ;;  %v1593_v22 = vrot.slane %v1591_v17, 5  ;;  %v1598_v47 = vrot.slane %v1596_v13, 4 }
 0x119   :  { %v1584_v32 = vsel %vm8059_vm2, %v1579_v5, %v1583_v11  ;;  %v1601_v49 = vrot.slane %v1599_v60, 5  ;;  %v2340_v14 = vrot.slane %v9721_v37, 5  ;;  %v7143_v2 = vcombine.low %v9704_v25, %v9721_v37 }
 0x11a   :  { %v9730_v12 = vpop.permute.xlu0 %4120  ;;  %4308 = vrot.lane.b32.xlu1 %v7142_v7, %s8001_s26  ;;  %v1589_v18 = vrot.slane %v1588_v6, 4  ;;  %v9754_v54 = vsel %vm5285_vm7, %v9238_v61, %v9641_v51  ;;  %v9759_v5 = vsel %vm5285_vm7, %v9254_v40, %v9663_v45  ;;  %v6854_v44 = vrot.slane %v6822_v34, 9  ;;  %v6894_v61 = vld [vmem:[%s12345_s0 + $0x78] sm:$0xf] }
 0x11b   :  { %v9739_v36 = vpop.permute.xlu1 %4292  ;;  %v2333_v25 = vrot.slane %v9674_v50, 5  ;;  %v2336_v11 = vrot.slane %v9695_v48, 5  ;;  %v1602_v17 = vor.u32 %v1601_v49, %v1598_v47  ;;  %v1605_v7 = vshll.u32 %v9721_v37, 16  ;;  %v9777_v50 = vld [vmem:[%s12345_s0 + $0x7c] sm:$0xf] }
 0x11c   :  { %5138 = vrot.lane.b32.xlu0 %v7301_v57, %s8006_s16  ;;  %v1594_v40 = vsel %vm8059_vm2, %v1589_v18, %v1593_v22  ;;  %v1611_v45 = vrot.slane %v1609_v63, 4  ;;  %v1615_v13 = vshll.u32 %v6791_v4, 16  ;;  %v2343_v60 = vrot.slane %v6791_v4, 5  ;;  %v6823_v22 = vld [vmem:[%s12345_s0 + $0x78] sm:$0xe] }
 0x11d   :  { %v7174_v48 = vcombine.low %v1584_v32, %v1594_v40  ;;  %v2334_v37 = vsel %vm8536_vm5, %v6854_v44, %v2333_v25  ;;  %v2335_v34 = vrot.slane %v2333_v25, 4  ;;  %v1603_v6 = vrot.slane %v1602_v17, 4 }
 0x11e   :  { %v9761_v56 = vpop.permute.xlu0 %4124  ;;  %v1607_v47 = vrot.slane %v1605_v7, 5  ;;  %v1617_v49 = vrot.slane %v1615_v13, 5  ;;  %v9784_v57 = vsel %vm5285_vm7, %v9294_v31, %v9679_v39  ;;  %v9789_v63 = vsel %vm5285_vm7, %v9318_v30, %v9697_v10 }
 0x11f   :  { %v9769_v51 = vpop.permute.xlu1 %4452  ;;  %4468 = vrot.lane.b32.xlu1 %v7174_v48, %s8002_s9  ;;  %v2337_v4 = vsel %vm8536_vm5, %v2335_v34, %v2336_v11  ;;  %v2789_v18 = vshrl.u32 %v6894_v61, 16  ;;  %v2792_v44 = vshll.u32 %v6894_v61, 16  ;;  %v2802_v31 = vshrl.u32 %v9777_v50, 16  ;;  %v9809_v11 = vld [vmem:[%s12345_s0 + $0x80] sm:$0x1] }
 0x120   :  { %4310 = vrot.lane.b32.xlu0 %v7143_v2, %s8001_s26  ;;  %v7206_v30 = vcombine.low %v2334_v37, %v2337_v4  ;;  %v1608_v10 = vsel %vm8059_vm2, %v1603_v6, %v1607_v47  ;;  %v1612_v25 = vor.u32 %v1611_v45, %v1607_v47  ;;  %v7238_v17 = vcombine.low %v6894_v61, %v9777_v50  ;;  %v9825_v37 = vld [vmem:[%s12345_s0 + $0x84] sm:$0xf] }
 0x121   :  { %v2791_v7 = vrot.slane %v2789_v18, 4  ;;  %v2794_v40 = vrot.slane %v2792_v44, 5  ;;  %v6855_v13 = vrot.slane %v6823_v22, 9  ;;  %v2342_v48 = vrot.slane %v2340_v14, 4 }
 0x122   :  { %v9794_v32 = vpop.permute.xlu0 %4294  ;;  %v1613_v34 = vrot.slane %v1612_v25, 4  ;;  %v9814_v2 = vsel %vm5285_vm7, %v9322_v62, %v9706_v20  ;;  %v9819_v45 = vsel %vm5285_vm7, %v9332_v38, %v9730_v12  ;;  %v2798_v61 = vshll.u32 %v9777_v50, 16  ;;  %v9837_v12 = vld [vmem:[%s12345_s0 + $0x88] sm:$0xf] }
 0x123   :  { %v9800_v39 = vpop.permute.xlu1 %4612  ;;  %4628 = vrot.lane.b32.xlu1 %v7206_v30, %s8003_s15  ;;  %v2341_v62 = vsel %vm8536_vm5, %v6855_v13, %v2340_v14  ;;  %v2344_v20 = vsel %vm8536_vm5, %v2342_v48, %v2343_v60  ;;  %v2795_v47 = vor.u32 %v2794_v40, %v2791_v7  ;;  %v2804_v38 = vrot.slane %v2802_v31, 4  ;;  %v6982_v7 = vld [vmem:[%s12345_s0 + $0x78] sm:$0xe] }
 0x124   :  { %v1618_v4 = vsel %vm8059_vm2, %v1613_v34, %v1617_v49  ;;  %v7207_v18 = vcombine.low %v2341_v62, %v2344_v20  ;;  %v2800_v44 = vrot.slane %v2798_v61, 5  ;;  %v2808_v30 = vshll.u32 %v9809_v11, 16  ;;  %v9861_v20 = vld [vmem:[%s12345_s0 + $0x8c] sm:$0x1] }
 0x125   :  { %v7175_v14 = vcombine.low %v1608_v10, %v1618_v4  ;;  %v2796_v25 = vrot.slane %v2795_v47, 4  ;;  %v2813_v60 = vshrl.u32 %v9825_v37, 16  ;;  %v2816_v31 = vshll.u32 %v9825_v37, 16 }
 0x126   :  { %v9827_v6 = vpop.permute.xlu0 %4454  ;;  %v2805_v40 = vor.u32 %v2804_v38, %v2800_v44  ;;  %v2810_v13 = vrot.slane %v2808_v30, 5  ;;  %v2826_v48 = vshrl.u32 %v9837_v12, 16  ;;  %v7239_v49 = vcombine.low %v9825_v37, %v9837_v12 }
 0x127   :  { %v9839_v22 = vpop.permute.xlu1 %4804  ;;  %4470 = vrot.lane.b32.xlu0 %v7175_v14, %s8002_s9  ;;  %4820 = vrot.lane.b32.xlu1 %v7238_v17, %s8004_s20  ;;  %v2801_v10 = vsel %vm8059_vm2, %v2796_v25, %v2800_v44  ;;  %v2815_v61 = vrot.slane %v2813_v60, 4  ;;  %v2818_v62 = vrot.slane %v2816_v31, 5  ;;  %v5352_v37 = vsel %vm5350_vm8, %v9646_v52, %v9739_v36  ;;  %v6738_v60 = vld [vmem:[%s12345_s0 + $0x84] sm:$0xf] }
 0x128   :  { %v2806_v47 = vrot.slane %v2805_v40, 4  ;;  %v9869_v17 = vsel %vm5285_vm7, %v9396_v58, %v9761_v56  ;;  %v7014_v38 = vrot.slane %v6982_v7, 9  ;;  %v3550_v44 = vrot.slane %v9777_v50, 5  ;;  %v9885_v56 = vld [vmem:[%s12345_s0 + $0x88] sm:$0xf] }
 0x129   :  { %v3553_v30 = vrot.slane %v9809_v11, 5  ;;  %v2819_v14 = vor.u32 %v2818_v62, %v2815_v61  ;;  %v2822_v25 = vshll.u32 %v9837_v12, 16  ;;  %v2828_v36 = vrot.slane %v2826_v48, 4 }
 0x12a   :  { %v9852_v34 = vpop.permute.xlu0 %4614  ;;  %v2811_v52 = vsel %vm8059_vm2, %v2806_v47, %v2810_v13  ;;  %v2832_v58 = vshll.u32 %v9861_v20, 16  ;;  %v3551_v31 = vsel %vm8536_vm5, %v7014_v38, %v3550_v44  ;;  %v3552_v7 = vrot.slane %v3550_v44, 4  ;;  %v6983_v47 = vld [vmem:[%s12345_s0 + $0x84] sm:$0xe] }
 0x12b   :  { %v9871_v4 = vpop.permute.xlu1 %4964  ;;  %4630 = vrot.lane.b32.xlu0 %v7207_v18, %s8003_s15  ;;  %v7270_v11 = vcombine.low %v2801_v10, %v2811_v52  ;;  %v2820_v40 = vrot.slane %v2819_v14, 4  ;;  %v2824_v13 = vrot.slane %v2822_v25, 5  ;;  %v5417_v61 = vsel %vm5415_vm9, %v5352_v37, %v9769_v51 }
 0x12c   :  { %v2834_v48 = vrot.slane %v2832_v58, 5  ;;  %v5354_v62 = vsel %vm5350_vm8, %v9634_v15, %v9794_v32  ;;  %v3554_v10 = vsel %vm8536_vm5, %v3552_v7, %v3553_v30  ;;  %v1620_v38 = vshrl.u32 %v6738_v60, 16  ;;  %v9916_v7 = vld [vmem:[%s12345_s0 + $0x8c] sm:$0x1] }
 0x12d   :  { %4980 = vrot.lane.b32.xlu1 %v7270_v11, %s8005_s28  ;;  %v1623_v44 = vshll.u32 %v6738_v60, 16  ;;  %v1633_v14 = vshrl.u32 %v9885_v56, 16  ;;  %v7302_v51 = vcombine.low %v3551_v31, %v3554_v10  ;;  %v2825_v37 = vsel %vm8059_vm2, %v2820_v40, %v2824_v13 }
 0x12e   :  { %v9887_v50 = vpop.permute.xlu0 %4806  ;;  %v2829_v15 = vor.u32 %v2828_v36, %v2824_v13  ;;  %v7144_v32 = vcombine.low %v6738_v60, %v9885_v56  ;;  %v1622_v52 = vrot.slane %v1620_v38, 4  ;;  %v7015_v11 = vrot.slane %v6983_v47, 9 }
 0x12f   :  { %v9900_v18 = vpop.permute.xlu1 %5124  ;;  %4822 = vrot.lane.b32.xlu0 %v7239_v49, %s8004_s20  ;;  %v1625_v58 = vrot.slane %v1623_v44, 5  ;;  %v3557_v30 = vrot.slane %v9837_v12, 5  ;;  %v3560_v40 = vrot.slane %v9861_v20, 5  ;;  %v5419_v60 = vsel %vm5415_vm9, %v5354_v62, %v9827_v6  ;;  %v9924_v49 = vld [vmem:[%s12345_s0 + $0x90] sm:$0xf] }
 0x130   :  { %v2830_v31 = vrot.slane %v2829_v15, 4  ;;  %v5482_v20 = vsel %vm5480_vm10, %v5417_v61, %v9800_v39  ;;  %v1629_v62 = vshll.u32 %v9885_v56, 16  ;;  %v1635_v10 = vrot.slane %v1633_v14, 4  ;;  %v9940_v44 = vld [vmem:[%s12345_s0 + $0x94] sm:$0xf] }
 0x131   :  { %5140 = vrot.lane.b32.xlu1 %v7302_v51, %s8006_s16  ;;  %v3558_v12 = vsel %vm8536_vm5, %v7015_v11, %v3557_v30  ;;  %v3559_v13 = vrot.slane %v3557_v30, 4  ;;  %v1626_v47 = vor.u32 %v1625_v58, %v1622_v52  ;;  %v1639_v38 = vshll.u32 %v9916_v7, 16  ;;  %v6824_v30 = vld [vmem:[%s12345_s0 + $0x84] sm:$0xe] }
 0x132   :  { %v9909_v25 = vpop.permute.xlu0 %4966  ;;  %v2835_v6 = vsel %vm8059_vm2, %v2830_v31, %v2834_v48  ;;  %v1644_v52 = vshrl.u32 %v9924_v49, 16  ;;  %v1631_v58 = vrot.slane %v1629_v62, 5  ;;  %v1647_v14 = vshll.u32 %v9924_v49, 16  ;;  %v9963_v62 = vld [vmem:[%s12345_s0 + $0x98] sm:$0x1] }
 0x133   :  { %v9926_v36 = vpop.permute.xlu1 %4296  ;;  %v7271_v15 = vcombine.low %v2825_v37, %v2835_v6  ;;  %v3561_v39 = vsel %vm8536_vm5, %v3559_v13, %v3560_v40  ;;  %v1627_v61 = vrot.slane %v1626_v47, 4  ;;  %v1641_v11 = vrot.slane %v1639_v38, 5 }
 0x134   :  { %v7303_v48 = vcombine.low %v3558_v12, %v3561_v39  ;;  %v1646_v37 = vrot.slane %v1644_v52, 4  ;;  %v1657_v31 = vshrl.u32 %v9940_v44, 16  ;;  %v7145_v40 = vcombine.low %v9924_v49, %v9940_v44 }
 0x135   :  { %4982 = vrot.lane.b32.xlu0 %v7271_v15, %s8005_s28  ;;  %4312 = vrot.lane.b32.xlu1 %v7144_v32, %s8001_s26  ;;  %v1632_v12 = vsel %vm8059_vm2, %v1627_v61, %v1631_v58  ;;  %v1636_v13 = vor.u32 %v1635_v10, %v1631_v58  ;;  %v1649_v47 = vrot.slane %v1647_v14, 5  ;;  %v5547_v6 = vsel %vm5545_vm11, %v5482_v20, %v9839_v22 }
 0x136   :  { %v9942_v51 = vpop.permute.xlu0 %5126  ;;  %v5484_v49 = vsel %vm5480_vm10, %v5419_v60, %v9852_v34  ;;  %v6856_v15 = vrot.slane %v6824_v30, 9  ;;  %v2347_v39 = vrot.slane %v9885_v56, 5  ;;  %v2350_v10 = vrot.slane %v9916_v7, 5  ;;  %v6898_v34 = vld [vmem:[%s12345_s0 + $0x90] sm:$0xf] }
 0x137   :  { %v1637_v61 = vrot.slane %v1636_v13, 4  ;;  %v1650_v52 = vor.u32 %v1649_v47, %v1646_v37  ;;  %v1653_v22 = vshll.u32 %v9940_v44, 16  ;;  %v1659_v20 = vrot.slane %v1657_v31, 4  ;;  %v6825_v37 = vld [vmem:[%s12345_s0 + $0x90] sm:$0xe] }
 0x138   :  { %v2348_v58 = vsel %vm8536_vm5, %v6856_v15, %v2347_v39  ;;  %v2349_v14 = vrot.slane %v2347_v39, 4  ;;  %v1663_v28 = vshll.u32 %v9963_v62, 16  ;;  %vm5610_vm12 = vcmask 228352  }
 0x139   :  { %v9965_v32 = vpop.permute.xlu1 %4456  ;;  %5142 = vrot.lane.b32.xlu0 %v7303_v48, %s8006_s16  ;;  %v1642_v56 = vsel %vm8059_vm2, %v1637_v61, %v1641_v11  ;;  %v1651_v7 = vrot.slane %v1650_v52, 4  ;;  %v1655_v60 = vrot.slane %v1653_v22, 5  ;;  %v5612_v30 = vsel %vm5610_vm12, %v5547_v6, %v9871_v4  ;;  %v9988_v48 = vld [vmem:[%s12345_s0 + $0x94] sm:$0xf] }
 0x13a   :  { %v9967_v38 = vpop.permute.xlu0 %4298  ;;  %v7176_v13 = vcombine.low %v1632_v12, %v1642_v56  ;;  %v2351_v11 = vsel %vm8536_vm5, %v2349_v14, %v2350_v10  ;;  %v1665_v47 = vrot.slane %v1663_v28, 5  ;;  %v5549_v15 = vsel %vm5545_vm11, %v5484_v49, %v9887_v50  ;;  %v7859_v52 = vld [vmem:[%s12346_s1 + $0x10] ss:$0 sps:$4 sm:$0x33]   ;;  %v10013_v10 = vld [vmem:[%s12345_s0 + $0x98] sm:$0x1] }
 0x13b   :  { %v7208_v4 = vcombine.low %v2348_v58, %v2351_v11  ;;  %v1656_v6 = vsel %vm8059_vm2, %v1651_v7, %v1655_v60  ;;  %v1660_v39 = vor.u32 %v1659_v20, %v1655_v60  ;;  %v2837_v61 = vshrl.u32 %v6898_v34, 16 }
 0x13c   :  { %4472 = vrot.lane.b32.xlu1 %v7176_v13, %s8002_s9  ;;  %v2840_v28 = vshll.u32 %v6898_v34, 16  ;;  %v2850_v12 = vshrl.u32 %v9988_v48, 16  ;;  %v7240_v50 = vcombine.low %v6898_v34, %v9988_v48  ;;  %v6857_v49 = vrot.slane %v6825_v37, 9  ;;  %v10028_v37 = vld [vmem:[%s12345_s0 + $0xa0] sm:$0xf] }
 0x13d   :  { %v9993_v31 = vpop.permute.xlu1 %4616  ;;  %4314 = vrot.lane.b32.xlu0 %v7145_v40, %s8001_s26  ;;  %v1661_v20 = vrot.slane %v1660_v39, 4  ;;  %v2839_v58 = vrot.slane %v2837_v61, 4  ;;  %v2354_v14 = vrot.slane %v9940_v44, 5  ;;  %v2357_v56 = vrot.slane %v9963_v62, 5  ;;  %v10020_v40 = vld [vmem:[%s12345_s0 + $0x9c] sm:$0xf] }
 0x13e   :  { %v10004_v22 = vpop.permute.xlu0 %4458  ;;  %v2842_v7 = vrot.slane %v2840_v28, 5  ;;  %v5614_v34 = vsel %vm5610_vm12, %v5549_v15, %v9909_v25  ;;  %vm5825_vm13 = vcmask 1041408   ;;  %v2846_v60 = vshll.u32 %v9988_v48, 16 }
 0x13f   :  { %v1666_v44 = vsel %vm8059_vm2, %v1661_v20, %v1665_v47  ;;  %v2355_v62 = vsel %vm8536_vm5, %v6857_v49, %v2354_v14  ;;  %v2356_v13 = vrot.slane %v2354_v14, 4  ;;  %7791 = vmatprep.subr.msk.bf16.mxu0 %vm5825_vm13, %v7859_v52  ;;  %v2852_v11 = vrot.slane %v2850_v12, 4  ;;  %7792 = vmatprep.subr.msk.bf16.mxu1 %vm5825_vm13, %v7859_v52 }
 0x140   :  { %4632 = vrot.lane.b32.xlu1 %v7208_v4, %s8003_s15  ;;  %v7177_v15 = vcombine.low %v1656_v6, %v1666_v44  ;;  %v2843_v61 = vor.u32 %v2842_v7, %v2839_v58  ;;  %v2848_v28 = vrot.slane %v2846_v60, 5  ;;  %v2856_v47 = vshll.u32 %v10013_v10, 16  ;;  %v6984_v6 = vld [vmem:[%s12345_s0 + $0x90] sm:$0xe] }
 0x141   :  { %v10035_v39 = vpop.permute.xlu1 %4808  ;;  %v2358_v49 = vsel %vm8536_vm5, %v2356_v13, %v2357_v56  ;;  %v2861_v20 = vshrl.u32 %v10020_v40, 16  ;;  %v2864_v12 = vshll.u32 %v10020_v40, 16  ;;  %v2874_v14 = vshrl.u32 %v10028_v37, 16  ;;  %v6953_v13 = vld [vmem:[%s12345_s0 + $0xa4] sm:$0x1] }
 0x142   :  { %v10037_v25 = vpop.permute.xlu0 %4618  ;;  %4474 = vrot.lane.b32.xlu0 %v7177_v15, %s8002_s9  ;;  %v7209_v41 = vcombine.low %v2355_v62, %v2358_v49  ;;  %v2844_v3 = vrot.slane %v2843_v61, 4  ;;  %v2853_v42 = vor.u32 %v2852_v11, %v2848_v28  ;;  %v2858_v4 = vrot.slane %v2856_v47, 5 }
 0x143   :  { %v2863_v58 = vrot.slane %v2861_v20, 4  ;;  %v2866_v7 = vrot.slane %v2864_v12, 5  ;;  %v7241_v56 = vcombine.low %v10020_v40, %v10028_v37  ;;  %vm5675_vm14 = vcmask 261120  }
 0x144   :  { %4824 = vrot.lane.b32.xlu1 %v7240_v50, %s8004_s20  ;;  %v2849_v60 = vsel %vm8059_vm2, %v2844_v3, %v2848_v28  ;;  %v2854_v44 = vrot.slane %v2853_v42, 4  ;;  %v5677_v62 = vsel %vm5675_vm14, %v5612_v30, %v9900_v18  ;;  %vm5760_vm15 = vcmask 293888  }
 0x145   :  { %7721 = vmatprep.mubr.msk.bf16.mxu0 %vm5760_vm15, %v5677_v62  ;;  %v5827_v11 = vsel %vm5825_vm13, %v7859_v52, 0  ;;  %v5356_v50 = vsel %vm5350_vm8, %v9669_v29, %v9926_v36  ;;  %v5679_v3 = vsel %vm5675_vm14, %v5614_v34, %v9942_v51  ;;  %v7016_v42 = vrot.slane %v6984_v6, 9  ;;  %v940_v29 = vld [vmem:[%s12345_s0 + $0x9c] sm:$0xe] }
 0x146   :  { %v10070_v18 = vpop.permute.xlu0 %4810  ;;  %4634 = vrot.lane.b32.xlu0 %v7209_v41, %s8003_s15  ;;  %v2859_v30 = vsel %vm8059_vm2, %v2854_v44, %v2858_v4  ;;  %7720 = vmatpush3.bf16.msra.mxu0 %v5827_v11  ;;  %v3564_v52 = vrot.slane %v9988_v48, 5  ;;  %v3567_v15 = vrot.slane %v10013_v10, 5  ;;  %v2867_v61 = vor.u32 %v2866_v7, %v2863_v58  ;;  %v6985_v41 = vld [vmem:[%s12345_s0 + $0x9c] sm:$0xe] }
 0x147   :  { %v10068_v40 = vpop.permute.xlu1 %4968  ;;  %v7272_v36 = vcombine.low %v2849_v60, %v2859_v30  ;;  %v2870_v51 = vshll.u32 %v10028_v37, 16  ;;  %v2876_v34 = vrot.slane %v2874_v14, 4  ;;  %v2880_v28 = vshll.u32 %v6953_v13, 16  ;;  %7790 = vmatpush3.bf16.msra.mxu1 %v5827_v11 }
 0x148   :  { %v3565_v48 = vsel %vm8536_vm5, %v7016_v42, %v3564_v52  ;;  %v3566_v47 = vrot.slane %v3564_v52, 4  ;;  %v2868_v10 = vrot.slane %v2867_v61, 4  ;;  %v5421_v49 = vsel %vm5415_vm9, %v5356_v50, %v9965_v32  ;;  %v7966_v32 = vld [vmem:[%s12345_s0 + $0xa0] sm:$0xf]  ;;  %v10110_v50 = vld [vmem:[%s12345_s0 + $0xac] sm:$0xf] }
 0x149   :  { %4984 = vrot.lane.b32.xlu1 %v7272_v36, %s8005_s28  ;;  %v2872_v20 = vrot.slane %v2870_v51, 5  ;;  %v2882_v12 = vrot.slane %v2880_v28, 5  ;;  %7722 = vmatmul.mubr.msk.bf16.vlgmr.msra.gmra.mrb[0].mxu0 %vm5760_vm15, %v5679_v3  ;;  %v5358_v14 = vsel %vm5350_vm8, %v9661_v16, %v9967_v38  ;;  %v6699_v4 = vrot.slane %v940_v29, 9  ;;  %v6744_v16 = vld [vmem:[%s12345_s0 + $0xa8] sm:$0xf] }
 0x14a   :  { %4826 = vrot.lane.b32.xlu0 %v7241_v56, %s8004_s20  ;;  %v3568_v58 = vsel %vm8536_vm5, %v3566_v47, %v3567_v15  ;;  %v1151_v7 = vrot.slane %v7966_v32, 5  ;;  %v7017_v60 = vrot.slane %v6985_v41, 9  ;;  %v3571_v44 = vrot.slane %v10028_v37, 5  ;;  %v10126_v36 = vld [vmem:[%s12345_s0 + $0x9c] sm:$0xf] }
 0x14b   :  { %v10093_v6 = vpop.permute.xlu1 %5128  ;;  %v7304_v38 = vcombine.low %v3565_v48, %v3568_v58  ;;  %v2873_v62 = vsel %vm8059_vm2, %v2868_v10, %v2872_v20  ;;  %v2877_v56 = vor.u32 %v2876_v34, %v2872_v20  ;;  %v3574_v11 = vrot.slane %v6953_v13, 5 }
 0x14c   :  { %v1152_v37 = vsel %vm8536_vm5, %v6699_v4, %v1151_v7  ;;  %v1153_v42 = vrot.slane %v1151_v7, 4  ;;  %v3572_v30 = vsel %vm8536_vm5, %v7017_v60, %v3571_v44  ;;  %v3573_v52 = vrot.slane %v3571_v44, 4  ;;  %v6795_v7 = vld [vmem:[%s12345_s0 + $0xb0] sm:$0x1] }
 0x14d   :  { %v10112_v3 = vpop.permute.xlu0 %4970  ;;  %5144 = vrot.lane.b32.xlu1 %v7304_v38, %s8006_s16  ;;  %v2878_v15 = vrot.slane %v2877_v56, 4  ;;  %v5486_v13 = vsel %vm5480_vm10, %v5421_v49, %v9993_v31  ;;  %v5423_v61 = vsel %vm5415_vm9, %v5358_v14, %v10004_v22  ;;  %v1692_v29 = vshrl.u32 %v6744_v16, 16  ;;  %v6743_v22 = vld [vmem:[%s12345_s0 + $0xa0] sm:$0xf] }
 0x14e   :  { %v12395_v51 = vrot.slane %v8208_v46, 5  ;;  %v3575_v28 = vsel %vm8536_vm5, %v3573_v52, %v3574_v11  ;;  %v1695_v41 = vshll.u32 %v6744_v16, 16  ;;  %v1705_v31 = vshrl.u32 %v10110_v50, 16 }
 0x14f   :  { %v10138_v48 = vpop.permute.xlu1 %4300  ;;  %v2883_v47 = vsel %vm8059_vm2, %v2878_v15, %v2882_v12  ;;  %v7305_v46 = vcombine.low %v3572_v30, %v3575_v28  ;;  %v1694_v49 = vrot.slane %v1692_v29, 4  ;;  %v7147_v58 = vcombine.low %v6744_v16, %v10110_v50  ;;  %v6794_v16 = vld [vmem:[%s12345_s0 + $0xa4] sm:$0x1] }
 0x150   :  { %v1155_v34 = vsel %vm8536_vm5, %v1153_v42, %v12395_v51  ;;  %v7273_v14 = vcombine.low %v2873_v62, %v2883_v47  ;;  %v1697_v4 = vrot.slane %v1695_v41, 5  ;;  %v1668_v32 = vshrl.u32 %v10126_v36, 16  ;;  %v6827_v51 = vld [vmem:[%s12345_s0 + $0xa8] sm:$0xe]  ;;  %v6826_v47 = vld [vmem:[%s12345_s0 + $0x9c] sm:$0xe] }
 0x151   :  { %v7115_v10 = vcombine.low %v1152_v37, %v1155_v34  ;;  %v10142_v20 = vpop.permute.xlu0 %5130  ;;  %v1671_v60 = vshll.u32 %v10126_v36, 16  ;;  %v1681_v12 = vshrl.u32 %v6743_v22, 16  ;;  %v7146_v44 = vcombine.low %v10126_v36, %v6743_v22 }
 0x152   :  { %v5551_v38 = vsel %vm5545_vm11, %v5486_v13, %v10035_v39  ;;  %4986 = vrot.lane.b32.xlu0 %v7273_v14, %s8005_s28  ;;  %v1670_v62 = vrot.slane %v1668_v32, 4  ;;  %v5488_v56 = vsel %vm5480_vm10, %v5423_v61, %v10037_v25  ;;  %v1698_v11 = vor.u32 %v1697_v4, %v1694_v49 }
 0x153   :  { %4126 = vrot.lane.b32.xlu1 %v7115_v10, %s8000_s13  ;;  %v1701_v37 = vshll.u32 %v10110_v50, 16  ;;  %v1673_v42 = vrot.slane %v1671_v60, 5  ;;  %v1707_v30 = vrot.slane %v1705_v31, 4  ;;  %v1711_v52 = vshll.u32 %v6795_v7, 16 }
 0x154   :  { %v1677_v15 = vshll.u32 %v6743_v22, 16  ;;  %v1699_v29 = vrot.slane %v1698_v11, 4  ;;  %v1683_v39 = vrot.slane %v1681_v12, 4  ;;  %v1687_v13 = vshll.u32 %v6794_v16, 16 }
 0x155   :  { %v1703_v36 = vrot.slane %v1701_v37, 5  ;;  %v10164_v34 = vpop.permute.xlu1 %4460  ;;  %v10166_v28 = vpop.permute.xlu0 %4302  ;;  %v1713_v25 = vrot.slane %v1711_v52, 5  ;;  %v1674_v61 = vor.u32 %v1673_v42, %v1670_v62  ;;  %v5616_v31 = vsel %vm5610_vm12, %v5551_v38, %v10068_v40 }
 0x156   :  { %v1679_v41 = vrot.slane %v1677_v15, 5  ;;  %5146 = vrot.lane.b32.xlu0 %v7305_v46, %s8006_s16  ;;  %v1689_v14 = vrot.slane %v1687_v13, 5  ;;  %v5553_v4 = vsel %vm5545_vm11, %v5488_v56, %v10070_v18  ;;  %v6859_v60 = vrot.slane %v6827_v51, 9  ;;  %v6904_v56 = vld [vmem:[%s12345_s0 + $0xb4] sm:$0xf] }
 0x157   :  { %4318 = vrot.lane.b32.xlu1 %v7147_v58, %s8001_s26  ;;  %v1704_v10 = vsel %vm8059_vm2, %v1699_v29, %v1703_v36  ;;  %v1708_v49 = vor.u32 %v1707_v30, %v1703_v36  ;;  %v1675_v58 = vrot.slane %v1674_v61, 4  ;;  %v2368_v12 = vrot.slane %v10110_v50, 5  ;;  %v10197_v15 = vld [vmem:[%s12345_s0 + $0xb8] sm:$0xf]  ;;  %v6902_v13 = vld [vmem:[%s12345_s0 + $0xa8] sm:$0xf] }
 0x158   :  { %v1684_v32 = vor.u32 %v1683_v39, %v1679_v41  ;;  %v2371_v38 = vrot.slane %v6795_v7, 5  ;;  %v6858_v62 = vrot.slane %v6826_v47, 9  ;;  %v2361_v11 = vrot.slane %v6743_v22, 5  ;;  %v10213_v51 = vld [vmem:[%s12345_s0 + $0xac] sm:$0xf] }
 0x159   :  { %v1709_v40 = vrot.slane %v1708_v49, 4  ;;  %v10180_v37 = vpop.permute.xlu1 %4620  ;;  %v1680_v46 = vsel %vm8059_vm2, %v1675_v58, %v1679_v41  ;;  %v2369_v30 = vsel %vm8536_vm5, %v6859_v60, %v2368_v12  ;;  %v2370_v52 = vrot.slane %v2368_v12, 4 }
 0x15a   :  { %v1685_v42 = vrot.slane %v1684_v32, 4  ;;  %4316 = vrot.lane.b32.xlu0 %v7146_v44, %s8001_s26  ;;  %v2362_v50 = vsel %vm8536_vm5, %v6858_v62, %v2361_v11  ;;  %v2363_v7 = vrot.slane %v2361_v11, 4  ;;  %v2364_v22 = vrot.slane %v6794_v16, 5 }
 0x15b   :  { %v1714_v18 = vsel %vm8059_vm2, %v1709_v40, %v1713_v25  ;;  %v2372_v39 = vsel %vm8536_vm5, %v2370_v52, %v2371_v38  ;;  %v5681_v16 = vsel %vm5675_vm14, %v5616_v31, %v10093_v6  ;;  %v5618_v47 = vsel %vm5610_vm12, %v5553_v4, %v10112_v3  ;;  %v6955_v3 = vld [vmem:[%s12345_s0 + $0xbc] sm:$0x1] }
 0x15c   :  { %v10199_v29 = vpop.permute.xlu0 %4462  ;;  %v7179_v44 = vcombine.low %v1704_v10, %v1714_v18  ;;  %v1690_v36 = vsel %vm8059_vm2, %v1685_v42, %v1689_v14  ;;  %v7211_v61 = vcombine.low %v2369_v30, %v2372_v39  ;;  %v2365_v41 = vsel %vm8536_vm5, %v2363_v7, %v2364_v22  ;;  %7725 = vmatprep.mubr.msk.bf16.mxu0 %vm5760_vm15, %v5681_v16 }
 0x15d   :  { %v7178_v25 = vcombine.low %v1680_v46, %v1690_v36  ;;  %v7210_v6 = vcombine.low %v2362_v50, %v2365_v41  ;;  %v2909_v31 = vshrl.u32 %v6904_v56, 16  ;;  %v2912_v10 = vshll.u32 %v6904_v56, 16  ;;  %v10228_v4 = vpop.permute.xlu1 %4812  ;;  %v10239_v46 = vld [vmem:[%s12345_s0 + $0xb0] sm:$0x1] }
 0x15e   :  { %4478 = vrot.lane.b32.xlu1 %v7179_v44, %s8002_s9  ;;  %v2922_v49 = vshrl.u32 %v10197_v15, 16  ;;  %v7243_v14 = vcombine.low %v6904_v56, %v10197_v15  ;;  %v2885_v58 = vshrl.u32 %v6902_v13, 16  ;;  %v2888_v32 = vshll.u32 %v6902_v13, 16 }
 0x15f   :  { %4476 = vrot.lane.b32.xlu0 %v7178_v25, %s8002_s9  ;;  %v2898_v60 = vshrl.u32 %v10213_v51, 16  ;;  %v2911_v40 = vrot.slane %v2909_v31, 4  ;;  %v2914_v38 = vrot.slane %v2912_v10, 5  ;;  %v7242_v62 = vcombine.low %v6902_v13, %v10213_v51 }
 0x160   :  { %v10230_v12 = vpop.permute.xlu0 %4622  ;;  %v5360_v11 = vsel %vm5350_vm8, %v9715_v21, %v10138_v48  ;;  %v2887_v42 = vrot.slane %v2885_v58, 4  ;;  %v2890_v30 = vrot.slane %v2888_v32, 5  ;;  %v5683_v52 = vsel %vm5675_vm14, %v5618_v47, %v10142_v20  ;;  %v6987_v20 = vld [vmem:[%s12345_s0 + $0xb4] sm:$0xe] }
 0x161   :  { %v2918_v18 = vshll.u32 %v10197_v15, 16  ;;  %v2915_v50 = vor.u32 %v2914_v38, %v2911_v40  ;;  %v2924_v7 = vrot.slane %v2922_v49, 4  ;;  %v2928_v22 = vshll.u32 %v6955_v3, 16  ;;  %7726 = vmatmul.mubr.msk.bf16.gmra.mrb[4].mxu0 %vm5760_vm15, %v5683_v52  ;;  %v942_v52 = vld [vmem:[%s12345_s0 + $0xb4] sm:$0xe] }
 0x162   :  { %4638 = vrot.lane.b32.xlu1 %v7211_v61, %s8003_s15  ;;  %v2894_v56 = vshll.u32 %v10213_v51, 16  ;;  %v2891_v48 = vor.u32 %v2890_v30, %v2887_v42  ;;  %v2900_v44 = vrot.slane %v2898_v60, 4  ;;  %v2904_v36 = vshll.u32 %v10239_v46, 16  ;;  %v6986_v61 = vld [vmem:[%s12345_s0 + $0xa8] sm:$0xe] }
 0x163   :  { %4636 = vrot.lane.b32.xlu0 %v7210_v6, %s8003_s15  ;;  %v2920_v21 = vrot.slane %v2918_v18, 5  ;;  %v2916_v39 = vrot.slane %v2915_v50, 4  ;;  %v2930_v16 = vrot.slane %v2928_v22, 5  ;;  %v5425_v25 = vsel %vm5415_vm9, %v5360_v11, %v10164_v34  ;;  %v941_v50 = vld [vmem:[%s12345_s0 + $0xa8] sm:$0xe] }
 0x164   :  { %v2896_v13 = vrot.slane %v2894_v56, 5  ;;  %v2892_v47 = vrot.slane %v2891_v48, 4  ;;  %v2906_v6 = vrot.slane %v2904_v36, 5  ;;  %v5362_v31 = vsel %vm5350_vm8, %v9711_v24, %v10166_v28  ;;  %v10262_v49 = vpop.permute.xlu0 %4814 }
 0x165   :  { %v2925_v41 = vor.u32 %v2924_v7, %v2920_v21  ;;  %v2921_v34 = vsel %vm8059_vm2, %v2916_v39, %v2920_v21  ;;  %v7019_v32 = vrot.slane %v6987_v20, 9  ;;  %v3585_v60 = vrot.slane %v10197_v15, 5  ;;  %v7967_v20 = vld [vmem:[%s12345_s0 + $0xb8] sm:$0xf] }
 0x166   :  { %v10260_v10 = vpop.permute.xlu1 %4972  ;;  %4830 = vrot.lane.b32.xlu1 %v7243_v14, %s8004_s20  ;;  %v2901_v58 = vor.u32 %v2900_v44, %v2896_v13  ;;  %v2897_v38 = vsel %vm8059_vm2, %v2892_v47, %v2896_v13  ;;  %v3588_v24 = vrot.slane %v6955_v3, 5  ;;  %v7018_v28 = vrot.slane %v6986_v61, 9  ;;  %v7968_v13 = vld [vmem:[%s12345_s0 + $0xac] sm:$0xf] }
 0x167   :  { %4828 = vrot.lane.b32.xlu0 %v7242_v62, %s8004_s20  ;;  %v2926_v40 = vrot.slane %v2925_v41, 4  ;;  %v3586_v42 = vsel %vm8536_vm5, %v7019_v32, %v3585_v60  ;;  %v3587_v14 = vrot.slane %v3585_v60, 4  ;;  %v3578_v30 = vrot.slane %v10213_v51, 5  ;;  %v10314_v41 = vld [vmem:[%s12345_s0 + $0xc4] sm:$0xf] }
 0x168   :  { %v2902_v11 = vrot.slane %v2901_v58, 4  ;;  %v3581_v62 = vrot.slane %v10239_v46, 5  ;;  %v5490_v3 = vsel %vm5480_vm10, %v5425_v25, %v10180_v37  ;;  %v5427_v18 = vsel %vm5415_vm9, %v5362_v31, %v10199_v29  ;;  %v10298_v37 = vld [vmem:[%s12345_s0 + $0xc0] sm:$0xf] }
 0x169   :  { %v2931_v15 = vsel %vm8059_vm2, %v2926_v40, %v2930_v16  ;;  %v3589_v56 = vsel %vm8536_vm5, %v3587_v14, %v3588_v24  ;;  %v3579_v46 = vsel %vm8536_vm5, %v7018_v28, %v3578_v30  ;;  %v3580_v48 = vrot.slane %v3578_v30, 4 }
 0x16a   :  { %v10287_v51 = vpop.permute.xlu1 %5132  ;;  %v7275_v7 = vcombine.low %v2921_v34, %v2931_v15  ;;  %v2907_v22 = vsel %vm8059_vm2, %v2902_v11, %v2906_v6  ;;  %v7307_v21 = vcombine.low %v3586_v42, %v3589_v56  ;;  %v6701_v44 = vrot.slane %v942_v52, 9  ;;  %v6797_v56 = vld [vmem:[%s12345_s0 + $0xc8] sm:$0x1] }
 0x16b   :  { %v7274_v29 = vcombine.low %v2897_v38, %v2907_v22  ;;  %v10300_v36 = vpop.permute.xlu0 %4974  ;;  %v1165_v39 = vrot.slane %v7967_v20, 5  ;;  %v6700_v16 = vrot.slane %v941_v50, 9  ;;  %v1158_v25 = vrot.slane %v7968_v13, 5 }
 0x16c   :  { %4990 = vrot.lane.b32.xlu1 %v7275_v7, %s8005_s28  ;;  %v5555_v61 = vsel %vm5545_vm11, %v5490_v3, %v10228_v4  ;;  %v3582_v47 = vsel %vm8536_vm5, %v3580_v48, %v3581_v62  ;;  %v5492_v6 = vsel %vm5480_vm10, %v5427_v18, %v10230_v12  ;;  %v1740_v31 = vshrl.u32 %v10298_v37, 16  ;;  %v6746_v4 = vld [vmem:[%s12345_s0 + $0xb4] sm:$0xf]  ;;  %v10333_v12 = vld [vmem:[%s12345_s0 + $0xb8] sm:$0xf] }
 0x16d   :  { %4988 = vrot.lane.b32.xlu0 %v7274_v29, %s8005_s28  ;;  %v1743_v34 = vshll.u32 %v10298_v37, 16  ;;  %v7306_v58 = vcombine.low %v3579_v46, %v3582_v47  ;;  %v1166_v32 = vsel %vm8536_vm5, %v6701_v44, %v1165_v39  ;;  %v1167_v60 = vrot.slane %v1165_v39, 4 }
 0x16e   :  { %v1159_v40 = vsel %vm8536_vm5, %v6700_v16, %v1158_v25  ;;  %v10335_v38 = vpop.permute.xlu1 %4304  ;;  %v1160_v24 = vrot.slane %v1158_v25, 4  ;;  %v1742_v28 = vrot.slane %v1740_v31, 4  ;;  %v1753_v42 = vshrl.u32 %v10314_v41, 16 }
 0x16f   :  { %v1745_v11 = vrot.slane %v1743_v34, 5  ;;  %v10338_v14 = vpop.permute.xlu0 %5134  ;;  %v12396_v30 = vrot.slane %v8241_v23, 5  ;;  %v7149_v15 = vcombine.low %v10298_v37, %v10314_v41  ;;  %v1716_v62 = vshrl.u32 %v6746_v4, 16 }
 0x170   :  { %5150 = vrot.lane.b32.xlu1 %v7307_v21, %s8006_s16  ;;  %v1719_v3 = vshll.u32 %v6746_v4, 16  ;;  %v12397_v50 = vrot.slane %v8256_v43, 5  ;;  %v1729_v22 = vshrl.u32 %v10333_v12, 16  ;;  %v7148_v23 = vcombine.low %v6746_v4, %v10333_v12  ;;  %v6796_v43 = vld [vmem:[%s12345_s0 + $0xbc] sm:$0x1] }
 0x171   :  { %v1169_v52 = vsel %vm8536_vm5, %v1167_v60, %v12396_v30  ;;  %5148 = vrot.lane.b32.xlu0 %v7306_v58, %s8006_s16  ;;  %v1718_v37 = vrot.slane %v1716_v62, 4  ;;  %v5620_v21 = vsel %vm5610_vm12, %v5555_v61, %v10260_v10  ;;  %v5557_v48 = vsel %vm5545_vm11, %v5492_v6, %v10262_v49  ;;  %v6829_v10 = vld [vmem:[%s12345_s0 + $0xc0] sm:$0xe] }
 0x172   :  { %v7117_v18 = vcombine.low %v1166_v32, %v1169_v52  ;;  %v1162_v7 = vsel %vm8536_vm5, %v1160_v24, %v12397_v50  ;;  %v1721_v29 = vrot.slane %v1719_v3, 5  ;;  %v1746_v44 = vor.u32 %v1745_v11, %v1742_v28  ;;  %v6828_v24 = vld [vmem:[%s12345_s0 + $0xb4] sm:$0xe] }
 0x173   :  { %v7116_v46 = vcombine.low %v1159_v40, %v1162_v7  ;;  %v1749_v20 = vshll.u32 %v10314_v41, 16  ;;  %v1755_v39 = vrot.slane %v1753_v42, 4  ;;  %v1759_v16 = vshll.u32 %v6797_v56, 16  ;;  %v10372_v31 = vpop.permute.xlu0 %4306 }
 0x174   :  { %4130 = vrot.lane.b32.xlu1 %v7117_v18, %s8000_s13  ;;  %v1722_v13 = vor.u32 %v1721_v29, %v1718_v37  ;;  %v1725_v25 = vshll.u32 %v10333_v12, 16  ;;  %v1731_v47 = vrot.slane %v1729_v22, 4  ;;  %v1747_v49 = vrot.slane %v1746_v44, 4 }
 0x175   :  { %v10370_v61 = vpop.permute.xlu1 %4464  ;;  %4128 = vrot.lane.b32.xlu0 %v7116_v46, %s8000_s13  ;;  %v1751_v6 = vrot.slane %v1749_v20, 5  ;;  %v1735_v34 = vshll.u32 %v6796_v43, 16  ;;  %v5685_v4 = vsel %vm5675_vm14, %v5620_v21, %v10287_v51  ;;  %v1761_v58 = vrot.slane %v1759_v16, 5  ;;  %v10394_v46 = vld [vmem:[%s12345_s0 + $0xcc] sm:$0xf] }
 0x176   :  { %v1723_v32 = vrot.slane %v1722_v13, 4  ;;  %v1727_v60 = vrot.slane %v1725_v25, 5  ;;  %v5622_v40 = vsel %vm5610_vm12, %v5557_v48, %v10300_v36  ;;  %7729 = vmatprep.mubr.msk.bf16.mxu0 %vm5760_vm15, %v5685_v4  ;;  %v6861_v30 = vrot.slane %v6829_v10, 9  ;;  %v10410_v48 = vld [vmem:[%s12345_s0 + $0xd0] sm:$0xf] }
 0x177   :  { %v1752_v28 = vsel %vm8059_vm2, %v1747_v49, %v1751_v6  ;;  %v1756_v11 = vor.u32 %v1755_v39, %v1751_v6  ;;  %v1737_v42 = vrot.slane %v1735_v34, 5  ;;  %v2382_v36 = vrot.slane %v10314_v41, 5  ;;  %v6906_v39 = vld [vmem:[%s12345_s0 + $0xc0] sm:$0xf] }
 0x178   :  { %4322 = vrot.lane.b32.xlu1 %v7149_v15, %s8001_s26  ;;  %v1728_v51 = vsel %vm8059_vm2, %v1723_v32, %v1727_v60  ;;  %v1732_v52 = vor.u32 %v1731_v47, %v1727_v60  ;;  %v2385_v62 = vrot.slane %v6797_v56, 5  ;;  %v6860_v50 = vrot.slane %v6828_v24, 9 }
 0x179   :  { %v4625_v3 = vpop.permute.xlu1 %4624  ;;  %4320 = vrot.lane.b32.xlu0 %v7148_v23, %s8001_s26  ;;  %v1757_v18 = vrot.slane %v1756_v11, 4  ;;  %v2375_v7 = vrot.slane %v10333_v12, 5  ;;  %v2378_v22 = vrot.slane %v6796_v43, 5  ;;  %v2383_v37 = vsel %vm8536_vm5, %v6861_v30, %v2382_v36 }
 0x17a   :  { %v1733_v15 = vrot.slane %v1732_v52, 4  ;;  %v2384_v29 = vrot.slane %v2382_v36, 4  ;;  %v5364_v41 = vsel %vm5350_vm8, %v9759_v5, %v10335_v38  ;;  %v5687_v43 = vsel %vm5675_vm14, %v5622_v40, %v10338_v14  ;;  %v10423_v14 = vld [vmem:[%s12345_s0 + $0xc4] sm:$0xf]  ;;  %v6956_v52 = vld [vmem:[%s12345_s0 + $0xc8] sm:$0x1] }
 0x17b   :  { %v4467_v23 = vpop.permute.xlu0 %4466  ;;  %v1762_v56 = vsel %vm8059_vm2, %v1757_v18, %v1761_v58  ;;  %v2376_v12 = vsel %vm8536_vm5, %v6860_v50, %v2375_v7  ;;  %v2377_v21 = vrot.slane %v2375_v7, 4  ;;  %v2957_v20 = vshrl.u32 %v10394_v46, 16  ;;  %7730 = vmatmul.mubr.msk.bf16.gmra.mrb[8].mxu0 %vm5760_vm15, %v5687_v43  ;;  %v6988_v43 = vld [vmem:[%s12345_s0 + $0xc0] sm:$0xe] }
 0x17c   :  { %v7181_v44 = vcombine.low %v1752_v28, %v1762_v56  ;;  %v1738_v5 = vsel %vm8059_vm2, %v1733_v15, %v1737_v42  ;;  %v2386_v38 = vsel %vm8536_vm5, %v2384_v29, %v2385_v62  ;;  %v2960_v47 = vshll.u32 %v10394_v46, 16  ;;  %v6957_v28 = vld [vmem:[%s12345_s0 + $0xd4] sm:$0x1] }
 0x17d   :  { %v7180_v16 = vcombine.low %v1728_v51, %v1738_v5  ;;  %v7213_v13 = vcombine.low %v2383_v37, %v2386_v38  ;;  %v2379_v25 = vsel %vm8536_vm5, %v2377_v21, %v2378_v22  ;;  %v2959_v49 = vrot.slane %v2957_v20, 4  ;;  %v4817_v4 = vpop.permute.xlu1 %4816 }
 0x17e   :  { %4482 = vrot.lane.b32.xlu1 %v7181_v44, %s8002_s9  ;;  %v7212_v10 = vcombine.low %v2376_v12, %v2379_v25  ;;  %v2970_v6 = vshrl.u32 %v10410_v48, 16  ;;  %v7245_v34 = vcombine.low %v10394_v46, %v10410_v48  ;;  %v2962_v32 = vrot.slane %v2960_v47, 5 }
 0x17f   :  { %v4627_v58 = vpop.permute.xlu0 %4626  ;;  %4480 = vrot.lane.b32.xlu0 %v7180_v16, %s8002_s9  ;;  %v2933_v60 = vshrl.u32 %v6906_v39, 16  ;;  %v2936_v40 = vshll.u32 %v6906_v39, 16  ;;  %v2946_v24 = vshrl.u32 %v10423_v14, 16  ;;  %v7244_v11 = vcombine.low %v6906_v39, %v10423_v14 }
 0x180   :  { %v5429_v42 = vsel %vm5415_vm9, %v5364_v41, %v10370_v61  ;;  %v5366_v30 = vsel %vm5350_vm8, %v9754_v54, %v10372_v31  ;;  %v2966_v51 = vshll.u32 %v10410_v48, 16  ;;  %v2963_v18 = vor.u32 %v2962_v32, %v2959_v49  ;;  %v6989_v54 = vld [vmem:[%s12345_s0 + $0xcc] sm:$0xe]  ;;  %v944_v32 = vld [vmem:[%s12345_s0 + $0xe4] sm:$0xe] }
 0x181   :  { %v2935_v36 = vrot.slane %v2933_v60, 4  ;;  %v2938_v62 = vrot.slane %v2936_v40, 5  ;;  %v2972_v50 = vrot.slane %v2970_v6, 4  ;;  %v2976_v22 = vshll.u32 %v6957_v28, 16 }
 0x182   :  { %4642 = vrot.lane.b32.xlu1 %v7213_v13, %s8003_s15  ;;  %v2968_v7 = vrot.slane %v2966_v51, 5  ;;  %v2942_v61 = vshll.u32 %v10423_v14, 16  ;;  %v2948_v46 = vrot.slane %v2946_v24, 4  ;;  %v2964_v31 = vrot.slane %v2963_v18, 4  ;;  %v10488_v18 = vld [vmem:[%s12345_s0 + $0xf0] sm:$0xf] }
 0x183   :  { %4640 = vrot.lane.b32.xlu0 %v7212_v10, %s8003_s15  ;;  %v2939_v15 = vor.u32 %v2938_v62, %v2935_v36  ;;  %v2952_v37 = vshll.u32 %v6956_v52, 16  ;;  %v5494_v29 = vsel %vm5480_vm10, %v5429_v42, %v4625_v3  ;;  %v2978_v56 = vrot.slane %v2976_v22, 5  ;;  %v4819_v5 = vpop.permute.xlu0 %4818 }
 0x184   :  { %v2973_v41 = vor.u32 %v2972_v50, %v2968_v7  ;;  %v2944_v12 = vrot.slane %v2942_v61, 5  ;;  %v5431_v21 = vsel %vm5415_vm9, %v5366_v30, %v4467_v23  ;;  %v4977_v44 = vpop.permute.xlu1 %4976  ;;  %v2969_v38 = vsel %vm8059_vm2, %v2964_v31, %v2968_v7  ;;  %v943_v30 = vld [vmem:[%s12345_s0 + $0xd8] sm:$0xe]  ;;  %v7969_v61 = vld [vmem:[%s12345_s0 + $0xe8] sm:$0xf] }
 0x185   :  { %v2940_v20 = vrot.slane %v2939_v15, 4  ;;  %v2954_v39 = vrot.slane %v2952_v37, 5  ;;  %v7021_v16 = vrot.slane %v6989_v54, 9  ;;  %v3599_v25 = vrot.slane %v10410_v48, 5  ;;  %v7970_v15 = vld [vmem:[%s12345_s0 + $0xdc] sm:$0xf] }
 0x186   :  { %4834 = vrot.lane.b32.xlu1 %v7245_v34, %s8004_s20  ;;  %v2974_v3 = vrot.slane %v2973_v41, 4  ;;  %v2949_v13 = vor.u32 %v2948_v46, %v2944_v12  ;;  %v3602_v47 = vrot.slane %v6957_v28, 5  ;;  %v7020_v10 = vrot.slane %v6988_v43, 9  ;;  %v10508_v41 = vld [vmem:[%s12345_s0 + $0xe4] sm:$0xf] }
 0x187   :  { %4832 = vrot.lane.b32.xlu0 %v7244_v11, %s8004_s20  ;;  %v2945_v23 = vsel %vm8059_vm2, %v2940_v20, %v2944_v12  ;;  %v3592_v49 = vrot.slane %v10423_v14, 5  ;;  %v3595_v6 = vrot.slane %v6956_v52, 5  ;;  %v3600_v48 = vsel %vm8536_vm5, %v7021_v16, %v3599_v25 }
 0x188   :  { %v2979_v34 = vsel %vm8059_vm2, %v2974_v3, %v2978_v56  ;;  %v2950_v60 = vrot.slane %v2949_v13, 4  ;;  %v3601_v40 = vrot.slane %v3599_v25, 4  ;;  %v5137_v24 = vpop.permute.xlu1 %5136  ;;  %v5559_v14 = vsel %vm5545_vm11, %v5494_v29, %v4817_v4  ;;  %v10522_v3 = vld [vmem:[%s12345_s0 + $0xe8] sm:$0xf] }
 0x189   :  { %v7277_v28 = vcombine.low %v2969_v38, %v2979_v34  ;;  %v3593_v11 = vsel %vm8536_vm5, %v7020_v10, %v3592_v49  ;;  %v3594_v42 = vrot.slane %v3592_v49, 4  ;;  %v5496_v36 = vsel %vm5480_vm10, %v5431_v21, %v4627_v58  ;;  %v10499_v58 = vld [vmem:[%s12345_s0 + $0xf4] sm:$0xf] }
 0x18a   :  { %v2955_v51 = vsel %vm8059_vm2, %v2950_v60, %v2954_v39  ;;  %v3603_v52 = vsel %vm8536_vm5, %v3601_v40, %v3602_v47  ;;  %v6703_v62 = vrot.slane %v944_v32, 9  ;;  %v4979_v50 = vpop.permute.xlu0 %4978  ;;  %v1179_v46 = vrot.slane %v7969_v61, 5  ;;  %v6831_v61 = vld [vmem:[%s12345_s0 + $0xf0] sm:$0xe] }
 0x18b   :  { %4994 = vrot.lane.b32.xlu1 %v7277_v28, %s8005_s28  ;;  %v7276_v4 = vcombine.low %v2945_v23, %v2955_v51  ;;  %v7309_v7 = vcombine.low %v3600_v48, %v3603_v52  ;;  %v3596_v22 = vsel %vm8536_vm5, %v3594_v42, %v3595_v6  ;;  %v6702_v31 = vrot.slane %v943_v30, 9  ;;  %v12399_v6 = vld [vmem:[#allocation2_spill] sm:$0xff] }
 0x18c   :  { %v7308_v54 = vcombine.low %v3593_v11, %v3596_v22  ;;  %v1172_v37 = vrot.slane %v7970_v15, 5  ;;  %v5624_v29 = vsel %vm5610_vm12, %v5559_v14, %v4977_v44  ;;  %v4309_v56 = vpop.permute.xlu1 %4308  ;;  %v1180_v12 = vsel %vm8536_vm5, %v6703_v62, %v1179_v46  ;;  %v10547_v14 = vld [vmem:[%s12345_s0 + $0xec] sm:$0x1] }
 0x18d   :  { %4992 = vrot.lane.b32.xlu0 %v7276_v4, %s8005_s28  ;;  %v1181_v21 = vrot.slane %v1179_v46, 4  ;;  %v5561_v43 = vsel %vm5545_vm11, %v5496_v36, %v4819_v5  ;;  %v1788_v38 = vshrl.u32 %v10488_v18, 16  ;;  %v1791_v39 = vshll.u32 %v10488_v18, 16 }
 0x18e   :  { %v1173_v20 = vsel %vm8536_vm5, %v6702_v31, %v1172_v37  ;;  %v1174_v44 = vrot.slane %v1172_v37, 4  ;;  %v1801_v16 = vshrl.u32 %v10499_v58, 16  ;;  %v5139_v13 = vpop.permute.xlu0 %5138  ;;  %v12398_v5 = vrot.slane %v8273_v1, 5  ;;  %v6799_v1 = vld [vmem:[%s12345_s0 + $0xf8] sm:$0x1] }
 0x18f   :  { %5154 = vrot.lane.b32.xlu1 %v7309_v7, %s8006_s16  ;;  %v1790_v47 = vrot.slane %v1788_v38, 4  ;;  %v7151_v23 = vcombine.low %v10488_v18, %v10499_v58  ;;  %v1764_v10 = vshrl.u32 %v10508_v41, 16  ;;  %v12400_v32 = vrot.slane %v12399_v6, 5 }
 0x190   :  { %v1183_v25 = vsel %vm8536_vm5, %v1181_v21, %v12398_v5  ;;  %v1793_v60 = vrot.slane %v1791_v39, 5  ;;  %v1767_v48 = vshll.u32 %v10508_v41, 16  ;;  %v1777_v11 = vshrl.u32 %v10522_v3, 16 }
 0x191   :  { %v7119_v49 = vcombine.low %v1180_v12, %v1183_v25  ;;  %v1176_v34 = vsel %vm8536_vm5, %v1174_v44, %v12400_v32  ;;  %5152 = vrot.lane.b32.xlu0 %v7308_v54, %s8006_s16  ;;  %v1766_v28 = vrot.slane %v1764_v10, 4  ;;  %v7150_v42 = vcombine.low %v10508_v41, %v10522_v3  ;;  %v4469_v30 = vpop.permute.xlu1 %4468  ;;  %v6830_v12 = vld [vmem:[%s12345_s0 + $0xe4] sm:$0xe] }
 0x192   :  { %v7118_v40 = vcombine.low %v1173_v20, %v1176_v34  ;;  %v1769_v51 = vrot.slane %v1767_v48, 5  ;;  %v5689_v52 = vsel %vm5675_vm14, %v5624_v29, %v5137_v24  ;;  %v5626_v36 = vsel %vm5610_vm12, %v5561_v43, %v4979_v50  ;;  %v4311_v46 = vpop.permute.xlu0 %4310 }
 0x193   :  { %v1794_v62 = vor.u32 %v1793_v60, %v1790_v47  ;;  %4134 = vrot.lane.b32.xlu1 %v7119_v49, %s8000_s13  ;;  %v1797_v18 = vshll.u32 %v10499_v58, 16  ;;  %v1803_v4 = vrot.slane %v1801_v16, 4  ;;  %v1807_v7 = vshll.u32 %v6799_v1, 16  ;;  %7733 = vmatprep.mubr.msk.bf16.mxu0 %vm5760_vm15, %v5689_v52 }
 0x194   :  { %v1773_v22 = vshll.u32 %v10522_v3, 16  ;;  %v1770_v24 = vor.u32 %v1769_v51, %v1766_v28  ;;  %v1779_v31 = vrot.slane %v1777_v11, 4  ;;  %v1783_v50 = vshll.u32 %v10547_v14, 16  ;;  %v10603_v51 = vld [vmem:[%s12345_s0 + $0xf4] sm:$0xf] }
 0x195   :  { %v1795_v54 = vrot.slane %v1794_v62, 4  ;;  %4132 = vrot.lane.b32.xlu0 %v7118_v40, %s8000_s13  ;;  %v1799_v15 = vrot.slane %v1797_v18, 5  ;;  %v1809_v37 = vrot.slane %v1807_v7, 5  ;;  %v5368_v41 = vsel %vm5350_vm8, %v9789_v63, %v4309_v56  ;;  %v4629_v21 = vpop.permute.xlu1 %4628  ;;  %v10587_v40 = vld [vmem:[%s12345_s0 + $0x100] sm:$0xf] }
 0x196   :  { %v1775_v29 = vrot.slane %v1773_v22, 5  ;;  %v1771_v43 = vrot.slane %v1770_v24, 4  ;;  %v1785_v38 = vrot.slane %v1783_v50, 5  ;;  %v5691_v20 = vsel %vm5675_vm14, %v5626_v36, %v5139_v13  ;;  %v6959_v50 = vld [vmem:[%s12345_s0 + $0x104] sm:$0x1] }
 0x197   :  { %v6863_v44 = vrot.slane %v6831_v61, 9  ;;  %4326 = vrot.lane.b32.xlu1 %v7151_v23, %s8001_s26  ;;  %v1800_v39 = vsel %vm8059_vm2, %v1795_v54, %v1799_v15  ;;  %v1804_v16 = vor.u32 %v1803_v4, %v1799_v15  ;;  %v2396_v25 = vrot.slane %v10499_v58, 5  ;;  %7734 = vmatmul.mubr.msk.bf16.gmra.mrb[12].mxu0 %vm5760_vm15, %v5691_v20 }
 0x198   :  { %v1780_v5 = vor.u32 %v1779_v31, %v1775_v29  ;;  %v1776_v63 = vsel %vm8059_vm2, %v1771_v43, %v1775_v29  ;;  %v2399_v56 = vrot.slane %v6799_v1, 5  ;;  %v6862_v47 = vrot.slane %v6830_v12, 9  ;;  %v10620_v12 = vld [vmem:[%s12345_s0 + $0xf8] sm:$0x1] }
 0x199   :  { %v2389_v10 = vrot.slane %v10522_v3, 5  ;;  %4324 = vrot.lane.b32.xlu0 %v7150_v42, %s8001_s26  ;;  %v1805_v13 = vrot.slane %v1804_v16, 4  ;;  %v2397_v49 = vsel %vm8536_vm5, %v6863_v44, %v2396_v25  ;;  %v2398_v6 = vrot.slane %v2396_v25, 4  ;;  %v4471_v32 = vpop.permute.xlu0 %4470  ;;  %v4821_v34 = vpop.permute.xlu1 %4820  ;;  %v6912_v3 = vld [vmem:[%s12345_s0 + $0xfc] sm:$0xf] }
 0x19a   :  { %v1781_v23 = vrot.slane %v1780_v5, 4  ;;  %v2392_v48 = vrot.slane %v10547_v14, 5  ;;  %v5433_v1 = vsel %vm5415_vm9, %v5368_v41, %v4469_v30  ;;  %v5370_v14 = vsel %vm5350_vm8, %v9784_v57, %v4311_v46  ;;  %v6910_v30 = vld [vmem:[%s12345_s0 + $0xf0] sm:$0xf] }
 0x19b   :  { %v2390_v58 = vsel %vm8536_vm5, %v6862_v47, %v2389_v10  ;;  %v2391_v60 = vrot.slane %v2389_v10, 4  ;;  %v1810_v28 = vsel %vm8059_vm2, %v1805_v13, %v1809_v37  ;;  %v2400_v42 = vsel %vm8536_vm5, %v2398_v6, %v2399_v56 }
 0x19c   :  { %v1786_v11 = vsel %vm8059_vm2, %v1781_v23, %v1785_v38  ;;  %v7183_v52 = vcombine.low %v1800_v39, %v1810_v28  ;;  %v7215_v62 = vcombine.low %v2397_v49, %v2400_v42  ;;  %v3005_v7 = vshrl.u32 %v6912_v3, 16  ;;  %v6991_v23 = vld [vmem:[%s12345_s0 + $0xfc] sm:$0xe] }
 0x19d   :  { %v7182_v36 = vcombine.low %v1776_v63, %v1786_v11  ;;  %v2393_v18 = vsel %vm8536_vm5, %v2391_v60, %v2392_v48  ;;  %v3008_v22 = vshll.u32 %v6912_v3, 16  ;;  %v3018_v57 = vshrl.u32 %v10587_v40, 16  ;;  %v4631_v61 = vpop.permute.xlu0 %4630  ;;  %v6990_v60 = vld [vmem:[%s12345_s0 + $0xf0] sm:$0xe] }
 0x19e   :  { %v7214_v4 = vcombine.low %v2390_v58, %v2393_v18  ;;  %4486 = vrot.lane.b32.xlu1 %v7183_v52, %s8002_s9  ;;  %v7247_v46 = vcombine.low %v6912_v3, %v10587_v40  ;;  %v2981_v54 = vshrl.u32 %v6910_v30, 16  ;;  %v2984_v24 = vshll.u32 %v6910_v30, 16 }
 0x19f   :  { %4484 = vrot.lane.b32.xlu0 %v7182_v36, %s8002_s9  ;;  %v2994_v31 = vshrl.u32 %v10603_v51, 16  ;;  %v3007_v15 = vrot.slane %v3005_v7, 4  ;;  %v3010_v37 = vrot.slane %v3008_v22, 5  ;;  %v7246_v29 = vcombine.low %v6910_v30, %v10603_v51  ;;  %v4981_v43 = vpop.permute.xlu1 %4980 }
 0x1a0   :  { %v5498_v41 = vsel %vm5480_vm10, %v5433_v1, %v4629_v21  ;;  %v2983_v38 = vrot.slane %v2981_v54, 4  ;;  %v2986_v20 = vrot.slane %v2984_v24, 5  ;;  %v5435_v44 = vsel %vm5415_vm9, %v5370_v14, %v4471_v32 }
 0x1a1   :  { %v3014_v39 = vshll.u32 %v10587_v40, 16  ;;  %v3011_v16 = vor.u32 %v3010_v37, %v3007_v15  ;;  %v3020_v5 = vrot.slane %v3018_v57, 4  ;;  %v3024_v25 = vshll.u32 %v6959_v50, 16  ;;  %v4823_v56 = vpop.permute.xlu0 %4822 }
 0x1a2   :  { %v2990_v63 = vshll.u32 %v10603_v51, 16  ;;  %4646 = vrot.lane.b32.xlu1 %v7215_v62, %s8003_s15  ;;  %v2987_v47 = vor.u32 %v2986_v20, %v2983_v38  ;;  %v2996_v10 = vrot.slane %v2994_v31, 4  ;;  %v3000_v13 = vshll.u32 %v10620_v12, 16 }
 0x1a3   :  { %4644 = vrot.lane.b32.xlu0 %v7214_v4, %s8003_s15  ;;  %v3016_v21 = vrot.slane %v3014_v39, 5  ;;  %v3012_v49 = vrot.slane %v3011_v16, 4  ;;  %v3026_v6 = vrot.slane %v3024_v25, 5  ;;  %v5563_v58 = vsel %vm5545_vm11, %v5498_v41, %v4821_v34  ;;  %v5141_v48 = vpop.permute.xlu1 %5140  ;;  %v10666_v41 = vld [vmem:[%s12345_s0 + $0x108] sm:$0xf] }
 0x1a4   :  { %v2992_v32 = vrot.slane %v2990_v63, 5  ;;  %v2988_v3 = vrot.slane %v2987_v47, 4  ;;  %v3002_v28 = vrot.slane %v3000_v13, 5  ;;  %v5500_v11 = vsel %vm5480_vm10, %v5435_v44, %v4631_v61  ;;  %v7971_v39 = vld [vmem:[%s12345_s0 + $0x100] sm:$0xf] }
 0x1a5   :  { %v3021_v1 = vor.u32 %v3020_v5, %v3016_v21  ;;  %v3017_v42 = vsel %vm8059_vm2, %v3012_v49, %v3016_v21  ;;  %v7023_v30 = vrot.slane %v6991_v23, 9  ;;  %v3613_v52 = vrot.slane %v10587_v40, 5  ;;  %v946_v40 = vld [vmem:[%s12345_s0 + $0xfc] sm:$0xe]  ;;  %v7972_v25 = vld [vmem:[%s12345_s0 + $0xf4] sm:$0xf] }
 0x1a6   :  { %v2997_v14 = vor.u32 %v2996_v10, %v2992_v32  ;;  %4838 = vrot.lane.b32.xlu1 %v7247_v46, %s8004_s20  ;;  %v2993_v36 = vsel %vm8059_vm2, %v2988_v3, %v2992_v32  ;;  %v3616_v62 = vrot.slane %v6959_v50, 5  ;;  %v7022_v18 = vrot.slane %v6990_v60, 9  ;;  %v945_v50 = vld [vmem:[%s12345_s0 + $0xf0] sm:$0xe]  ;;  %v10679_v21 = vld [vmem:[%s12345_s0 + $0x10c] sm:$0xf] }
 0x1a7   :  { %4836 = vrot.lane.b32.xlu0 %v7246_v29, %s8004_s20  ;;  %v3022_v34 = vrot.slane %v3021_v1, 4  ;;  %v3614_v7 = vsel %vm8536_vm5, %v7023_v30, %v3613_v52  ;;  %v3615_v22 = vrot.slane %v3613_v52, 4  ;;  %v3606_v57 = vrot.slane %v10603_v51, 5  ;;  %v4983_v61 = vpop.permute.xlu0 %4982  ;;  %v10698_v1 = vld [vmem:[%s12345_s0 + $0x100] sm:$0xf] }
 0x1a8   :  { %v2998_v4 = vrot.slane %v2997_v14, 4  ;;  %v3609_v54 = vrot.slane %v10620_v12, 5  ;;  %v5628_v24 = vsel %vm5610_vm12, %v5563_v58, %v4981_v43  ;;  %v5565_v31 = vsel %vm5545_vm11, %v5500_v11, %v4823_v56  ;;  %v4313_v12 = vpop.permute.xlu1 %4312 }
 0x1a9   :  { %v3027_v46 = vsel %vm8059_vm2, %v3022_v34, %v3026_v6  ;;  %v3617_v37 = vsel %vm8536_vm5, %v3615_v22, %v3616_v62  ;;  %v3607_v29 = vsel %vm8536_vm5, %v7022_v18, %v3606_v57  ;;  %v3608_v20 = vrot.slane %v3606_v57, 4  ;;  %v6754_v6 = vld [vmem:[%s12345_s0 + $0xfc] sm:$0xf] }
 0x1aa   :  { %v7279_v15 = vcombine.low %v3017_v42, %v3027_v46  ;;  %v3003_v51 = vsel %vm8059_vm2, %v2998_v4, %v3002_v28  ;;  %v7311_v38 = vcombine.low %v3614_v7, %v3617_v37  ;;  %v6705_v44 = vrot.slane %v946_v40, 9  ;;  %v12402_v7 = vld [vmem:[#allocation13_spill] sm:$0xff] }
 0x1ab   :  { %v7278_v43 = vcombine.low %v2993_v36, %v3003_v51  ;;  %v1193_v16 = vrot.slane %v7971_v39, 5  ;;  %v6704_v5 = vrot.slane %v945_v50, 9  ;;  %v1186_v63 = vrot.slane %v7972_v25, 5  ;;  %v5143_v47 = vpop.permute.xlu0 %5142  ;;  %v6800_v50 = vld [vmem:[%s12345_s0 + $0x104] sm:$0x1] }
 0x1ac   :  { %4998 = vrot.lane.b32.xlu1 %v7279_v15, %s8005_s28  ;;  %v5693_v56 = vsel %vm5675_vm14, %v5628_v24, %v5141_v48  ;;  %v3610_v10 = vsel %vm8536_vm5, %v3608_v20, %v3609_v54  ;;  %v5630_v13 = vsel %vm5610_vm12, %v5565_v31, %v4983_v61  ;;  %v1836_v23 = vshrl.u32 %v10666_v41, 16  ;;  %v6801_v61 = vld [vmem:[%s12345_s0 + $0x110] sm:$0x1] }
 0x1ad   :  { %4996 = vrot.lane.b32.xlu0 %v7278_v43, %s8005_s28  ;;  %v1839_v49 = vshll.u32 %v10666_v41, 16  ;;  %7737 = vmatprep.mubr.msk.bf16.mxu0 %vm5760_vm15, %v5693_v56  ;;  %v7310_v32 = vcombine.low %v3607_v29, %v3610_v10  ;;  %v1194_v58 = vsel %vm8536_vm5, %v6705_v44, %v1193_v16  ;;  %v1195_v60 = vrot.slane %v1193_v16, 4  ;;  %v6832_v10 = vld [vmem:[%s12345_s0 + $0xfc] sm:$0xe] }
 0x1ae   :  { %v1187_v48 = vsel %vm8536_vm5, %v6704_v5, %v1186_v63  ;;  %v1188_v3 = vrot.slane %v1186_v63, 4  ;;  %v1838_v28 = vrot.slane %v1836_v23, 4  ;;  %v1849_v42 = vshrl.u32 %v10679_v21, 16  ;;  %v4473_v62 = vpop.permute.xlu1 %4472 }
 0x1af   :  { %v1841_v11 = vrot.slane %v1839_v49, 5  ;;  %v12401_v14 = vrot.slane %v8929_v35, 5  ;;  %v7153_v52 = vcombine.low %v10666_v41, %v10679_v21  ;;  %v1812_v34 = vshrl.u32 %v6754_v6, 16  ;;  %v4315_v18 = vpop.permute.xlu0 %4314 }
 0x1b0   :  { %5158 = vrot.lane.b32.xlu1 %v7311_v38, %s8006_s16  ;;  %v1815_v36 = vshll.u32 %v6754_v6, 16  ;;  %v12403_v22 = vrot.slane %v12402_v7, 5  ;;  %v1825_v35 = vshrl.u32 %v10698_v1, 16  ;;  %v7152_v40 = vcombine.low %v6754_v6, %v10698_v1 }
 0x1b1   :  { %v1197_v30 = vsel %vm8536_vm5, %v1195_v60, %v12401_v14  ;;  %5156 = vrot.lane.b32.xlu0 %v7310_v32, %s8006_s16  ;;  %v1814_v54 = vrot.slane %v1812_v34, 4  ;;  %v5372_v31 = vsel %vm5350_vm8, %v9819_v45, %v4313_v12  ;;  %v5695_v15 = vsel %vm5675_vm14, %v5630_v13, %v5143_v47  ;;  %v6833_v45 = vld [vmem:[%s12345_s0 + $0x108] sm:$0xe] }
 0x1b2   :  { %v7121_v4 = vcombine.low %v1194_v58, %v1197_v30  ;;  %v1190_v57 = vsel %vm8536_vm5, %v1188_v3, %v12403_v22  ;;  %v1817_v24 = vrot.slane %v1815_v36, 5  ;;  %v1842_v51 = vor.u32 %v1841_v11, %v1838_v28  ;;  %7738 = vmatmul.mubr.msk.bf16.gmra.mrb[16].mxu0 %vm5760_vm15, %v5695_v15  ;;  %v4633_v12 = vpop.permute.xlu1 %4632  ;;  %v10749_v30 = vld [vmem:[%s12345_s0 + $0x114] sm:$0xf]  ;;  %v10762_v22 = vld [vmem:[%s12345_s0 + $0x118] sm:$0xf] }
 0x1b3   :  { %v7120_v46 = vcombine.low %v1187_v48, %v1190_v57  ;;  %v1845_v37 = vshll.u32 %v10679_v21, 16  ;;  %v1851_v29 = vrot.slane %v1849_v42, 4  ;;  %v1855_v41 = vshll.u32 %v6801_v61, 16 }
 0x1b4   :  { %4138 = vrot.lane.b32.xlu1 %v7121_v4, %s8000_s13  ;;  %v1818_v43 = vor.u32 %v1817_v24, %v1814_v54  ;;  %v1821_v38 = vshll.u32 %v10698_v1, 16  ;;  %v1827_v20 = vrot.slane %v1825_v35, 4  ;;  %v1843_v44 = vrot.slane %v1842_v51, 4  ;;  %v4475_v13 = vpop.permute.xlu0 %4474  ;;  %v10775_v54 = vld [vmem:[%s12345_s0 + $0x10c] sm:$0xf] }
 0x1b5   :  { %4136 = vrot.lane.b32.xlu0 %v7120_v46, %s8000_s13  ;;  %v1847_v39 = vrot.slane %v1845_v37, 5  ;;  %v1831_v16 = vshll.u32 %v6800_v50, 16  ;;  %v5437_v5 = vsel %vm5415_vm9, %v5372_v31, %v4473_v62  ;;  %v1857_v25 = vrot.slane %v1855_v41, 5  ;;  %v6914_v46 = vld [vmem:[%s12345_s0 + $0x108] sm:$0xf] }
 0x1b6   :  { %v1819_v63 = vrot.slane %v1818_v43, 4  ;;  %v1823_v56 = vrot.slane %v1821_v38, 5  ;;  %v5374_v47 = vsel %vm5350_vm8, %v9814_v2, %v4315_v18  ;;  %v6865_v32 = vrot.slane %v6833_v45, 9  ;;  %v4825_v3 = vpop.permute.xlu1 %4824 }
 0x1b7   :  { %v1848_v23 = vsel %vm8059_vm2, %v1843_v44, %v1847_v39  ;;  %v1852_v49 = vor.u32 %v1851_v29, %v1847_v39  ;;  %v1833_v6 = vrot.slane %v1831_v16, 5  ;;  %v2410_v48 = vrot.slane %v10679_v21, 5  ;;  %v6961_v44 = vld [vmem:[%s12345_s0 + $0x11c] sm:$0x1] }
 0x1b8   :  { %4330 = vrot.lane.b32.xlu1 %v7153_v52, %s8001_s26  ;;  %v1824_v58 = vsel %vm8059_vm2, %v1819_v63, %v1823_v56  ;;  %v1828_v60 = vor.u32 %v1827_v20, %v1823_v56  ;;  %v2413_v2 = vrot.slane %v6801_v61, 5  ;;  %v6864_v11 = vrot.slane %v6832_v10, 9  ;;  %v4635_v62 = vpop.permute.xlu0 %4634  ;;  %v6960_v63 = vld [vmem:[%s12345_s0 + $0x110] sm:$0x1] }
 0x1b9   :  { %4328 = vrot.lane.b32.xlu0 %v7152_v40, %s8001_s26  ;;  %v1853_v28 = vrot.slane %v1852_v49, 4  ;;  %v2403_v42 = vrot.slane %v10698_v1, 5  ;;  %v2406_v14 = vrot.slane %v6800_v50, 5  ;;  %v2411_v34 = vsel %vm8536_vm5, %v6865_v32, %v2410_v48 }
 0x1ba   :  { %v1829_v52 = vrot.slane %v1828_v60, 4  ;;  %v2412_v36 = vrot.slane %v2410_v48, 4  ;;  %v5502_v21 = vsel %vm5480_vm10, %v5437_v5, %v4633_v12  ;;  %v5439_v7 = vsel %vm5415_vm9, %v5374_v47, %v4475_v13  ;;  %v6993_v48 = vld [vmem:[%s12345_s0 + $0x114] sm:$0xe] }
 0x1bb   :  { %v1858_v18 = vsel %vm8059_vm2, %v1853_v28, %v1857_v25  ;;  %v2404_v1 = vsel %vm8536_vm5, %v6864_v11, %v2403_v42  ;;  %v2405_v4 = vrot.slane %v2403_v42, 4  ;;  %v3053_v61 = vshrl.u32 %v10749_v30, 16  ;;  %v4985_v51 = vpop.permute.xlu1 %4984 }
 0x1bc   :  { %v7185_v57 = vcombine.low %v1848_v23, %v1858_v18  ;;  %v1834_v35 = vsel %vm8059_vm2, %v1829_v52, %v1833_v6  ;;  %v2414_v40 = vsel %vm8536_vm5, %v2412_v36, %v2413_v2  ;;  %v3056_v15 = vshll.u32 %v10749_v30, 16  ;;  %v4827_v56 = vpop.permute.xlu0 %4826 }
 0x1bd   :  { %v7184_v24 = vcombine.low %v1824_v58, %v1834_v35  ;;  %v7217_v31 = vcombine.low %v2411_v34, %v2414_v40  ;;  %v2407_v50 = vsel %vm8536_vm5, %v2405_v4, %v2406_v14  ;;  %v3055_v29 = vrot.slane %v3053_v61, 4  ;;  %v6992_v34 = vld [vmem:[%s12345_s0 + $0x108] sm:$0xe] }
 0x1be   :  { %4490 = vrot.lane.b32.xlu1 %v7185_v57, %s8002_s9  ;;  %v7216_v37 = vcombine.low %v2404_v1, %v2407_v50  ;;  %v3066_v41 = vshrl.u32 %v10762_v22, 16  ;;  %v7249_v43 = vcombine.low %v10749_v30, %v10762_v22  ;;  %v3058_v38 = vrot.slane %v3056_v15, 5  ;;  %v948_v50 = vld [vmem:[%s12345_s0 + $0x114] sm:$0xe] }
 0x1bf   :  { %4488 = vrot.lane.b32.xlu0 %v7184_v24, %s8002_s9  ;;  %v3029_v20 = vshrl.u32 %v6914_v46, 16  ;;  %v3032_v45 = vshll.u32 %v6914_v46, 16  ;;  %v3042_v12 = vshrl.u32 %v10775_v54, 16  ;;  %v7248_v39 = vcombine.low %v6914_v46, %v10775_v54  ;;  %v5145_v49 = vpop.permute.xlu1 %5144 }
 0x1c0   :  { %v5567_v16 = vsel %vm5545_vm11, %v5502_v21, %v4825_v3  ;;  %v5504_v5 = vsel %vm5480_vm10, %v5439_v7, %v4635_v62  ;;  %v3062_v25 = vshll.u32 %v10762_v22, 16  ;;  %v3059_v13 = vor.u32 %v3058_v38, %v3055_v29  ;;  %v947_v38 = vld [vmem:[%s12345_s0 + $0x108] sm:$0xe] }
 0x1c1   :  { %v3031_v47 = vrot.slane %v3029_v20, 4  ;;  %v3034_v10 = vrot.slane %v3032_v45, 5  ;;  %v3068_v23 = vrot.slane %v3066_v41, 4  ;;  %v3072_v32 = vshll.u32 %v6961_v44, 16 }
 0x1c2   :  { %4650 = vrot.lane.b32.xlu1 %v7217_v31, %s8003_s15  ;;  %v3064_v6 = vrot.slane %v3062_v25, 5  ;;  %v3038_v58 = vshll.u32 %v10775_v54, 16  ;;  %v3044_v60 = vrot.slane %v3042_v12, 4  ;;  %v3060_v2 = vrot.slane %v3059_v13, 4 }
 0x1c3   :  { %4648 = vrot.lane.b32.xlu0 %v7216_v37, %s8003_s15  ;;  %v3035_v3 = vor.u32 %v3034_v10, %v3031_v47  ;;  %v3048_v28 = vshll.u32 %v6960_v63, 16  ;;  %v5632_v11 = vsel %vm5610_vm12, %v5567_v16, %v4985_v51  ;;  %v3074_v14 = vrot.slane %v3072_v32, 5  ;;  %v10837_v16 = vld [vmem:[%s12345_s0 + $0x120] sm:$0xf]  ;;  %v10848_v10 = vld [vmem:[%s12345_s0 + $0x124] sm:$0xf] }
 0x1c4   :  { %v3069_v42 = vor.u32 %v3068_v23, %v3064_v6  ;;  %v3040_v30 = vrot.slane %v3038_v58, 5  ;;  %v5569_v52 = vsel %vm5545_vm11, %v5504_v5, %v4827_v56  ;;  %v3065_v36 = vsel %vm8059_vm2, %v3060_v2, %v3064_v6  ;;  %v4987_v40 = vpop.permute.xlu0 %4986  ;;  %v7973_v56 = vld [vmem:[%s12345_s0 + $0x118] sm:$0xf]  ;;  %v7974_v6 = vld [vmem:[%s12345_s0 + $0x10c] sm:$0xf] }
 0x1c5   :  { %v3036_v21 = vrot.slane %v3035_v3, 4  ;;  %v3050_v62 = vrot.slane %v3048_v28, 5  ;;  %v7025_v18 = vrot.slane %v6993_v48, 9  ;;  %v4127_v1 = vpop.permute.xlu1 %4126  ;;  %v3627_v57 = vrot.slane %v10762_v22, 5 }
 0x1c6   :  { %4842 = vrot.lane.b32.xlu1 %v7249_v43, %s8004_s20  ;;  %v3070_v4 = vrot.slane %v3069_v42, 4  ;;  %v3045_v7 = vor.u32 %v3044_v60, %v3040_v30  ;;  %v3630_v35 = vrot.slane %v6961_v44, 5  ;;  %v7024_v46 = vrot.slane %v6992_v34, 9  ;;  %v10858_v60 = vld [vmem:[%s12345_s0 + $0x114] sm:$0xf]  ;;  %v12404_v34 = vld [vmem:[#allocation14_spill] sm:$0xff] }
 0x1c7   :  { %4840 = vrot.lane.b32.xlu0 %v7248_v39, %s8004_s20  ;;  %v3041_v61 = vsel %vm8059_vm2, %v3036_v21, %v3040_v30  ;;  %v3620_v24 = vrot.slane %v10775_v54, 5  ;;  %v3623_v31 = vrot.slane %v6960_v63, 5  ;;  %v3628_v22 = vsel %vm8536_vm5, %v7025_v18, %v3627_v57  ;;  %v10872_v30 = vld [vmem:[%s12345_s0 + $0x118] sm:$0xf] }
 0x1c8   :  { %v3075_v15 = vsel %vm8059_vm2, %v3070_v4, %v3074_v14  ;;  %v3046_v51 = vrot.slane %v3045_v7, 4  ;;  %v3629_v37 = vrot.slane %v3627_v57, 4  ;;  %v5697_v54 = vsel %vm5675_vm14, %v5632_v11, %v5145_v49  ;;  %v5147_v39 = vpop.permute.xlu0 %5146  ;;  %v12406_v7 = vld [vmem:[#allocation15_spill] sm:$0xff] }
 0x1c9   :  { %v7281_v29 = vcombine.low %v3065_v36, %v3075_v15  ;;  %v3621_v41 = vsel %vm8536_vm5, %v7024_v46, %v3620_v24  ;;  %v3622_v43 = vrot.slane %v3620_v24, 4  ;;  %v5634_v12 = vsel %vm5610_vm12, %v5569_v52, %v4987_v40  ;;  %7741 = vmatprep.mubr.msk.bf16.mxu0 %vm5760_vm15, %v5697_v54  ;;  %v4319_v13 = vpop.permute.xlu1 %4318  ;;  %v6803_v46 = vld [vmem:[%s12345_s0 + $0x128] sm:$0x1] }
 0x1ca   :  { %v3051_v20 = vsel %vm8059_vm2, %v3046_v51, %v3050_v62  ;;  %v3631_v45 = vsel %vm8536_vm5, %v3629_v37, %v3630_v35  ;;  %v6707_v44 = vrot.slane %v948_v50, 9  ;;  %v1207_v47 = vrot.slane %v7973_v56, 5  ;;  %v6802_v51 = vld [vmem:[%s12345_s0 + $0x11c] sm:$0x1] }
 0x1cb   :  { %5002 = vrot.lane.b32.xlu1 %v7281_v29, %s8005_s28  ;;  %v7280_v5 = vcombine.low %v3041_v61, %v3051_v20  ;;  %v7313_v25 = vcombine.low %v3628_v22, %v3631_v45  ;;  %v3624_v63 = vsel %vm8536_vm5, %v3622_v43, %v3623_v31  ;;  %v6706_v49 = vrot.slane %v947_v38, 9 }
 0x1cc   :  { %v7312_v23 = vcombine.low %v3621_v41, %v3624_v63  ;;  %v1200_v32 = vrot.slane %v7974_v6, 5  ;;  %v5313_v58 = vsel %vm5285_vm7, %v9380_v0, %v4127_v1  ;;  %v1208_v48 = vsel %vm8536_vm5, %v6707_v44, %v1207_v47  ;;  %v4317_v52 = vpop.permute.xlu0 %4316  ;;  %v6835_v44 = vld [vmem:[%s12345_s0 + $0x120] sm:$0xe] }
 0x1cd   :  { %5000 = vrot.lane.b32.xlu0 %v7280_v5, %s8005_s28  ;;  %v1209_v2 = vrot.slane %v1207_v47, 4  ;;  %v5699_v3 = vsel %vm5675_vm14, %v5634_v12, %v5147_v39  ;;  %v1884_v28 = vshrl.u32 %v10837_v16, 16  ;;  %v1887_v0 = vshll.u32 %v10837_v16, 16 }
 0x1ce   :  { %v1201_v11 = vsel %vm8536_vm5, %v6706_v49, %v1200_v32  ;;  %v1202_v42 = vrot.slane %v1200_v32, 4  ;;  %v1897_v14 = vshrl.u32 %v10848_v10, 16  ;;  %7742 = vmatmul.mubr.msk.bf16.gmra.mrb[20].mxu0 %vm5760_vm15, %v5699_v3  ;;  %v12405_v36 = vrot.slane %v12404_v34, 5 }
 0x1cf   :  { %5162 = vrot.lane.b32.xlu1 %v7313_v25, %s8006_s16  ;;  %v1886_v62 = vrot.slane %v1884_v28, 4  ;;  %v7155_v18 = vcombine.low %v10837_v16, %v10848_v10  ;;  %v1860_v1 = vshrl.u32 %v10858_v60, 16  ;;  %v12407_v57 = vrot.slane %v12406_v7, 5  ;;  %v10932_v7 = vld [vmem:[%s12345_s0 + $0x130] sm:$0xf] }
 0x1d0   :  { %v1211_v21 = vsel %vm8536_vm5, %v1209_v2, %v12405_v36  ;;  %v1889_v40 = vrot.slane %v1887_v0, 5  ;;  %v1863_v61 = vshll.u32 %v10858_v60, 16  ;;  %v1873_v50 = vshrl.u32 %v10872_v30, 16  ;;  %v4479_v22 = vpop.permute.xlu1 %4478 }
 0x1d1   :  { %v7123_v4 = vcombine.low %v1208_v48, %v1211_v21  ;;  %v1204_v35 = vsel %vm8536_vm5, %v1202_v42, %v12407_v57  ;;  %5160 = vrot.lane.b32.xlu0 %v7312_v23, %s8006_s16  ;;  %v1862_v31 = vrot.slane %v1860_v1, 4  ;;  %v7154_v15 = vcombine.low %v10858_v60, %v10872_v30  ;;  %v4477_v54 = vpop.permute.xlu0 %4476 }
 0x1d2   :  { %v7122_v24 = vcombine.low %v1201_v11, %v1204_v35  ;;  %v1865_v37 = vrot.slane %v1863_v61, 5  ;;  %v5378_v29 = vsel %vm5350_vm8, %v5313_v58, %v4319_v13  ;;  %v5376_v41 = vsel %vm5350_vm8, %v9869_v17, %v4317_v52  ;;  %v6834_v13 = vld [vmem:[%s12345_s0 + $0x114] sm:$0xe] }
 0x1d3   :  { %v1890_v43 = vor.u32 %v1889_v40, %v1886_v62  ;;  %4142 = vrot.lane.b32.xlu1 %v7123_v4, %s8000_s13  ;;  %v1893_v38 = vshll.u32 %v10848_v10, 16  ;;  %v1899_v20 = vrot.slane %v1897_v14, 4  ;;  %v1903_v45 = vshll.u32 %v6803_v46, 16 }
 0x1d4   :  { %v1869_v12 = vshll.u32 %v10872_v30, 16  ;;  %v1866_v16 = vor.u32 %v1865_v37, %v1862_v31  ;;  %v1875_v5 = vrot.slane %v1873_v50, 4  ;;  %v1879_v25 = vshll.u32 %v6802_v51, 16  ;;  %v4639_v23 = vpop.permute.xlu1 %4638  ;;  %v10947_v31 = vld [vmem:[%s12345_s0 + $0x124] sm:$0xf] }
 0x1d5   :  { %v1891_v39 = vrot.slane %v1890_v43, 4  ;;  %4140 = vrot.lane.b32.xlu0 %v7122_v24, %s8000_s13  ;;  %v1895_v17 = vrot.slane %v1893_v38, 5  ;;  %v1905_v63 = vrot.slane %v1903_v45, 5  ;;  %v5443_v47 = vsel %vm5415_vm9, %v5378_v29, %v4479_v22  ;;  %v4637_v60 = vpop.permute.xlu0 %4636  ;;  %v6918_v24 = vld [vmem:[%s12345_s0 + $0x120] sm:$0xf] }
 0x1d6   :  { %v1871_v56 = vrot.slane %v1869_v12, 5  ;;  %v1867_v49 = vrot.slane %v1866_v16, 4  ;;  %v1881_v6 = vrot.slane %v1879_v25, 5  ;;  %v5441_v32 = vsel %vm5415_vm9, %v5376_v41, %v4477_v54  ;;  %v6963_v12 = vld [vmem:[%s12345_s0 + $0x134] sm:$0x1] }
 0x1d7   :  { %v6867_v58 = vrot.slane %v6835_v44, 9  ;;  %4334 = vrot.lane.b32.xlu1 %v7155_v18, %s8001_s26  ;;  %v1896_v48 = vsel %vm8059_vm2, %v1891_v39, %v1895_v17  ;;  %v1900_v2 = vor.u32 %v1899_v20, %v1895_v17  ;;  %v2424_v28 = vrot.slane %v10848_v10, 5  ;;  %v10964_v25 = vld [vmem:[%s12345_s0 + $0x128] sm:$0x1] }
 0x1d8   :  { %v1876_v3 = vor.u32 %v1875_v5, %v1871_v56  ;;  %v1872_v11 = vsel %vm8059_vm2, %v1867_v49, %v1871_v56  ;;  %v2427_v42 = vrot.slane %v6803_v46, 5  ;;  %v6866_v0 = vrot.slane %v6834_v13, 9  ;;  %v4831_v62 = vpop.permute.xlu1 %4830 }
 0x1d9   :  { %v2417_v14 = vrot.slane %v10872_v30, 5  ;;  %4332 = vrot.lane.b32.xlu0 %v7154_v15, %s8001_s26  ;;  %v1901_v52 = vrot.slane %v1900_v2, 4  ;;  %v2425_v36 = vsel %vm8536_vm5, %v6867_v58, %v2424_v28  ;;  %v2426_v21 = vrot.slane %v2424_v28, 4  ;;  %v6920_v30 = vld [vmem:[%s12345_s0 + $0x12c] sm:$0xf]  ;;  %v4829_v57 = vpop.permute.xlu0 %4828 }
 0x1da   :  { %v1877_v34 = vrot.slane %v1876_v3, 4  ;;  %v2420_v1 = vrot.slane %v6802_v51, 5  ;;  %v5508_v4 = vsel %vm5480_vm10, %v5443_v47, %v4639_v23  ;;  %v5506_v46 = vsel %vm5480_vm10, %v5441_v32, %v4637_v60  ;;  %v6995_v28 = vld [vmem:[%s12345_s0 + $0x12c] sm:$0xe] }
 0x1db   :  { %v2418_v18 = vsel %vm8536_vm5, %v6866_v0, %v2417_v14  ;;  %v2419_v10 = vrot.slane %v2417_v14, 4  ;;  %v1906_v35 = vsel %vm8059_vm2, %v1901_v52, %v1905_v63  ;;  %v2428_v61 = vsel %vm8536_vm5, %v2426_v21, %v2427_v42  ;;  %v6994_v52 = vld [vmem:[%s12345_s0 + $0x120] sm:$0xe] }
 0x1dc   :  { %v1882_v40 = vsel %vm8059_vm2, %v1877_v34, %v1881_v6  ;;  %v7187_v50 = vcombine.low %v1896_v48, %v1906_v35  ;;  %v7219_v51 = vcombine.low %v2425_v36, %v2428_v61  ;;  %v3101_v29 = vshrl.u32 %v6920_v30, 16 }
 0x1dd   :  { %v7186_v15 = vcombine.low %v1872_v11, %v1882_v40  ;;  %v2421_v22 = vsel %vm8536_vm5, %v2419_v10, %v2420_v1  ;;  %v3104_v41 = vshll.u32 %v6920_v30, 16  ;;  %v3114_v43 = vshrl.u32 %v10932_v7, 16 }
 0x1de   :  { %v7218_v37 = vcombine.low %v2418_v18, %v2421_v22  ;;  %4494 = vrot.lane.b32.xlu1 %v7187_v50, %s8002_s9  ;;  %v7251_v54 = vcombine.low %v6920_v30, %v10932_v7  ;;  %v3077_v38 = vshrl.u32 %v6918_v24, 16  ;;  %v3080_v20 = vshll.u32 %v6918_v24, 16  ;;  %v4991_v17 = vpop.permute.xlu1 %4990 }
 0x1df   :  { %4492 = vrot.lane.b32.xlu0 %v7186_v15, %s8002_s9  ;;  %v3090_v45 = vshrl.u32 %v10947_v31, 16  ;;  %v3103_v44 = vrot.slane %v3101_v29, 4  ;;  %v3106_v39 = vrot.slane %v3104_v41, 5  ;;  %v7250_v16 = vcombine.low %v6918_v24, %v10947_v31  ;;  %v4989_v23 = vpop.permute.xlu0 %4988 }
 0x1e0   :  { %v5573_v5 = vsel %vm5545_vm11, %v5508_v4, %v4831_v62  ;;  %v3079_v63 = vrot.slane %v3077_v38, 4  ;;  %v3082_v56 = vrot.slane %v3080_v20, 5  ;;  %v5571_v47 = vsel %vm5545_vm11, %v5506_v46, %v4829_v57 }
 0x1e1   :  { %v3110_v13 = vshll.u32 %v10932_v7, 16  ;;  %v3107_v49 = vor.u32 %v3106_v39, %v3103_v44  ;;  %v3116_v6 = vrot.slane %v3114_v43, 4  ;;  %v3120_v32 = vshll.u32 %v6963_v12, 16  ;;  %v11011_v44 = vld [vmem:[%s12345_s0 + $0x138] sm:$0xf] }
 0x1e2   :  { %v3086_v58 = vshll.u32 %v10947_v31, 16  ;;  %4654 = vrot.lane.b32.xlu1 %v7219_v51, %s8003_s15  ;;  %v3083_v48 = vor.u32 %v3082_v56, %v3079_v63  ;;  %v3092_v2 = vrot.slane %v3090_v45, 4  ;;  %v3096_v3 = vshll.u32 %v10964_v25, 16  ;;  %v5151_v34 = vpop.permute.xlu1 %5150 }
 0x1e3   :  { %4652 = vrot.lane.b32.xlu0 %v7218_v37, %s8003_s15  ;;  %v3112_v60 = vrot.slane %v3110_v13, 5  ;;  %v3108_v11 = vrot.slane %v3107_v49, 4  ;;  %v3122_v42 = vrot.slane %v3120_v32, 5  ;;  %v5638_v14 = vsel %vm5610_vm12, %v5573_v5, %v4991_v17  ;;  %v5149_v10 = vpop.permute.xlu0 %5148  ;;  %v7975_v17 = vld [vmem:[%s12345_s0 + $0x130] sm:$0xf] }
 0x1e4   :  { %v3088_v0 = vrot.slane %v3086_v58, 5  ;;  %v3084_v21 = vrot.slane %v3083_v48, 4  ;;  %v3098_v62 = vrot.slane %v3096_v3, 5  ;;  %v5636_v18 = vsel %vm5610_vm12, %v5571_v47, %v4989_v23  ;;  %v7976_v47 = vld [vmem:[%s12345_s0 + $0x124] sm:$0xf] }
 0x1e5   :  { %v3117_v36 = vor.u32 %v3116_v6, %v3112_v60  ;;  %v3113_v1 = vsel %vm8059_vm2, %v3108_v11, %v3112_v60  ;;  %v7027_v30 = vrot.slane %v6995_v28, 9  ;;  %v3641_v57 = vrot.slane %v10932_v7, 5  ;;  %v950_v7 = vld [vmem:[%s12345_s0 + $0x12c] sm:$0xe]  ;;  %v11026_v49 = vld [vmem:[%s12345_s0 + $0x13c] sm:$0xf] }
 0x1e6   :  { %v3093_v4 = vor.u32 %v3092_v2, %v3088_v0  ;;  %4846 = vrot.lane.b32.xlu1 %v7251_v54, %s8004_s20  ;;  %v3089_v40 = vsel %vm8059_vm2, %v3084_v21, %v3088_v0  ;;  %v3644_v61 = vrot.slane %v6963_v12, 5  ;;  %v7026_v46 = vrot.slane %v6994_v52, 9  ;;  %v4131_v22 = vpop.permute.xlu1 %4130  ;;  %v949_v54 = vld [vmem:[%s12345_s0 + $0x120] sm:$0xe] }
 0x1e7   :  { %4844 = vrot.lane.b32.xlu0 %v7250_v16, %s8004_s20  ;;  %v3118_v35 = vrot.slane %v3117_v36, 4  ;;  %v3642_v50 = vsel %vm8536_vm5, %v7027_v30, %v3641_v57  ;;  %v3643_v15 = vrot.slane %v3641_v57, 4  ;;  %v3634_v51 = vrot.slane %v10947_v31, 5  ;;  %v4129_v38 = vpop.permute.xlu0 %4128  ;;  %v12408_v36 = vld [vmem:[#allocation3_spill] sm:$0xff]  ;;  %v12410_v30 = vld [vmem:[#allocation4_spill] sm:$0xff] }
 0x1e8   :  { %v3094_v24 = vrot.slane %v3093_v4, 4  ;;  %v3637_v29 = vrot.slane %v10964_v25, 5  ;;  %v5703_v41 = vsel %vm5675_vm14, %v5638_v14, %v5151_v34  ;;  %v5701_v43 = vsel %vm5675_vm14, %v5636_v18, %v5149_v10 }
 0x1e9   :  { %v3123_v37 = vsel %vm8059_vm2, %v3118_v35, %v3122_v42  ;;  %v3645_v45 = vsel %vm8536_vm5, %v3643_v15, %v3644_v61  ;;  %v3635_v12 = vsel %vm8536_vm5, %v7026_v46, %v3634_v51  ;;  %7745 = vmatprep.mubr.msk.bf16.mxu0 %vm5760_vm15, %v5701_v43  ;;  %v3636_v5 = vrot.slane %v3634_v51, 4  ;;  %v6805_v46 = vld [vmem:[%s12345_s0 + $0x140] sm:$0x1] }
 0x1ea   :  { %v7283_v31 = vcombine.low %v3113_v1, %v3123_v37  ;;  %v3099_v20 = vsel %vm8059_vm2, %v3094_v24, %v3098_v62  ;;  %v7315_v16 = vcombine.low %v3642_v50, %v3645_v45  ;;  %v6709_v25 = vrot.slane %v950_v7, 9  ;;  %7746 = vmatmul.mubr.msk.bf16.gmra.mrb[24].mxu0 %vm5760_vm15, %v5703_v41  ;;  %v4323_v6 = vpop.permute.xlu1 %4322  ;;  %v6804_v7 = vld [vmem:[%s12345_s0 + $0x134] sm:$0x1] }
 0x1eb   :  { %v7282_v39 = vcombine.low %v3089_v40, %v3099_v20  ;;  %v1221_v63 = vrot.slane %v7975_v17, 5  ;;  %v6708_v56 = vrot.slane %v949_v54, 9  ;;  %v1214_v13 = vrot.slane %v7976_v47, 5  ;;  %v4321_v2 = vpop.permute.xlu0 %4320  ;;  %v6836_v47 = vld [vmem:[%s12345_s0 + $0x12c] sm:$0xe] }
 0x1ec   :  { %5006 = vrot.lane.b32.xlu1 %v7283_v31, %s8005_s28  ;;  %v5317_v23 = vsel %vm5285_vm7, %v9417_v8, %v4131_v22  ;;  %v3638_v32 = vsel %vm8536_vm5, %v3636_v5, %v3637_v29  ;;  %v5315_v58 = vsel %vm5285_vm7, %v9436_v9, %v4129_v38  ;;  %v1932_v60 = vshrl.u32 %v11011_v44, 16  ;;  %v6762_v8 = vld [vmem:[%s12345_s0 + $0x12c] sm:$0xf]  ;;  %v11045_v9 = vld [vmem:[%s12345_s0 + $0x130] sm:$0xf] }
 0x1ed   :  { %5004 = vrot.lane.b32.xlu0 %v7282_v39, %s8005_s28  ;;  %v1935_v48 = vshll.u32 %v11011_v44, 16  ;;  %v7314_v3 = vcombine.low %v3635_v12, %v3638_v32  ;;  %v1222_v28 = vsel %vm8536_vm5, %v6709_v25, %v1221_v63  ;;  %v1223_v11 = vrot.slane %v1221_v63, 4  ;;  %v6837_v12 = vld [vmem:[%s12345_s0 + $0x138] sm:$0xe] }
 0x1ee   :  { %v1215_v42 = vsel %vm8536_vm5, %v6708_v56, %v1214_v13  ;;  %v1216_v0 = vrot.slane %v1214_v13, 4  ;;  %v1934_v14 = vrot.slane %v1932_v60, 4  ;;  %v1945_v34 = vshrl.u32 %v11026_v49, 16 }
 0x1ef   :  { %v1937_v52 = vrot.slane %v1935_v48, 5  ;;  %v12409_v21 = vrot.slane %v12408_v36, 5  ;;  %v7157_v18 = vcombine.low %v11011_v44, %v11026_v49  ;;  %v1908_v10 = vshrl.u32 %v6762_v8, 16 }
 0x1f0   :  { %5166 = vrot.lane.b32.xlu1 %v7315_v16, %s8006_s16  ;;  %v1911_v1 = vshll.u32 %v6762_v8, 16  ;;  %v12411_v57 = vrot.slane %v12410_v30, 5  ;;  %v1921_v40 = vshrl.u32 %v11045_v9, 16  ;;  %v7156_v61 = vcombine.low %v6762_v8, %v11045_v9  ;;  %v4483_v22 = vpop.permute.xlu1 %4482 }
 0x1f1   :  { %v1225_v62 = vsel %vm8536_vm5, %v1223_v11, %v12409_v21  ;;  %5164 = vrot.lane.b32.xlu0 %v7314_v3, %s8006_s16  ;;  %v1910_v50 = vrot.slane %v1908_v10, 4  ;;  %v5382_v51 = vsel %vm5350_vm8, %v5317_v23, %v4323_v6  ;;  %v5380_v37 = vsel %vm5350_vm8, %v5315_v58, %v4321_v2  ;;  %v4481_v54 = vpop.permute.xlu0 %4480 }
 0x1f2   :  { %v7125_v4 = vcombine.low %v1222_v28, %v1225_v62  ;;  %v1218_v35 = vsel %vm8536_vm5, %v1216_v0, %v12411_v57  ;;  %v1913_v15 = vrot.slane %v1911_v1, 5  ;;  %v1938_v29 = vor.u32 %v1937_v52, %v1934_v14  ;;  %v11093_v14 = vld [vmem:[%s12345_s0 + $0x144] sm:$0xf]  ;;  %v11106_v1 = vld [vmem:[%s12345_s0 + $0x148] sm:$0xf] }
 0x1f3   :  { %v7124_v24 = vcombine.low %v1215_v42, %v1218_v35  ;;  %v1941_v41 = vshll.u32 %v11026_v49, 16  ;;  %v1947_v43 = vrot.slane %v1945_v34, 4  ;;  %v1951_v38 = vshll.u32 %v6805_v46, 16 }
 0x1f4   :  { %4146 = vrot.lane.b32.xlu1 %v7125_v4, %s8000_s13  ;;  %v1914_v31 = vor.u32 %v1913_v15, %v1910_v50  ;;  %v1917_v20 = vshll.u32 %v11045_v9, 16  ;;  %v1923_v45 = vrot.slane %v1921_v40, 4  ;;  %v1939_v44 = vrot.slane %v1938_v29, 4  ;;  %v4643_v13 = vpop.permute.xlu1 %4642 }
 0x1f5   :  { %4144 = vrot.lane.b32.xlu0 %v7124_v24, %s8000_s13  ;;  %v1943_v39 = vrot.slane %v1941_v41, 5  ;;  %v1927_v16 = vshll.u32 %v6804_v7, 16  ;;  %v5447_v5 = vsel %vm5415_vm9, %v5382_v51, %v4483_v22  ;;  %v1953_v25 = vrot.slane %v1951_v38, 5  ;;  %v4641_v60 = vpop.permute.xlu0 %4640 }
 0x1f6   :  { %v1915_v17 = vrot.slane %v1914_v31, 4  ;;  %v1919_v63 = vrot.slane %v1917_v20, 5  ;;  %v5445_v56 = vsel %vm5415_vm9, %v5380_v37, %v4481_v54  ;;  %v6869_v58 = vrot.slane %v6837_v12, 9  ;;  %v6965_v31 = vld [vmem:[%s12345_s0 + $0x14c] sm:$0x1] }
 0x1f7   :  { %v1944_v23 = vsel %vm8059_vm2, %v1939_v44, %v1943_v39  ;;  %v1948_v6 = vor.u32 %v1947_v43, %v1943_v39  ;;  %v1929_v32 = vrot.slane %v1927_v16, 5  ;;  %v2438_v2 = vrot.slane %v11026_v49, 5  ;;  %v6964_v16 = vld [vmem:[%s12345_s0 + $0x140] sm:$0x1] }
 0x1f8   :  { %4338 = vrot.lane.b32.xlu1 %v7157_v18, %s8001_s26  ;;  %v1920_v48 = vsel %vm8059_vm2, %v1915_v17, %v1919_v63  ;;  %v1924_v8 = vor.u32 %v1923_v45, %v1919_v63  ;;  %v2441_v3 = vrot.slane %v6805_v46, 5  ;;  %v6868_v11 = vrot.slane %v6836_v47, 9  ;;  %v4835_v21 = vpop.permute.xlu1 %4834  ;;  %v11119_v46 = vld [vmem:[%s12345_s0 + $0x13c] sm:$0xf] }
 0x1f9   :  { %4336 = vrot.lane.b32.xlu0 %v7156_v61, %s8001_s26  ;;  %v1949_v28 = vrot.slane %v1948_v6, 4  ;;  %v2431_v42 = vrot.slane %v11045_v9, 5  ;;  %v2434_v0 = vrot.slane %v6804_v7, 5  ;;  %v2439_v34 = vsel %vm8536_vm5, %v6869_v58, %v2438_v2  ;;  %v4833_v4 = vpop.permute.xlu0 %4832  ;;  %v6922_v61 = vld [vmem:[%s12345_s0 + $0x138] sm:$0xf] }
 0x1fa   :  { %v1925_v52 = vrot.slane %v1924_v8, 4  ;;  %v2440_v36 = vrot.slane %v2438_v2, 4  ;;  %v5512_v49 = vsel %vm5480_vm10, %v5447_v5, %v4643_v13  ;;  %v5510_v10 = vsel %vm5480_vm10, %v5445_v56, %v4641_v60 }
 0x1fb   :  { %v1954_v62 = vsel %vm8059_vm2, %v1949_v28, %v1953_v25  ;;  %v2432_v9 = vsel %vm8536_vm5, %v6868_v11, %v2431_v42  ;;  %v2433_v18 = vrot.slane %v2431_v42, 4  ;;  %v3149_v40 = vshrl.u32 %v11093_v14, 16 }
 0x1fc   :  { %v7189_v30 = vcombine.low %v1944_v23, %v1954_v62  ;;  %v1930_v57 = vsel %vm8059_vm2, %v1925_v52, %v1929_v32  ;;  %v2442_v35 = vsel %vm8536_vm5, %v2440_v36, %v2441_v3  ;;  %v3152_v51 = vshll.u32 %v11093_v14, 16  ;;  %v6997_v32 = vld [vmem:[%s12345_s0 + $0x144] sm:$0xe] }
 0x1fd   :  { %v7188_v24 = vcombine.low %v1920_v48, %v1930_v57  ;;  %v7221_v50 = vcombine.low %v2439_v34, %v2442_v35  ;;  %v2435_v15 = vsel %vm8536_vm5, %v2433_v18, %v2434_v0  ;;  %v3151_v22 = vrot.slane %v3149_v40, 4  ;;  %v4995_v20 = vpop.permute.xlu1 %4994  ;;  %v6996_v0 = vld [vmem:[%s12345_s0 + $0x138] sm:$0xe]  ;;  %v952_v35 = vld [vmem:[%s12345_s0 + $0x144] sm:$0xe] }
 0x1fe   :  { %4498 = vrot.lane.b32.xlu1 %v7189_v30, %s8002_s9  ;;  %v7220_v7 = vcombine.low %v2432_v9, %v2435_v15  ;;  %v3162_v37 = vshrl.u32 %v11106_v1, 16  ;;  %v7253_v29 = vcombine.low %v11093_v14, %v11106_v1  ;;  %v3154_v41 = vrot.slane %v3152_v51, 5 }
 0x1ff   :  { %4496 = vrot.lane.b32.xlu0 %v7188_v24, %s8002_s9  ;;  %v3125_v43 = vshrl.u32 %v6922_v61, 16  ;;  %v3128_v54 = vshll.u32 %v6922_v61, 16  ;;  %v3138_v38 = vshrl.u32 %v11119_v46, 16  ;;  %v7252_v45 = vcombine.low %v6922_v61, %v11119_v46  ;;  %v4993_v56 = vpop.permute.xlu0 %4992 }
 0x200   :  { %v5577_v12 = vsel %vm5545_vm11, %v5512_v49, %v4835_v21  ;;  %v5575_v44 = vsel %vm5545_vm11, %v5510_v10, %v4833_v4  ;;  %v3158_v39 = vshll.u32 %v11106_v1, 16  ;;  %v3155_v17 = vor.u32 %v3154_v41, %v3151_v22  ;;  %v951_v22 = vld [vmem:[%s12345_s0 + $0x138] sm:$0xe] }
 0x201   :  { %v3127_v5 = vrot.slane %v3125_v43, 4  ;;  %v3130_v25 = vrot.slane %v3128_v54, 5  ;;  %v3164_v63 = vrot.slane %v3162_v37, 4  ;;  %v3168_v13 = vshll.u32 %v6965_v31, 16  ;;  %v5155_v2 = vpop.permute.xlu1 %5154 }
 0x202   :  { %4658 = vrot.lane.b32.xlu1 %v7221_v50, %s8003_s15  ;;  %v3160_v47 = vrot.slane %v3158_v39, 5  ;;  %v3134_v23 = vshll.u32 %v11119_v46, 16  ;;  %v3140_v6 = vrot.slane %v3138_v38, 4  ;;  %v3156_v58 = vrot.slane %v3155_v17, 4  ;;  %v11180_v38 = vld [vmem:[%s12345_s0 + $0x150] sm:$0xf] }
 0x203   :  { %4656 = vrot.lane.b32.xlu0 %v7220_v7, %s8003_s15  ;;  %v3131_v60 = vor.u32 %v3130_v25, %v3127_v5  ;;  %v3144_v48 = vshll.u32 %v6964_v16, 16  ;;  %v5642_v8 = vsel %vm5610_vm12, %v5577_v12, %v4995_v20  ;;  %v3170_v28 = vrot.slane %v3168_v13, 5  ;;  %v5153_v49 = vpop.permute.xlu0 %5152  ;;  %v7977_v12 = vld [vmem:[%s12345_s0 + $0x148] sm:$0xf]  ;;  %v7978_v17 = vld [vmem:[%s12345_s0 + $0x13c] sm:$0xf] }
 0x204   :  { %v3165_v3 = vor.u32 %v3164_v63, %v3160_v47  ;;  %v3136_v11 = vrot.slane %v3134_v23, 5  ;;  %v5640_v42 = vsel %vm5610_vm12, %v5575_v44, %v4993_v56  ;;  %v3161_v14 = vsel %vm8059_vm2, %v3156_v58, %v3160_v47  ;;  %v11203_v56 = vld [vmem:[%s12345_s0 + $0x154] sm:$0xf] }
 0x205   :  { %v3132_v52 = vrot.slane %v3131_v60, 4  ;;  %v3146_v34 = vrot.slane %v3144_v48, 5  ;;  %v7029_v36 = vrot.slane %v6997_v32, 9  ;;  %v3655_v9 = vrot.slane %v11106_v1, 5  ;;  %v4135_v40 = vpop.permute.xlu1 %4134 }
 0x206   :  { %4850 = vrot.lane.b32.xlu1 %v7253_v29, %s8004_s20  ;;  %v3166_v21 = vrot.slane %v3165_v3, 4  ;;  %v3141_v62 = vor.u32 %v3140_v6, %v3136_v11  ;;  %v3658_v18 = vrot.slane %v6965_v31, 5  ;;  %v7028_v4 = vrot.slane %v6996_v0, 9 }
 0x207   :  { %4848 = vrot.lane.b32.xlu0 %v7252_v45, %s8004_s20  ;;  %v3137_v10 = vsel %vm8059_vm2, %v3132_v52, %v3136_v11  ;;  %v3648_v30 = vrot.slane %v11119_v46, 5  ;;  %v3651_v57 = vrot.slane %v6964_v16, 5  ;;  %v3656_v1 = vsel %vm8536_vm5, %v7029_v36, %v3655_v9  ;;  %v4133_v37 = vpop.permute.xlu0 %4132 }
 0x208   :  { %v3171_v61 = vsel %vm8059_vm2, %v3166_v21, %v3170_v28  ;;  %v3142_v24 = vrot.slane %v3141_v62, 4  ;;  %v3657_v50 = vrot.slane %v3655_v9, 4  ;;  %v5707_v46 = vsel %vm5675_vm14, %v5642_v8, %v5155_v2  ;;  %v6767_v8 = vld [vmem:[%s12345_s0 + $0x148] sm:$0xf]  ;;  %v12413_v2 = vld [vmem:[#allocation5_spill] sm:$0xff] }
 0x209   :  { %v7285_v15 = vcombine.low %v3161_v14, %v3171_v61  ;;  %v3649_v51 = vsel %vm8536_vm5, %v7028_v4, %v3648_v30  ;;  %v3650_v7 = vrot.slane %v3648_v30, 4  ;;  %v5705_v43 = vsel %vm5675_vm14, %v5640_v42, %v5153_v49  ;;  %v6807_v49 = vld [vmem:[%s12345_s0 + $0x158] sm:$0x1] }
 0x20a   :  { %v3147_v29 = vsel %vm8059_vm2, %v3142_v24, %v3146_v34  ;;  %v3659_v41 = vsel %vm8536_vm5, %v3657_v50, %v3658_v18  ;;  %v6711_v54 = vrot.slane %v952_v35, 9  ;;  %v1235_v44 = vrot.slane %v7977_v12, 5  ;;  %7749 = vmatprep.mubr.msk.bf16.mxu0 %vm5760_vm15, %v5705_v43 }
 0x20b   :  { %5010 = vrot.lane.b32.xlu1 %v7285_v15, %s8005_s28  ;;  %v7284_v31 = vcombine.low %v3137_v10, %v3147_v29  ;;  %v7317_v20 = vcombine.low %v3656_v1, %v3659_v41  ;;  %v3652_v45 = vsel %vm8536_vm5, %v3650_v7, %v3651_v57  ;;  %v12412_v39 = vcombine.low %v9607_v53, %v9612_v27  ;;  %v11208_v53 = vld [vmem:[%s12345_s0 + $0x144] sm:$0xf]  ;;  %v4325_v6 = vpop.permute.xlu0 %4324  ;;  %v6806_v10 = vld [vmem:[%s12345_s0 + $0x14c] sm:$0x1] }
 0x20c   :  { %v7316_v5 = vcombine.low %v3649_v51, %v3652_v45  ;;  %v6710_v25 = vrot.slane %v951_v22, 9  ;;  %v1228_v63 = vrot.slane %v7978_v17, 5  ;;  %7750 = vmatmul.mubr.msk.bf16.gmra.mrb[28].mxu0 %vm5760_vm15, %v5707_v46  ;;  %v1236_v27 = vsel %vm8536_vm5, %v6711_v54, %v1235_v44  ;;  %v6839_v51 = vld [vmem:[%s12345_s0 + $0x150] sm:$0xe] }
 0x20d   :  { %v11194_v16 = vsel %vm5188_vm6, %v12412_v39, %v9311_v33  ;;  %v4327_v33 = vpop.permute.xlu1 %4326  ;;  %5008 = vrot.lane.b32.xlu0 %v7284_v31, %s8005_s28  ;;  %v1237_v47 = vrot.slane %v1235_v44, 4  ;;  %v5321_v13 = vsel %vm5285_vm7, %v9467_v19, %v4135_v40  ;;  %v1980_v23 = vshrl.u32 %v11180_v38, 16 }
 0x20e   :  { %v1229_v32 = vsel %vm8536_vm5, %v6710_v25, %v1228_v63  ;;  %v1230_v58 = vrot.slane %v1228_v63, 4  ;;  %v5319_v60 = vsel %vm5285_vm7, %v9486_v55, %v4133_v37  ;;  %v1983_v48 = vshll.u32 %v11180_v38, 16  ;;  %v12415_v55 = vld [vmem:[#allocation6_spill] sm:$0xff] }
 0x20f   :  { %5170 = vrot.lane.b32.xlu1 %v7317_v20, %s8006_s16  ;;  %v12414_v19 = vrot.slane %v12413_v2, 5  ;;  %v1982_v28 = vrot.slane %v1980_v23, 4  ;;  %v1993_v11 = vshrl.u32 %v11203_v56, 16  ;;  %v1956_v42 = vshrl.u32 %v11208_v53, 16  ;;  %v11278_v2 = vld [vmem:[%s12345_s0 + $0x160] sm:$0xf] }
 0x210   :  { %v12416_v14 = vrot.slane %v12415_v55, 5  ;;  %v1985_v34 = vrot.slane %v1983_v48, 5  ;;  %v1959_v36 = vshll.u32 %v11208_v53, 16  ;;  %v7159_v62 = vcombine.low %v11180_v38, %v11203_v56  ;;  %v6838_v38 = vld [vmem:[%s12345_s0 + $0x144] sm:$0xe] }
 0x211   :  { %v1239_v3 = vsel %vm8536_vm5, %v1237_v47, %v12414_v19  ;;  %5168 = vrot.lane.b32.xlu0 %v7316_v5, %s8006_s16  ;;  %v1958_v9 = vrot.slane %v1956_v42, 4  ;;  %v1969_v18 = vshrl.u32 %v6767_v8, 16  ;;  %v7158_v30 = vcombine.low %v11208_v53, %v6767_v8  ;;  %v4487_v40 = vpop.permute.xlu1 %4486  ;;  %v4485_v61 = vpop.permute.xlu0 %4484  ;;  %v6926_v55 = vld [vmem:[%s12345_s0 + $0x150] sm:$0xf] }
 0x212   :  { %v7127_v0 = vcombine.low %v1236_v27, %v1239_v3  ;;  %v1232_v52 = vsel %vm8536_vm5, %v1230_v58, %v12416_v14  ;;  %v1961_v4 = vrot.slane %v1959_v36, 5  ;;  %v5386_v57 = vsel %vm5350_vm8, %v5321_v13, %v4327_v33  ;;  %v11293_v14 = vld [vmem:[%s12345_s0 + $0x154] sm:$0xf] }
 0x213   :  { %v7126_v21 = vcombine.low %v1229_v32, %v1232_v52  ;;  %v1986_v35 = vor.u32 %v1985_v34, %v1982_v28  ;;  %v1989_v24 = vshll.u32 %v11203_v56, 16  ;;  %v1995_v1 = vrot.slane %v1993_v11, 4 }
 0x214   :  { %4150 = vrot.lane.b32.xlu1 %v7127_v0, %s8000_s13  ;;  %v1999_v50 = vshll.u32 %v6807_v49, 16  ;;  %v1965_v15 = vshll.u32 %v6767_v8, 16  ;;  %v1962_v46 = vor.u32 %v1961_v4, %v1958_v9  ;;  %v1971_v22 = vrot.slane %v1969_v18, 4 }
 0x215   :  { %v1987_v7 = vrot.slane %v1986_v35, 4  ;;  %v1975_v37 = vshll.u32 %v6806_v10, 16  ;;  %4148 = vrot.lane.b32.xlu0 %v7126_v21, %s8000_s13  ;;  %v5384_v29 = vsel %vm5350_vm8, %v5319_v60, %v4325_v6  ;;  %v1991_v41 = vrot.slane %v1989_v24, 5  ;;  %v4647_v44 = vpop.permute.xlu1 %4646  ;;  %v4645_v39 = vpop.permute.xlu0 %4644  ;;  %v11307_v35 = vld [vmem:[%s12345_s0 + $0x164] sm:$0x1] }
 0x216   :  { %v2001_v43 = vrot.slane %v1999_v50, 5  ;;  %v1967_v54 = vrot.slane %v1965_v15, 5  ;;  %v1963_v31 = vrot.slane %v1962_v46, 4  ;;  %v5451_v45 = vsel %vm5415_vm9, %v5386_v57, %v4487_v40  ;;  %v11315_v50 = vld [vmem:[%s12345_s0 + $0x158] sm:$0x1] }
 0x217   :  { %v1977_v20 = vrot.slane %v1975_v37, 5  ;;  %v6871_v12 = vrot.slane %v6839_v51, 9  ;;  %v1996_v5 = vor.u32 %v1995_v1, %v1991_v41  ;;  %v5449_v17 = vsel %vm5415_vm9, %v5384_v29, %v4485_v61 }
 0x218   :  { %4342 = vrot.lane.b32.xlu1 %v7159_v62, %s8001_s26  ;;  %v1972_v25 = vor.u32 %v1971_v22, %v1967_v54  ;;  %v2452_v63 = vrot.slane %v11203_v56, 5  ;;  %v1992_v53 = vsel %vm8059_vm2, %v1987_v7, %v1991_v41  ;;  %v2455_v33 = vrot.slane %v6807_v49, 5 }
 0x219   :  { %v6870_v27 = vrot.slane %v6838_v38, 9  ;;  %v2445_v47 = vrot.slane %v6767_v8, 5  ;;  %4340 = vrot.lane.b32.xlu0 %v7158_v30, %s8001_s26  ;;  %v1997_v13 = vrot.slane %v1996_v5, 4  ;;  %v1968_v23 = vsel %vm8059_vm2, %v1963_v31, %v1967_v54  ;;  %v11273_v8 = vld [vmem:[%s12345_s0 + $0x15c] sm:$0xf]  ;;  %v4839_v19 = vpop.permute.xlu1 %4838  ;;  %v4837_v3 = vpop.permute.xlu0 %4836 }
 0x21a   :  { %v1973_v6 = vrot.slane %v1972_v25, 4  ;;  %v2454_v32 = vrot.slane %v2452_v63, 4  ;;  %v2453_v58 = vsel %vm8536_vm5, %v6871_v12, %v2452_v63  ;;  %v2448_v48 = vrot.slane %v6806_v10, 5  ;;  %v6999_v5 = vld [vmem:[%s12345_s0 + $0x15c] sm:$0xe] }
 0x21b   :  { %v2446_v56 = vsel %vm8536_vm5, %v6870_v27, %v2445_v47  ;;  %v2447_v60 = vrot.slane %v2445_v47, 4  ;;  %v2002_v28 = vsel %vm8059_vm2, %v1997_v13, %v2001_v43  ;;  %v5516_v0 = vsel %vm5480_vm10, %v5451_v45, %v4647_v44  ;;  %v6998_v27 = vld [vmem:[%s12345_s0 + $0x150] sm:$0xe] }
 0x21c   :  { %v1978_v11 = vsel %vm8059_vm2, %v1973_v6, %v1977_v20  ;;  %v2456_v42 = vsel %vm8536_vm5, %v2454_v32, %v2455_v33  ;;  %v7191_v52 = vcombine.low %v1992_v53, %v2002_v28  ;;  %v5514_v49 = vsel %vm5480_vm10, %v5449_v17, %v4645_v39  ;;  %v11317_v51 = vpop.f32.mrb[0].mxu0 }
 0x21d   :  { %v7190_v34 = vcombine.low %v1968_v23, %v1978_v11  ;;  %v2449_v36 = vsel %vm8536_vm5, %v2447_v60, %v2448_v48  ;;  %v7223_v21 = vcombine.low %v2453_v58, %v2456_v42  ;;  %v3197_v62 = vshrl.u32 %v11273_v8, 16  ;;  %v11321_v41 = vpop.f32.mrb[1].mxu0 }
 0x21e   :  { %v3200_v9 = vshll.u32 %v11273_v8, 16  ;;  %v3210_v18 = vshrl.u32 %v11278_v2, 16  ;;  %4502 = vrot.lane.b32.xlu1 %v7191_v52, %s8002_s9  ;;  %v7222_v10 = vcombine.low %v2446_v56, %v2449_v36  ;;  %v3173_v4 = vshrl.u32 %v6926_v55, 16  ;;  %v4999_v15 = vpop.permute.xlu1 %4998  ;;  %v11325_v20 = vpop.f32.mrb[2].mxu0 }
 0x21f   :  { %4500 = vrot.lane.b32.xlu0 %v7190_v34, %s8002_s9  ;;  %v3176_v30 = vshll.u32 %v6926_v55, 16  ;;  %v3186_v57 = vshrl.u32 %v11293_v14, 16  ;;  %v3199_v40 = vrot.slane %v3197_v62, 4  ;;  %v7255_v24 = vcombine.low %v11273_v8, %v11278_v2  ;;  %v4997_v29 = vpop.permute.xlu0 %4996  ;;  %v11333_v25 = vpop.f32.mrb[3].mxu0 }
 0x220   :  { %v3202_v61 = vrot.slane %v3200_v9, 5  ;;  %v7254_v1 = vcombine.low %v6926_v55, %v11293_v14  ;;  %v3175_v7 = vrot.slane %v3173_v4, 4  ;;  %v5581_v22 = vsel %vm5545_vm11, %v5516_v0, %v4839_v19  ;;  %v954_v19 = vld [vmem:[%s12345_s0 + $0x15c] sm:$0xe]  ;;  %v953_v9 = vld [vmem:[%s12345_s0 + $0x150] sm:$0xe] }
 0x221   :  { %v3178_v46 = vrot.slane %v3176_v30, 5  ;;  %v3206_v37 = vshll.u32 %v11278_v2, 16  ;;  %v3212_v54 = vrot.slane %v3210_v18, 4  ;;  %v3216_v38 = vshll.u32 %v11307_v35, 16 }
 0x222   :  { %v3203_v43 = vor.u32 %v3202_v61, %v3199_v40  ;;  %v3182_v31 = vshll.u32 %v11293_v14, 16  ;;  %4662 = vrot.lane.b32.xlu1 %v7223_v21, %s8003_s15  ;;  %v3188_v44 = vrot.slane %v3186_v57, 4  ;;  %v3192_v39 = vshll.u32 %v11315_v50, 16  ;;  %v5159_v47 = vpop.permute.xlu1 %5158  ;;  %v7979_v61 = vld [vmem:[%s12345_s0 + $0x160] sm:$0xf] }
 0x223   :  { %4660 = vrot.lane.b32.xlu0 %v7222_v10, %s8003_s15  ;;  %v3208_v45 = vrot.slane %v3206_v37, 5  ;;  %v3179_v12 = vor.u32 %v3178_v46, %v3175_v7  ;;  %v5579_v17 = vsel %vm5545_vm11, %v5514_v49, %v4837_v3  ;;  %v3218_v53 = vrot.slane %v3216_v38, 5  ;;  %v5157_v58 = vpop.permute.xlu0 %5156  ;;  %v7980_v7 = vld [vmem:[%s12345_s0 + $0x154] sm:$0xf]  ;;  %v11384_v37 = vld [vmem:[%s12345_s0 + $0x16c] sm:$0xf] }
 0x224   :  { %v3204_v63 = vrot.slane %v3203_v43, 4  ;;  %v3184_v33 = vrot.slane %v3182_v31, 5  ;;  %v3194_v6 = vrot.slane %v3192_v39, 5  ;;  %v5646_v32 = vsel %vm5610_vm12, %v5581_v22, %v4999_v15  ;;  %v12417_v31 = vld [vmem:[#allocation24_spill] sm:$0xff] }
 0x225   :  { %v3213_v13 = vor.u32 %v3212_v54, %v3208_v45  ;;  %v3180_v23 = vrot.slane %v3179_v12, 4  ;;  %v5644_v60 = vsel %vm5610_vm12, %v5579_v17, %v4997_v29  ;;  %v7031_v48 = vrot.slane %v6999_v5, 9  ;;  %v6770_v12 = vld [vmem:[%s12345_s0 + $0x15c] sm:$0xf] }
 0x226   :  { %v3189_v56 = vor.u32 %v3188_v44, %v3184_v33  ;;  %v3669_v8 = vrot.slane %v11278_v2, 5  ;;  %4854 = vrot.lane.b32.xlu1 %v7255_v24, %s8004_s20  ;;  %v3209_v3 = vsel %vm8059_vm2, %v3204_v63, %v3208_v45  ;;  %v3672_v11 = vrot.slane %v11307_v35, 5  ;;  %v4139_v34 = vpop.permute.xlu1 %4138 }
 0x227   :  { %4852 = vrot.lane.b32.xlu0 %v7254_v1, %s8004_s20  ;;  %v3214_v28 = vrot.slane %v3213_v13, 4  ;;  %v7030_v42 = vrot.slane %v6998_v27, 9  ;;  %v3185_v0 = vsel %vm8059_vm2, %v3180_v23, %v3184_v33  ;;  %v3662_v52 = vrot.slane %v11293_v14, 5  ;;  %v4137_v18 = vpop.permute.xlu0 %4136  ;;  %v11374_v1 = vld [vmem:[%s12345_s0 + $0x168] sm:$0xf]  ;;  %v12420_v13 = vld [vmem:[#allocation25_spill] sm:$0xff] }
 0x228   :  { %v3190_v55 = vrot.slane %v3189_v56, 4  ;;  %v3671_v2 = vrot.slane %v3669_v8, 4  ;;  %v3670_v49 = vsel %vm8536_vm5, %v7031_v48, %v3669_v8  ;;  %v3665_v21 = vrot.slane %v11315_v50, 5  ;;  %v12418_v33 = vld [vmem:[#allocation7_spill] sm:$0xff]  ;;  %v12421_v56 = vld [vmem:[#allocation8_spill] sm:$0xff] }
 0x229   :  { %v3219_v36 = vsel %vm8059_vm2, %v3214_v28, %v3218_v53  ;;  %v6713_v62 = vrot.slane %v954_v19, 9  ;;  %v5711_v30 = vsel %vm5675_vm14, %v5646_v32, %v5159_v47  ;;  %v3663_v35 = vsel %vm8536_vm5, %v7030_v42, %v3662_v52  ;;  %v11404_v53 = vld [vmem:[%s12345_s0 + $0x160] sm:$0xf] }
 0x22a   :  { %v7287_v10 = vcombine.low %v3209_v3, %v3219_v36  ;;  %v3195_v4 = vsel %vm8059_vm2, %v3190_v55, %v3194_v6  ;;  %v3673_v14 = vsel %vm8536_vm5, %v3671_v2, %v3672_v11  ;;  %v3664_v40 = vrot.slane %v3662_v52, 4  ;;  %v4331_v29 = vpop.permute.xlu1 %4330  ;;  %v11422_v3 = vld [vmem:[%s12345_s0 + $0x170] sm:$0x1]  ;;  %v11429_v55 = vld [vmem:[%s12345_s0 + $0x164] sm:$0x1] }
 0x22b   :  { %v7286_v57 = vcombine.low %v3185_v0, %v3195_v4  ;;  %v1249_v24 = vrot.slane %v7979_v61, 5  ;;  %v7319_v50 = vcombine.low %v3670_v49, %v3673_v14  ;;  %v6712_v15 = vrot.slane %v953_v9, 9  ;;  %v4329_v44 = vpop.permute.xlu0 %4328 }
 0x22c   :  { %5014 = vrot.lane.b32.xlu1 %v7287_v10, %s8005_s28  ;;  %v1242_v46 = vrot.slane %v7980_v7, 5  ;;  %v5709_v22 = vsel %vm5675_vm14, %v5644_v60, %v5157_v58  ;;  %v3666_v43 = vsel %vm8536_vm5, %v3664_v40, %v3665_v21  ;;  %v5325_v45 = vsel %vm5285_vm7, %v12417_v31, %v4139_v34 }
 0x22d   :  { %5012 = vrot.lane.b32.xlu0 %v7286_v57, %s8005_s28  ;;  %v1250_v54 = vsel %vm8536_vm5, %v6713_v62, %v1249_v24  ;;  %v1251_v38 = vrot.slane %v1249_v24, 4  ;;  %7753 = vmatprep.mubr.msk.bf16.mxu1 %vm5760_vm15, %v5709_v22  ;;  %v7318_v39 = vcombine.low %v3663_v35, %v3666_v43  ;;  %v2028_v63 = vshrl.u32 %v11374_v1, 16  ;;  %v6840_v22 = vld [vmem:[%s12345_s0 + $0x15c] sm:$0xe] }
 0x22e   :  { %v1243_v5 = vsel %vm8536_vm5, %v6712_v15, %v1242_v46  ;;  %v1244_v17 = vrot.slane %v1242_v46, 4  ;;  %7754 = vmatmul.mubr.msk.bf16.vlgmr.msra.gmra.mrb[0].mxu1 %vm5760_vm15, %v5711_v30  ;;  %v12419_v27 = vrot.slane %v12418_v33, 5  ;;  %v5323_v23 = vsel %vm5285_vm7, %v12420_v13, %v4137_v18 }
 0x22f   :  { %v2031_v6 = vshll.u32 %v11374_v1, 16  ;;  %v2041_v32 = vshrl.u32 %v11384_v37, 16  ;;  %v12422_v60 = vrot.slane %v12421_v56, 5  ;;  %v2030_v8 = vrot.slane %v2028_v63, 4 }
 0x230   :  { %v1253_v47 = vsel %vm8536_vm5, %v1251_v38, %v12419_v27  ;;  %5174 = vrot.lane.b32.xlu1 %v7319_v50, %s8006_s16  ;;  %v2004_v19 = vshrl.u32 %v6770_v12, 16  ;;  %v2007_v42 = vshll.u32 %v6770_v12, 16  ;;  %v2017_v0 = vshrl.u32 %v11404_v53, 16  ;;  %v4491_v49 = vpop.permute.xlu1 %4490 }
 0x231   :  { %v7129_v58 = vcombine.low %v1250_v54, %v1253_v47  ;;  %v1246_v48 = vsel %vm8536_vm5, %v1244_v17, %v12422_v60  ;;  %5172 = vrot.lane.b32.xlu0 %v7318_v39, %s8006_s16  ;;  %v2033_v11 = vrot.slane %v2031_v6, 5  ;;  %v7161_v2 = vcombine.low %v11374_v1, %v11384_v37  ;;  %v4489_v10 = vpop.permute.xlu0 %4488  ;;  %v6841_v1 = vld [vmem:[%s12345_s0 + $0x168] sm:$0xe] }
 0x232   :  { %v7128_v28 = vcombine.low %v1243_v5, %v1246_v48  ;;  %v2006_v52 = vrot.slane %v2004_v19, 4  ;;  %v7160_v34 = vcombine.low %v6770_v12, %v11404_v53  ;;  %v5390_v36 = vsel %vm5350_vm8, %v5325_v45, %v4331_v29 }
 0x233   :  { %v2009_v21 = vrot.slane %v2007_v42, 5  ;;  %v2034_v62 = vor.u32 %v2033_v11, %v2030_v8  ;;  %v2037_v9 = vshll.u32 %v11384_v37, 16  ;;  %v2043_v18 = vrot.slane %v2041_v32, 4 }
 0x234   :  { %4154 = vrot.lane.b32.xlu1 %v7129_v58, %s8000_s13  ;;  %v2047_v4 = vshll.u32 %v11422_v3, 16  ;;  %v2013_v14 = vshll.u32 %v11404_v53, 16  ;;  %v2019_v30 = vrot.slane %v2017_v0, 4  ;;  %v2023_v57 = vshll.u32 %v11429_v55, 16  ;;  %v4651_v29 = vpop.permute.xlu1 %4650  ;;  %v11455_v17 = vpop.f32.mrb[4].mxu0 }
 0x235   :  { %4152 = vrot.lane.b32.xlu0 %v7128_v28, %s8000_s13  ;;  %v5388_v35 = vsel %vm5350_vm8, %v5323_v23, %v4329_v44  ;;  %v2035_v40 = vrot.slane %v2034_v62, 4  ;;  %v2039_v61 = vrot.slane %v2037_v9, 5  ;;  %v2010_v24 = vor.u32 %v2009_v21, %v2006_v52  ;;  %v4649_v45 = vpop.permute.xlu0 %4648  ;;  %v11462_v13 = vpop.f32.mrb[5].mxu0 }
 0x236   :  { %v2049_v50 = vrot.slane %v2047_v4, 5  ;;  %v2015_v15 = vrot.slane %v2013_v14, 5  ;;  %v2025_v7 = vrot.slane %v2023_v57, 5  ;;  %v5455_v46 = vsel %vm5415_vm9, %v5390_v36, %v4491_v49  ;;  %v11467_v56 = vpop.f32.mrb[6].mxu0 }
 0x237   :  { %v2040_v43 = vsel %vm8059_vm2, %v2035_v40, %v2039_v61  ;;  %v2044_v54 = vor.u32 %v2043_v18, %v2039_v61  ;;  %v2011_v38 = vrot.slane %v2010_v24, 4  ;;  %v5453_v31 = vsel %vm5415_vm9, %v5388_v35, %v4489_v10  ;;  %v11476_v28 = vpop.f32.mrb[7].mxu0  ;;  %v6930_v10 = vld [vmem:[%s12345_s0 + $0x168] sm:$0xf] }
 0x238   :  { %4346 = vrot.lane.b32.xlu1 %v7161_v2, %s8001_s26  ;;  %v2020_v12 = vor.u32 %v2019_v30, %v2015_v15  ;;  %v6873_v44 = vrot.slane %v6841_v1, 9  ;;  %v2466_v39 = vrot.slane %v11384_v37, 5  ;;  %v2469_v5 = vrot.slane %v11422_v3, 5  ;;  %v4843_v58 = vpop.permute.xlu1 %4842  ;;  %v11490_v2 = vld [vmem:[%s12345_s0 + $0x178] sm:$0xf] }
 0x239   :  { %4344 = vrot.lane.b32.xlu0 %v7160_v34, %s8001_s26  ;;  %v2045_v63 = vrot.slane %v2044_v54, 4  ;;  %v2016_v33 = vsel %vm8059_vm2, %v2011_v38, %v2015_v15  ;;  %v6513_v27 = vmul.f32 %v11317_v51, %v11317_v51  ;;  %v6872_v47 = vrot.slane %v6840_v22, 9  ;;  %v4841_v3 = vpop.permute.xlu0 %4840  ;;  %v6968_v38 = vld [vmem:[%s12345_s0 + $0x170] sm:$0x1] }
 0x23a   :  { %v2021_v23 = vrot.slane %v2020_v12, 4  ;;  %v2467_v37 = vsel %vm8536_vm5, %v6873_v44, %v2466_v39  ;;  %v2468_v6 = vrot.slane %v2466_v39, 4  ;;  %v2459_v32 = vrot.slane %v11404_v53, 5 }
 0x23b   :  { %v2050_v60 = vsel %vm8059_vm2, %v2045_v63, %v2049_v50  ;;  %v6511_v48 = vmul.f32 %v11321_v41, %v11321_v41  ;;  %v2462_v8 = vrot.slane %v11429_v55, 5  ;;  %v7497_v19 = vpack.c.bf16 %v11325_v20, %v11317_v51  ;;  %v6932_v55 = vld [vmem:[%s12345_s0 + $0x174] sm:$0xf] }
 0x23c   :  { %v7193_v11 = vcombine.low %v2040_v43, %v2050_v60  ;;  %v2026_v53 = vsel %vm8059_vm2, %v2021_v23, %v2025_v7  ;;  %v2470_v42 = vsel %vm8536_vm5, %v2468_v6, %v2469_v5  ;;  %v2460_v0 = vsel %vm8536_vm5, %v6872_v47, %v2459_v32  ;;  %v7001_v47 = vld [vmem:[%s12345_s0 + $0x174] sm:$0xe] }
 0x23d   :  { %v7192_v52 = vcombine.low %v2016_v33, %v2026_v53  ;;  %v7225_v34 = vcombine.low %v2467_v37, %v2470_v42  ;;  %v2461_v36 = vrot.slane %v2459_v32, 4  ;;  %7649 = vst [vmem:[%s12347_s2 + $0x8] sm:$0xff] %v7497_v19   ;;  %v5520_v49 = vsel %vm5480_vm10, %v5455_v46, %v4651_v29  ;;  %v6969_v46 = vld [vmem:[%s12345_s0 + $0x17c] sm:$0x1] }
 0x23e   :  { %4506 = vrot.lane.b32.xlu1 %v7193_v11, %s8002_s9  ;;  %v7492_v21 = vpack.c.bf16 %v11333_v25, %v11321_v41  ;;  %v6439_v62 = vadd.f32 %v11333_v25, %v11321_v41  ;;  %v6512_v9 = vmul.f32 %v11333_v25, %v11333_v25  ;;  %v5518_v18 = vsel %vm5480_vm10, %v5453_v31, %v4649_v45  ;;  %v6931_v41 = vld [vmem:[%s12345_s0 + $0x16c] sm:$0xf]  ;;  %v5003_v25 = vpop.permute.xlu1 %5002 }
 0x23f   :  { %4504 = vrot.lane.b32.xlu0 %v7192_v52, %s8002_s9  ;;  %v2463_v4 = vsel %vm8536_vm5, %v2461_v36, %v2462_v8  ;;  %v3245_v14 = vshrl.u32 %v6932_v55, 16  ;;  %v3248_v30 = vshll.u32 %v6932_v55, 16  ;;  %v3258_v57 = vshrl.u32 %v11490_v2, 16  ;;  %v5001_v22 = vpop.permute.xlu0 %5000 }
 0x240   :  { %v7224_v35 = vcombine.low %v2460_v0, %v2463_v4  ;;  %7493 = vst [vmem:[%s12347_s2] sm:$0xff] %v7492_v21   ;;  %v11518_v40 = vadd.f32 %v11317_v51, %v6439_v62  ;;  %v6575_v61 = vadd.f32 %v6512_v9, %v6511_v48  ;;  %v7257_v24 = vcombine.low %v6932_v55, %v11490_v2 }
 0x241   :  { %v3247_v1 = vrot.slane %v3245_v14, 4  ;;  %v3250_v50 = vrot.slane %v3248_v30, 5  ;;  %v3221_v15 = vshrl.u32 %v6930_v10, 16  ;;  %v3224_v7 = vshll.u32 %v6930_v10, 16 }
 0x242   :  { %4666 = vrot.lane.b32.xlu1 %v7225_v34, %s8003_s15  ;;  %v11525_v29 = vadd.f32 %v6575_v61, %v6513_v27  ;;  %v3234_v43 = vshrl.u32 %v6931_v41, 16  ;;  %v7256_v54 = vcombine.low %v6930_v10, %v6931_v41  ;;  %v5585_v51 = vsel %vm5545_vm11, %v5520_v49, %v4843_v58  ;;  %v5163_v39 = vpop.permute.xlu1 %5162 }
 0x243   :  { %4664 = vrot.lane.b32.xlu0 %v7224_v35, %s8003_s15  ;;  %v3223_v31 = vrot.slane %v3221_v15, 4  ;;  %v3226_v45 = vrot.slane %v3224_v7, 5  ;;  %v5583_v12 = vsel %vm5545_vm11, %v5518_v18, %v4841_v3  ;;  %v3251_v44 = vor.u32 %v3250_v50, %v3247_v1  ;;  %v5161_v58 = vpop.permute.xlu0 %5160  ;;  %v7000_v3 = vld [vmem:[%s12345_s0 + $0x168] sm:$0xe] }
 0x244   :  { %v3254_v5 = vshll.u32 %v11490_v2, 16  ;;  %v3260_v63 = vrot.slane %v3258_v57, 4  ;;  %v3264_v33 = vshll.u32 %v6969_v46, 16  ;;  %v3230_v27 = vshll.u32 %v6931_v41, 16 }
 0x245   :  { %v3252_v23 = vrot.slane %v3251_v44, 4  ;;  %v3227_v37 = vor.u32 %v3226_v45, %v3223_v31  ;;  %v3236_v6 = vrot.slane %v3234_v43, 4  ;;  %v3240_v32 = vshll.u32 %v6968_v38, 16  ;;  %v7981_v44 = vld [vmem:[%s12345_s0 + $0x178] sm:$0xf] }
 0x246   :  { %4858 = vrot.lane.b32.xlu1 %v7257_v24, %s8004_s20  ;;  %v3256_v60 = vrot.slane %v3254_v5, 5  ;;  %v3266_v48 = vrot.slane %v3264_v33, 5  ;;  %v3232_v8 = vrot.slane %v3230_v27, 5  ;;  %v5650_v19 = vsel %vm5610_vm12, %v5585_v51, %v5003_v25  ;;  %v4143_v55 = vpop.permute.xlu1 %4142  ;;  %v956_v24 = vld [vmem:[%s12345_s0 + $0x174] sm:$0xe] }
 0x247   :  { %4856 = vrot.lane.b32.xlu0 %v7256_v54, %s8004_s20  ;;  %v3228_v11 = vrot.slane %v3227_v37, 4  ;;  %v3242_v53 = vrot.slane %v3240_v32, 5  ;;  %v5648_v42 = vsel %vm5610_vm12, %v5583_v12, %v5001_v22  ;;  %v7033_v0 = vrot.slane %v7001_v47, 9  ;;  %v4141_v10 = vpop.permute.xlu0 %4140  ;;  %v7982_v27 = vld [vmem:[%s12345_s0 + $0x16c] sm:$0xf] }
 0x248   :  { %v3257_v52 = vsel %vm8059_vm2, %v3252_v23, %v3256_v60  ;;  %v3261_v34 = vor.u32 %v3260_v63, %v3256_v60  ;;  %v3237_v36 = vor.u32 %v3236_v6, %v3232_v8  ;;  %v3683_v49 = vrot.slane %v11490_v2, 5  ;;  %v11586_v63 = vld [vmem:[%s12345_s0 + $0x184] sm:$0xf]  ;;  %v11599_v32 = vld [vmem:[%s12345_s0 + $0x174] sm:$0xf] }
 0x249   :  { %v3233_v21 = vsel %vm8059_vm2, %v3228_v11, %v3232_v8  ;;  %v3686_v62 = vrot.slane %v6969_v46, 5  ;;  %v7032_v9 = vrot.slane %v7000_v3, 9  ;;  %v3676_v18 = vrot.slane %v6931_v41, 5  ;;  %v955_v41 = vld [vmem:[%s12345_s0 + $0x168] sm:$0xe]  ;;  %v12423_v23 = vld [vmem:[#allocation26_spill] sm:$0xff] }
 0x24a   :  { %v3262_v4 = vrot.slane %v3261_v34, 4  ;;  %v3238_v14 = vrot.slane %v3237_v36, 4  ;;  %v3684_v30 = vsel %vm8536_vm5, %v7033_v0, %v3683_v49  ;;  %v3685_v57 = vrot.slane %v3683_v49, 4  ;;  %v11570_v46 = vld [vmem:[%s12345_s0 + $0x180] sm:$0xf]  ;;  %v4335_v22 = vpop.permute.xlu1 %4334 }
 0x24b   :  { %v3677_v25 = vsel %vm8536_vm5, %v7032_v9, %v3676_v18  ;;  %v3678_v35 = vrot.slane %v3676_v18, 4  ;;  %v3679_v61 = vrot.slane %v6968_v38, 5  ;;  %v5715_v2 = vsel %vm5675_vm14, %v5650_v19, %v5163_v39  ;;  %v4333_v31 = vpop.permute.xlu0 %4332  ;;  %v11609_v3 = vld [vmem:[%s12345_s0 + $0x178] sm:$0xf] }
 0x24c   :  { %v3267_v1 = vsel %vm8059_vm2, %v3262_v4, %v3266_v48  ;;  %v3243_v50 = vsel %vm8059_vm2, %v3238_v14, %v3242_v53  ;;  %v3687_v15 = vsel %vm8536_vm5, %v3685_v57, %v3686_v62  ;;  %v5713_v7 = vsel %vm5675_vm14, %v5648_v42, %v5161_v58  ;;  %v12424_v48 = vld [vmem:[#allocation27_spill] sm:$0xff] }
 0x24d   :  { %v11574_v43 = vmul.f32 %v11325_v20, %v11325_v20  ;;  %v7289_v54 = vcombine.low %v3257_v52, %v3267_v1  ;;  %v7288_v51 = vcombine.low %v3233_v21, %v3243_v50  ;;  %v3680_v38 = vsel %vm8536_vm5, %v3678_v35, %v3679_v61  ;;  %7757 = vmatprep.mubr.msk.bf16.mxu1 %vm5760_vm15, %v5713_v7 }
 0x24e   :  { %v7321_v45 = vcombine.low %v3684_v30, %v3687_v15  ;;  %v6715_v12 = vrot.slane %v956_v24, 9  ;;  %v1263_v39 = vrot.slane %v7981_v44, 5  ;;  %v6714_v5 = vrot.slane %v955_v41, 9  ;;  %7758 = vmatmul.mubr.msk.bf16.gmra.mrb[4].mxu1 %vm5760_vm15, %v5715_v2  ;;  %v11636_v35 = vpop.f32.mrb[8].mxu0 }
 0x24f   :  { %5018 = vrot.lane.b32.xlu1 %v7289_v54, %s8005_s28  ;;  %5016 = vrot.lane.b32.xlu0 %v7288_v51, %s8005_s28  ;;  %v7320_v33 = vcombine.low %v3677_v25, %v3680_v38  ;;  %v1256_v47 = vrot.slane %v7982_v27, 5  ;;  %v5329_v37 = vsel %vm5285_vm7, %v12423_v23, %v4143_v55  ;;  %v2076_v6 = vshrl.u32 %v11570_v46, 16  ;;  %v12425_v55 = vld [vmem:[#allocation9_spill] sm:$0xff]  ;;  %v11634_v25 = vld [vmem:[%s12345_s0 + $0x188] sm:$0x1]  ;;  %v11640_v1 = vpop.f32.mrb[9].mxu0 }
 0x250   :  { %v1264_v58 = vsel %vm8536_vm5, %v6715_v12, %v1263_v39  ;;  %v1265_v60 = vrot.slane %v1263_v39, 4  ;;  %v5327_v8 = vsel %vm5285_vm7, %v12424_v48, %v4141_v10  ;;  %v2079_v19 = vshll.u32 %v11570_v46, 16  ;;  %v4495_v62 = vpop.permute.xlu1 %4494  ;;  %v12427_v10 = vld [vmem:[#allocation10_spill] sm:$0xff]  ;;  %v11645_v54 = vpop.f32.mrb[10].mxu0 }
 0x251   :  { %v1257_v11 = vsel %vm8536_vm5, %v6714_v5, %v1256_v47  ;;  %v1258_v53 = vrot.slane %v1256_v47, 4  ;;  %v2078_v42 = vrot.slane %v2076_v6, 4  ;;  %v2089_v0 = vshrl.u32 %v11586_v63, 16  ;;  %v11620_v9 = vpop.permute.xlu0 %4492 }
 0x252   :  { %v12426_v52 = vrot.slane %v12425_v55, 5  ;;  %v2081_v36 = vrot.slane %v2079_v19, 5  ;;  %v2052_v49 = vshrl.u32 %v11599_v32, 16  ;;  %v2055_v21 = vshll.u32 %v11599_v32, 16  ;;  %v6843_v19 = vld [vmem:[%s12345_s0 + $0x180] sm:$0xe] }
 0x253   :  { %5178 = vrot.lane.b32.xlu1 %v7321_v45, %s8006_s16  ;;  %5176 = vrot.lane.b32.xlu0 %v7320_v33, %s8006_s16  ;;  %v12428_v4 = vrot.slane %v12427_v10, 5  ;;  %v7163_v30 = vcombine.low %v11570_v46, %v11586_v63  ;;  %v2065_v57 = vshrl.u32 %v11609_v3, 16  ;;  %v7162_v41 = vcombine.low %v11599_v32, %v11609_v3  ;;  %v11665_v33 = vpop.f32.mrb[11].mxu0 }
 0x254   :  { %v1267_v34 = vsel %vm8536_vm5, %v1265_v60, %v12426_v52  ;;  %v2054_v2 = vrot.slane %v2052_v49, 4  ;;  %v2057_v24 = vrot.slane %v2055_v21, 5  ;;  %v5394_v50 = vsel %vm5350_vm8, %v5329_v37, %v4335_v22  ;;  %v11652_v44 = vpop.permute.xlu1 %4654 }
 0x255   :  { %v7131_v18 = vcombine.low %v1264_v58, %v1267_v34  ;;  %v1260_v14 = vsel %vm8536_vm5, %v1258_v53, %v12428_v4  ;;  %v5392_v15 = vsel %vm5350_vm8, %v5327_v8, %v4333_v31  ;;  %v2082_v7 = vor.u32 %v2081_v36, %v2078_v42  ;;  %v11654_v39 = vpop.permute.xlu0 %4652 }
 0x256   :  { %v7130_v61 = vcombine.low %v1257_v11, %v1260_v14  ;;  %v2085_v46 = vshll.u32 %v11586_v63, 16  ;;  %v2091_v51 = vrot.slane %v2089_v0, 4  ;;  %v2095_v38 = vshll.u32 %v11634_v25, 16 }
 0x257   :  { %v6441_v45 = vadd.f32 %v11325_v20, %v11518_v40  ;;  %v6515_v12 = vmul.f32 %v11462_v13, %v11462_v13  ;;  %4158 = vrot.lane.b32.xlu1 %v7131_v18, %s8000_s13  ;;  %v2083_v22 = vrot.slane %v2082_v7, 4  ;;  %v6577_v5 = vadd.f32 %v11525_v29, %v11574_v43  ;;  %v11663_v20 = vld [vmem:[%s12345_s0 + $0x17c] sm:$0x1] }
 0x258   :  { %4156 = vrot.lane.b32.xlu0 %v7130_v61, %s8000_s13  ;;  %v2087_v31 = vrot.slane %v2085_v46, 5  ;;  %v2058_v40 = vor.u32 %v2057_v24, %v2054_v2  ;;  %v6517_v27 = vmul.f32 %v11455_v17, %v11455_v17  ;;  %v2061_v23 = vshll.u32 %v11609_v3, 16  ;;  %v11679_v11 = vpop.permute.xlu1 %4846 }
 0x259   :  { %v6442_v47 = vadd.f32 %v6441_v45, %v11462_v13  ;;  %v2067_v37 = vrot.slane %v2065_v57, 4  ;;  %v2097_v32 = vrot.slane %v2095_v38, 5  ;;  %v6578_v58 = vadd.f32 %v6577_v5, %v6515_v12  ;;  %v11681_v53 = vpop.permute.xlu0 %4844  ;;  %v6934_v12 = vld [vmem:[%s12345_s0 + $0x180] sm:$0xf] }
 0x25a   :  { %v2092_v6 = vor.u32 %v2091_v51, %v2087_v31  ;;  %v2059_v29 = vrot.slane %v2058_v40, 4  ;;  %v2088_v43 = vsel %vm8059_vm2, %v2083_v22, %v2087_v31  ;;  %v2063_v60 = vrot.slane %v2061_v23, 5  ;;  %v11742_v40 = vld [vmem:[%s12345_s0 + $0x184] sm:$0xf] }
 0x25b   :  { %v2071_v48 = vshll.u32 %v11663_v20, 16  ;;  %v7507_v8 = vpack.c.bf16 %v11467_v56, %v11455_v17  ;;  %4350 = vrot.lane.b32.xlu1 %v7163_v30, %s8001_s26  ;;  %v5459_v0 = vsel %vm5415_vm9, %v5394_v50, %v4495_v62  ;;  %v7502_v55 = vpack.c.bf16 %v11476_v28, %v11462_v13  ;;  %v6842_v62 = vld [vmem:[%s12345_s0 + $0x174] sm:$0xe] }
 0x25c   :  { %4348 = vrot.lane.b32.xlu0 %v7162_v41, %s8001_s26  ;;  %v2093_v42 = vrot.slane %v2092_v6, 4  ;;  %v6443_v52 = vadd.f32 %v6442_v47, %v11476_v28  ;;  %v2064_v34 = vsel %vm8059_vm2, %v2059_v29, %v2063_v60  ;;  %v2068_v36 = vor.u32 %v2067_v37, %v2063_v60  ;;  %v6971_v29 = vld [vmem:[%s12345_s0 + $0x194] sm:$0x1] }
 0x25d   :  { %v2073_v49 = vrot.slane %v2071_v48, 5  ;;  %7651 = vst [vmem:[%s12347_s2 + $0x18] sm:$0xff] %v7507_v8   ;;  %v6516_v21 = vmul.f32 %v11476_v28, %v11476_v28  ;;  %7650 = vst [vmem:[%s12347_s2 + $0x10] sm:$0xff] %v7502_v55   ;;  %v5457_v10 = vsel %vm5415_vm9, %v5392_v15, %v11620_v9  ;;  %v6875_v4 = vrot.slane %v6843_v19, 9 }
 0x25e   :  { %v2098_v13 = vsel %vm8059_vm2, %v2093_v42, %v2097_v32  ;;  %v11705_v18 = vadd.f32 %v11455_v17, %v6443_v52  ;;  %v2069_v28 = vrot.slane %v2068_v36, 4  ;;  %v2480_v57 = vrot.slane %v11586_v63, 5  ;;  %v6936_v17 = vld [vmem:[%s12345_s0 + $0x18c] sm:$0xf]  ;;  %v5007_v50 = vpop.permute.xlu1 %5006  ;;  %v6970_v42 = vld [vmem:[%s12345_s0 + $0x188] sm:$0x1] }
 0x25f   :  { %v7195_v14 = vcombine.low %v2088_v43, %v2098_v13  ;;  %v6579_v30 = vadd.f32 %v6578_v58, %v6516_v21  ;;  %v2483_v61 = vrot.slane %v11634_v25, 5  ;;  %v6874_v2 = vrot.slane %v6842_v62, 9  ;;  %v5005_v7 = vpop.permute.xlu0 %5004 }
 0x260   :  { %v2473_v24 = vrot.slane %v11609_v3, 5  ;;  %v2476_v41 = vrot.slane %v11663_v20, 5  ;;  %v2074_v9 = vsel %vm8059_vm2, %v2069_v28, %v2073_v49  ;;  %v2481_v63 = vsel %vm8536_vm5, %v6875_v4, %v2480_v57  ;;  %v11726_v3 = vld [vmem:[%s12345_s0 + $0x190] sm:$0xf] }
 0x261   :  { %4510 = vrot.lane.b32.xlu1 %v7195_v14, %s8002_s9  ;;  %v11719_v15 = vadd.f32 %v6579_v30, %v6517_v27  ;;  %v2482_v25 = vrot.slane %v2480_v57, 4  ;;  %v7194_v46 = vcombine.low %v2064_v34, %v2074_v9  ;;  %v5524_v45 = vsel %vm5480_vm10, %v5459_v0, %v11652_v44 }
 0x262   :  { %v2474_v51 = vsel %vm8536_vm5, %v6874_v2, %v2473_v24  ;;  %v2475_v38 = vrot.slane %v2473_v24, 4  ;;  %v5522_v31 = vsel %vm5480_vm10, %v5457_v10, %v11654_v39  ;;  %v3293_v5 = vshrl.u32 %v6936_v17, 16  ;;  %v11749_v37 = vpop.permute.xlu1 %5166  ;;  %v7002_v24 = vld [vmem:[%s12345_s0 + $0x180] sm:$0xe] }
 0x263   :  { %v2484_v22 = vsel %vm8536_vm5, %v2482_v25, %v2483_v61  ;;  %v3296_v20 = vshll.u32 %v6936_v17, 16  ;;  %4508 = vrot.lane.b32.xlu0 %v7194_v46, %s8002_s9  ;;  %v3306_v47 = vshrl.u32 %v11726_v3, 16  ;;  %v7259_v23 = vcombine.low %v6936_v17, %v11726_v3  ;;  %v11754_v43 = vpop.permute.xlu0 %5164 }
 0x264   :  { %v7227_v44 = vcombine.low %v2481_v63, %v2484_v22  ;;  %v2477_v27 = vsel %vm8536_vm5, %v2475_v38, %v2476_v41  ;;  %v3295_v6 = vrot.slane %v3293_v5, 4  ;;  %v3269_v58 = vshrl.u32 %v6934_v12, 16 }
 0x265   :  { %v7226_v39 = vcombine.low %v2474_v51, %v2477_v27  ;;  %v3298_v32 = vrot.slane %v3296_v20, 5  ;;  %v3272_v60 = vshll.u32 %v6934_v12, 16  ;;  %v3282_v48 = vshrl.u32 %v11742_v40, 16 }
 0x266   :  { %4670 = vrot.lane.b32.xlu1 %v7227_v44, %s8003_s15  ;;  %v7258_v8 = vcombine.low %v6934_v12, %v11742_v40  ;;  %v5589_v19 = vsel %vm5545_vm11, %v5524_v45, %v11679_v11  ;;  %v3271_v0 = vrot.slane %v3269_v58, 4  ;;  %v5587_v55 = vsel %vm5545_vm11, %v5522_v31, %v11681_v53  ;;  %v11769_v13 = vpop.permute.xlu1 %4146  ;;  %v7003_v53 = vld [vmem:[%s12345_s0 + $0x18c] sm:$0xe] }
 0x267   :  { %v3299_v52 = vor.u32 %v3298_v32, %v3295_v6  ;;  %v3302_v34 = vshll.u32 %v11726_v3, 16  ;;  %4668 = vrot.lane.b32.xlu0 %v7226_v39, %s8003_s15  ;;  %v3274_v36 = vrot.slane %v3272_v60, 5  ;;  %v3308_v49 = vrot.slane %v3306_v47, 4  ;;  %v4145_v28 = vpop.permute.xlu0 %4144  ;;  %v957_v32 = vld [vmem:[%s12345_s0 + $0x180] sm:$0xe] }
 0x268   :  { %v3312_v21 = vshll.u32 %v6971_v29, 16  ;;  %v3278_v62 = vshll.u32 %v11742_v40, 16  ;;  %v3284_v4 = vrot.slane %v3282_v48, 4  ;;  %v3288_v14 = vshll.u32 %v6970_v42, 16 }
 0x269   :  { %v3300_v11 = vrot.slane %v3299_v52, 4  ;;  %v3304_v10 = vrot.slane %v3302_v34, 5  ;;  %v3275_v57 = vor.u32 %v3274_v36, %v3271_v0  ;;  %v5654_v2 = vsel %vm5610_vm12, %v5589_v19, %v5007_v50  ;;  %v11824_v34 = vld [vmem:[%s12345_s0 + $0x198] sm:$0xf] }
 0x26a   :  { %4862 = vrot.lane.b32.xlu1 %v7259_v23, %s8004_s20  ;;  %v3314_v30 = vrot.slane %v3312_v21, 5  ;;  %v3280_v61 = vrot.slane %v3278_v62, 5  ;;  %v3290_v9 = vrot.slane %v3288_v14, 5  ;;  %v5652_v63 = vsel %vm5610_vm12, %v5587_v55, %v5005_v7  ;;  %v11784_v45 = vpop.permute.xlu1 %4338  ;;  %v11796_v47 = vpop.f32.mrb[12].mxu0  ;;  %v11832_v21 = vld [vmem:[%s12345_s0 + $0x190] sm:$0xf] }
 0x26b   :  { %v3305_v41 = vsel %vm8059_vm2, %v3300_v11, %v3304_v10  ;;  %v3309_v17 = vor.u32 %v3308_v49, %v3304_v10  ;;  %4860 = vrot.lane.b32.xlu0 %v7258_v8, %s8004_s20  ;;  %v3276_v25 = vrot.slane %v3275_v57, 4  ;;  %v7035_v51 = vrot.slane %v7003_v53, 9  ;;  %v11787_v5 = vpop.permute.xlu0 %4336  ;;  %v11805_v58 = vpop.f32.mrb[13].mxu0  ;;  %v11847_v14 = vld [vmem:[%s12345_s0 + $0x184] sm:$0xf] }
 0x26c   :  { %v3285_v46 = vor.u32 %v3284_v4, %v3280_v61  ;;  %v3697_v38 = vrot.slane %v11726_v3, 5  ;;  %v3700_v12 = vrot.slane %v6971_v29, 5  ;;  %v7034_v22 = vrot.slane %v7002_v24, 9  ;;  %v958_v3 = vld [vmem:[%s12345_s0 + $0x18c] sm:$0xe]  ;;  %v11813_v19 = vpop.f32.mrb[14].mxu0 }
 0x26d   :  { %v3310_v50 = vrot.slane %v3309_v17, 4  ;;  %v3690_v31 = vrot.slane %v11742_v40, 5  ;;  %v3281_v20 = vsel %vm8059_vm2, %v3276_v25, %v3280_v61  ;;  %v3693_v6 = vrot.slane %v6970_v42, 5  ;;  %v11826_v36 = vpop.f32.mrb[15].mxu0 }
 0x26e   :  { %v3286_v7 = vrot.slane %v3285_v46, 4  ;;  %v3698_v44 = vsel %vm8536_vm5, %v7035_v51, %v3697_v38  ;;  %v3699_v27 = vrot.slane %v3697_v38, 4  ;;  %v5719_v8 = vsel %vm5675_vm14, %v5654_v2, %v11749_v37 }
 0x26f   :  { %v3315_v23 = vsel %vm8059_vm2, %v3310_v50, %v3314_v30  ;;  %v3691_v40 = vsel %vm8536_vm5, %v7034_v22, %v3690_v31  ;;  %v3692_v39 = vrot.slane %v3690_v31, 4  ;;  %v6518_v42 = vmul.f32 %v11467_v56, %v11467_v56  ;;  %v12429_v30 = vld [vmem:[#allocation28_spill] sm:$0xff] }
 0x270   :  { %v7291_v29 = vcombine.low %v3305_v41, %v3315_v23  ;;  %v3291_v60 = vsel %vm8059_vm2, %v3286_v7, %v3290_v9  ;;  %v3701_v48 = vsel %vm8536_vm5, %v3699_v27, %v3700_v12  ;;  %v5717_v52 = vsel %vm5675_vm14, %v5652_v63, %v11754_v43  ;;  %v11839_v43 = vld [vmem:[%s12345_s0 + $0x19c] sm:$0xf]  ;;  %v11841_v10 = vpop.permute.xlu1 %4498  ;;  %v11880_v31 = vld [vmem:[%s12345_s0 + $0x190] sm:$0xf] }
 0x271   :  { %v7290_v0 = vcombine.low %v3281_v20, %v3291_v60  ;;  %v3694_v55 = vsel %vm8536_vm5, %v3692_v39, %v3693_v6  ;;  %v7323_v37 = vcombine.low %v3698_v44, %v3701_v48  ;;  %v6717_v49 = vrot.slane %v958_v3, 9  ;;  %7761 = vmatprep.mubr.msk.bf16.mxu1 %vm5760_vm15, %v5717_v52  ;;  %v11856_v2 = vpop.permute.xlu0 %4496  ;;  %v12432_v44 = vld [vmem:[#allocation12_spill] sm:$0xff] }
 0x272   :  { %5022 = vrot.lane.b32.xlu1 %v7291_v29, %s8005_s28  ;;  %v1277_v62 = vrot.slane %v11832_v21, 5  ;;  %v6716_v11 = vrot.slane %v957_v32, 9  ;;  %v7322_v4 = vcombine.low %v3691_v40, %v3694_v55  ;;  %v1270_v53 = vrot.slane %v11847_v14, 5  ;;  %7762 = vmatmul.mubr.msk.bf16.gmra.mrb[8].mxu1 %vm5760_vm15, %v5719_v8 }
 0x273   :  { %5020 = vrot.lane.b32.xlu0 %v7290_v0, %s8005_s28  ;;  %v5333_v57 = vsel %vm5285_vm7, %v12429_v30, %v11769_v13  ;;  %v5331_v61 = vsel %vm5285_vm7, %v11194_v16, %v4145_v28  ;;  %v2124_v17 = vshrl.u32 %v11824_v34, 16  ;;  %v2127_v9 = vshll.u32 %v11824_v34, 16  ;;  %v6778_v16 = vld [vmem:[%s12345_s0 + $0x18c] sm:$0xf] }
 0x274   :  { %v1278_v24 = vsel %vm8536_vm5, %v6717_v49, %v1277_v62  ;;  %v1279_v41 = vrot.slane %v1277_v62, 4  ;;  %v1271_v63 = vsel %vm8536_vm5, %v6716_v11, %v1270_v53  ;;  %v1272_v25 = vrot.slane %v1270_v53, 4  ;;  %v12430_v28 = vld [vmem:[#allocation11_spill] sm:$0xff]  ;;  %v11882_v20 = vpop.permute.xlu1 %4658 }
 0x275   :  { %v6521_v13 = vmul.f32 %v11636_v35, %v11636_v35  ;;  %v2137_v46 = vshrl.u32 %v11839_v43, 16  ;;  %v12431_v51 = vrot.slane %v12430_v28, 5  ;;  %v2126_v50 = vrot.slane %v2124_v17, 4 }
 0x276   :  { %5182 = vrot.lane.b32.xlu1 %v7323_v37, %s8006_s16  ;;  %v2129_v12 = vrot.slane %v2127_v9, 5  ;;  %v6445_v22 = vadd.f32 %v11467_v56, %v11705_v18  ;;  %v12433_v27 = vrot.slane %v12432_v44, 5  ;;  %v6519_v23 = vmul.f32 %v11640_v1, %v11640_v1  ;;  %v11892_v18 = vpop.permute.xlu0 %4656 }
 0x277   :  { %v1281_v38 = vsel %vm8536_vm5, %v1279_v41, %v12431_v51  ;;  %5180 = vrot.lane.b32.xlu0 %v7322_v4, %s8006_s16  ;;  %v6581_v56 = vadd.f32 %v11719_v15, %v6518_v42  ;;  %v2100_v6 = vshrl.u32 %v6778_v16, 16  ;;  %v2103_v32 = vshll.u32 %v6778_v16, 16  ;;  %v11903_v15 = vld [vmem:[%s12345_s0 + $0x1a0] sm:$0x1] }
 0x278   :  { %v7133_v7 = vcombine.low %v1278_v24, %v1281_v38  ;;  %v1274_v3 = vsel %vm8536_vm5, %v1272_v25, %v12433_v27  ;;  %v6446_v39 = vadd.f32 %v6445_v22, %v11640_v1  ;;  %v7165_v29 = vcombine.low %v11824_v34, %v11839_v43  ;;  %v11911_v34 = vpop.permute.xlu1 %4850 }
 0x279   :  { %v7132_v40 = vcombine.low %v1271_v63, %v1274_v3  ;;  %v6582_v60 = vadd.f32 %v6581_v56, %v6519_v23  ;;  %v2113_v48 = vshrl.u32 %v11880_v31, 16  ;;  %v7517_v8 = vpack.c.bf16 %v11645_v54, %v11636_v35 }
 0x27a   :  { %4162 = vrot.lane.b32.xlu1 %v7133_v7, %s8000_s13  ;;  %v2102_v42 = vrot.slane %v2100_v6, 4  ;;  %v2105_v0 = vrot.slane %v2103_v32, 5  ;;  %v7164_v55 = vcombine.low %v6778_v16, %v11880_v31  ;;  %v11909_v52 = vmul.f32 %v11645_v54, %v11645_v54  ;;  %v11924_v4 = vpop.permute.xlu0 %4848  ;;  %v6845_v16 = vld [vmem:[%s12345_s0 + $0x198] sm:$0xe] }
 0x27b   :  { %4160 = vrot.lane.b32.xlu0 %v7132_v40, %s8000_s13  ;;  %7653 = vst [vmem:[%s12347_s2 + $0x28] sm:$0xff] %v7517_v8   ;;  %v5398_v37 = vsel %vm5350_vm8, %v5333_v57, %v11784_v45  ;;  %v7512_v49 = vpack.c.bf16 %v11665_v33, %v11640_v1  ;;  %v6447_v62 = vadd.f32 %v6446_v39, %v11665_v33  ;;  %v2133_v30 = vshll.u32 %v11839_v43, 16  ;;  %v6812_v45 = vld [vmem:[%s12345_s0 + $0x194] sm:$0x1] }
 0x27c   :  { %v6520_v11 = vmul.f32 %v11665_v33, %v11665_v33  ;;  %v2130_v53 = vor.u32 %v2129_v12, %v2126_v50  ;;  %v2139_v24 = vrot.slane %v2137_v46, 4  ;;  %v2143_v41 = vshll.u32 %v11903_v15, 16  ;;  %v6844_v50 = vld [vmem:[%s12345_s0 + $0x18c] sm:$0xe] }
 0x27d   :  { %7652 = vst [vmem:[%s12347_s2 + $0x20] sm:$0xff] %v7512_v49   ;;  %v11935_v1 = vadd.f32 %v11636_v35, %v6447_v62  ;;  %v2106_v57 = vor.u32 %v2105_v0, %v2102_v42  ;;  %v2109_v17 = vshll.u32 %v11880_v31, 16  ;;  %v5396_v9 = vsel %vm5350_vm8, %v5331_v61, %v11787_v5  ;;  %v11950_v12 = vpop.permute.xlu1 %5010  ;;  %v6938_v62 = vld [vmem:[%s12345_s0 + $0x198] sm:$0xf] }
 0x27e   :  { %v6583_v33 = vadd.f32 %v6582_v60, %v6520_v11  ;;  %4354 = vrot.lane.b32.xlu1 %v7165_v29, %s8001_s26  ;;  %v2131_v63 = vrot.slane %v2130_v53, 4  ;;  %v2135_v25 = vrot.slane %v2133_v30, 5  ;;  %v2115_v46 = vrot.slane %v2113_v48, 4 }
 0x27f   :  { %4352 = vrot.lane.b32.xlu0 %v7164_v55, %s8001_s26  ;;  %v2107_v28 = vrot.slane %v2106_v57, 4  ;;  %v2111_v51 = vrot.slane %v2109_v17, 5  ;;  %v2119_v38 = vshll.u32 %v6812_v45, 16  ;;  %v2145_v22 = vrot.slane %v2143_v41, 5  ;;  %v11958_v23 = vpop.permute.xlu0 %5008  ;;  %v11999_v41 = vld [vmem:[%s12345_s0 + $0x19c] sm:$0xf] }
 0x280   :  { %v11945_v35 = vadd.f32 %v6583_v33, %v6521_v13  ;;  %v2136_v5 = vsel %vm8059_vm2, %v2131_v63, %v2135_v25  ;;  %v2140_v61 = vor.u32 %v2139_v24, %v2135_v25  ;;  %v5463_v7 = vsel %vm5415_vm9, %v5398_v37, %v11841_v10 }
 0x281   :  { %v2116_v44 = vor.u32 %v2115_v46, %v2111_v51  ;;  %v2121_v13 = vrot.slane %v2119_v38, 5  ;;  %v5461_v27 = vsel %vm5415_vm9, %v5396_v9, %v11856_v2  ;;  %v6877_v3 = vrot.slane %v6845_v16, 9  ;;  %v11968_v2 = vld [vmem:[%s12345_s0 + $0x1a4] sm:$0xf]  ;;  %v11970_v48 = vpop.permute.xlu1 %5170 }
 0x282   :  { %v2141_v56 = vrot.slane %v2140_v61, 4  ;;  %v2494_v40 = vrot.slane %v11839_v43, 5  ;;  %v2497_v39 = vrot.slane %v11903_v15, 5  ;;  %v6876_v6 = vrot.slane %v6844_v50, 9 }
 0x283   :  { %v2112_v32 = vsel %vm8059_vm2, %v2107_v28, %v2111_v51  ;;  %v2117_v29 = vrot.slane %v2116_v44, 4  ;;  %v2487_v10 = vrot.slane %v11880_v31, 5  ;;  %v2490_v60 = vrot.slane %v6812_v45, 5  ;;  %v11981_v31 = vld [vmem:[%s12345_s0 + $0x1a8] sm:$0xf]  ;;  %v11990_v11 = vpop.permute.xlu0 %5168 }
 0x284   :  { %v2146_v43 = vsel %vm8059_vm2, %v2141_v56, %v2145_v22  ;;  %v2495_v8 = vsel %vm8536_vm5, %v6877_v3, %v2494_v40  ;;  %v2496_v15 = vrot.slane %v2494_v40, 4  ;;  %v5528_v42 = vsel %vm5480_vm10, %v5463_v7, %v11882_v20  ;;  %v6973_v28 = vld [vmem:[%s12345_s0 + $0x1ac] sm:$0x1] }
 0x285   :  { %v7197_v0 = vcombine.low %v2136_v5, %v2146_v43  ;;  %v2122_v55 = vsel %vm8059_vm2, %v2117_v29, %v2121_v13  ;;  %v2488_v37 = vsel %vm8536_vm5, %v6876_v6, %v2487_v10  ;;  %v2489_v49 = vrot.slane %v2487_v10, 4  ;;  %v6972_v5 = vld [vmem:[%s12345_s0 + $0x1a0] sm:$0x1]  ;;  %v12028_v3 = vpop.f32.mrb[16].mxu0 }
 0x286   :  { %v7196_v20 = vcombine.low %v2112_v32, %v2122_v55  ;;  %v2498_v53 = vsel %vm8536_vm5, %v2496_v15, %v2497_v39  ;;  %v3341_v30 = vshrl.u32 %v11968_v2, 16  ;;  %v3344_v24 = vshll.u32 %v11968_v2, 16  ;;  %v12007_v9 = vpop.permute.xlu1 %4150  ;;  %v12032_v32 = vpop.f32.mrb[17].mxu0  ;;  %v7004_v55 = vld [vmem:[%s12345_s0 + $0x198] sm:$0xe] }
 0x287   :  { %4514 = vrot.lane.b32.xlu1 %v7197_v0, %s8002_s9  ;;  %v7229_v45 = vcombine.low %v2495_v8, %v2498_v53  ;;  %v2491_v33 = vsel %vm8536_vm5, %v2489_v49, %v2490_v60  ;;  %v5526_v57 = vsel %vm5480_vm10, %v5461_v27, %v11892_v18  ;;  %v3354_v17 = vshrl.u32 %v11981_v31, 16  ;;  %v12020_v61 = vpop.permute.xlu0 %4148  ;;  %v7005_v27 = vld [vmem:[%s12345_s0 + $0x1a4] sm:$0xe]  ;;  %v12037_v43 = vpop.f32.mrb[18].mxu0 }
 0x288   :  { %4512 = vrot.lane.b32.xlu0 %v7196_v20, %s8002_s9  ;;  %v7228_v63 = vcombine.low %v2488_v37, %v2491_v33  ;;  %v3343_v25 = vrot.slane %v3341_v30, 4  ;;  %v3346_v46 = vrot.slane %v3344_v24, 5  ;;  %v3317_v16 = vshrl.u32 %v6938_v62, 16  ;;  %v12046_v49 = vpop.f32.mrb[19].mxu0 }
 0x289   :  { %v7261_v51 = vcombine.low %v11968_v2, %v11981_v31  ;;  %v3320_v38 = vshll.u32 %v6938_v62, 16  ;;  %v3330_v18 = vshrl.u32 %v11999_v41, 16  ;;  %v7260_v50 = vcombine.low %v6938_v62, %v11999_v41 }
 0x28a   :  { %v3319_v22 = vrot.slane %v3317_v16, 4  ;;  %v5593_v7 = vsel %vm5545_vm11, %v5528_v42, %v11911_v34  ;;  %v3347_v44 = vor.u32 %v3346_v46, %v3343_v25  ;;  %v3350_v13 = vshll.u32 %v11981_v31, 16  ;;  %v12035_v2 = vpop.permute.xlu1 %4342 }
 0x28b   :  { %4674 = vrot.lane.b32.xlu1 %v7229_v45, %s8003_s15  ;;  %v3322_v56 = vrot.slane %v3320_v38, 5  ;;  %v3356_v40 = vrot.slane %v3354_v17, 4  ;;  %v3360_v39 = vshll.u32 %v6973_v28, 16  ;;  %v3326_v6 = vshll.u32 %v11999_v41, 16  ;;  %v12044_v37 = vpop.permute.xlu0 %4340 }
 0x28c   :  { %4672 = vrot.lane.b32.xlu0 %v7228_v63, %s8003_s15  ;;  %v3348_v34 = vrot.slane %v3347_v44, 4  ;;  %v3352_v29 = vrot.slane %v3350_v13, 5  ;;  %v3332_v10 = vrot.slane %v3330_v18, 4  ;;  %v3336_v60 = vshll.u32 %v6972_v5, 16 }
 0x28d   :  { %v5591_v8 = vsel %vm5545_vm11, %v5526_v57, %v11924_v4  ;;  %v3362_v15 = vrot.slane %v3360_v39, 5  ;;  %v3323_v42 = vor.u32 %v3322_v56, %v3319_v22  ;;  %v3328_v0 = vrot.slane %v3326_v6, 5 }
 0x28e   :  { %v3353_v62 = vsel %vm8059_vm2, %v3348_v34, %v3352_v29  ;;  %v3357_v20 = vor.u32 %v3356_v40, %v3352_v29  ;;  %v3338_v53 = vrot.slane %v3336_v60, 5  ;;  %v5658_v30 = vsel %vm5610_vm12, %v5593_v7, %v11950_v12 }
 0x28f   :  { %4866 = vrot.lane.b32.xlu1 %v7261_v51, %s8004_s20  ;;  %v3324_v4 = vrot.slane %v3323_v42, 4  ;;  %v3333_v24 = vor.u32 %v3332_v10, %v3328_v0  ;;  %v7037_v45 = vrot.slane %v7005_v27, 9  ;;  %v3711_v33 = vrot.slane %v11981_v31, 5 }
 0x290   :  { %4864 = vrot.lane.b32.xlu0 %v7260_v50, %s8004_s20  ;;  %v3358_v57 = vrot.slane %v3357_v20, 4  ;;  %v3714_v17 = vrot.slane %v6973_v28, 5  ;;  %v7036_v63 = vrot.slane %v7004_v55, 9  ;;  %v3704_v25 = vrot.slane %v11999_v41, 5  ;;  %v4503_v28 = vpop.permute.xlu1 %4502 }
 0x291   :  { %v3329_v46 = vsel %vm8059_vm2, %v3324_v4, %v3328_v0  ;;  %v3334_v16 = vrot.slane %v3333_v24, 4  ;;  %v5656_v12 = vsel %vm5610_vm12, %v5591_v8, %v11958_v23  ;;  %v3713_v51 = vrot.slane %v3711_v33, 4  ;;  %v12064_v22 = vpop.permute.xlu0 %4500  ;;  %v7987_v8 = vld [vmem:[%s12345_s0 + $0x138] sm:$0xf] }
 0x292   :  { %v3363_v38 = vsel %vm8059_vm2, %v3358_v57, %v3362_v15  ;;  %v3712_v31 = vsel %vm8536_vm5, %v7037_v45, %v3711_v33  ;;  %v3706_v18 = vrot.slane %v3704_v25, 4  ;;  %v3707_v50 = vrot.slane %v6972_v5, 5  ;;  %v7988_v15 = vld [vmem:[%s12345_s0 + $0x13c] sm:$0xf]  ;;  %v12434_v33 = vld [vmem:[#allocation16_spill] sm:$0xff] }
 0x293   :  { %v7293_v41 = vcombine.low %v3353_v62, %v3363_v38  ;;  %v3339_v7 = vsel %vm8059_vm2, %v3334_v16, %v3338_v53  ;;  %v3715_v44 = vsel %vm8536_vm5, %v3713_v51, %v3714_v17  ;;  %v3705_v23 = vsel %vm8536_vm5, %v7036_v63, %v3704_v25 }
 0x294   :  { %v7292_v13 = vcombine.low %v3329_v46, %v3339_v7  ;;  %v3708_v27 = vsel %vm8536_vm5, %v3706_v18, %v3707_v50  ;;  %v5723_v5 = vsel %vm5675_vm14, %v5658_v30, %v11970_v48  ;;  %v5721_v56 = vsel %vm5675_vm14, %v5656_v12, %v11990_v11  ;;  %v4663_v11 = vpop.permute.xlu1 %4662 }
 0x295   :  { %5026 = vrot.lane.b32.xlu1 %v7293_v41, %s8005_s28  ;;  %v7325_v26 = vcombine.low %v3712_v31, %v3715_v44  ;;  %v6449_v40 = vadd.f32 %v11645_v54, %v11935_v1  ;;  %v6523_v39 = vmul.f32 %v11805_v58, %v11805_v58  ;;  %v7324_v6 = vcombine.low %v3705_v23, %v3708_v27  ;;  %v4661_v34 = vpop.permute.xlu0 %4660 }
 0x296   :  { %5024 = vrot.lane.b32.xlu0 %v7292_v13, %s8005_s28  ;;  %v6585_v59 = vadd.f32 %v11945_v35, %v11909_v52  ;;  %7765 = vmatprep.mubr.msk.bf16.mxu1 %vm5760_vm15, %v5721_v56  ;;  %v7527_v48 = vpack.c.bf16 %v11813_v19, %v11796_v47  ;;  %v7522_v54 = vpack.c.bf16 %v11826_v36, %v11805_v58  ;;  %v7985_v52 = vld [vmem:[%s12345_s0 + $0x144] sm:$0xf]  ;;  %v7986_v35 = vld [vmem:[%s12345_s0 + $0x148] sm:$0xf] }
 0x297   :  { %v6450_v29 = vadd.f32 %v6449_v40, %v11805_v58  ;;  %7766 = vmatmul.mubr.msk.bf16.gmra.mrb[12].mxu1 %vm5760_vm15, %v5723_v5  ;;  %v6524_v1 = vmul.f32 %v11826_v36, %v11826_v36  ;;  %v7063_v60 = vcombine.low %v7985_v52, %v7986_v35  ;;  %v7062_v42 = vcombine.low %v7987_v8, %v7988_v15 }
 0x298   :  { %v6586_v10 = vadd.f32 %v6585_v59, %v6523_v39  ;;  %7655 = vst [vmem:[%s12347_s2 + $0x38] sm:$0xff] %v7527_v48   ;;  %7654 = vst [vmem:[%s12347_s2 + $0x30] sm:$0xff] %v7522_v54   ;;  %v6525_v0 = vmul.f32 %v11796_v47, %v11796_v47  ;;  %v4855_v62 = vpop.permute.xlu1 %4854  ;;  %v6526_v30 = vmul.f32 %v11813_v19, %v11813_v19 }
 0x299   :  { %5186 = vrot.lane.b32.xlu1 %v7325_v26, %s8006_s16  ;;  %v6451_v58 = vadd.f32 %v6450_v29, %v11826_v36  ;;  %v4853_v20 = vpop.permute.xlu0 %4852  ;;  %v7537_v36 = vpack.c.bf16 %v12037_v43, %v12028_v3  ;;  %v6527_v24 = vmul.f32 %v12032_v32, %v12032_v32  ;;  %v7532_v45 = vpack.c.bf16 %v12046_v49, %v12032_v32 }
 0x29a   :  { %5184 = vrot.lane.b32.xlu0 %v7324_v6, %s8006_s16  ;;  %v6587_v55 = vadd.f32 %v6586_v10, %v6524_v1  ;;  %v5266_v57 = vsel %vm5188_vm6, %v7063_v60, %v12434_v33  ;;  %v6528_v16 = vmul.f32 %v12046_v49, %v12046_v49  ;;  %v7990_v33 = vld [vmem:[%s12345_s0 + $0x160] sm:$0xf] }
 0x29b   :  { %v6452_v53 = vadd.f32 %v11796_v47, %v6451_v58  ;;  %7657 = vst [vmem:[%s12347_s2 + $0x48] sm:$0xff] %v7537_v36   ;;  %v12435_v47 = vld [vmem:[#allocation17_spill] sm:$0xff]  ;;  %v5337_v25 = vsel %vm5285_vm7, %v5266_v57, %v12007_v9  ;;  %7656 = vst [vmem:[%s12347_s2 + $0x40] sm:$0xff] %v7532_v45  }
 0x29c   :  { %v6588_v4 = vadd.f32 %v6587_v55, %v6525_v0  ;;  %v5263_v63 = vsel %vm5188_vm6, %v7062_v42, %v12435_v47  ;;  %v7989_v45 = vld [vmem:[%s12345_s0 + $0x15c] sm:$0xf]  ;;  %v7992_v47 = vld [vmem:[%s12345_s0 + $0x154] sm:$0xf] }
 0x29d   :  { %v6453_v17 = vadd.f32 %v11813_v19, %v6452_v53  ;;  %v5335_v12 = vsel %vm5285_vm7, %v5263_v63, %v12020_v61  ;;  %v5402_v19 = vsel %vm5350_vm8, %v5337_v25, %v12035_v2  ;;  %v7065_v57 = vcombine.low %v7989_v45, %v7990_v33 }
 0x29e   :  { %v6589_v46 = vadd.f32 %v6588_v4, %v6526_v30  ;;  %v5015_v51 = vpop.permute.xlu1 %5014  ;;  %v5400_v9 = vsel %vm5350_vm8, %v5335_v12, %v12044_v37  ;;  %v5467_v31 = vsel %vm5415_vm9, %v5402_v19, %v4503_v28  ;;  %v12437_v19 = vld [vmem:[#allocation19_spill] sm:$0xff] }
 0x29f   :  { %v6454_v38 = vadd.f32 %v6453_v17, %v12032_v32  ;;  %v5013_v18 = vpop.permute.xlu0 %5012  ;;  %v5465_v41 = vsel %vm5415_vm9, %v5400_v9, %v12064_v22  ;;  %v5532_v7 = vsel %vm5480_vm10, %v5467_v31, %v4663_v11  ;;  %v6529_v32 = vmul.f32 %v12028_v3, %v12028_v3  ;;  %v7991_v17 = vld [vmem:[%s12345_s0 + $0x150] sm:$0xf] }
 0x2a0   :  { %v6590_v50 = vadd.f32 %v6589_v46, %v6527_v24  ;;  %v5530_v44 = vsel %vm5480_vm10, %v5465_v41, %v4661_v34  ;;  %v5597_v2 = vsel %vm5545_vm11, %v5532_v7, %v4855_v62  ;;  %v7064_v63 = vcombine.low %v7991_v17, %v7992_v47  ;;  %v12438_v17 = vld [vmem:[#allocation20_spill] sm:$0xff] }
 0x2a1   :  { %v6455_v61 = vadd.f32 %v6454_v38, %v12046_v49  ;;  %v5595_v37 = vsel %vm5545_vm11, %v5530_v44, %v4853_v20  ;;  %v5662_v28 = vsel %vm5610_vm12, %v5597_v2, %v5015_v51  ;;  %v6530_v49 = vmul.f32 %v12037_v43, %v12037_v43  ;;  %v7743_v40 = vpop.f32.mrb[20].mxu0 }
 0x2a2   :  { %v6591_v23 = vadd.f32 %v6590_v50, %v6528_v16  ;;  %v5175_v13 = vpop.permute.xlu1 %5174  ;;  %v5660_v22 = vsel %vm5610_vm12, %v5595_v37, %v5013_v18  ;;  %v5943_v6 = vpop.f32.mrb[21].mxu0  ;;  %v6533_v58 = vmul.f32 %v7743_v40, %v7743_v40  ;;  %v12436_v16 = vld [vmem:[#allocation18_spill] sm:$0xff]  ;;  %v5269_v51 = vsel %vm5188_vm6, %v7064_v63, %v12437_v19  ;;  %v12439_v63 = vld [vmem:[#allocation21_spill] sm:$0xff] }
 0x2a3   :  { %v6456_v27 = vadd.f32 %v12028_v3, %v6455_v61  ;;  %v5727_v5 = vsel %vm5675_vm14, %v5662_v28, %v5175_v13  ;;  %v5173_v26 = vpop.permute.xlu0 %5172  ;;  %v6531_v48 = vmul.f32 %v5943_v6, %v5943_v6  ;;  %v7744_v3 = vpop.f32.mrb[22].mxu0  ;;  %v5272_v12 = vsel %vm5188_vm6, %v7065_v57, %v12436_v16 }
 0x2a4   :  { %v6592_v56 = vadd.f32 %v6591_v23, %v6529_v32  ;;  %v5725_v39 = vsel %vm5675_vm14, %v5660_v22, %v5173_v26  ;;  %v7547_v54 = vpack.c.bf16 %v7744_v3, %v7743_v40  ;;  %v5946_v1 = vpop.f32.mrb[23].mxu0  ;;  %v6534_v55 = vmul.f32 %v7744_v3, %v7744_v3 }
 0x2a5   :  { %v6457_v59 = vadd.f32 %v12037_v43, %v6456_v27  ;;  %7769 = vmatprep.mubr.msk.bf16.mxu1 %vm5760_vm15, %v5725_v39  ;;  %v7542_v35 = vpack.c.bf16 %v5946_v1, %v5943_v6  ;;  %v6532_v60 = vmul.f32 %v5946_v1, %v5946_v1 }
 0x2a6   :  { %v6593_v11 = vadd.f32 %v6592_v56, %v6530_v49  ;;  %7770 = vmatmul.mubr.msk.bf16.gmra.mrb[16].mxu1 %vm5760_vm15, %v5727_v5  ;;  %v4155_v34 = vpop.permute.xlu1 %4154  ;;  %7659 = vst [vmem:[%s12347_s2 + $0x58] sm:$0xff] %v7547_v54  }
 0x2a7   :  { %v6458_v29 = vadd.f32 %v6457_v59, %v5943_v6  ;;  %v4153_v10 = vpop.permute.xlu0 %4152  ;;  %7658 = vst [vmem:[%s12347_s2 + $0x50] sm:$0xff] %v7542_v35   ;;  %v5341_v38 = vsel %vm5285_vm7, %v5272_v12, %v4155_v34 }
 0x2a8   :  { %v6594_v52 = vadd.f32 %v6593_v11, %v6531_v48  ;;  %v5339_v31 = vsel %vm5285_vm7, %v5269_v51, %v4153_v10 }
 0x2a9   :  { %v6459_v43 = vadd.f32 %v6458_v29, %v5946_v1 }
 0x2aa   :  { %v6595_v8 = vadd.f32 %v6594_v52, %v6532_v60  ;;  %v4347_v15 = vpop.permute.xlu1 %4346 }
 0x2ab   :  { %v6460_v42 = vadd.f32 %v7743_v40, %v6459_v43  ;;  %v4345_v0 = vpop.permute.xlu0 %4344  ;;  %v5406_v18 = vsel %vm5350_vm8, %v5341_v38, %v4347_v15 }
 0x2ac   :  { %v6596_v62 = vadd.f32 %v6595_v8, %v6533_v58  ;;  %v5404_v41 = vsel %vm5350_vm8, %v5339_v31, %v4345_v0 }
 0x2ad   :  { %v6461_v20 = vadd.f32 %v7744_v3, %v6460_v42 }
 0x2ae   :  { %v6597_v36 = vadd.f32 %v6596_v62, %v6534_v55 }
 0x2b0   :  { %v4507_v53 = vpop.permute.xlu1 %4506 }
 0x2b1   :  { %v4505_v30 = vpop.permute.xlu0 %4504  ;;  %v5471_v7 = vsel %vm5415_vm9, %v5406_v18, %v4507_v53 }
 0x2b2   :  { %v5469_v23 = vsel %vm5415_vm9, %v5404_v41, %v4505_v30  ;;  %v7995_v30 = vld [vmem:[%s12345_s0 + $0x168] sm:$0xf] }
 0x2b4   :  { %v4667_v4 = vpop.permute.xlu1 %4666 }
 0x2b5   :  { %v4665_v24 = vpop.permute.xlu0 %4664  ;;  %v5536_v37 = vsel %vm5480_vm10, %v5471_v7, %v4667_v4  ;;  %v7996_v4 = vld [vmem:[%s12345_s0 + $0x16c] sm:$0xf] }
 0x2b6   :  { %v5534_v13 = vsel %vm5480_vm10, %v5469_v23, %v4665_v24  ;;  %v7066_v24 = vcombine.low %v7995_v30, %v7996_v4  ;;  %v12441_v4 = vld [vmem:[#allocation23_spill] sm:$0xff] }
 0x2b8   :  { %v4859_v25 = vpop.permute.xlu1 %4858 }
 0x2b9   :  { %v4857_v46 = vpop.permute.xlu0 %4856  ;;  %v5601_v27 = vsel %vm5545_vm11, %v5536_v37, %v4859_v25  ;;  %v5275_v25 = vsel %vm5188_vm6, %v7066_v24, %v12439_v63 }
 0x2ba   :  { %v5599_v56 = vsel %vm5545_vm11, %v5534_v13, %v4857_v46 }
 0x2bd   :  { %v7747_v9 = vpop.f32.mrb[24].mxu0 }
 0x2be   :  { %v5959_v50 = vpop.f32.mrb[25].mxu0  ;;  %v6537_v3 = vmul.f32 %v7747_v9, %v7747_v9 }
 0x2bf   :  { %v6462_v2 = vadd.f32 %v6461_v20, %v5959_v50  ;;  %v6535_v32 = vmul.f32 %v5959_v50, %v5959_v50  ;;  %v7748_v28 = vpop.f32.mrb[26].mxu0  ;;  %v7993_v20 = vld [vmem:[%s12345_s0 + $0x174] sm:$0xf] }
 0x2c0   :  { %v7557_v49 = vpack.c.bf16 %v7748_v28, %v7747_v9  ;;  %v5962_v5 = vpop.f32.mrb[27].mxu0  ;;  %v6538_v10 = vmul.f32 %v7748_v28, %v7748_v28 }
 0x2c1   :  { %v5019_v61 = vpop.permute.xlu1 %5018  ;;  %v5017_v44 = vpop.permute.xlu0 %5016  ;;  %v6598_v22 = vadd.f32 %v6597_v36, %v6535_v32  ;;  %v7552_v26 = vpack.c.bf16 %v5962_v5, %v5959_v50  ;;  %v6463_v40 = vadd.f32 %v6462_v2, %v5962_v5  ;;  %v6536_v39 = vmul.f32 %v5962_v5, %v5962_v5  ;;  %v7994_v36 = vld [vmem:[%s12345_s0 + $0x178] sm:$0xf] }
 0x2c2   :  { %v5666_v6 = vsel %vm5610_vm12, %v5601_v27, %v5019_v61  ;;  %v5664_v59 = vsel %vm5610_vm12, %v5599_v56, %v5017_v44  ;;  %7661 = vst [vmem:[%s12347_s2 + $0x68] sm:$0xff] %v7557_v49   ;;  %v7067_v53 = vcombine.low %v7993_v20, %v7994_v36  ;;  %v12440_v36 = vld [vmem:[#allocation22_spill] sm:$0xff] }
 0x2c3   :  { %7660 = vst [vmem:[%s12347_s2 + $0x60] sm:$0xff] %v7552_v26   ;;  %v6464_v54 = vadd.f32 %v7747_v9, %v6463_v40  ;;  %v6599_v1 = vadd.f32 %v6598_v22, %v6536_v39 }
 0x2c4   :  { %v5278_v47 = vsel %vm5188_vm6, %v7067_v53, %v12438_v17 }
 0x2c5   :  { %v5179_v48 = vpop.permute.xlu1 %5178  ;;  %v5177_v11 = vpop.permute.xlu0 %5176  ;;  %v6600_v52 = vadd.f32 %v6599_v1, %v6537_v3  ;;  %v6465_v35 = vadd.f32 %v7748_v28, %v6464_v54 }
 0x2c6   :  { %v5731_v34 = vsel %vm5675_vm14, %v5666_v6, %v5179_v48  ;;  %v5729_v29 = vsel %vm5675_vm14, %v5664_v59, %v5177_v11 }
 0x2c7   :  { %7773 = vmatprep.mubr.msk.bf16.mxu1 %vm5760_vm15, %v5729_v29  ;;  %v6601_v58 = vadd.f32 %v6600_v52, %v6538_v10 }
 0x2c8   :  { %7774 = vmatmul.mubr.msk.bf16.gmra.mrb[20].mxu1 %vm5760_vm15, %v5731_v34 }
 0x2c9   :  { %v4159_v60 = vpop.permute.xlu1 %4158 }
 0x2ca   :  { %v4157_v43 = vpop.permute.xlu0 %4156  ;;  %v5345_v16 = vsel %vm5285_vm7, %v5278_v47, %v4159_v60 }
 0x2cb   :  { %v5343_v12 = vsel %vm5285_vm7, %v5275_v25, %v4157_v43 }
 0x2cd   :  { %v4351_v8 = vpop.permute.xlu1 %4350 }
 0x2ce   :  { %v4349_v15 = vpop.permute.xlu0 %4348  ;;  %v5410_v9 = vsel %vm5350_vm8, %v5345_v16, %v4351_v8  ;;  %v7997_v8 = vld [vmem:[%s12345_s0 + $0x18c] sm:$0xf] }
 0x2cf   :  { %v5408_v31 = vsel %vm5350_vm8, %v5343_v12, %v4349_v15  ;;  %v7069_v15 = vcombine.low %v7997_v8, %v11832_v21 }
 0x2d1   :  { %v5284_v53 = vsel %vm5188_vm6, %v7069_v15, %v12440_v36 }
 0x2d3   :  { %v4511_v42 = vpop.permute.xlu1 %4510 }
 0x2d4   :  { %v5475_v7 = vsel %vm5415_vm9, %v5410_v9, %v4511_v42  ;;  %v7998_v42 = vld [vmem:[%s12345_s0 + $0x180] sm:$0xf] }
 0x2d5   :  { %v4509_v0 = vpop.permute.xlu0 %4508 }
 0x2d6   :  { %v5473_v23 = vsel %vm5415_vm9, %v5408_v31, %v4509_v0  ;;  %v7068_v0 = vcombine.low %v7998_v42, %v11847_v14 }
 0x2d8   :  { %v4671_v55 = vpop.permute.xlu1 %4670  ;;  %v5281_v24 = vsel %vm5188_vm6, %v7068_v0, %v12441_v4 }
 0x2d9   :  { %v4669_v62 = vpop.permute.xlu0 %4668  ;;  %v5540_v37 = vsel %vm5480_vm10, %v5475_v7, %v4671_v55 }
 0x2da   :  { %v5538_v13 = vsel %vm5480_vm10, %v5473_v23, %v4669_v62 }
 0x2dc   :  { %v4863_v45 = vpop.permute.xlu1 %4862 }
 0x2dd   :  { %v4861_v33 = vpop.permute.xlu0 %4860  ;;  %v5605_v27 = vsel %vm5545_vm11, %v5540_v37, %v4863_v45 }
 0x2de   :  { %v5603_v49 = vsel %vm5545_vm11, %v5538_v13, %v4861_v33 }
 0x2df   :  { %v7751_v57 = vpop.f32.mrb[28].mxu0 }
 0x2e0   :  { %v5975_v46 = vpop.f32.mrb[29].mxu0  ;;  %v6541_v26 = vmul.f32 %v7751_v57, %v7751_v57 }
 0x2e1   :  { %v6466_v19 = vadd.f32 %v6465_v35, %v5975_v46  ;;  %v6539_v51 = vmul.f32 %v5975_v46, %v5975_v46  ;;  %v7752_v38 = vpop.f32.mrb[30].mxu0 }
 0x2e2   :  { %v7567_v50 = vpack.c.bf16 %v7752_v38, %v7751_v57  ;;  %v5978_v41 = vpop.f32.mrb[31].mxu0  ;;  %v6542_v3 = vmul.f32 %v7752_v38, %v7752_v38 }
 0x2e3   :  { %v6602_v44 = vadd.f32 %v6601_v58, %v6539_v51  ;;  %v7562_v2 = vpack.c.bf16 %v5978_v41, %v5975_v46  ;;  %v6467_v32 = vadd.f32 %v6466_v19, %v5978_v41  ;;  %v6540_v28 = vmul.f32 %v5978_v41, %v5978_v41 }
 0x2e4   :  { %v5023_v18 = vpop.permute.xlu1 %5022  ;;  %7663 = vst [vmem:[%s12347_s2 + $0x78] sm:$0xff] %v7567_v50  }
 0x2e5   :  { %v5021_v61 = vpop.permute.xlu0 %5020  ;;  %7662 = vst [vmem:[%s12347_s2 + $0x70] sm:$0xff] %v7562_v2   ;;  %v6468_v22 = vadd.f32 %v7751_v57, %v6467_v32  ;;  %v5670_v5 = vsel %vm5610_vm12, %v5605_v27, %v5023_v18  ;;  %v6603_v40 = vadd.f32 %v6602_v44, %v6540_v28 }
 0x2e6   :  { %v5668_v39 = vsel %vm5610_vm12, %v5603_v49, %v5021_v61 }
 0x2e7   :  { %v6469_v48 = vadd.f32 %v7752_v38, %v6468_v22  ;;  %v6604_v34 = vadd.f32 %v6603_v40, %v6541_v26 }
 0x2e8   :  { %v5183_v56 = vpop.permute.xlu1 %5182 }
 0x2e9   :  { %v5735_v6 = vsel %vm5675_vm14, %v5670_v5, %v5183_v56  ;;  %v5181_v59 = vpop.permute.xlu0 %5180  ;;  %v6605_v29 = vadd.f32 %v6604_v34, %v6542_v3 }
 0x2ea   :  { %v5733_v11 = vsel %vm5675_vm14, %v5668_v39, %v5181_v59 }
 0x2eb   :  { %7777 = vmatprep.mubr.msk.bf16.mxu1 %vm5760_vm15, %v5733_v11 }
 0x2ec   :  { %7778 = vmatmul.mubr.msk.bf16.gmra.mrb[24].mxu1 %vm5760_vm15, %v5735_v6  ;;  %v4163_v54 = vpop.permute.xlu1 %4162 }
 0x2ed   :  { %v4161_v1 = vpop.permute.xlu0 %4160  ;;  %v5349_v45 = vsel %vm5285_vm7, %v5284_v53, %v4163_v54 }
 0x2ee   :  { %v5347_v17 = vsel %vm5285_vm7, %v5281_v24, %v4161_v1 }
 0x2f0   :  { %v4355_v10 = vpop.permute.xlu1 %4354 }
 0x2f1   :  { %v4353_v52 = vpop.permute.xlu0 %4352  ;;  %v5414_v47 = vsel %vm5350_vm8, %v5349_v45, %v4355_v10 }
 0x2f2   :  { %v5412_v19 = vsel %vm5350_vm8, %v5347_v17, %v4353_v52 }
 0x2f9   :  { %v4515_v35 = vpop.permute.xlu1 %4514 }
 0x2fa   :  { %v4513_v60 = vpop.permute.xlu0 %4512  ;;  %v5479_v51 = vsel %vm5415_vm9, %v5414_v47, %v4515_v35 }
 0x2fb   :  { %v5477_v9 = vsel %vm5415_vm9, %v5412_v19, %v4513_v60 }
 0x2fd   :  { %v4675_v43 = vpop.permute.xlu1 %4674 }
 0x2fe   :  { %v4673_v58 = vpop.permute.xlu0 %4672  ;;  %v5544_v7 = vsel %vm5480_vm10, %v5479_v51, %v4675_v43 }
 0x2ff   :  { %v5542_v61 = vsel %vm5480_vm10, %v5477_v9, %v4673_v58 }
 0x301   :  { %v4867_v55 = vpop.permute.xlu1 %4866  ;;  %v7755_v20 = vpop.f32.mrb[0].mxu1 }
 0x302   :  { %v4865_v62 = vpop.permute.xlu0 %4864  ;;  %v5991_v30 = vpop.f32.mrb[1].mxu1  ;;  %v6545_v18 = vmul.f32 %v7755_v20, %v7755_v20  ;;  %v5609_v44 = vsel %vm5545_vm11, %v5544_v7, %v4867_v55 }
 0x303   :  { %v6470_v33 = vadd.f32 %v6469_v48, %v5991_v30  ;;  %v6543_v21 = vmul.f32 %v5991_v30, %v5991_v30  ;;  %v7756_v57 = vpop.f32.mrb[2].mxu1  ;;  %v5607_v37 = vsel %vm5545_vm11, %v5542_v61, %v4865_v62 }
 0x304   :  { %v7577_v14 = vpack.c.bf16 %v7756_v57, %v7755_v20  ;;  %v5994_v63 = vpop.f32.mrb[3].mxu1  ;;  %v6546_v2 = vmul.f32 %v7756_v57, %v7756_v57 }
 0x305   :  { %v6606_v25 = vadd.f32 %v6605_v29, %v6543_v21  ;;  %v7572_v46 = vpack.c.bf16 %v5994_v63, %v5991_v30  ;;  %v6471_v16 = vadd.f32 %v6470_v33, %v5994_v63  ;;  %v6544_v12 = vmul.f32 %v5994_v63, %v5994_v63 }
 0x306   :  { %7665 = vst [vmem:[%s12347_s2 + $0x88] sm:$0xff] %v7577_v14   ;;  %v8007_v14 = vmov 0.0  }
 0x307   :  { %v5027_v38 = vpop.permute.xlu1 %5026  ;;  %7664 = vst [vmem:[%s12347_s2 + $0x80] sm:$0xff] %v7572_v46   ;;  %v6472_v50 = vadd.f32 %v7755_v20, %v6471_v16  ;;  %v6607_v41 = vadd.f32 %v6606_v25, %v6544_v12  ;;  %58 = vst [vmem:[%s12348_s3] sm:$0x1] %v8007_v14 }
 0x308   :  { %v5025_v31 = vpop.permute.xlu0 %5024  ;;  %v5674_v28 = vsel %vm5610_vm12, %v5609_v44, %v5027_v38  ;;  %59 = vst [vmem:[%s12349_s4] sm:$0x1] %v8007_v14 }
 0x309   :  { %v6608_v32 = vadd.f32 %v6607_v41, %v6545_v18  ;;  %v6473_v23 = vadd.f32 %v7756_v57, %v6472_v50  ;;  %v5672_v27 = vsel %vm5610_vm12, %v5607_v37, %v5025_v31 }
 0x30b   :  { %v5187_v13 = vpop.permute.xlu1 %5186  ;;  %v6609_v5 = vadd.f32 %v6608_v32, %v6546_v2 }
 0x30c   :  { %v5739_v22 = vsel %vm5675_vm14, %v5674_v28, %v5187_v13  ;;  %v5185_v49 = vpop.permute.xlu0 %5184 }
 0x30d   :  { %v5737_v56 = vsel %vm5675_vm14, %v5672_v27, %v5185_v49 }
 0x30e   :  { %7781 = vmatprep.mubr.msk.bf16.mxu1 %vm5760_vm15, %v5737_v56 }
 0x30f   :  { %7782 = vmatmul.mubr.msk.bf16.gmra.mrb[28].mxu1 %vm5760_vm15, %v5739_v22 }
 0x321   :  { %v7759_v26 = vpop.f32.mrb[4].mxu1 }
 0x322   :  { %v6007_v40 = vpop.f32.mrb[5].mxu1  ;;  %v6549_v1 = vmul.f32 %v7759_v26, %v7759_v26 }
 0x323   :  { %v6474_v39 = vadd.f32 %v6473_v23, %v6007_v40  ;;  %v6547_v6 = vmul.f32 %v6007_v40, %v6007_v40  ;;  %v7760_v59 = vpop.f32.mrb[6].mxu1 }
 0x324   :  { %v7587_v48 = vpack.c.bf16 %v7760_v59, %v7759_v26  ;;  %v6010_v11 = vpop.f32.mrb[7].mxu1  ;;  %v6550_v35 = vmul.f32 %v7760_v59, %v7760_v59 }
 0x325   :  { %v6610_v3 = vadd.f32 %v6609_v5, %v6547_v6  ;;  %v7582_v34 = vpack.c.bf16 %v6010_v11, %v6007_v40  ;;  %v6475_v29 = vadd.f32 %v6474_v39, %v6010_v11  ;;  %v6548_v54 = vmul.f32 %v6010_v11, %v6010_v11 }
 0x326   :  { %7667 = vst [vmem:[%s12347_s2 + $0x98] sm:$0xff] %v7587_v48  }
 0x327   :  { %7666 = vst [vmem:[%s12347_s2 + $0x90] sm:$0xff] %v7582_v34   ;;  %v6476_v10 = vadd.f32 %v7759_v26, %v6475_v29  ;;  %v6611_v52 = vadd.f32 %v6610_v3, %v6548_v54 }
 0x329   :  { %v6612_v60 = vadd.f32 %v6611_v52, %v6549_v1  ;;  %v6477_v43 = vadd.f32 %v7760_v59, %v6476_v10 }
 0x32b   :  { %v6613_v58 = vadd.f32 %v6612_v60, %v6550_v35 }
 0x345   :  { %v7763_v8 = vpop.f32.mrb[8].mxu1 }
 0x346   :  { %v6023_v15 = vpop.f32.mrb[9].mxu1  ;;  %v6553_v24 = vmul.f32 %v7763_v8, %v7763_v8 }
 0x347   :  { %v6478_v42 = vadd.f32 %v6477_v43, %v6023_v15  ;;  %v6551_v0 = vmul.f32 %v6023_v15, %v6023_v15  ;;  %v7764_v55 = vpop.f32.mrb[10].mxu1 }
 0x348   :  { %v7597_v62 = vpack.c.bf16 %v7764_v55, %v7763_v8  ;;  %v6026_v20 = vpop.f32.mrb[11].mxu1  ;;  %v6554_v21 = vmul.f32 %v7764_v55, %v7764_v55 }
 0x349   :  { %v6614_v36 = vadd.f32 %v6613_v58, %v6551_v0  ;;  %v7592_v53 = vpack.c.bf16 %v6026_v20, %v6023_v15  ;;  %v6479_v30 = vadd.f32 %v6478_v42, %v6026_v20  ;;  %v6552_v4 = vmul.f32 %v6026_v20, %v6026_v20 }
 0x34a   :  { %7669 = vst [vmem:[%s12347_s2 + $0xa8] sm:$0xff] %v7597_v62  }
 0x34b   :  { %7668 = vst [vmem:[%s12347_s2 + $0xa0] sm:$0xff] %v7592_v53   ;;  %v6480_v45 = vadd.f32 %v7763_v8, %v6479_v30  ;;  %v6615_v33 = vadd.f32 %v6614_v36, %v6552_v4 }
 0x34d   :  { %v6616_v57 = vadd.f32 %v6615_v33, %v6553_v24  ;;  %v6481_v17 = vadd.f32 %v7764_v55, %v6480_v45 }
 0x34f   :  { %v6617_v47 = vadd.f32 %v6616_v57, %v6554_v21 }
 0x36a   :  { %v7767_v63 = vpop.f32.mrb[12].mxu1 }
 0x36b   :  { %v6039_v25 = vpop.f32.mrb[13].mxu1  ;;  %v6557_v50 = vmul.f32 %v7767_v63, %v7767_v63 }
 0x36c   :  { %v6482_v46 = vadd.f32 %v6481_v17, %v6039_v25  ;;  %v6555_v16 = vmul.f32 %v6039_v25, %v6039_v25  ;;  %v7768_v12 = vpop.f32.mrb[14].mxu1 }
 0x36d   :  { %v7607_v19 = vpack.c.bf16 %v7768_v12, %v7767_v63  ;;  %v6042_v51 = vpop.f32.mrb[15].mxu1  ;;  %v6558_v61 = vmul.f32 %v7768_v12, %v7768_v12 }
 0x36e   :  { %v6618_v38 = vadd.f32 %v6617_v47, %v6555_v16  ;;  %v7602_v9 = vpack.c.bf16 %v6042_v51, %v6039_v25  ;;  %v6483_v31 = vadd.f32 %v6482_v46, %v6042_v51  ;;  %v6556_v18 = vmul.f32 %v6042_v51, %v6042_v51 }
 0x36f   :  { %7671 = vst [vmem:[%s12347_s2 + $0xb8] sm:$0xff] %v7607_v19  }
 0x370   :  { %7670 = vst [vmem:[%s12347_s2 + $0xb0] sm:$0xff] %v7602_v9   ;;  %v6484_v41 = vadd.f32 %v7767_v63, %v6483_v31  ;;  %v6619_v7 = vadd.f32 %v6618_v38, %v6556_v18 }
 0x372   :  { %v6620_v44 = vadd.f32 %v6619_v7, %v6557_v50  ;;  %v6485_v2 = vadd.f32 %v7768_v12, %v6484_v41 }
 0x374   :  { %v6621_v32 = vadd.f32 %v6620_v44, %v6558_v61 }
 0x379   :  { %v7771_v23 = vpop.f32.mrb[16].mxu1 }
 0x37a   :  { %v6055_v37 = vpop.f32.mrb[17].mxu1  ;;  %v6561_v39 = vmul.f32 %v7771_v23, %v7771_v23 }
 0x37b   :  { %v6486_v28 = vadd.f32 %v6485_v2, %v6055_v37  ;;  %v6559_v13 = vmul.f32 %v6055_v37, %v6055_v37  ;;  %v7772_v27 = vpop.f32.mrb[18].mxu1 }
 0x37c   :  { %v7617_v22 = vpack.c.bf16 %v7772_v27, %v7771_v23  ;;  %v6058_v49 = vpop.f32.mrb[19].mxu1  ;;  %v6562_v48 = vmul.f32 %v7772_v27, %v7772_v27 }
 0x37d   :  { %v6622_v5 = vadd.f32 %v6621_v32, %v6559_v13  ;;  %v7612_v56 = vpack.c.bf16 %v6058_v49, %v6055_v37  ;;  %v6487_v26 = vadd.f32 %v6486_v28, %v6058_v49  ;;  %v6560_v40 = vmul.f32 %v6058_v49, %v6058_v49 }
 0x37e   :  { %7673 = vst [vmem:[%s12347_s2 + $0xc8] sm:$0xff] %v7617_v22  }
 0x37f   :  { %7672 = vst [vmem:[%s12347_s2 + $0xc0] sm:$0xff] %v7612_v56   ;;  %v6488_v6 = vadd.f32 %v7771_v23, %v6487_v26  ;;  %v6623_v59 = vadd.f32 %v6622_v5, %v6560_v40 }
 0x381   :  { %v6624_v11 = vadd.f32 %v6623_v59, %v6561_v39  ;;  %v6489_v3 = vadd.f32 %v7772_v27, %v6488_v6 }
 0x383   :  { %v6625_v34 = vadd.f32 %v6624_v11, %v6562_v48 }
 0x39b   :  { %v7775_v29 = vpop.f32.mrb[20].mxu1 }
 0x39c   :  { %v6071_v54 = vpop.f32.mrb[21].mxu1  ;;  %v6565_v42 = vmul.f32 %v7775_v29, %v7775_v29 }
 0x39d   :  { %v6490_v1 = vadd.f32 %v6489_v3, %v6071_v54  ;;  %v6563_v10 = vmul.f32 %v6071_v54, %v6071_v54  ;;  %v7776_v52 = vpop.f32.mrb[22].mxu1 }
 0x39e   :  { %v7627_v35 = vpack.c.bf16 %v7776_v52, %v7775_v29  ;;  %v6074_v60 = vpop.f32.mrb[23].mxu1  ;;  %v6566_v62 = vmul.f32 %v7776_v52, %v7776_v52 }
 0x39f   :  { %v6626_v43 = vadd.f32 %v6625_v34, %v6563_v10  ;;  %v7622_v58 = vpack.c.bf16 %v6074_v60, %v6071_v54  ;;  %v6491_v8 = vadd.f32 %v6490_v1, %v6074_v60  ;;  %v6564_v15 = vmul.f32 %v6074_v60, %v6074_v60  ;;  %v6438_v34 = vld [vmem:[%s12348_s3] sm:$0x1] }
 0x3a0   :  { %7675 = vst [vmem:[%s12347_s2 + $0xd8] sm:$0xff] %v7627_v35   ;;  %v6510_v1 = vld [vmem:[%s12349_s4] sm:$0x1] }
 0x3a1   :  { %7674 = vst [vmem:[%s12347_s2 + $0xd0] sm:$0xff] %v7622_v58   ;;  %v6492_v0 = vadd.f32 %v7775_v29, %v6491_v8  ;;  %v6627_v55 = vadd.f32 %v6626_v43, %v6564_v15 }
 0x3a3   :  { %v6628_v20 = vadd.f32 %v6627_v55, %v6565_v42  ;;  %v6493_v36 = vadd.f32 %v7776_v52, %v6492_v0 }
 0x3a5   :  { %v6629_v53 = vadd.f32 %v6628_v20, %v6566_v62 }
 0x3bf   :  { %v7779_v30 = vpop.f32.mrb[24].mxu1 }
 0x3c0   :  { %v6087_v4 = vpop.f32.mrb[25].mxu1  ;;  %v6569_v25 = vmul.f32 %v7779_v30, %v7779_v30 }
 0x3c1   :  { %v6494_v24 = vadd.f32 %v6493_v36, %v6087_v4  ;;  %v6567_v45 = vmul.f32 %v6087_v4, %v6087_v4  ;;  %v7780_v33 = vpop.f32.mrb[26].mxu1 }
 0x3c2   :  { %v7637_v21 = vpack.c.bf16 %v7780_v33, %v7779_v30  ;;  %v6090_v57 = vpop.f32.mrb[27].mxu1  ;;  %v6570_v12 = vmul.f32 %v7780_v33, %v7780_v33 }
 0x3c3   :  { %v6630_v17 = vadd.f32 %v6629_v53, %v6567_v45  ;;  %v7632_v47 = vpack.c.bf16 %v6090_v57, %v6087_v4  ;;  %v6495_v14 = vadd.f32 %v6494_v24, %v6090_v57  ;;  %v6568_v63 = vmul.f32 %v6090_v57, %v6090_v57 }
 0x3c4   :  { %7677 = vst [vmem:[%s12347_s2 + $0xe8] sm:$0xff] %v7637_v21  }
 0x3c5   :  { %7676 = vst [vmem:[%s12347_s2 + $0xe0] sm:$0xff] %v7632_v47   ;;  %v6496_v46 = vadd.f32 %v7779_v30, %v6495_v14  ;;  %v6631_v16 = vadd.f32 %v6630_v17, %v6568_v63 }
 0x3c7   :  { %v6632_v19 = vadd.f32 %v6631_v16, %v6569_v25  ;;  %v6497_v51 = vadd.f32 %v7780_v33, %v6496_v46 }
 0x3c9   :  { %v6633_v38 = vadd.f32 %v6632_v19, %v6570_v12 }
 0x3e2   :  { %v7783_v9 = vpop.f32.mrb[28].mxu1 }
 0x3e3   :  { %v6103_v31 = vpop.f32.mrb[29].mxu1  ;;  %v6573_v37 = vmul.f32 %v7783_v9, %v7783_v9 }
 0x3e4   :  { %v6498_v18 = vadd.f32 %v6497_v51, %v6103_v31  ;;  %v6571_v50 = vmul.f32 %v6103_v31, %v6103_v31  ;;  %v7784_v41 = vpop.f32.mrb[30].mxu1 }
 0x3e5   :  { %v7647_v7 = vpack.c.bf16 %v7784_v41, %v7783_v9  ;;  %v6106_v61 = vpop.f32.mrb[31].mxu1  ;;  %v6574_v27 = vmul.f32 %v7784_v41, %v7784_v41 }
 0x3e6   :  { %v6634_v44 = vadd.f32 %v6633_v38, %v6571_v50  ;;  %v7642_v2 = vpack.c.bf16 %v6106_v61, %v6103_v31  ;;  %v6499_v32 = vadd.f32 %v6498_v18, %v6106_v61  ;;  %v6572_v23 = vmul.f32 %v6106_v61, %v6106_v61 }
 0x3e7   :  { %7679 = vst [vmem:[%s12347_s2 + $0xf8] sm:$0xff] %v7647_v7  }
 0x3e8   :  { %7678 = vst [vmem:[%s12347_s2 + $0xf0] sm:$0xff] %v7642_v2   ;;  %v6500_v28 = vadd.f32 %v7783_v9, %v6499_v32  ;;  %v6635_v13 = vadd.f32 %v6634_v44, %v6572_v23 }
 0x3ea   :  { %v6501_v22 = vadd.f32 %v7784_v41, %v6500_v28  ;;  %v6636_v49 = vadd.f32 %v6635_v13, %v6573_v37 }
 0x3ec   :  { %v6502_v5 = vrot.slane %v6501_v22, 4  ;;  %v6637_v56 = vadd.f32 %v6636_v49, %v6574_v27 }
 0x3ee   :  { %v6503_v26 = vadd.f32 %v6502_v5, %v6501_v22  ;;  %v6638_v40 = vrot.slane %v6637_v56, 4 }
 0x3f0   :  { %v6504_v39 = vrot.slane %v6503_v26, 2  ;;  %v6639_v6 = vadd.f32 %v6638_v40, %v6637_v56 }
 0x3f2   :  { %v6505_v59 = vadd.f32 %v6504_v39, %v6503_v26  ;;  %v6640_v48 = vrot.slane %v6639_v6, 2 }
 0x3f4   :  { %v6506_v11 = vrot.slane %v6505_v59, 1  ;;  %v6641_v3 = vadd.f32 %v6640_v48, %v6639_v6 }
 0x3f6   :  { %v6507_v29 = vadd.f32 %v6506_v11, %v6505_v59  ;;  %v6642_v54 = vrot.slane %v6641_v3, 1 }
 0x3f8   :  { %v6508_v10 = vadd.f32 %v6507_v29, %v6438_v34  ;;  %v6643_v52 = vadd.f32 %v6642_v54, %v6641_v3 }
 0x3fa   :  { %6509 = vst [vmem:[%s12348_s3] sm:$0x1] %v6508_v10  ;;  %v6644_v35 = vadd.f32 %v6643_v52, %v6510_v1 }
 0x3fc   :  { %6645 = vst [vmem:[%s12349_s4] sm:$0x1] %v6644_v35 }

</bundles_post_ra>
